<compile_context>
chip_gen: v7x
topology: tpu7x:2x2x1
jax: 0.10.0
libtpu: 0.0.40
codegen_flags: <defaults>
</compile_context>

<pallas_src>
import functools
import numpy as np

import jax
import jax.numpy as jnp
from jax.experimental import pallas as pl
from jax.experimental.pallas import tpu as pltpu


def _round_up(x, m):
    return ((x + m - 1) // m) * m


def _vmem_limit_bytes():
    """3/4 of physical VMEM: ~48 MiB on v7x (64 MiB), ~96 MiB on v5e/v6e (128 MiB)."""
    try:
        info = pltpu.get_tpu_info()
        cap = int(getattr(info, "vmem_capacity_bytes", 64 * 1024 * 1024))
    except Exception:
        cap = 64 * 1024 * 1024
    return int(min(cap * 3 // 4, 100 * 1024 * 1024))


VMEM_LIMIT_BYTES = _vmem_limit_bytes()


# ----------------------------- Pallas kernels ------------------------------

def _conv_bias_act_kernel(p_ref, w_ref, b_ref, o_ref, *, leaky):
    """One M-tile of the layer-1 im2col matmul (bf16 in, f32 acc) + bias
    (+ LeakyReLU(0.2)); result stored in the (bf16) output dtype."""
    acc = jnp.dot(p_ref[...], w_ref[...], preferred_element_type=jnp.float32)
    acc = acc + b_ref[...]                                  # (tm, C) + (1, C)
    if leaky:
        acc = jnp.where(acc >= 0, acc, 0.2 * acc)
    o_ref[...] = acc.astype(o_ref.dtype)


def _fused_tap_conv_kernel(x_ref, w_ref, b_ref, mask_ref, o_ref, *,
                           starts, slab_len, inv_count):
    """One (image, Cout-tile) block of Conv(k=4,p=1) + bias + InstanceNorm2d
    (eps=1e-5, no affine, biased var) + LeakyReLU(0.2), fully fused.

    The conv is tap-decomposed: for each tap we take a contiguous slab of the
    flattened padded image (rows = oy*Wp + ox, including a few junk columns)
    and do a plain 2-D bf16 matmul with that tap's (Ce, TC) weight, accumulating
    in f32.  Junk rows are excluded from the IN statistics via a static (1, L)
    mask applied as a tiny MXU dot; they are sliced away outside the kernel."""
    acc = None
    for t, s in enumerate(starts):
        xs = x_ref[0, s:s + slab_len, :]                     # (L, Ce) bf16
        d = jnp.dot(xs, w_ref[t], preferred_element_type=jnp.float32)
        acc = d if acc is None else acc + d
    y = acc + b_ref[...]                                     # (L, TC) f32

    msk = mask_ref[...]                                      # (1, L) f32
    m = jnp.dot(msk, y, preferred_element_type=jnp.float32) * inv_count
    sq = jnp.dot(msk, y * y, preferred_element_type=jnp.float32) * inv_count
    var = jnp.maximum(sq - m * m, 0.0)                       # one-pass biased var
    y = (y - m) * jax.lax.rsqrt(var + 1e-5)

    y = jnp.where(y >= 0, y, 0.2 * y)                        # LeakyReLU(0.2)
    o_ref[0] = y.astype(o_ref.dtype)


# --------------------------- layer 1 (im2col matmul) ------------------------

def _pick_row_tile(M, granule=16, lo=256, hi=1024):
    """Largest multiple of `granule` dividing M within the target range.
    Target keeps >= ~4 grid steps so both v7x TensorCores stay busy; returning a
    divisor of M avoids re-padding/copying the patch matrix."""
    if M < granule:
        return 0
    target = int(min(hi, max(lo, M // 4)))
    t = min((target // granule) * granule, (M // granule) * granule)
    while t >= granule:
        if M % t == 0:
            return t
        t -= granule
    return 0


def conv_matmul_tiled(patches, w_mat, bias, *, leaky, out_dtype=jnp.bfloat16):
    """Tiled (M, K) @ (K, C) + bias (+ LeakyReLU).  Patch tiles are pipelined
    through VMEM; weight/bias blocks are grid-invariant (stay resident)."""
    M, K = patches.shape
    Kw, C = w_mat.shape
    assert K == Kw
    tm = _pick_row_tile(M)
    if tm == 0:                      # rare fallback: M not a multiple of 16
        tm = min(1024, _round_up(M, 16))
        Mp = _round_up(M, tm)
        patches = jnp.pad(patches, ((0, Mp - M), (0, 0)))
    else:
        Mp = M
    b2 = bias.reshape(1, C).astype(jnp.float32)

    out = pl.pallas_call(
        functools.partial(_conv_bias_act_kernel, leaky=leaky),
        out_shape=jax.ShapeDtypeStruct((Mp, C), out_dtype),
        grid=(Mp // tm,),
        in_specs=[
            pl.BlockSpec((tm, K), lambda i: (i, 0)),    # pipelined patch tiles
            pl.BlockSpec((K, C), lambda i: (0, 0)),     # weights: VMEM-resident
            pl.BlockSpec((1, C), lambda i: (0, 0)),     # bias:    VMEM-resident
        ],
        out_specs=pl.BlockSpec((tm, C), lambda i: (i, 0)),
        compiler_params=pltpu.CompilerParams(
            dimension_semantics=("parallel",),
            vmem_limit_bytes=VMEM_LIMIT_BYTES),
    )(patches.astype(jnp.bfloat16), w_mat.astype(jnp.bfloat16), b2)
    return out[:M]


def im2col(x_nhwc, k, stride, pad, out_dtype=jnp.bfloat16):
    x_nhwc = x_nhwc.astype(out_dtype)
    N, H, W, C = x_nhwc.shape
    xp = jnp.pad(x_nhwc, ((0, 0), (pad, pad), (pad, pad), (0, 0)))
    Hout = (H + 2 * pad - k) // stride + 1
    Wout = (W + 2 * pad - k) // stride + 1
    cols = []
    for ky in range(k):
        for kx in range(k):
            cols.append(xp[:, ky:ky + stride * Hout:stride,
                            kx:kx + stride * Wout:stride, :])
    p = jnp.stack(cols, axis=3)                              # (N, Ho, Wo, k*k, C)
    return p.reshape(N * Hout * Wout, k * k * C), Hout, Wout


def _weight_matrix(w_oihw, dtype):
    O, Cin, kh, kw = w_oihw.shape
    # OIHW -> (kh, kw, Cin, O) -> (kh*kw*Cin, O), matching im2col (ky, kx, c) order
    return jnp.transpose(w_oihw, (2, 3, 1, 0)).reshape(kh * kw * Cin, O).astype(dtype)


def conv2d_bias_lrelu(x_nhwc, w_oihw, b, stride, pad):
    """Layer 1: Conv2d + bias + LeakyReLU via the M-tiled Pallas matmul (bf16 out)."""
    N = x_nhwc.shape[0]
    O, Cin, kh, kw = w_oihw.shape
    patches, Hout, Wout = im2col(x_nhwc, kh, stride, pad)
    w_mat = _weight_matrix(w_oihw, jnp.bfloat16)
    out = conv_matmul_tiled(patches, w_mat, b, leaky=True)
    return out.reshape(N, Hout, Wout, O)


# ------------------ layers 2-4 (fused conv + IN + LeakyReLU) ----------------

def _space_to_depth2(xp):
    """(N, Hp, Wp, C) -> (N, Hp//2, Wp//2, 4*C); channel order (dy, dx, c)."""
    N, Hp, Wp, C = xp.shape
    assert Hp % 2 == 0 and Wp % 2 == 0
    x = xp.reshape(N, Hp // 2, 2, Wp // 2, 2, C)
    x = jnp.transpose(x, (0, 1, 3, 2, 4, 5))
    return x.reshape(N, Hp // 2, Wp // 2, 4 * C)


def _weight_taps_stride2(w_oihw, dtype):
    """OIHW (O, C, 4, 4) stride-2 conv -> (4, 4C, O): 2x2 stride-1 taps over the
    space-to-depth input; tap index = a*2 + b, rows ordered (dy, dx, c)."""
    O, C, kh, kw = w_oihw.shape
    assert kh == 4 and kw == 4
    w = w_oihw.reshape(O, C, 2, 2, 2, 2)            # (O, C, a, dy, b, dx)
    w = jnp.transpose(w, (2, 4, 3, 5, 1, 0))        # (a, b, dy, dx, C, O)
    return w.reshape(4, 4 * C, O).astype(dtype)


def _weight_taps_stride1(w_oihw, dtype):
    """OIHW (O, C, kh, kw) -> (kh*kw, C, O), tap index ky*kw + kx."""
    O, C, kh, kw = w_oihw.shape
    w = jnp.transpose(w_oihw, (2, 3, 1, 0))         # (kh, kw, C, O)
    return w.reshape(kh * kw, C, O).astype(dtype)


def conv2d_in_lrelu_fused(x_nhwc, w_oihw, b, stride, *, out_dtype=jnp.bfloat16,
                          co_tile=128):
    """Conv2d(k=4, pad=1, stride in {1,2}) + bias + InstanceNorm2d + LeakyReLU
    in ONE Pallas kernel, with no im2col.  Grid = (image, Cout tile), both
    parallel (IN is per-channel)."""
    N, H, W, Cin = x_nhwc.shape
    O, Cin_w, kh, kw = w_oihw.shape
    assert (kh, kw) == (4, 4) and Cin_w == Cin and stride in (1, 2)

    xp = jnp.pad(x_nhwc.astype(jnp.bfloat16), ((0, 0), (1, 1), (1, 1), (0, 0)))
    if stride == 2:
        assert H % 2 == 0 and W % 2 == 0, "stride-2 path needs even H, W"
        xin = _space_to_depth2(xp)                      # (N, H/2+1, W/2+1, 4*Cin)
        w_taps = _weight_taps_stride2(w_oihw, jnp.bfloat16)
        offsets = [(a, bb) for a in range(2) for bb in range(2)]
        Ho, Wo = H // 2, W // 2
    else:
        xin = xp                                        # (N, H+2, W+2, Cin)
        w_taps = _weight_taps_stride1(w_oihw, jnp.bfloat16)
        offsets = [(ky, kx) for ky in range(4) for kx in range(4)]
        Ho, Wo = H - 1, W - 1

    _, Hp, Wp, Ce = xin.shape
    taps = w_taps.shape[0]
    xin_flat = xin.reshape(N, Hp * Wp, Ce)              # leading-dim merge only
    L = (Ho - 1) * Wp + Wo                              # slab length per tap
    starts = [dy * Wp + dx for (dy, dx) in offsets]
    # static validity mask: row j = oy*Wp + ox is a real output iff (j % Wp) < Wo
    mask = jnp.asarray((np.arange(L) % Wp < Wo).astype(np.float32).reshape(1, L))
    b2 = b.reshape(1, O).astype(jnp.float32)

    TC = min(co_tile, O) if O % 128 == 0 else O
    n_co = O // TC

    out_flat = pl.pallas_call(
        functools.partial(_fused_tap_conv_kernel, starts=starts, slab_len=L,
                          inv_count=1.0 / float(Ho * Wo)),
        out_shape=jax.ShapeDtypeStruct((N, L, O), out_dtype),
        grid=(N, n_co),
        in_specs=[
            pl.BlockSpec((1, Hp * Wp, Ce), lambda n, co: (n, 0, 0)),   # image (reused across co)
            pl.BlockSpec((taps, Ce, TC), lambda n, co: (0, 0, co)),    # tap weights
            pl.BlockSpec((1, TC), lambda n, co: (0, co)),              # bias
            pl.BlockSpec((1, L), lambda n, co: (0, 0)),                # stats mask
        ],
        out_specs=pl.BlockSpec((1, L, TC), lambda n, co: (n, 0, co)),
        compiler_params=pltpu.CompilerParams(
            dimension_semantics=("parallel", "parallel"),
            vmem_limit_bytes=VMEM_LIMIT_BYTES),
    )(xin_flat, w_taps, b2, mask)

    # Undo the padded-width flattening: keep rows j = oy*Wp + ox with ox < Wo.
    out = jnp.pad(out_flat, ((0, 0), (0, Ho * Wp - L), (0, 0)))
    return out.reshape(N, Ho, Wp, O)[:, :, :Wo, :]


# ------------------- layer 5 + global average pool (folded) -----------------

def conv_avgpool_head(x_nhwc, w_oihw, b):
    """Final Conv2d(512->1, k4, s1, p1) + global avg-pool + view.  No
    nonlinearity follows, so mean_spatial(conv(x)) == (mean of im2col columns)
    @ w + b exactly (linearity, zero padding included)."""
    N, H, W, C = x_nhwc.shape
    O, Cin, kh, kw = w_oihw.shape
    pad = 1
    xp = jnp.pad(x_nhwc.astype(jnp.float32),
                 ((0, 0), (pad, pad), (pad, pad), (0, 0)))
    Hout = H + 2 * pad - kh + 1
    Wout = W + 2 * pad - kw + 1
    cols = []
    for ky in range(kh):
        for kx in range(kw):
            win = xp[:, ky:ky + Hout, kx:kx + Wout, :]       # (N, Ho, Wo, C)
            cols.append(jnp.mean(win, axis=(1, 2)))          # (N, C)
    colmean = jnp.stack(cols, axis=1).reshape(N, kh * kw * Cin)   # (ky,kx,c) order
    w_mat = _weight_matrix(w_oihw, jnp.float32)
    return jnp.dot(colmean, w_mat,
                   precision=jax.lax.Precision.HIGHEST) + b[None, :]   # (N, 1)


# --------------------------------- forward ----------------------------------

def discriminator_forward(x_nchw, params):
    x = jnp.transpose(x_nchw, (0, 2, 3, 1)).astype(jnp.float32)   # NCHW -> NHWC

    # Conv(input_nc -> 64, k4 s2 p1) + LeakyReLU(0.2): M-tiled matmul kernel.
    x = conv2d_bias_lrelu(x, params['w1'], params['b1'], 2, 1)
    # Conv + InstanceNorm + LeakyReLU: tap-decomposed fused kernels (no im2col).
    x = conv2d_in_lrelu_fused(x, params['w2'], params['b2'], 2)
    x = conv2d_in_lrelu_fused(x, params['w3'], params['b3'], 2)
    x = conv2d_in_lrelu_fused(x, params['w4'], params['b4'], 1,
                              out_dtype=jnp.float32)
    # Conv(512 -> 1, k4 s1 p1) + F.avg_pool2d(., spatial).view(N, -1)  (folded)
    return conv_avgpool_head(x, params['w5'], params['b5'])


# ----------------------- deterministic parameter init -----------------------

def init_params(key, input_nc):
    specs = [(64, input_nc, 4, 4), (128, 64, 4, 4), (256, 128, 4, 4),
             (512, 256, 4, 4), (1, 512, 4, 4)]
    params = {}
    for i, (o, c, kh, kw) in enumerate(specs, 1):
        key, k1, k2 = jax.random.split(key, 3)
        bound = 1.0 / np.sqrt(c * kh * kw)          # matches torch default init scale
        params[f'w{i}'] = jax.random.uniform(k1, (o, c, kh, kw), jnp.float32,
                                             -bound, bound)
        params[f'b{i}'] = jax.random.uniform(k2, (o,), jnp.float32, -bound, bound)
    return params


# ----------------------------- pure-JAX reference ---------------------------

def reference_forward(x, params):
    def conv(x, w, b, s, p):
        y = jax.lax.conv_general_dilated(
            x, w, (s, s), [(p, p), (p, p)],
            dimension_numbers=('NCHW', 'OIHW', 'NCHW'),
            precision=jax.lax.Precision.HIGHEST)
        return y + b[None, :, None, None]

    def inorm(x):
        m = jnp.mean(x, axis=(2, 3), keepdims=True)
        v = jnp.mean(jnp.square(x - m), axis=(2, 3), keepdims=True)
        return (x - m) * jax.lax.rsqrt(v + 1e-5)

    def lrelu(x):
        return jnp.where(x >= 0, x, 0.2 * x)

    x = lrelu(conv(x, params['w1'], params['b1'], 2, 1))
    x = lrelu(inorm(conv(x, params['w2'], params['b2'], 2, 1)))
    x = lrelu(inorm(conv(x, params['w3'], params['b3'], 2, 1)))
    x = lrelu(inorm(conv(x, params['w4'], params['b4'], 1, 1)))
    x = conv(x, params['w5'], params['b5'], 1, 1)
    return jnp.mean(x, axis=(2, 3)).reshape(x.shape[0], -1)


# ---------------------------------- main -------------------------------------

if __name__ == "__main__":
    key = jax.random.PRNGKey(0)
    kx, kp = jax.random.split(key)

    input_nc = 4
    # 32x32 is the smallest spatial size for which all five convs are valid.
    x = jax.random.normal(kx, (2, input_nc, 32, 32), jnp.float32)
    params = init_params(kp, input_nc)

    fwd = jax.jit(discriminator_forward)
    out = jax.block_until_ready(fwd(x, params))
    assert out.shape == (2, 1), out.shape

    ref = jax.block_until_ready(reference_forward(x, params))
    # bf16 MXU inputs + bf16 inter-layer activations (f32 accumulate/stats) vs
    # f32 HIGHEST-precision reference.
    if not np.allclose(np.asarray(out), np.asarray(ref), rtol=2e-2, atol=2e-2):
        raise AssertionError(
            f"mismatch vs reference: {np.abs(np.asarray(out) - np.asarray(ref)).max()}")

    print("KERNEL_OK")
</pallas_src>

<mosaic_0001>
module attributes {stable_mosaic.version = 11 : i64} {
  func.func @_conv_bias_act_kernel(%arg0: i32, %arg1: memref<256x64xbf16, #tpu.memory_space<vmem>>, %arg2: memref<64x64xbf16, #tpu.memory_space<vmem>>, %arg3: memref<1x64xf32, #tpu.memory_space<vmem>>, %arg4: memref<256x64xbf16, #tpu.memory_space<vmem>>) attributes {dimension_semantics = [#tpu.dimension_semantics<parallel>], iteration_bounds = array<i64: 2>, scalar_prefetch = 0 : i64, scratch_operands = 0 : i64, tpu.core_type = #tpu.core_type<tc>, window_params = [{transform_indices = @transform_0, window_bounds = array<i64: 256, 64>}, {pipeline_mode = #tpu.pipeline_mode<synchronous>, transform_indices = @transform_1, window_bounds = array<i64: 64, 64>}, {pipeline_mode = #tpu.pipeline_mode<synchronous>, transform_indices = @transform_2, window_bounds = array<i64: 1, 64>}, {transform_indices = @transform_3, window_bounds = array<i64: 256, 64>}]} {
    %c0 = arith.constant 0 : index
    %c0_0 = arith.constant 0 : index
    %0 = vector.load %arg1[%c0, %c0_0] : memref<256x64xbf16, #tpu.memory_space<vmem>>, vector<256x64xbf16>
    %c0_1 = arith.constant 0 : index
    %c0_2 = arith.constant 0 : index
    %1 = vector.load %arg2[%c0_1, %c0_2] : memref<64x64xbf16, #tpu.memory_space<vmem>>, vector<64x64xbf16>
    %cst = arith.constant dense<0.000000e+00> : vector<256x64xf32>
    %2 = tpu.matmul %0, %1, %cst {dimension_numbers = #tpu.dot_dimension_numbers<[1], [0], [0], [1], [0, 0, 1, 1], [], []>} : vector<256x64xbf16>, vector<64x64xbf16>, vector<256x64xf32> -> vector<256x64xf32>
    %c0_3 = arith.constant 0 : index
    %c0_4 = arith.constant 0 : index
    %3 = vector.load %arg3[%c0_3, %c0_4] : memref<1x64xf32, #tpu.memory_space<vmem>>, vector<1x64xf32>
    %4 = vector.broadcast %3 : vector<1x64xf32> to vector<256x64xf32>
    %5 = arith.addf %2, %4 : vector<256x64xf32>
    %cst_5 = arith.constant 0.000000e+00 : f32
    %6 = vector.broadcast %cst_5 : f32 to vector<256x64xf32>
    %7 = arith.cmpf oge, %5, %6 : vector<256x64xf32>
    %cst_6 = arith.constant 2.000000e-01 : f32
    %8 = vector.broadcast %cst_6 : f32 to vector<256x64xf32>
    %9 = arith.mulf %8, %5 : vector<256x64xf32>
    %10 = arith.select %7, %5, %9 : vector<256x64xi1>, vector<256x64xf32>
    %11 = arith.truncf %10 : vector<256x64xf32> to vector<256x64xbf16>
    %c0_7 = arith.constant 0 : index
    %c0_8 = arith.constant 0 : index
    %12 = vector.load %arg4[%c0_7, %c0_8] : memref<256x64xbf16, #tpu.memory_space<vmem>>, vector<256x64xbf16>
    tpu.vector_store %arg4[%c0_7, %c0_8], %11 {strides = array<i32>} : memref<256x64xbf16, #tpu.memory_space<vmem>>, vector<256x64xbf16>,
    return
  }
  func.func @transform_0(%arg0: i32) -> (i32, i32) {
    %c0_i32 = arith.constant 0 : i32
    %c0_i32_0 = arith.constant 0 : i32
    return %arg0, %c0_i32 : i32, i32
  }
  func.func @transform_1(%arg0: i32) -> (i32, i32) {
    %c0_i32 = arith.constant 0 : i32
    %c0_i32_0 = arith.constant 0 : i32
    %c0_i32_1 = arith.constant 0 : i32
    return %c0_i32, %c0_i32_0 : i32, i32
  }
  func.func @transform_2(%arg0: i32) -> (i32, i32) {
    %c0_i32 = arith.constant 0 : i32
    %c0_i32_0 = arith.constant 0 : i32
    %c0_i32_1 = arith.constant 0 : i32
    return %c0_i32, %c0_i32_0 : i32, i32
  }
  func.func @transform_3(%arg0: i32) -> (i32, i32) {
    %c0_i32 = arith.constant 0 : i32
    %c0_i32_0 = arith.constant 0 : i32
    return %arg0, %c0_i32 : i32, i32
  }
}

module attributes {stable_mosaic.version = 11 : i64} {
  func.func @_fused_tap_conv_kernel(%arg0: i32, %arg1: i32, %arg2: memref<1x81x256xbf16, #tpu.memory_space<vmem>>, %arg3: memref<4x256x128xbf16, #tpu.memory_space<vmem>>, %arg4: memref<1x128xf32, #tpu.memory_space<vmem>>, %arg5: memref<1x71xf32, #tpu.memory_space<vmem>>, %arg6: memref<1x71x128xbf16, #tpu.memory_space<vmem>>) attributes {dimension_semantics = [#tpu.dimension_semantics<parallel>, #tpu.dimension_semantics<parallel>], iteration_bounds = array<i64: 2, 1>, scalar_prefetch = 0 : i64, scratch_operands = 0 : i64, tpu.core_type = #tpu.core_type<tc>, window_params = [{transform_indices = @transform_0, window_bounds = array<i64: 1, 81, 256>}, {transform_indices = @transform_1, window_bounds = array<i64: 4, 256, 128>}, {transform_indices = @transform_2, window_bounds = array<i64: 1, 128>}, {pipeline_mode = #tpu.pipeline_mode<synchronous>, transform_indices = @transform_3, window_bounds = array<i64: 1, 71>}, {transform_indices = @transform_4, window_bounds = array<i64: 1, 71, 128>}]} {
    %c0 = arith.constant 0 : index
    %c0_0 = arith.constant 0 : index
    %c0_1 = arith.constant 0 : index
    %0 = vector.load %arg2[%c0, %c0_0, %c0_1] : memref<1x81x256xbf16, #tpu.memory_space<vmem>>, vector<1x71x256xbf16>
    %1 = vector.shape_cast %0 : vector<1x71x256xbf16> to vector<71x256xbf16>
    %c0_2 = arith.constant 0 : index
    %c0_3 = arith.constant 0 : index
    %c0_4 = arith.constant 0 : index
    %2 = vector.load %arg3[%c0_2, %c0_3, %c0_4] : memref<4x256x128xbf16, #tpu.memory_space<vmem>>, vector<1x256x128xbf16>
    %3 = vector.shape_cast %2 : vector<1x256x128xbf16> to vector<256x128xbf16>
    %cst = arith.constant dense<0.000000e+00> : vector<71x128xf32>
    %4 = tpu.matmul %1, %3, %cst {dimension_numbers = #tpu.dot_dimension_numbers<[1], [0], [0], [1], [0, 0, 1, 1], [], []>} : vector<71x256xbf16>, vector<256x128xbf16>, vector<71x128xf32> -> vector<71x128xf32>
    %c0_5 = arith.constant 0 : index
    %c1 = arith.constant 1 : index
    %c0_6 = arith.constant 0 : index
    %5 = vector.load %arg2[%c0_5, %c1, %c0_6] : memref<1x81x256xbf16, #tpu.memory_space<vmem>>, vector<1x71x256xbf16>
    %6 = vector.shape_cast %5 : vector<1x71x256xbf16> to vector<71x256xbf16>
    %c1_7 = arith.constant 1 : index
    %c0_8 = arith.constant 0 : index
    %c0_9 = arith.constant 0 : index
    %7 = vector.load %arg3[%c1_7, %c0_8, %c0_9] : memref<4x256x128xbf16, #tpu.memory_space<vmem>>, vector<1x256x128xbf16>
    %8 = vector.shape_cast %7 : vector<1x256x128xbf16> to vector<256x128xbf16>
    %cst_10 = arith.constant dense<0.000000e+00> : vector<71x128xf32>
    %9 = tpu.matmul %6, %8, %cst_10 {dimension_numbers = #tpu.dot_dimension_numbers<[1], [0], [0], [1], [0, 0, 1, 1], [], []>} : vector<71x256xbf16>, vector<256x128xbf16>, vector<71x128xf32> -> vector<71x128xf32>
    %10 = arith.addf %4, %9 : vector<71x128xf32>
    %c0_11 = arith.constant 0 : index
    %c9 = arith.constant 9 : index
    %c0_12 = arith.constant 0 : index
    %11 = vector.load %arg2[%c0_11, %c9, %c0_12] : memref<1x81x256xbf16, #tpu.memory_space<vmem>>, vector<1x71x256xbf16>
    %12 = vector.shape_cast %11 : vector<1x71x256xbf16> to vector<71x256xbf16>
    %c2 = arith.constant 2 : index
    %c0_13 = arith.constant 0 : index
    %c0_14 = arith.constant 0 : index
    %13 = vector.load %arg3[%c2, %c0_13, %c0_14] : memref<4x256x128xbf16, #tpu.memory_space<vmem>>, vector<1x256x128xbf16>
    %14 = vector.shape_cast %13 : vector<1x256x128xbf16> to vector<256x128xbf16>
    %cst_15 = arith.constant dense<0.000000e+00> : vector<71x128xf32>
    %15 = tpu.matmul %12, %14, %cst_15 {dimension_numbers = #tpu.dot_dimension_numbers<[1], [0], [0], [1], [0, 0, 1, 1], [], []>} : vector<71x256xbf16>, vector<256x128xbf16>, vector<71x128xf32> -> vector<71x128xf32>
    %16 = arith.addf %10, %15 : vector<71x128xf32>
    %c0_16 = arith.constant 0 : index
    %c10 = arith.constant 10 : index
    %c0_17 = arith.constant 0 : index
    %17 = vector.load %arg2[%c0_16, %c10, %c0_17] : memref<1x81x256xbf16, #tpu.memory_space<vmem>>, vector<1x71x256xbf16>
    %18 = vector.shape_cast %17 : vector<1x71x256xbf16> to vector<71x256xbf16>
    %c3 = arith.constant 3 : index
    %c0_18 = arith.constant 0 : index
    %c0_19 = arith.constant 0 : index
    %19 = vector.load %arg3[%c3, %c0_18, %c0_19] : memref<4x256x128xbf16, #tpu.memory_space<vmem>>, vector<1x256x128xbf16>
    %20 = vector.shape_cast %19 : vector<1x256x128xbf16> to vector<256x128xbf16>
    %cst_20 = arith.constant dense<0.000000e+00> : vector<71x128xf32>
    %21 = tpu.matmul %18, %20, %cst_20 {dimension_numbers = #tpu.dot_dimension_numbers<[1], [0], [0], [1], [0, 0, 1, 1], [], []>} : vector<71x256xbf16>, vector<256x128xbf16>, vector<71x128xf32> -> vector<71x128xf32>
    %22 = arith.addf %16, %21 : vector<71x128xf32>
    %c0_21 = arith.constant 0 : index
    %c0_22 = arith.constant 0 : index
    %23 = vector.load %arg4[%c0_21, %c0_22] : memref<1x128xf32, #tpu.memory_space<vmem>>, vector<1x128xf32>
    %24 = vector.broadcast %23 : vector<1x128xf32> to vector<71x128xf32>
    %25 = arith.addf %22, %24 : vector<71x128xf32>
    %c0_23 = arith.constant 0 : index
    %c0_24 = arith.constant 0 : index
    %26 = vector.load %arg5[%c0_23, %c0_24] : memref<1x71xf32, #tpu.memory_space<vmem>>, vector<1x71xf32>
    %cst_25 = arith.constant dense<0.000000e+00> : vector<1x128xf32>
    %27 = tpu.matmul %26, %25, %cst_25 {dimension_numbers = #tpu.dot_dimension_numbers<[1], [0], [0], [1], [0, 0, 1, 1], [], []>} : vector<1x71xf32>, vector<71x128xf32>, vector<1x128xf32> -> vector<1x128xf32>
    %cst_26 = arith.constant 1.562500e-02 : f32
    %28 = vector.broadcast %cst_26 : f32 to vector<1x128xf32>
    %29 = arith.mulf %27, %28 : vector<1x128xf32>
    %30 = arith.mulf %25, %25 : vector<71x128xf32>
    %cst_27 = arith.constant dense<0.000000e+00> : vector<1x128xf32>
    %31 = tpu.matmul %26, %30, %cst_27 {dimension_numbers = #tpu.dot_dimension_numbers<[1], [0], [0], [1], [0, 0, 1, 1], [], []>} : vector<1x71xf32>, vector<71x128xf32>, vector<1x128xf32> -> vector<1x128xf32>
    %cst_28 = arith.constant 1.562500e-02 : f32
    %32 = vector.broadcast %cst_28 : f32 to vector<1x128xf32>
    %33 = arith.mulf %31, %32 : vector<1x128xf32>
    %34 = arith.mulf %29, %29 : vector<1x128xf32>
    %35 = arith.subf %33, %34 : vector<1x128xf32>
    %cst_29 = arith.constant 0.000000e+00 : f32
    %36 = vector.broadcast %cst_29 : f32 to vector<1x128xf32>
    %37 = arith.maximumf %35, %36 : vector<1x128xf32>
    %38 = vector.broadcast %29 : vector<1x128xf32> to vector<71x128xf32>
    %39 = arith.subf %25, %38 : vector<71x128xf32>
    %cst_30 = arith.constant 9.99999974E-6 : f32
    %40 = vector.broadcast %cst_30 : f32 to vector<1x128xf32>
    %41 = arith.addf %37, %40 : vector<1x128xf32>
    %42 = math.rsqrt %41 : vector<1x128xf32>
    %43 = vector.broadcast %42 : vector<1x128xf32> to vector<71x128xf32>
    %44 = arith.mulf %39, %43 : vector<71x128xf32>
    %cst_31 = arith.constant 0.000000e+00 : f32
    %45 = vector.broadcast %cst_31 : f32 to vector<71x128xf32>
    %46 = arith.cmpf oge, %44, %45 : vector<71x128xf32>
    %cst_32 = arith.constant 2.000000e-01 : f32
    %47 = vector.broadcast %cst_32 : f32 to vector<71x128xf32>
    %48 = arith.mulf %47, %44 : vector<71x128xf32>
    %49 = arith.select %46, %44, %48 : vector<71x128xi1>, vector<71x128xf32>
    %50 = arith.truncf %49 : vector<71x128xf32> to vector<71x128xbf16>
    %c0_33 = arith.constant 0 : index
    %c0_34 = arith.constant 0 : index
    %c0_35 = arith.constant 0 : index
    %51 = vector.load %arg6[%c0_33, %c0_34, %c0_35] : memref<1x71x128xbf16, #tpu.memory_space<vmem>>, vector<1x71x128xbf16>
    %52 = vector.shape_cast %51 : vector<1x71x128xbf16> to vector<71x128xbf16>
    %53 = vector.shape_cast %50 : vector<71x128xbf16> to vector<1x71x128xbf16>
    tpu.vector_store %arg6[%c0_33, %c0_34, %c0_35], %53 {strides = array<i32>} : memref<1x71x128xbf16, #tpu.memory_space<vmem>>, vector<1x71x128xbf16>,
    return
  }
  func.func @transform_0(%arg0: i32, %arg1: i32) -> (i32, i32, i32) {
    %c0_i32 = arith.constant 0 : i32
    %c0_i32_0 = arith.constant 0 : i32
    %c0_i32_1 = arith.constant 0 : i32
    return %arg0, %c0_i32, %c0_i32_0 : i32, i32, i32
  }
  func.func @transform_1(%arg0: i32, %arg1: i32) -> (i32, i32, i32) {
    %c0_i32 = arith.constant 0 : i32
    %c0_i32_0 = arith.constant 0 : i32
    %c0_i32_1 = arith.constant 0 : i32
    return %c0_i32, %c0_i32_0, %arg1 : i32, i32, i32
  }
  func.func @transform_2(%arg0: i32, %arg1: i32) -> (i32, i32) {
    %c0_i32 = arith.constant 0 : i32
    %c0_i32_0 = arith.constant 0 : i32
    return %c0_i32, %arg1 : i32, i32
  }
  func.func @transform_3(%arg0: i32, %arg1: i32) -> (i32, i32) {
    %c0_i32 = arith.constant 0 : i32
    %c0_i32_0 = arith.constant 0 : i32
    %c0_i32_1 = arith.constant 0 : i32
    return %c0_i32, %c0_i32_0 : i32, i32
  }
  func.func @transform_4(%arg0: i32, %arg1: i32) -> (i32, i32, i32) {
    %c0_i32 = arith.constant 0 : i32
    %c0_i32_0 = arith.constant 0 : i32
    return %arg0, %c0_i32, %arg1 : i32, i32, i32
  }
}

module attributes {stable_mosaic.version = 11 : i64} {
  func.func @_fused_tap_conv_kernel(%arg0: i32, %arg1: i32, %arg2: memref<1x25x512xbf16, #tpu.memory_space<vmem>>, %arg3: memref<4x512x128xbf16, #tpu.memory_space<vmem>>, %arg4: memref<1x128xf32, #tpu.memory_space<vmem>>, %arg5: memref<1x19xf32, #tpu.memory_space<vmem>>, %arg6: memref<1x19x128xbf16, #tpu.memory_space<vmem>>) attributes {dimension_semantics = [#tpu.dimension_semantics<parallel>, #tpu.dimension_semantics<parallel>], iteration_bounds = array<i64: 2, 2>, scalar_prefetch = 0 : i64, scratch_operands = 0 : i64, tpu.core_type = #tpu.core_type<tc>, window_params = [{transform_indices = @transform_0, window_bounds = array<i64: 1, 25, 512>}, {transform_indices = @transform_1, window_bounds = array<i64: 4, 512, 128>}, {transform_indices = @transform_2, window_bounds = array<i64: 1, 128>}, {pipeline_mode = #tpu.pipeline_mode<synchronous>, transform_indices = @transform_3, window_bounds = array<i64: 1, 19>}, {transform_indices = @transform_4, window_bounds = array<i64: 1, 19, 128>}]} {
    %c0 = arith.constant 0 : index
    %c0_0 = arith.constant 0 : index
    %c0_1 = arith.constant 0 : index
    %0 = vector.load %arg2[%c0, %c0_0, %c0_1] : memref<1x25x512xbf16, #tpu.memory_space<vmem>>, vector<1x19x512xbf16>
    %1 = vector.shape_cast %0 : vector<1x19x512xbf16> to vector<19x512xbf16>
    %c0_2 = arith.constant 0 : index
    %c0_3 = arith.constant 0 : index
    %c0_4 = arith.constant 0 : index
    %2 = vector.load %arg3[%c0_2, %c0_3, %c0_4] : memref<4x512x128xbf16, #tpu.memory_space<vmem>>, vector<1x512x128xbf16>
    %3 = vector.shape_cast %2 : vector<1x512x128xbf16> to vector<512x128xbf16>
    %cst = arith.constant dense<0.000000e+00> : vector<19x128xf32>
    %4 = tpu.matmul %1, %3, %cst {dimension_numbers = #tpu.dot_dimension_numbers<[1], [0], [0], [1], [0, 0, 1, 1], [], []>} : vector<19x512xbf16>, vector<512x128xbf16>, vector<19x128xf32> -> vector<19x128xf32>
    %c0_5 = arith.constant 0 : index
    %c1 = arith.constant 1 : index
    %c0_6 = arith.constant 0 : index
    %5 = vector.load %arg2[%c0_5, %c1, %c0_6] : memref<1x25x512xbf16, #tpu.memory_space<vmem>>, vector<1x19x512xbf16>
    %6 = vector.shape_cast %5 : vector<1x19x512xbf16> to vector<19x512xbf16>
    %c1_7 = arith.constant 1 : index
    %c0_8 = arith.constant 0 : index
    %c0_9 = arith.constant 0 : index
    %7 = vector.load %arg3[%c1_7, %c0_8, %c0_9] : memref<4x512x128xbf16, #tpu.memory_space<vmem>>, vector<1x512x128xbf16>
    %8 = vector.shape_cast %7 : vector<1x512x128xbf16> to vector<512x128xbf16>
    %cst_10 = arith.constant dense<0.000000e+00> : vector<19x128xf32>
    %9 = tpu.matmul %6, %8, %cst_10 {dimension_numbers = #tpu.dot_dimension_numbers<[1], [0], [0], [1], [0, 0, 1, 1], [], []>} : vector<19x512xbf16>, vector<512x128xbf16>, vector<19x128xf32> -> vector<19x128xf32>
    %10 = arith.addf %4, %9 : vector<19x128xf32>
    %c0_11 = arith.constant 0 : index
    %c5 = arith.constant 5 : index
    %c0_12 = arith.constant 0 : index
    %11 = vector.load %arg2[%c0_11, %c5, %c0_12] : memref<1x25x512xbf16, #tpu.memory_space<vmem>>, vector<1x19x512xbf16>
    %12 = vector.shape_cast %11 : vector<1x19x512xbf16> to vector<19x512xbf16>
    %c2 = arith.constant 2 : index
    %c0_13 = arith.constant 0 : index
    %c0_14 = arith.constant 0 : index
    %13 = vector.load %arg3[%c2, %c0_13, %c0_14] : memref<4x512x128xbf16, #tpu.memory_space<vmem>>, vector<1x512x128xbf16>
    %14 = vector.shape_cast %13 : vector<1x512x128xbf16> to vector<512x128xbf16>
    %cst_15 = arith.constant dense<0.000000e+00> : vector<19x128xf32>
    %15 = tpu.matmul %12, %14, %cst_15 {dimension_numbers = #tpu.dot_dimension_numbers<[1], [0], [0], [1], [0, 0, 1, 1], [], []>} : vector<19x512xbf16>, vector<512x128xbf16>, vector<19x128xf32> -> vector<19x128xf32>
    %16 = arith.addf %10, %15 : vector<19x128xf32>
    %c0_16 = arith.constant 0 : index
    %c6 = arith.constant 6 : index
    %c0_17 = arith.constant 0 : index
    %17 = vector.load %arg2[%c0_16, %c6, %c0_17] : memref<1x25x512xbf16, #tpu.memory_space<vmem>>, vector<1x19x512xbf16>
    %18 = vector.shape_cast %17 : vector<1x19x512xbf16> to vector<19x512xbf16>
    %c3 = arith.constant 3 : index
    %c0_18 = arith.constant 0 : index
    %c0_19 = arith.constant 0 : index
    %19 = vector.load %arg3[%c3, %c0_18, %c0_19] : memref<4x512x128xbf16, #tpu.memory_space<vmem>>, vector<1x512x128xbf16>
    %20 = vector.shape_cast %19 : vector<1x512x128xbf16> to vector<512x128xbf16>
    %cst_20 = arith.constant dense<0.000000e+00> : vector<19x128xf32>
    %21 = tpu.matmul %18, %20, %cst_20 {dimension_numbers = #tpu.dot_dimension_numbers<[1], [0], [0], [1], [0, 0, 1, 1], [], []>} : vector<19x512xbf16>, vector<512x128xbf16>, vector<19x128xf32> -> vector<19x128xf32>
    %22 = arith.addf %16, %21 : vector<19x128xf32>
    %c0_21 = arith.constant 0 : index
    %c0_22 = arith.constant 0 : index
    %23 = vector.load %arg4[%c0_21, %c0_22] : memref<1x128xf32, #tpu.memory_space<vmem>>, vector<1x128xf32>
    %24 = vector.broadcast %23 : vector<1x128xf32> to vector<19x128xf32>
    %25 = arith.addf %22, %24 : vector<19x128xf32>
    %c0_23 = arith.constant 0 : index
    %c0_24 = arith.constant 0 : index
    %26 = vector.load %arg5[%c0_23, %c0_24] : memref<1x19xf32, #tpu.memory_space<vmem>>, vector<1x19xf32>
    %cst_25 = arith.constant dense<0.000000e+00> : vector<1x128xf32>
    %27 = tpu.matmul %26, %25, %cst_25 {dimension_numbers = #tpu.dot_dimension_numbers<[1], [0], [0], [1], [0, 0, 1, 1], [], []>} : vector<1x19xf32>, vector<19x128xf32>, vector<1x128xf32> -> vector<1x128xf32>
    %cst_26 = arith.constant 6.250000e-02 : f32
    %28 = vector.broadcast %cst_26 : f32 to vector<1x128xf32>
    %29 = arith.mulf %27, %28 : vector<1x128xf32>
    %30 = arith.mulf %25, %25 : vector<19x128xf32>
    %cst_27 = arith.constant dense<0.000000e+00> : vector<1x128xf32>
    %31 = tpu.matmul %26, %30, %cst_27 {dimension_numbers = #tpu.dot_dimension_numbers<[1], [0], [0], [1], [0, 0, 1, 1], [], []>} : vector<1x19xf32>, vector<19x128xf32>, vector<1x128xf32> -> vector<1x128xf32>
    %cst_28 = arith.constant 6.250000e-02 : f32
    %32 = vector.broadcast %cst_28 : f32 to vector<1x128xf32>
    %33 = arith.mulf %31, %32 : vector<1x128xf32>
    %34 = arith.mulf %29, %29 : vector<1x128xf32>
    %35 = arith.subf %33, %34 : vector<1x128xf32>
    %cst_29 = arith.constant 0.000000e+00 : f32
    %36 = vector.broadcast %cst_29 : f32 to vector<1x128xf32>
    %37 = arith.maximumf %35, %36 : vector<1x128xf32>
    %38 = vector.broadcast %29 : vector<1x128xf32> to vector<19x128xf32>
    %39 = arith.subf %25, %38 : vector<19x128xf32>
    %cst_30 = arith.constant 9.99999974E-6 : f32
    %40 = vector.broadcast %cst_30 : f32 to vector<1x128xf32>
    %41 = arith.addf %37, %40 : vector<1x128xf32>
    %42 = math.rsqrt %41 : vector<1x128xf32>
    %43 = vector.broadcast %42 : vector<1x128xf32> to vector<19x128xf32>
    %44 = arith.mulf %39, %43 : vector<19x128xf32>
    %cst_31 = arith.constant 0.000000e+00 : f32
    %45 = vector.broadcast %cst_31 : f32 to vector<19x128xf32>
    %46 = arith.cmpf oge, %44, %45 : vector<19x128xf32>
    %cst_32 = arith.constant 2.000000e-01 : f32
    %47 = vector.broadcast %cst_32 : f32 to vector<19x128xf32>
    %48 = arith.mulf %47, %44 : vector<19x128xf32>
    %49 = arith.select %46, %44, %48 : vector<19x128xi1>, vector<19x128xf32>
    %50 = arith.truncf %49 : vector<19x128xf32> to vector<19x128xbf16>
    %c0_33 = arith.constant 0 : index
    %c0_34 = arith.constant 0 : index
    %c0_35 = arith.constant 0 : index
    %51 = vector.load %arg6[%c0_33, %c0_34, %c0_35] : memref<1x19x128xbf16, #tpu.memory_space<vmem>>, vector<1x19x128xbf16>
    %52 = vector.shape_cast %51 : vector<1x19x128xbf16> to vector<19x128xbf16>
    %53 = vector.shape_cast %50 : vector<19x128xbf16> to vector<1x19x128xbf16>
    tpu.vector_store %arg6[%c0_33, %c0_34, %c0_35], %53 {strides = array<i32>} : memref<1x19x128xbf16, #tpu.memory_space<vmem>>, vector<1x19x128xbf16>,
    return
  }
  func.func @transform_0(%arg0: i32, %arg1: i32) -> (i32, i32, i32) {
    %c0_i32 = arith.constant 0 : i32
    %c0_i32_0 = arith.constant 0 : i32
    %c0_i32_1 = arith.constant 0 : i32
    return %arg0, %c0_i32, %c0_i32_0 : i32, i32, i32
  }
  func.func @transform_1(%arg0: i32, %arg1: i32) -> (i32, i32, i32) {
    %c0_i32 = arith.constant 0 : i32
    %c0_i32_0 = arith.constant 0 : i32
    %c0_i32_1 = arith.constant 0 : i32
    return %c0_i32, %c0_i32_0, %arg1 : i32, i32, i32
  }
  func.func @transform_2(%arg0: i32, %arg1: i32) -> (i32, i32) {
    %c0_i32 = arith.constant 0 : i32
    %c0_i32_0 = arith.constant 0 : i32
    return %c0_i32, %arg1 : i32, i32
  }
  func.func @transform_3(%arg0: i32, %arg1: i32) -> (i32, i32) {
    %c0_i32 = arith.constant 0 : i32
    %c0_i32_0 = arith.constant 0 : i32
    %c0_i32_1 = arith.constant 0 : i32
    return %c0_i32, %c0_i32_0 : i32, i32
  }
  func.func @transform_4(%arg0: i32, %arg1: i32) -> (i32, i32, i32) {
    %c0_i32 = arith.constant 0 : i32
    %c0_i32_0 = arith.constant 0 : i32
    return %arg0, %c0_i32, %arg1 : i32, i32, i32
  }
}

module attributes {stable_mosaic.version = 11 : i64} {
  func.func @_fused_tap_conv_kernel(%arg0: i32, %arg1: i32, %arg2: memref<1x36x256xbf16, #tpu.memory_space<vmem>>, %arg3: memref<16x256x128xbf16, #tpu.memory_space<vmem>>, %arg4: memref<1x128xf32, #tpu.memory_space<vmem>>, %arg5: memref<1x15xf32, #tpu.memory_space<vmem>>, %arg6: memref<1x15x128xf32, #tpu.memory_space<vmem>>) attributes {dimension_semantics = [#tpu.dimension_semantics<parallel>, #tpu.dimension_semantics<parallel>], iteration_bounds = array<i64: 2, 4>, scalar_prefetch = 0 : i64, scratch_operands = 0 : i64, tpu.core_type = #tpu.core_type<tc>, window_params = [{transform_indices = @transform_0, window_bounds = array<i64: 1, 36, 256>}, {transform_indices = @transform_1, window_bounds = array<i64: 16, 256, 128>}, {transform_indices = @transform_2, window_bounds = array<i64: 1, 128>}, {pipeline_mode = #tpu.pipeline_mode<synchronous>, transform_indices = @transform_3, window_bounds = array<i64: 1, 15>}, {transform_indices = @transform_4, window_bounds = array<i64: 1, 15, 128>}]} {
    %c0 = arith.constant 0 : index
    %c0_0 = arith.constant 0 : index
    %c0_1 = arith.constant 0 : index
    %0 = vector.load %arg2[%c0, %c0_0, %c0_1] : memref<1x36x256xbf16, #tpu.memory_space<vmem>>, vector<1x15x256xbf16>
    %1 = vector.shape_cast %0 : vector<1x15x256xbf16> to vector<15x256xbf16>
    %c0_2 = arith.constant 0 : index
    %c0_3 = arith.constant 0 : index
    %c0_4 = arith.constant 0 : index
    %2 = vector.load %arg3[%c0_2, %c0_3, %c0_4] : memref<16x256x128xbf16, #tpu.memory_space<vmem>>, vector<1x256x128xbf16>
    %3 = vector.shape_cast %2 : vector<1x256x128xbf16> to vector<256x128xbf16>
    %cst = arith.constant dense<0.000000e+00> : vector<15x128xf32>
    %4 = tpu.matmul %1, %3, %cst {dimension_numbers = #tpu.dot_dimension_numbers<[1], [0], [0], [1], [0, 0, 1, 1], [], []>} : vector<15x256xbf16>, vector<256x128xbf16>, vector<15x128xf32> -> vector<15x128xf32>
    %c0_5 = arith.constant 0 : index
    %c1 = arith.constant 1 : index
    %c0_6 = arith.constant 0 : index
    %5 = vector.load %arg2[%c0_5, %c1, %c0_6] : memref<1x36x256xbf16, #tpu.memory_space<vmem>>, vector<1x15x256xbf16>
    %6 = vector.shape_cast %5 : vector<1x15x256xbf16> to vector<15x256xbf16>
    %c1_7 = arith.constant 1 : index
    %c0_8 = arith.constant 0 : index
    %c0_9 = arith.constant 0 : index
    %7 = vector.load %arg3[%c1_7, %c0_8, %c0_9] : memref<16x256x128xbf16, #tpu.memory_space<vmem>>, vector<1x256x128xbf16>
    %8 = vector.shape_cast %7 : vector<1x256x128xbf16> to vector<256x128xbf16>
    %cst_10 = arith.constant dense<0.000000e+00> : vector<15x128xf32>
    %9 = tpu.matmul %6, %8, %cst_10 {dimension_numbers = #tpu.dot_dimension_numbers<[1], [0], [0], [1], [0, 0, 1, 1], [], []>} : vector<15x256xbf16>, vector<256x128xbf16>, vector<15x128xf32> -> vector<15x128xf32>
    %10 = arith.addf %4, %9 : vector<15x128xf32>
    %c0_11 = arith.constant 0 : index
    %c2 = arith.constant 2 : index
    %c0_12 = arith.constant 0 : index
    %11 = vector.load %arg2[%c0_11, %c2, %c0_12] : memref<1x36x256xbf16, #tpu.memory_space<vmem>>, vector<1x15x256xbf16>
    %12 = vector.shape_cast %11 : vector<1x15x256xbf16> to vector<15x256xbf16>
    %c2_13 = arith.constant 2 : index
    %c0_14 = arith.constant 0 : index
    %c0_15 = arith.constant 0 : index
    %13 = vector.load %arg3[%c2_13, %c0_14, %c0_15] : memref<16x256x128xbf16, #tpu.memory_space<vmem>>, vector<1x256x128xbf16>
    %14 = vector.shape_cast %13 : vector<1x256x128xbf16> to vector<256x128xbf16>
    %cst_16 = arith.constant dense<0.000000e+00> : vector<15x128xf32>
    %15 = tpu.matmul %12, %14, %cst_16 {dimension_numbers = #tpu.dot_dimension_numbers<[1], [0], [0], [1], [0, 0, 1, 1], [], []>} : vector<15x256xbf16>, vector<256x128xbf16>, vector<15x128xf32> -> vector<15x128xf32>
    %16 = arith.addf %10, %15 : vector<15x128xf32>
    %c0_17 = arith.constant 0 : index
    %c3 = arith.constant 3 : index
    %c0_18 = arith.constant 0 : index
    %17 = vector.load %arg2[%c0_17, %c3, %c0_18] : memref<1x36x256xbf16, #tpu.memory_space<vmem>>, vector<1x15x256xbf16>
    %18 = vector.shape_cast %17 : vector<1x15x256xbf16> to vector<15x256xbf16>
    %c3_19 = arith.constant 3 : index
    %c0_20 = arith.constant 0 : index
    %c0_21 = arith.constant 0 : index
    %19 = vector.load %arg3[%c3_19, %c0_20, %c0_21] : memref<16x256x128xbf16, #tpu.memory_space<vmem>>, vector<1x256x128xbf16>
    %20 = vector.shape_cast %19 : vector<1x256x128xbf16> to vector<256x128xbf16>
    %cst_22 = arith.constant dense<0.000000e+00> : vector<15x128xf32>
    %21 = tpu.matmul %18, %20, %cst_22 {dimension_numbers = #tpu.dot_dimension_numbers<[1], [0], [0], [1], [0, 0, 1, 1], [], []>} : vector<15x256xbf16>, vector<256x128xbf16>, vector<15x128xf32> -> vector<15x128xf32>
    %22 = arith.addf %16, %21 : vector<15x128xf32>
    %c0_23 = arith.constant 0 : index
    %c6 = arith.constant 6 : index
    %c0_24 = arith.constant 0 : index
    %23 = vector.load %arg2[%c0_23, %c6, %c0_24] : memref<1x36x256xbf16, #tpu.memory_space<vmem>>, vector<1x15x256xbf16>
    %24 = vector.shape_cast %23 : vector<1x15x256xbf16> to vector<15x256xbf16>
    %c4 = arith.constant 4 : index
    %c0_25 = arith.constant 0 : index
    %c0_26 = arith.constant 0 : index
    %25 = vector.load %arg3[%c4, %c0_25, %c0_26] : memref<16x256x128xbf16, #tpu.memory_space<vmem>>, vector<1x256x128xbf16>
    %26 = vector.shape_cast %25 : vector<1x256x128xbf16> to vector<256x128xbf16>
    %cst_27 = arith.constant dense<0.000000e+00> : vector<15x128xf32>
    %27 = tpu.matmul %24, %26, %cst_27 {dimension_numbers = #tpu.dot_dimension_numbers<[1], [0], [0], [1], [0, 0, 1, 1], [], []>} : vector<15x256xbf16>, vector<256x128xbf16>, vector<15x128xf32> -> vector<15x128xf32>
    %28 = arith.addf %22, %27 : vector<15x128xf32>
    %c0_28 = arith.constant 0 : index
    %c7 = arith.constant 7 : index
    %c0_29 = arith.constant 0 : index
    %29 = vector.load %arg2[%c0_28, %c7, %c0_29] : memref<1x36x256xbf16, #tpu.memory_space<vmem>>, vector<1x15x256xbf16>
    %30 = vector.shape_cast %29 : vector<1x15x256xbf16> to vector<15x256xbf16>
    %c5 = arith.constant 5 : index
    %c0_30 = arith.constant 0 : index
    %c0_31 = arith.constant 0 : index
    %31 = vector.load %arg3[%c5, %c0_30, %c0_31] : memref<16x256x128xbf16, #tpu.memory_space<vmem>>, vector<1x256x128xbf16>
    %32 = vector.shape_cast %31 : vector<1x256x128xbf16> to vector<256x128xbf16>
    %cst_32 = arith.constant dense<0.000000e+00> : vector<15x128xf32>
    %33 = tpu.matmul %30, %32, %cst_32 {dimension_numbers = #tpu.dot_dimension_numbers<[1], [0], [0], [1], [0, 0, 1, 1], [], []>} : vector<15x256xbf16>, vector<256x128xbf16>, vector<15x128xf32> -> vector<15x128xf32>
    %34 = arith.addf %28, %33 : vector<15x128xf32>
    %c0_33 = arith.constant 0 : index
    %c8 = arith.constant 8 : index
    %c0_34 = arith.constant 0 : index
    %35 = vector.load %arg2[%c0_33, %c8, %c0_34] : memref<1x36x256xbf16, #tpu.memory_space<vmem>>, vector<1x15x256xbf16>
    %36 = vector.shape_cast %35 : vector<1x15x256xbf16> to vector<15x256xbf16>
    %c6_35 = arith.constant 6 : index
    %c0_36 = arith.constant 0 : index
    %c0_37 = arith.constant 0 : index
    %37 = vector.load %arg3[%c6_35, %c0_36, %c0_37] : memref<16x256x128xbf16, #tpu.memory_space<vmem>>, vector<1x256x128xbf16>
    %38 = vector.shape_cast %37 : vector<1x256x128xbf16> to vector<256x128xbf16>
    %cst_38 = arith.constant dense<0.000000e+00> : vector<15x128xf32>
    %39 = tpu.matmul %36, %38, %cst_38 {dimension_numbers = #tpu.dot_dimension_numbers<[1], [0], [0], [1], [0, 0, 1, 1], [], []>} : vector<15x256xbf16>, vector<256x128xbf16>, vector<15x128xf32> -> vector<15x128xf32>
    %40 = arith.addf %34, %39 : vector<15x128xf32>
    %c0_39 = arith.constant 0 : index
    %c9 = arith.constant 9 : index
    %c0_40 = arith.constant 0 : index
    %41 = vector.load %arg2[%c0_39, %c9, %c0_40] : memref<1x36x256xbf16, #tpu.memory_space<vmem>>, vector<1x15x256xbf16>
    %42 = vector.shape_cast %41 : vector<1x15x256xbf16> to vector<15x256xbf16>
    %c7_41 = arith.constant 7 : index
    %c0_42 = arith.constant 0 : index
    %c0_43 = arith.constant 0 : index
    %43 = vector.load %arg3[%c7_41, %c0_42, %c0_43] : memref<16x256x128xbf16, #tpu.memory_space<vmem>>, vector<1x256x128xbf16>
    %44 = vector.shape_cast %43 : vector<1x256x128xbf16> to vector<256x128xbf16>
    %cst_44 = arith.constant dense<0.000000e+00> : vector<15x128xf32>
    %45 = tpu.matmul %42, %44, %cst_44 {dimension_numbers = #tpu.dot_dimension_numbers<[1], [0], [0], [1], [0, 0, 1, 1], [], []>} : vector<15x256xbf16>, vector<256x128xbf16>, vector<15x128xf32> -> vector<15x128xf32>
    %46 = arith.addf %40, %45 : vector<15x128xf32>
    %c0_45 = arith.constant 0 : index
    %c12 = arith.constant 12 : index
    %c0_46 = arith.constant 0 : index
    %47 = vector.load %arg2[%c0_45, %c12, %c0_46] : memref<1x36x256xbf16, #tpu.memory_space<vmem>>, vector<1x15x256xbf16>
    %48 = vector.shape_cast %47 : vector<1x15x256xbf16> to vector<15x256xbf16>
    %c8_47 = arith.constant 8 : index
    %c0_48 = arith.constant 0 : index
    %c0_49 = arith.constant 0 : index
    %49 = vector.load %arg3[%c8_47, %c0_48, %c0_49] : memref<16x256x128xbf16, #tpu.memory_space<vmem>>, vector<1x256x128xbf16>
    %50 = vector.shape_cast %49 : vector<1x256x128xbf16> to vector<256x128xbf16>
    %cst_50 = arith.constant dense<0.000000e+00> : vector<15x128xf32>
    %51 = tpu.matmul %48, %50, %cst_50 {dimension_numbers = #tpu.dot_dimension_numbers<[1], [0], [0], [1], [0, 0, 1, 1], [], []>} : vector<15x256xbf16>, vector<256x128xbf16>, vector<15x128xf32> -> vector<15x128xf32>
    %52 = arith.addf %46, %51 : vector<15x128xf32>
    %c0_51 = arith.constant 0 : index
    %c13 = arith.constant 13 : index
    %c0_52 = arith.constant 0 : index
    %53 = vector.load %arg2[%c0_51, %c13, %c0_52] : memref<1x36x256xbf16, #tpu.memory_space<vmem>>, vector<1x15x256xbf16>
    %54 = vector.shape_cast %53 : vector<1x15x256xbf16> to vector<15x256xbf16>
    %c9_53 = arith.constant 9 : index
    %c0_54 = arith.constant 0 : index
    %c0_55 = arith.constant 0 : index
    %55 = vector.load %arg3[%c9_53, %c0_54, %c0_55] : memref<16x256x128xbf16, #tpu.memory_space<vmem>>, vector<1x256x128xbf16>
    %56 = vector.shape_cast %55 : vector<1x256x128xbf16> to vector<256x128xbf16>
    %cst_56 = arith.constant dense<0.000000e+00> : vector<15x128xf32>
    %57 = tpu.matmul %54, %56, %cst_56 {dimension_numbers = #tpu.dot_dimension_numbers<[1], [0], [0], [1], [0, 0, 1, 1], [], []>} : vector<15x256xbf16>, vector<256x128xbf16>, vector<15x128xf32> -> vector<15x128xf32>
    %58 = arith.addf %52, %57 : vector<15x128xf32>
    %c0_57 = arith.constant 0 : index
    %c14 = arith.constant 14 : index
    %c0_58 = arith.constant 0 : index
    %59 = vector.load %arg2[%c0_57, %c14, %c0_58] : memref<1x36x256xbf16, #tpu.memory_space<vmem>>, vector<1x15x256xbf16>
    %60 = vector.shape_cast %59 : vector<1x15x256xbf16> to vector<15x256xbf16>
    %c10 = arith.constant 10 : index
    %c0_59 = arith.constant 0 : index
    %c0_60 = arith.constant 0 : index
    %61 = vector.load %arg3[%c10, %c0_59, %c0_60] : memref<16x256x128xbf16, #tpu.memory_space<vmem>>, vector<1x256x128xbf16>
    %62 = vector.shape_cast %61 : vector<1x256x128xbf16> to vector<256x128xbf16>
    %cst_61 = arith.constant dense<0.000000e+00> : vector<15x128xf32>
    %63 = tpu.matmul %60, %62, %cst_61 {dimension_numbers = #tpu.dot_dimension_numbers<[1], [0], [0], [1], [0, 0, 1, 1], [], []>} : vector<15x256xbf16>, vector<256x128xbf16>, vector<15x128xf32> -> vector<15x128xf32>
    %64 = arith.addf %58, %63 : vector<15x128xf32>
    %c0_62 = arith.constant 0 : index
    %c15 = arith.constant 15 : index
    %c0_63 = arith.constant 0 : index
    %65 = vector.load %arg2[%c0_62, %c15, %c0_63] : memref<1x36x256xbf16, #tpu.memory_space<vmem>>, vector<1x15x256xbf16>
    %66 = vector.shape_cast %65 : vector<1x15x256xbf16> to vector<15x256xbf16>
    %c11 = arith.constant 11 : index
    %c0_64 = arith.constant 0 : index
    %c0_65 = arith.constant 0 : index
    %67 = vector.load %arg3[%c11, %c0_64, %c0_65] : memref<16x256x128xbf16, #tpu.memory_space<vmem>>, vector<1x256x128xbf16>
    %68 = vector.shape_cast %67 : vector<1x256x128xbf16> to vector<256x128xbf16>
    %cst_66 = arith.constant dense<0.000000e+00> : vector<15x128xf32>
    %69 = tpu.matmul %66, %68, %cst_66 {dimension_numbers = #tpu.dot_dimension_numbers<[1], [0], [0], [1], [0, 0, 1, 1], [], []>} : vector<15x256xbf16>, vector<256x128xbf16>, vector<15x128xf32> -> vector<15x128xf32>
    %70 = arith.addf %64, %69 : vector<15x128xf32>
    %c0_67 = arith.constant 0 : index
    %c18 = arith.constant 18 : index
    %c0_68 = arith.constant 0 : index
    %71 = vector.load %arg2[%c0_67, %c18, %c0_68] : memref<1x36x256xbf16, #tpu.memory_space<vmem>>, vector<1x15x256xbf16>
    %72 = vector.shape_cast %71 : vector<1x15x256xbf16> to vector<15x256xbf16>
    %c12_69 = arith.constant 12 : index
    %c0_70 = arith.constant 0 : index
    %c0_71 = arith.constant 0 : index
    %73 = vector.load %arg3[%c12_69, %c0_70, %c0_71] : memref<16x256x128xbf16, #tpu.memory_space<vmem>>, vector<1x256x128xbf16>
    %74 = vector.shape_cast %73 : vector<1x256x128xbf16> to vector<256x128xbf16>
    %cst_72 = arith.constant dense<0.000000e+00> : vector<15x128xf32>
    %75 = tpu.matmul %72, %74, %cst_72 {dimension_numbers = #tpu.dot_dimension_numbers<[1], [0], [0], [1], [0, 0, 1, 1], [], []>} : vector<15x256xbf16>, vector<256x128xbf16>, vector<15x128xf32> -> vector<15x128xf32>
    %76 = arith.addf %70, %75 : vector<15x128xf32>
    %c0_73 = arith.constant 0 : index
    %c19 = arith.constant 19 : index
    %c0_74 = arith.constant 0 : index
    %77 = vector.load %arg2[%c0_73, %c19, %c0_74] : memref<1x36x256xbf16, #tpu.memory_space<vmem>>, vector<1x15x256xbf16>
    %78 = vector.shape_cast %77 : vector<1x15x256xbf16> to vector<15x256xbf16>
    %c13_75 = arith.constant 13 : index
    %c0_76 = arith.constant 0 : index
    %c0_77 = arith.constant 0 : index
    %79 = vector.load %arg3[%c13_75, %c0_76, %c0_77] : memref<16x256x128xbf16, #tpu.memory_space<vmem>>, vector<1x256x128xbf16>
    %80 = vector.shape_cast %79 : vector<1x256x128xbf16> to vector<256x128xbf16>
    %cst_78 = arith.constant dense<0.000000e+00> : vector<15x128xf32>
    %81 = tpu.matmul %78, %80, %cst_78 {dimension_numbers = #tpu.dot_dimension_numbers<[1], [0], [0], [1], [0, 0, 1, 1], [], []>} : vector<15x256xbf16>, vector<256x128xbf16>, vector<15x128xf32> -> vector<15x128xf32>
    %82 = arith.addf %76, %81 : vector<15x128xf32>
    %c0_79 = arith.constant 0 : index
    %c20 = arith.constant 20 : index
    %c0_80 = arith.constant 0 : index
    %83 = vector.load %arg2[%c0_79, %c20, %c0_80] : memref<1x36x256xbf16, #tpu.memory_space<vmem>>, vector<1x15x256xbf16>
    %84 = vector.shape_cast %83 : vector<1x15x256xbf16> to vector<15x256xbf16>
    %c14_81 = arith.constant 14 : index
    %c0_82 = arith.constant 0 : index
    %c0_83 = arith.constant 0 : index
    %85 = vector.load %arg3[%c14_81, %c0_82, %c0_83] : memref<16x256x128xbf16, #tpu.memory_space<vmem>>, vector<1x256x128xbf16>
    %86 = vector.shape_cast %85 : vector<1x256x128xbf16> to vector<256x128xbf16>
    %cst_84 = arith.constant dense<0.000000e+00> : vector<15x128xf32>
    %87 = tpu.matmul %84, %86, %cst_84 {dimension_numbers = #tpu.dot_dimension_numbers<[1], [0], [0], [1], [0, 0, 1, 1], [], []>} : vector<15x256xbf16>, vector<256x128xbf16>, vector<15x128xf32> -> vector<15x128xf32>
    %88 = arith.addf %82, %87 : vector<15x128xf32>
    %c0_85 = arith.constant 0 : index
    %c21 = arith.constant 21 : index
    %c0_86 = arith.constant 0 : index
    %89 = vector.load %arg2[%c0_85, %c21, %c0_86] : memref<1x36x256xbf16, #tpu.memory_space<vmem>>, vector<1x15x256xbf16>
    %90 = vector.shape_cast %89 : vector<1x15x256xbf16> to vector<15x256xbf16>
    %c15_87 = arith.constant 15 : index
    %c0_88 = arith.constant 0 : index
    %c0_89 = arith.constant 0 : index
    %91 = vector.load %arg3[%c15_87, %c0_88, %c0_89] : memref<16x256x128xbf16, #tpu.memory_space<vmem>>, vector<1x256x128xbf16>
    %92 = vector.shape_cast %91 : vector<1x256x128xbf16> to vector<256x128xbf16>
    %cst_90 = arith.constant dense<0.000000e+00> : vector<15x128xf32>
    %93 = tpu.matmul %90, %92, %cst_90 {dimension_numbers = #tpu.dot_dimension_numbers<[1], [0], [0], [1], [0, 0, 1, 1], [], []>} : vector<15x256xbf16>, vector<256x128xbf16>, vector<15x128xf32> -> vector<15x128xf32>
    %94 = arith.addf %88, %93 : vector<15x128xf32>
    %c0_91 = arith.constant 0 : index
    %c0_92 = arith.constant 0 : index
    %95 = vector.load %arg4[%c0_91, %c0_92] : memref<1x128xf32, #tpu.memory_space<vmem>>, vector<1x128xf32>
    %96 = vector.broadcast %95 : vector<1x128xf32> to vector<15x128xf32>
    %97 = arith.addf %94, %96 : vector<15x128xf32>
    %c0_93 = arith.constant 0 : index
    %c0_94 = arith.constant 0 : index
    %98 = vector.load %arg5[%c0_93, %c0_94] : memref<1x15xf32, #tpu.memory_space<vmem>>, vector<1x15xf32>
    %cst_95 = arith.constant dense<0.000000e+00> : vector<1x128xf32>
    %99 = tpu.matmul %98, %97, %cst_95 {dimension_numbers = #tpu.dot_dimension_numbers<[1], [0], [0], [1], [0, 0, 1, 1], [], []>} : vector<1x15xf32>, vector<15x128xf32>, vector<1x128xf32> -> vector<1x128xf32>
    %cst_96 = arith.constant 0.111111112 : f32
    %100 = vector.broadcast %cst_96 : f32 to vector<1x128xf32>
    %101 = arith.mulf %99, %100 : vector<1x128xf32>
    %102 = arith.mulf %97, %97 : vector<15x128xf32>
    %cst_97 = arith.constant dense<0.000000e+00> : vector<1x128xf32>
    %103 = tpu.matmul %98, %102, %cst_97 {dimension_numbers = #tpu.dot_dimension_numbers<[1], [0], [0], [1], [0, 0, 1, 1], [], []>} : vector<1x15xf32>, vector<15x128xf32>, vector<1x128xf32> -> vector<1x128xf32>
    %cst_98 = arith.constant 0.111111112 : f32
    %104 = vector.broadcast %cst_98 : f32 to vector<1x128xf32>
    %105 = arith.mulf %103, %104 : vector<1x128xf32>
    %106 = arith.mulf %101, %101 : vector<1x128xf32>
    %107 = arith.subf %105, %106 : vector<1x128xf32>
    %cst_99 = arith.constant 0.000000e+00 : f32
    %108 = vector.broadcast %cst_99 : f32 to vector<1x128xf32>
    %109 = arith.maximumf %107, %108 : vector<1x128xf32>
    %110 = vector.broadcast %101 : vector<1x128xf32> to vector<15x128xf32>
    %111 = arith.subf %97, %110 : vector<15x128xf32>
    %cst_100 = arith.constant 9.99999974E-6 : f32
    %112 = vector.broadcast %cst_100 : f32 to vector<1x128xf32>
    %113 = arith.addf %109, %112 : vector<1x128xf32>
    %114 = math.rsqrt %113 : vector<1x128xf32>
    %115 = vector.broadcast %114 : vector<1x128xf32> to vector<15x128xf32>
    %116 = arith.mulf %111, %115 : vector<15x128xf32>
    %cst_101 = arith.constant 0.000000e+00 : f32
    %117 = vector.broadcast %cst_101 : f32 to vector<15x128xf32>
    %118 = arith.cmpf oge, %116, %117 : vector<15x128xf32>
    %cst_102 = arith.constant 2.000000e-01 : f32
    %119 = vector.broadcast %cst_102 : f32 to vector<15x128xf32>
    %120 = arith.mulf %119, %116 : vector<15x128xf32>
    %121 = arith.select %118, %116, %120 : vector<15x128xi1>, vector<15x128xf32>
    %c0_103 = arith.constant 0 : index
    %c0_104 = arith.constant 0 : index
    %c0_105 = arith.constant 0 : index
    %122 = vector.load %arg6[%c0_103, %c0_104, %c0_105] : memref<1x15x128xf32, #tpu.memory_space<vmem>>, vector<1x15x128xf32>
    %123 = vector.shape_cast %122 : vector<1x15x128xf32> to vector<15x128xf32>
    %124 = vector.shape_cast %121 : vector<15x128xf32> to vector<1x15x128xf32>
    tpu.vector_store %arg6[%c0_103, %c0_104, %c0_105], %124 {strides = array<i32>} : memref<1x15x128xf32, #tpu.memory_space<vmem>>, vector<1x15x128xf32>,
    return
  }
  func.func @transform_0(%arg0: i32, %arg1: i32) -> (i32, i32, i32) {
    %c0_i32 = arith.constant 0 : i32
    %c0_i32_0 = arith.constant 0 : i32
    %c0_i32_1 = arith.constant 0 : i32
    return %arg0, %c0_i32, %c0_i32_0 : i32, i32, i32
  }
  func.func @transform_1(%arg0: i32, %arg1: i32) -> (i32, i32, i32) {
    %c0_i32 = arith.constant 0 : i32
    %c0_i32_0 = arith.constant 0 : i32
    %c0_i32_1 = arith.constant 0 : i32
    return %c0_i32, %c0_i32_0, %arg1 : i32, i32, i32
  }
  func.func @transform_2(%arg0: i32, %arg1: i32) -> (i32, i32) {
    %c0_i32 = arith.constant 0 : i32
    %c0_i32_0 = arith.constant 0 : i32
    return %c0_i32, %arg1 : i32, i32
  }
  func.func @transform_3(%arg0: i32, %arg1: i32) -> (i32, i32) {
    %c0_i32 = arith.constant 0 : i32
    %c0_i32_0 = arith.constant 0 : i32
    %c0_i32_1 = arith.constant 0 : i32
    return %c0_i32, %c0_i32_0 : i32, i32
  }
  func.func @transform_4(%arg0: i32, %arg1: i32) -> (i32, i32, i32) {
    %c0_i32 = arith.constant 0 : i32
    %c0_i32_0 = arith.constant 0 : i32
    return %arg0, %c0_i32, %arg1 : i32, i32, i32
  }
}

</mosaic_0001>

<bundles_post_ra>
// kernel: discriminator_forward.4
= control target key start
LH: loop header
LB: loop body
LE: loop exit
PB: predicated region body
PF: predicated region fallthrough
CT: control target
= control target key end

     0   :  { %s1085_s12 = smov 0   ;;  %s1259_s0 = inlined_call_operand.vmem [shape: bf16[512,64], index: 0, kind: input, shape index: {}]   ;;  %s1260_s1 = inlined_call_operand.vmem [shape: bf16[64,64], index: 1, kind: input, shape index: {}]   ;;  %s1261_s2 = inlined_call_operand.vmem [shape: f32[1,64], index: 2, kind: input, shape index: {}]   ;;  %s1262_s3 = inlined_call_operand.vmem [shape: bf16[512,64], index: 3, kind: output, shape index: {}]  }
   0x1 LB: > { %s849_s13 = sadd.s32 4294967295, %s1063_s12   ;;  %p853_p0 = scmp.ge.s32.totalorder %s1063_s12, 1  ;;  %s1063_s12 = sphi %s1085_s12, %s13_s12  }
   0x2   : > { %p138_p1 = scmp.lt.s32.totalorder %s1063_s12, 3 }
   0x4   : > { %p139_p2 = pnand %p853_p0, %p138_p1 }
   0x5   : > { %v1037_v0 = vld [vmem:[%s1260_s1] sm:$0xff] (!%p139_p2)   ;;  %s854_s16 = sshll.u32 (!%p139_p2), %s849_s13, 5  ;;  %v1038_v1 = vld [vmem:[%s1260_s1 + $0x8] sm:$0xff] (!%p139_p2)   ;;  %v1039_v2 = vld [vmem:[%s1260_s1 + $0x10] sm:$0xff] (!%p139_p2)   ;;  %vm326_vm0 = vcmask (!%p139_p2), 523264   ;;  %vm760_vm1 = vcmask (!%p139_p2), 519168  }
   0x6   : > { %142 = sbr.rel (%p139_p2) target bundleno = 280 (0x118), region = 32  ;;  %p163_p3 = scmp.lt.s32.totalorder (!%p139_p2), %s854_s16, 63  ;;  %981 = vmatprep.subr.bf16.mxu0 (!%p139_p2), %v1037_v0  ;;  %1021 = vmatprep.subr.bf16.mxu1 (!%p139_p2), %v1037_v0  ;;  %v1040_v3 = vld [vmem:[%s1260_s1 + $0x18] sm:$0xff] (!%p139_p2)   ;;  %v1150_v20 = vld [vmem:[%s1261_s2] ss:$0 sm:$0xff] (!%p139_p2) }
   0x7   : > { %982 = vmatpush3.bf16.msra.mxu0 (!%p139_p2), %v1037_v0  ;;  %1025 = vmatpush3.bf16.msra.mxu1 (!%p139_p2), %v1037_v0 }
   0x8   : > { %983 = vmatprep.subr.bf16.mxu0 (!%p139_p2), %v1038_v1  ;;  %1022 = vmatprep.subr.bf16.mxu1 (!%p139_p2), %v1038_v1 }
   0xb   : > { %984 = vmatpush3.bf16.msra.mxu0 (!%p139_p2), %v1038_v1  ;;  %1026 = vmatpush3.bf16.msra.mxu1 (!%p139_p2), %v1038_v1 }
   0xc   : > { %985 = vmatprep.subr.bf16.mxu0 (!%p139_p2), %v1039_v2  ;;  %1023 = vmatprep.subr.bf16.mxu1 (!%p139_p2), %v1039_v2 }
   0xd   : > { %s1264_s16 = smov (!%p163_p3, %s854_s16), 63 }
   0xe   : > { %s855_s21 = sshll.u32 %s1264_s16, 2 }
   0xf   : > { %s1113_s26 = scalar_lea.vmem %s1259_s0, %s855_s21  ;;  %986 = vmatpush3.bf16.msra.mxu0 %v1039_v2  ;;  %1027 = vmatpush3.bf16.msra.mxu1 %v1039_v2  ;;  %s1161_s4 = scalar_lea.vmem %s1262_s3, %s855_s21 }
  0x10   : > { %v1041_v4 = vld [vmem:[%s1113_s26] sm:$0xff]   ;;  %987 = vmatprep.subr.bf16.mxu0 %v1040_v3  ;;  %1024 = vmatprep.subr.bf16.mxu1 %v1040_v3  ;;  %v1043_v6 = vld [vmem:[%s1113_s26 + $0x8] sm:$0xff]   ;;  %v1045_v8 = vld [vmem:[%s1113_s26 + $0x10] sm:$0xff]  }
  0x11   : > { %v1042_v5 = vld [vmem:[%s1113_s26 + $0x40] sm:$0xff]   ;;  %989 = vmatprep.mubr.msk.bf16.mxu0 %vm326_vm0, %v1041_v4  ;;  %v1044_v7 = vld [vmem:[%s1113_s26 + $0x48] sm:$0xff]   ;;  %v1046_v9 = vld [vmem:[%s1113_s26 + $0x50] sm:$0xff]  }
  0x12   : > { %1005 = vmatprep.mubr.msk.bf16.mxu1 %vm326_vm0, %v1042_v5  ;;  %v1047_v10 = vld [vmem:[%s1113_s26 + $0x18] sm:$0xff]   ;;  %v1049_v12 = vld [vmem:[%s1113_s26 + $0x20] sm:$0xff]   ;;  %v1051_v14 = vld [vmem:[%s1113_s26 + $0x28] sm:$0xff]  }
  0x13   : > { %988 = vmatpush3.bf16.msra.mxu0 %v1040_v3  ;;  %1028 = vmatpush3.bf16.msra.mxu1 %v1040_v3  ;;  %v1048_v11 = vld [vmem:[%s1113_s26 + $0x58] sm:$0xff]   ;;  %v1050_v13 = vld [vmem:[%s1113_s26 + $0x60] sm:$0xff]   ;;  %v1052_v15 = vld [vmem:[%s1113_s26 + $0x68] sm:$0xff]  }
  0x14   : > { %v1053_v16 = vld [vmem:[%s1113_s26 + $0x30] sm:$0xff]   ;;  %v1055_v18 = vld [vmem:[%s1113_s26 + $0x38] sm:$0xff]  }
  0x15   : > { %v1054_v17 = vld [vmem:[%s1113_s26 + $0x70] sm:$0xff]   ;;  %v1056_v19 = vld [vmem:[%s1113_s26 + $0x78] sm:$0xff]  }
  0x16   : > { %990 = vmatmul.mubr.msk.bf16.vlgmr.msra.gmra.mrb[0].mxu0 %vm326_vm0, %v1043_v6  ;;  %1006 = vmatmul.mubr.msk.bf16.vlgmr.msra.gmra.mrb[0].mxu1 %vm326_vm0, %v1044_v7 }
  0x17   : > { %993 = vmatprep.mubr.msk.bf16.mxu0 %vm326_vm0, %v1045_v8  ;;  %1009 = vmatprep.mubr.msk.bf16.mxu1 %vm326_vm0, %v1046_v9 }
  0x1e   : > { %994 = vmatmul.mubr.msk.bf16.gmra.mrb[4].mxu0 %vm326_vm0, %v1047_v10  ;;  %1010 = vmatmul.mubr.msk.bf16.gmra.mrb[4].mxu1 %vm326_vm0, %v1048_v11 }
  0x1f   : > { %997 = vmatprep.mubr.msk.bf16.mxu0 %vm326_vm0, %v1049_v12  ;;  %1013 = vmatprep.mubr.msk.bf16.mxu1 %vm326_vm0, %v1050_v13 }
  0x26   : > { %998 = vmatmul.mubr.msk.bf16.gmra.mrb[8].mxu0 %vm326_vm0, %v1051_v14  ;;  %1014 = vmatmul.mubr.msk.bf16.gmra.mrb[8].mxu1 %vm326_vm0, %v1052_v15 }
  0x27   : > { %1001 = vmatprep.mubr.msk.bf16.mxu0 %vm326_vm0, %v1053_v16  ;;  %1017 = vmatprep.mubr.msk.bf16.mxu1 %vm326_vm0, %v1054_v17 }
  0x2e   : > { %1002 = vmatmul.mubr.msk.bf16.gmra.mrb[12].mxu0 %vm326_vm0, %v1055_v18  ;;  %1018 = vmatmul.mubr.msk.bf16.gmra.mrb[12].mxu1 %vm326_vm0, %v1056_v19 }
  0xe9   : > { %v991_v21 = vpop.f32.mrb[0].mxu0  ;;  %v1007_v22 = vpop.f32.mrb[0].mxu1 }
  0xea   : > { %v418_v23 = vadd.f32 %v991_v21, %v1150_v20  ;;  %v482_v24 = vadd.f32 %v1007_v22, %v1150_v20  ;;  %v409_v25 = vpop.f32.mrb[1].mxu0  ;;  %v473_v26 = vpop.f32.mrb[1].mxu1 }
  0xeb   : > { %v410_v27 = vadd.f32 %v1150_v20, %v409_v25  ;;  %v474_v28 = vadd.f32 %v1150_v20, %v473_v26  ;;  %v992_v29 = vpop.f32.mrb[2].mxu0  ;;  %v1008_v30 = vpop.f32.mrb[2].mxu1 }
  0xec   : > { %vm538_vm2 = vcmp.ge.f32.partialorder %v418_v23, 0.0  ;;  %v570_v31 = vmul.f32 0.2, %v418_v23  ;;  %vm554_vm3 = vcmp.ge.f32.partialorder %v482_v24, 0.0  ;;  %v586_v32 = vmul.f32 0.2, %v482_v24 }
  0xed   : > { %vm536_vm4 = vcmp.ge.f32.partialorder %v410_v27, 0.0  ;;  %v568_v33 = vmul.f32 0.2, %v410_v27  ;;  %vm552_vm5 = vcmp.ge.f32.partialorder %v474_v28, 0.0  ;;  %v584_v34 = vmul.f32 0.2, %v474_v28 }
  0xee   : > { %v602_v35 = vsel %vm538_vm2, %v418_v23, %v570_v31  ;;  %v618_v36 = vsel %vm554_vm3, %v482_v24, %v586_v32  ;;  %v421_v37 = vadd.f32 %v992_v29, %v1150_v20  ;;  %v485_v38 = vadd.f32 %v1008_v30, %v1150_v20  ;;  %v412_v39 = vpop.f32.mrb[3].mxu0  ;;  %v476_v40 = vpop.f32.mrb[3].mxu1 }
  0xef   : > { %v931_v41 = vpack.c.bf16 %v602_v35, %v602_v35  ;;  %v947_v42 = vpack.c.bf16 %v618_v36, %v618_v36  ;;  %v600_v43 = vsel %vm536_vm4, %v410_v27, %v568_v33  ;;  %v616_v44 = vsel %vm552_vm5, %v474_v28, %v584_v34 }
  0xf0   : > { %v929_v45 = vpack.c.bf16 %v600_v43, %v600_v43  ;;  %v945_v46 = vpack.c.bf16 %v616_v44, %v616_v44  ;;  %vm539_vm6 = vcmp.ge.f32.partialorder %v421_v37, 0.0  ;;  %v571_v47 = vmul.f32 0.2, %v421_v37 }
  0xf1   : > { %763 = vst.msk [vmem:[%s1161_s4 + $0x8] sm:$0xf] %vm760_vm1, %v931_v41  ;;  %779 = vst.msk [vmem:[%s1161_s4 + $0x48] sm:$0xf] %vm760_vm1, %v947_v42  ;;  %vm555_vm7 = vcmp.ge.f32.partialorder %v485_v38, 0.0  ;;  %v413_v49 = vadd.f32 %v1150_v20, %v412_v39  ;;  %v477_v50 = vadd.f32 %v1150_v20, %v476_v40  ;;  %v995_v51 = vpop.f32.mrb[4].mxu0 }
  0xf2   : > { %v587_v48 = vmul.f32 0.2, %v485_v38  ;;  %v1011_v52 = vpop.f32.mrb[4].mxu1  ;;  %761 = vst.msk [vmem:[%s1161_s4] sm:$0xf] %vm760_vm1, %v929_v45  ;;  %v603_v53 = vsel %vm539_vm6, %v421_v37, %v571_v47  ;;  %v434_v54 = vadd.f32 %v995_v51, %v1150_v20  ;;  %v425_v56 = vpop.f32.mrb[5].mxu0 }
  0xf3   : > { %777 = vst.msk [vmem:[%s1161_s4 + $0x40] sm:$0xf] %vm760_vm1, %v945_v46  ;;  %v498_v55 = vadd.f32 %v1011_v52, %v1150_v20  ;;  %v489_v57 = vpop.f32.mrb[5].mxu1  ;;  %v932_v58 = vpack.c.bf16 %v603_v53, %v603_v53  ;;  %vm537_vm8 = vcmp.ge.f32.partialorder %v413_v49, 0.0  ;;  %v569_v60 = vmul.f32 0.2, %v413_v49 }
  0xf4   : > { %v619_v59 = vsel %vm555_vm7, %v485_v38, %v587_v48  ;;  %v996_v61 = vpop.f32.mrb[6].mxu0  ;;  %v1012_v62 = vpop.f32.mrb[6].mxu1  ;;  %vm553_vm9 = vcmp.ge.f32.partialorder %v477_v50, 0.0  ;;  %v585_v0 = vmul.f32 0.2, %v477_v50  ;;  %vm542_vm10 = vcmp.ge.f32.partialorder %v434_v54, 0.0 }
  0xf5   : > { %v948_v63 = vpack.c.bf16 %v619_v59, %v619_v59  ;;  %v428_v1 = vpop.f32.mrb[7].mxu0  ;;  %v492_v2 = vpop.f32.mrb[7].mxu1  ;;  %764 = vst.msk [vmem:[%s1161_s4 + $0xc] sm:$0xf] %vm760_vm1, %v932_v58  ;;  %v601_v3 = vsel %vm537_vm8, %v413_v49, %v569_v60  ;;  %v574_v4 = vmul.f32 0.2, %v434_v54  ;;  %v426_v8 = vadd.f32 %v1150_v20, %v425_v56 }
  0xf6   : > { %vm558_vm11 = vcmp.ge.f32.partialorder %v498_v55, 0.0  ;;  %v590_v5 = vmul.f32 0.2, %v498_v55  ;;  %v930_v6 = vpack.c.bf16 %v601_v3, %v601_v3  ;;  %v617_v7 = vsel %vm553_vm9, %v477_v50, %v585_v0 }
  0xf7   : > { %780 = vst.msk [vmem:[%s1161_s4 + $0x4c] sm:$0xf] %vm760_vm1, %v948_v63  ;;  %v490_v9 = vadd.f32 %v1150_v20, %v489_v57  ;;  %v946_v10 = vpack.c.bf16 %v617_v7, %v617_v7  ;;  %v606_v11 = vsel %vm542_vm10, %v434_v54, %v574_v4  ;;  %v437_v13 = vadd.f32 %v996_v61, %v1150_v20 }
  0xf8   : > { %v622_v12 = vsel %vm558_vm11, %v498_v55, %v590_v5  ;;  %762 = vst.msk [vmem:[%s1161_s4 + $0x4] sm:$0xf] %vm760_vm1, %v930_v6  ;;  %v935_v14 = vpack.c.bf16 %v606_v11, %v606_v11  ;;  %vm540_vm12 = vcmp.ge.f32.partialorder %v426_v8, 0.0  ;;  %v572_v16 = vmul.f32 0.2, %v426_v8 }
  0xf9   : > { %v951_v15 = vpack.c.bf16 %v622_v12, %v622_v12  ;;  %778 = vst.msk [vmem:[%s1161_s4 + $0x44] sm:$0xf] %vm760_vm1, %v946_v10  ;;  %vm556_vm13 = vcmp.ge.f32.partialorder %v490_v9, 0.0  ;;  %v588_v17 = vmul.f32 0.2, %v490_v9  ;;  %vm543_vm14 = vcmp.ge.f32.partialorder %v437_v13, 0.0 }
  0xfa   : > { %v575_v18 = vmul.f32 0.2, %v437_v13  ;;  %767 = vst.msk [vmem:[%s1161_s4 + $0x18] sm:$0xf] %vm760_vm1, %v935_v14  ;;  %v604_v19 = vsel %vm540_vm12, %v426_v8, %v572_v16  ;;  %v501_v21 = vadd.f32 %v1012_v62, %v1150_v20  ;;  %v429_v22 = vadd.f32 %v1150_v20, %v428_v1  ;;  %v999_v24 = vpop.f32.mrb[8].mxu0  ;;  %v1015_v25 = vpop.f32.mrb[8].mxu1 }
  0xfb   : > { %783 = vst.msk [vmem:[%s1161_s4 + $0x58] sm:$0xf] %vm760_vm1, %v951_v15  ;;  %v493_v23 = vadd.f32 %v1150_v20, %v492_v2  ;;  %v933_v26 = vpack.c.bf16 %v604_v19, %v604_v19  ;;  %v620_v27 = vsel %vm556_vm13, %v490_v9, %v588_v17  ;;  %v450_v29 = vadd.f32 %v999_v24, %v1150_v20  ;;  %v441_v30 = vpop.f32.mrb[9].mxu0  ;;  %v505_v31 = vpop.f32.mrb[9].mxu1 }
  0xfc   : > { %v607_v28 = vsel %vm543_vm14, %v437_v13, %v575_v18  ;;  %v949_v32 = vpack.c.bf16 %v620_v27, %v620_v27  ;;  %vm559_vm15 = vcmp.ge.f32.partialorder %v501_v21, 0.0  ;;  %v591_v34 = vmul.f32 0.2, %v501_v21  ;;  %v1000_v35 = vpop.f32.mrb[10].mxu0  ;;  %v1016_v36 = vpop.f32.mrb[10].mxu1 }
  0xfd   : > { %v936_v33 = vpack.c.bf16 %v607_v28, %v607_v28  ;;  %765 = vst.msk [vmem:[%s1161_s4 + $0x10] sm:$0xf] %vm760_vm1, %v933_v26  ;;  %vm541_vm0 = vcmp.ge.f32.partialorder %v429_v22, 0.0  ;;  %v573_v37 = vmul.f32 0.2, %v429_v22  ;;  %vm557_vm2 = vcmp.ge.f32.partialorder %v493_v23, 0.0 }
  0xfe   : > { %v589_v38 = vmul.f32 0.2, %v493_v23  ;;  %781 = vst.msk [vmem:[%s1161_s4 + $0x50] sm:$0xf] %vm760_vm1, %v949_v32  ;;  %v623_v39 = vsel %vm559_vm15, %v501_v21, %v591_v34  ;;  %vm546_vm3 = vcmp.ge.f32.partialorder %v450_v29, 0.0  ;;  %v514_v41 = vadd.f32 %v1015_v25, %v1150_v20  ;;  %v444_v42 = vpop.f32.mrb[11].mxu0 }
  0xff   : > { %768 = vst.msk [vmem:[%s1161_s4 + $0x1c] sm:$0xf] %vm760_vm1, %v936_v33  ;;  %v578_v40 = vmul.f32 0.2, %v450_v29  ;;  %v508_v43 = vpop.f32.mrb[11].mxu1  ;;  %v952_v44 = vpack.c.bf16 %v623_v39, %v623_v39  ;;  %v605_v45 = vsel %vm541_vm0, %v429_v22, %v573_v37  ;;  %v442_v47 = vadd.f32 %v1150_v20, %v441_v30 }
 0x100   : > { %v621_v46 = vsel %vm557_vm2, %v493_v23, %v589_v38  ;;  %v934_v48 = vpack.c.bf16 %v605_v45, %v605_v45  ;;  %vm562_vm4 = vcmp.ge.f32.partialorder %v514_v41, 0.0  ;;  %v594_v52 = vmul.f32 0.2, %v514_v41 }
 0x101   : > { %v950_v49 = vpack.c.bf16 %v621_v46, %v621_v46  ;;  %v610_v50 = vsel %vm546_vm3, %v450_v29, %v578_v40  ;;  %784 = vst.msk [vmem:[%s1161_s4 + $0x5c] sm:$0xf] %vm760_vm1, %v952_v44  ;;  %vm544_vm5 = vcmp.ge.f32.partialorder %v442_v47, 0.0  ;;  %v576_v53 = vmul.f32 0.2, %v442_v47  ;;  %v1003_v54 = vpop.f32.mrb[12].mxu0 }
 0x102   : > { %v939_v51 = vpack.c.bf16 %v610_v50, %v610_v50  ;;  %766 = vst.msk [vmem:[%s1161_s4 + $0x14] sm:$0xf] %vm760_vm1, %v934_v48  ;;  %v506_v55 = vadd.f32 %v1150_v20, %v505_v31  ;;  %v453_v56 = vadd.f32 %v1000_v35, %v1150_v20  ;;  %v517_v57 = vadd.f32 %v1016_v36, %v1150_v20  ;;  %v1019_v59 = vpop.f32.mrb[12].mxu1  ;;  %v457_v60 = vpop.f32.mrb[13].mxu0 }
 0x103   : > { %782 = vst.msk [vmem:[%s1161_s4 + $0x54] sm:$0xf] %vm760_vm1, %v950_v49  ;;  %v445_v58 = vadd.f32 %v1150_v20, %v444_v42  ;;  %v626_v61 = vsel %vm562_vm4, %v514_v41, %v594_v52  ;;  %v608_v62 = vsel %vm544_vm5, %v442_v47, %v576_v53  ;;  %v509_v63 = vadd.f32 %v1150_v20, %v508_v43  ;;  %v521_v1 = vpop.f32.mrb[13].mxu1  ;;  %v1004_v2 = vpop.f32.mrb[14].mxu0 }
 0x104   : > { %771 = vst.msk [vmem:[%s1161_s4 + $0x28] sm:$0xf] %vm760_vm1, %v939_v51  ;;  %v466_v0 = vadd.f32 %v1003_v54, %v1150_v20  ;;  %v955_v3 = vpack.c.bf16 %v626_v61, %v626_v61  ;;  %v937_v4 = vpack.c.bf16 %v608_v62, %v608_v62  ;;  %vm560_vm6 = vcmp.ge.f32.partialorder %v506_v55, 0.0  ;;  %v1020_v6 = vpop.f32.mrb[14].mxu1  ;;  %v460_v7 = vpop.f32.mrb[15].mxu0 }
 0x105   : > { %v592_v5 = vmul.f32 0.2, %v506_v55  ;;  %vm547_vm7 = vcmp.ge.f32.partialorder %v453_v56, 0.0  ;;  %v579_v8 = vmul.f32 0.2, %v453_v56  ;;  %vm563_vm8 = vcmp.ge.f32.partialorder %v517_v57, 0.0 }
 0x106   : > { %v595_v9 = vmul.f32 0.2, %v517_v57  ;;  %787 = vst.msk [vmem:[%s1161_s4 + $0x68] sm:$0xf] %vm760_vm1, %v955_v3  ;;  %769 = vst.msk [vmem:[%s1161_s4 + $0x20] sm:$0xf] %vm760_vm1, %v937_v4  ;;  %v530_v24 = vadd.f32 %v1019_v59, %v1150_v20  ;;  %v458_v26 = vadd.f32 %v1150_v20, %v457_v60  ;;  %v522_v27 = vadd.f32 %v1150_v20, %v521_v1 }
 0x107   : > { %v624_v10 = vsel %vm560_vm6, %v506_v55, %v592_v5  ;;  %vm545_vm9 = vcmp.ge.f32.partialorder %v445_v58, 0.0  ;;  %v577_v11 = vmul.f32 0.2, %v445_v58  ;;  %vm561_vm10 = vcmp.ge.f32.partialorder %v509_v63, 0.0  ;;  %v524_v12 = vpop.f32.mrb[15].mxu1 }
 0x108   : > { %v953_v13 = vpack.c.bf16 %v624_v10, %v624_v10  ;;  %v611_v14 = vsel %vm547_vm7, %v453_v56, %v579_v8  ;;  %v627_v15 = vsel %vm563_vm8, %v517_v57, %v595_v9  ;;  %v593_v16 = vmul.f32 0.2, %v509_v63 }
 0x109   : > { %v940_v17 = vpack.c.bf16 %v611_v14, %v611_v14  ;;  %v956_v18 = vpack.c.bf16 %v627_v15, %v627_v15  ;;  %v609_v19 = vsel %vm545_vm9, %v445_v58, %v577_v11  ;;  %vm550_vm11 = vcmp.ge.f32.partialorder %v466_v0, 0.0 }
 0x10a   : > { %785 = vst.msk [vmem:[%s1161_s4 + $0x60] sm:$0xf] %vm760_vm1, %v953_v13  ;;  %v938_v21 = vpack.c.bf16 %v609_v19, %v609_v19  ;;  %v625_v22 = vsel %vm561_vm10, %v509_v63, %v593_v16  ;;  %v582_v23 = vmul.f32 0.2, %v466_v0  ;;  %v469_v28 = vadd.f32 %v1004_v2, %v1150_v20 }
 0x10b   : > { %772 = vst.msk [vmem:[%s1161_s4 + $0x2c] sm:$0xf] %vm760_vm1, %v940_v17  ;;  %788 = vst.msk [vmem:[%s1161_s4 + $0x6c] sm:$0xf] %vm760_vm1, %v956_v18  ;;  %v954_v25 = vpack.c.bf16 %v625_v22, %v625_v22  ;;  %vm566_vm12 = vcmp.ge.f32.partialorder %v530_v24, 0.0  ;;  %v533_v31 = vadd.f32 %v1020_v6, %v1150_v20  ;;  %vm548_vm13 = vcmp.ge.f32.partialorder %v458_v26, 0.0 }
 0x10c   : > { %770 = vst.msk [vmem:[%s1161_s4 + $0x24] sm:$0xf] %vm760_vm1, %v938_v21  ;;  %v614_v29 = vsel %vm550_vm11, %v466_v0, %v582_v23  ;;  %v598_v30 = vmul.f32 0.2, %v530_v24  ;;  %v580_v33 = vmul.f32 0.2, %v458_v26  ;;  %v461_v43 = vadd.f32 %v1150_v20, %v460_v7 }
 0x10d   : > { %786 = vst.msk [vmem:[%s1161_s4 + $0x64] sm:$0xf] %vm760_vm1, %v954_v25  ;;  %v943_v32 = vpack.c.bf16 %v614_v29, %v614_v29  ;;  %vm564_vm14 = vcmp.ge.f32.partialorder %v522_v27, 0.0  ;;  %v596_v35 = vmul.f32 0.2, %v522_v27  ;;  %vm551_vm15 = vcmp.ge.f32.partialorder %v469_v28, 0.0 }
 0x10e   : > { %v630_v34 = vsel %vm566_vm12, %v530_v24, %v598_v30  ;;  %v583_v36 = vmul.f32 0.2, %v469_v28  ;;  %v612_v38 = vsel %vm548_vm13, %v458_v26, %v580_v33  ;;  %vm567_vm0 = vcmp.ge.f32.partialorder %v533_v31, 0.0 }
 0x10f   : > { %775 = vst.msk [vmem:[%s1161_s4 + $0x38] sm:$0xf] %vm760_vm1, %v943_v32  ;;  %v959_v37 = vpack.c.bf16 %v630_v34, %v630_v34  ;;  %v599_v39 = vmul.f32 0.2, %v533_v31  ;;  %v941_v40 = vpack.c.bf16 %v612_v38, %v612_v38  ;;  %v628_v41 = vsel %vm564_vm14, %v522_v27, %v596_v35 }
 0x110   : > { %v615_v42 = vsel %vm551_vm15, %v469_v28, %v583_v36  ;;  %v957_v44 = vpack.c.bf16 %v628_v41, %v628_v41  ;;  %v525_v47 = vadd.f32 %v1150_v20, %v524_v12  ;;  %vm549_vm2 = vcmp.ge.f32.partialorder %v461_v43, 0.0 }
 0x111   : > { %791 = vst.msk [vmem:[%s1161_s4 + $0x78] sm:$0xf] %vm760_vm1, %v959_v37  ;;  %v944_v45 = vpack.c.bf16 %v615_v42, %v615_v42  ;;  %v631_v46 = vsel %vm567_vm0, %v533_v31, %v599_v39  ;;  %773 = vst.msk [vmem:[%s1161_s4 + $0x30] sm:$0xf] %vm760_vm1, %v941_v40  ;;  %v581_v49 = vmul.f32 0.2, %v461_v43 }
 0x112   : > { %v960_v48 = vpack.c.bf16 %v631_v46, %v631_v46  ;;  %789 = vst.msk [vmem:[%s1161_s4 + $0x70] sm:$0xf] %vm760_vm1, %v957_v44  ;;  %vm565_vm3 = vcmp.ge.f32.partialorder %v525_v47, 0.0  ;;  %v597_v50 = vmul.f32 0.2, %v525_v47 }
 0x113   : > { %776 = vst.msk [vmem:[%s1161_s4 + $0x3c] sm:$0xf] %vm760_vm1, %v944_v45  ;;  %v613_v51 = vsel %vm549_vm2, %v461_v43, %v581_v49 }
 0x114   : > { %792 = vst.msk [vmem:[%s1161_s4 + $0x7c] sm:$0xf] %vm760_vm1, %v960_v48  ;;  %v942_v52 = vpack.c.bf16 %v613_v51, %v613_v51  ;;  %v629_v53 = vsel %vm565_vm3, %v525_v47, %v597_v50 }
 0x115   : > { %v958_v54 = vpack.c.bf16 %v629_v53, %v629_v53 }
 0x116   : > { %774 = vst.msk [vmem:[%s1161_s4 + $0x34] sm:$0xf] %vm760_vm1, %v942_v52 }
 0x117   : > { %790 = vst.msk [vmem:[%s1161_s4 + $0x74] sm:$0xf] %vm760_vm1, %v958_v54 }
 0x118 PF: > { %s13_s12 = sadd.s32 1, %s1063_s12  }
 0x119   : > { %p10_p4 = scmp.ge.s32.totalorder %s13_s12, 4  }
 0x11b   :  { %12 = sbr.rel (!%p10_p4) target bundleno = 1 (0x1), region = 62 }

// kernel: discriminator_forward.5
= control target key start
LH: loop header
LB: loop body
LE: loop exit
PB: predicated region body
PF: predicated region fallthrough
CT: control target
= control target key end

     0   :  { %s2510_s15 = smov 0   ;;  %s2512_s16 = smov 0   ;;  %s2959_s0 = inlined_call_operand.vmem [shape: bf16[2,81,256], index: 0, kind: input, shape index: {}]   ;;  %s2960_s1 = inlined_call_operand.vmem [shape: bf16[4,256,128], index: 1, kind: input, shape index: {}]   ;;  %s2961_s2 = inlined_call_operand.vmem [shape: f32[1,128], index: 2, kind: input, shape index: {}]   ;;  %s2962_s3 = inlined_call_operand.vmem [shape: f32[1,71], index: 3, kind: input, shape index: {}]   ;;  %s2963_s4 = inlined_call_operand.vmem [shape: bf16[2,71,128], index: 4, kind: output, shape index: {}]  }
   0x1   :  { %s2514_s17 = smov 0  }
   0x2 LB: > { %s26_s18 = sadd.s32 1, %s2476_s16  ;;  %p1828_p0 = scmp.ge.s32.totalorder %s2480_s17, 1  ;;  %s2480_s17 = sphi %s2514_s17, %s14_s17   ;;  %s2476_s16 = sphi %s2512_s16, %s2965_s16   ;;  %s2472_s15 = sphi %s2510_s15, %s2964_s15  }
   0x3   : > { %p28_p1 = scmp.ge.s32.totalorder %s26_s18, 2  ;;  %p193_p2 = scmp.lt.s32.totalorder %s2480_s17, 3 }
   0x5   : > { %s2967_s18 = smov (%p28_p1, %s26_s18), 0  ;;  %p194_p3 = pnand %p1828_p0, %p193_p2 }
   0x6   : > { %v2368_v0 = vld [vmem:[%s2960_s1 + $0xc0] sm:$0xff] (!%p194_p3)   ;;  %v2372_v4 = vld [vmem:[%s2960_s1 + $0xc8] sm:$0xff] (!%p194_p3)   ;;  %v2376_v8 = vld [vmem:[%s2960_s1 + $0xd0] sm:$0xff] (!%p194_p3)   ;;  %p229_p4 = scmp.lt.s32.totalorder (!%p194_p3), %s2472_s15, 1  ;;  %vm361_vm0 = vsmask.f32 (!%p194_p3), 7424 }
   0x7   : > { %197 = sbr.rel (%p194_p3) target bundleno = 584 (0x248), region = 36  ;;  %v2369_v1 = vld [vmem:[%s2960_s1 + $0x40] sm:$0xff] (!%p194_p3)   ;;  %2069 = vmatprep.subr.bf16.mxu0 (!%p194_p3), %v2368_v0  ;;  %v2373_v5 = vld [vmem:[%s2960_s1 + $0x48] sm:$0xff] (!%p194_p3)   ;;  %v2377_v9 = vld [vmem:[%s2960_s1 + $0x50] sm:$0xff] (!%p194_p3)   ;;  %vm1223_vm1 = vcmask (!%p194_p3), 1046528   ;;  %vm2483_vm2 = vmmov (!%p194_p3), 0  }
   0x8   : > { %v2370_v2 = vld [vmem:[%s2960_s1 + $0x80] sm:$0xff] (!%p194_p3)   ;;  %2115 = vmatprep.subr.bf16.mxu1 (!%p194_p3), %v2369_v1  ;;  %v2374_v6 = vld [vmem:[%s2960_s1 + $0x88] sm:$0xff] (!%p194_p3)   ;;  %v2378_v10 = vld [vmem:[%s2960_s1 + $0x90] sm:$0xff] (!%p194_p3)   ;;  %vm1446_vm3 = vcmask (!%p194_p3), 580608   ;;  %vm1711_vm4 = vcmask (!%p194_p3), 1043456  }
   0x9   : > { %v2371_v3 = vld [vmem:[%s2960_s1] sm:$0xff] (!%p194_p3)   ;;  %2070 = vmatpush3.bf16.msra.mxu0 (!%p194_p3), %v2370_v2  ;;  %v2375_v7 = vld [vmem:[%s2960_s1 + $0x8] sm:$0xff] (!%p194_p3)   ;;  %v2379_v11 = vld [vmem:[%s2960_s1 + $0x10] sm:$0xff] (!%p194_p3)   ;;  %vm1712_vm5 = vsmask.f32 (!%p194_p3), 3328 }
   0xa   : > { %2116 = vmatpush3.bf16.msra.mxu1 (!%p194_p3), %v2371_v3  ;;  %2071 = vmatprep.subr.bf16.mxu0 (!%p194_p3), %v2372_v4  ;;  %v2380_v12 = vld [vmem:[%s2960_s1 + $0xd8] sm:$0xff] (!%p194_p3)   ;;  %v2384_v16 = vld [vmem:[%s2960_s1 + $0xe0] sm:$0xff] (!%p194_p3)   ;;  %v2388_v20 = vld [vmem:[%s2960_s1 + $0xe8] sm:$0xff] (!%p194_p3)  }
   0xb   : > { %2117 = vmatprep.subr.bf16.mxu1 (!%p194_p3), %v2373_v5  ;;  %v2381_v13 = vld [vmem:[%s2960_s1 + $0x58] sm:$0xff] (!%p194_p3)   ;;  %v2385_v17 = vld [vmem:[%s2960_s1 + $0x60] sm:$0xff] (!%p194_p3)   ;;  %v2389_v21 = vld [vmem:[%s2960_s1 + $0x68] sm:$0xff] (!%p194_p3)  }
   0xc   : > { %v2382_v14 = vld [vmem:[%s2960_s1 + $0x98] sm:$0xff] (!%p194_p3)   ;;  %v2386_v18 = vld [vmem:[%s2960_s1 + $0xa0] sm:$0xff] (!%p194_p3)   ;;  %v2390_v22 = vld [vmem:[%s2960_s1 + $0xa8] sm:$0xff] (!%p194_p3)  }
   0xd   : > { %2072 = vmatpush3.bf16.msra.mxu0 (!%p194_p3), %v2374_v6  ;;  %v2383_v15 = vld [vmem:[%s2960_s1 + $0x18] sm:$0xff] (!%p194_p3)   ;;  %v2387_v19 = vld [vmem:[%s2960_s1 + $0x20] sm:$0xff] (!%p194_p3)   ;;  %v2391_v23 = vld [vmem:[%s2960_s1 + $0x28] sm:$0xff] (!%p194_p3)  }
   0xe   : > { %2118 = vmatpush3.bf16.msra.mxu1 %v2375_v7  ;;  %2073 = vmatprep.subr.bf16.mxu0 %v2376_v8  ;;  %s2969_s15 = smov (!%p229_p4, %s2472_s15), 1  ;;  %v2392_v24 = vld [vmem:[%s2960_s1 + $0xf0] sm:$0xff]   ;;  %v2396_v28 = vld [vmem:[%s2960_s1 + $0xf8] sm:$0xff]   ;;  %v2406_v44 = vld [vmem:[%s2960_s1 + $0x140] sm:$0xff]  }
   0xf   : > { %2119 = vmatprep.subr.bf16.mxu1 %v2377_v9  ;;  %v2393_v25 = vld [vmem:[%s2960_s1 + $0x70] sm:$0xff]   ;;  %s2339_s27 = smul.u32 88, %s2969_s15  ;;  %v2397_v29 = vld [vmem:[%s2960_s1 + $0x78] sm:$0xff]   ;;  %v2407_v56 = vld [vmem:[%s2960_s1 + $0x1c0] sm:$0xff]  }
  0x10   : > { %v2394_v26 = vld [vmem:[%s2960_s1 + $0xb0] sm:$0xff]   ;;  %v2398_v30 = vld [vmem:[%s2960_s1 + $0xb8] sm:$0xff]   ;;  %v2409_v60 = vld [vmem:[%s2960_s1 + $0x180] sm:$0xff]   ;;  %s2340_s25 = smul.u32 36, %s2969_s15 }
  0x11   : > { %2074 = vmatpush3.bf16.msra.mxu0 %v2378_v10  ;;  %v2395_v27 = vld [vmem:[%s2960_s1 + $0x30] sm:$0xff]   ;;  %s2628_s12 = scalar_lea.vmem %s2959_s0, %s2339_s27  ;;  %v2399_v31 = vld [vmem:[%s2960_s1 + $0x38] sm:$0xff]   ;;  %v2408_v0 = vld [vmem:[%s2960_s1 + $0x100] sm:$0xff]  }
  0x12   : > { %2120 = vmatpush3.bf16.msra.mxu1 %v2379_v11  ;;  %2075 = vmatprep.subr.bf16.mxu0 %v2380_v12  ;;  %v250_v32 = vld [vmem:[%s2628_s12] sm:$0xff]  ;;  %v2638_v33 = vld [vmem:[%s2628_s12 + $0x8] sm:$0xff]  ;;  %v2641_v34 = vld [vmem:[%s2628_s12 + $0x10] sm:$0xff]  ;;  %s248_s28 = scalar_lea.vmem %s2963_s4, %s2340_s25 }
  0x13   : > { %2121 = vmatprep.subr.bf16.mxu1 %v2381_v13  ;;  %v2644_v35 = vld [vmem:[%s2628_s12 + $0x18] sm:$0xff]  ;;  %v1864_v36 = vcombine.high %v250_v32, %v2638_v33  ;;  %v1863_v37 = vcombine.low %v250_v32, %v2638_v33  ;;  %v2649_v38 = vld [vmem:[%s2628_s12 + $0x20] sm:$0xff]  ;;  %v2652_v39 = vld [vmem:[%s2628_s12 + $0x28] sm:$0xff] }
  0x14   : > { %v1866_v40 = vcombine.high %v2641_v34, %v2644_v35  ;;  %v1865_v41 = vcombine.low %v2641_v34, %v2644_v35  ;;  %v1868_v42 = vcombine.high %v2649_v38, %v2652_v39  ;;  %v2662_v43 = vcombine.low %v2649_v38, %v2652_v39  ;;  %v2411_v4 = vld [vmem:[%s2960_s1 + $0x1c8] sm:$0xff]   ;;  %v2693_v12 = vld [vmem:[%s2628_s12 + $0x30] sm:$0xff]  ;;  %v2696_v13 = vld [vmem:[%s2628_s12 + $0x38] sm:$0xff] }
  0x15   : > { %2076 = vmatpush3.bf16.msra.mxu0 %v2382_v14  ;;  %v375_v45 = vshrl.u32 %v1864_v36, 16  ;;  %v377_v46 = vshll.u32 %v1864_v36, 16  ;;  %756 = vmatprep.mubr.bf16.mxu1 %v1864_v36  ;;  %v363_v47 = vshrl.u32 %v1863_v37, 16  ;;  %v365_v48 = vshll.u32 %v1863_v37, 16  ;;  %v2410_v6 = vld [vmem:[%s2960_s1 + $0x148] sm:$0xff]   ;;  %v2423_v36 = vld [vmem:[%s2960_s1 + $0x198] sm:$0xff]   ;;  %vm1713_vm15 = vmand %vm1711_vm4, %vm1712_vm5 }
  0x16   : > { %2122 = vmatpush3.bf16.msra.mxu1 %v2383_v15  ;;  %2077 = vmatprep.subr.bf16.mxu0 %v2384_v16  ;;  %v382_v49 = vshll.u32 %v1866_v40, 16  ;;  %v370_v50 = vshll.u32 %v1865_v41, 16  ;;  %v394_v51 = vshrl.u32 %v1866_v40, 16  ;;  %v398_v52 = vshll.u32 %v1868_v42, 16  ;;  %v2412_v7 = vld [vmem:[%s2960_s1 + $0x108] sm:$0xff]   ;;  %v2416_v16 = vld [vmem:[%s2960_s1 + $0x150] sm:$0xff]  }
  0x17   : > { %2123 = vmatprep.subr.bf16.mxu1 %v2385_v17  ;;  %v379_v53 = vrot.slane %v377_v46, 1  ;;  %v367_v54 = vrot.slane %v365_v48, 1  ;;  %v386_v55 = vshrl.u32 %v1865_v41, 16  ;;  %v390_v63 = vshll.u32 %v2662_v43, 16  ;;  %v2413_v8 = vld [vmem:[%s2960_s1 + $0x188] sm:$0xff]  }
  0x18   : > { %v384_v57 = vrot.slane %v382_v49, 1  ;;  %v372_v58 = vrot.slane %v370_v50, 1  ;;  %v400_v59 = vrot.slane %v398_v52, 1  ;;  %v410_v9 = vshrl.u32 %v1868_v42, 16  ;;  %v2428_v49 = vld [vmem:[%s2960_s1 + $0x120] sm:$0xff]   ;;  %v2430_v52 = vld [vmem:[%s2960_s1 + $0x168] sm:$0xff]  }
  0x19   : > { %2078 = vmatpush3.bf16.msra.mxu0 %v2386_v18  ;;  %v380_v61 = vor.u32 %v379_v53, %v375_v45  ;;  %v368_v62 = vor.u32 %v367_v54, %v363_v47  ;;  %v392_v11 = vrot.slane %v390_v63, 1  ;;  %v1870_v14 = vcombine.high %v2693_v12, %v2696_v13  ;;  %v2417_v18 = vld [vmem:[%s2960_s1 + $0x1d0] sm:$0xff]  }
  0x1a   : > { %2124 = vmatpush3.bf16.msra.mxu1 %v2387_v19  ;;  %2079 = vmatprep.subr.bf16.mxu0 %v2388_v20  ;;  %v396_v1 = vor.u32 %v394_v51, %v384_v57  ;;  %v388_v10 = vor.u32 %v386_v55, %v372_v58  ;;  %v1869_v15 = vcombine.low %v2693_v12, %v2696_v13  ;;  %v402_v17 = vshrl.u32 %v2662_v43, 16  ;;  %v2429_v51 = vld [vmem:[%s2960_s1 + $0x1a0] sm:$0xff]   ;;  %v2431_v55 = vld [vmem:[%s2960_s1 + $0x1e8] sm:$0xff]   ;;  %v2434_v63 = vld [vmem:[%s2960_s1 + $0x170] sm:$0xff]  }
  0x1b   : > { %2125 = vmatprep.subr.bf16.mxu1 %v2389_v21  ;;  %v385_v2 = vsel %vm361_vm0, %v380_v61, %v384_v57  ;;  %v373_v3 = vsel %vm361_vm0, %v368_v62, %v372_v58  ;;  %v412_v19 = vor.u32 %v410_v9, %v400_v59  ;;  %v414_v20 = vshll.u32 %v1870_v14, 16  ;;  %v2433_v61 = vld [vmem:[%s2960_s1 + $0x1a8] sm:$0xff]  }
  0x1c   : > { %578 = vmatprep.mubr.bf16.mxu0 %v385_v2  ;;  %v401_v5 = vsel %vm361_vm0, %v396_v1, %v400_v59  ;;  %v406_v21 = vshll.u32 %v1869_v15, 16  ;;  %v418_v46 = vshrl.u32 %v1869_v15, 16  ;;  %v1938_v53 = vcombine.high %v2638_v33, %v2641_v34  ;;  %v2432_v59 = vld [vmem:[%s2960_s1 + $0x128] sm:$0xff]  }
  0x1d   : > { %2080 = vmatpush3.bf16.msra.mxu0 %v2390_v22  ;;  %v2418_v22 = vld [vmem:[%s2960_s1 + $0x110] sm:$0xff]   ;;  %v1937_v1 = vcombine.low %v2638_v33, %v2641_v34  ;;  %v2438_v33 = vld [vmem:[%s2960_s1 + $0x178] sm:$0xff]  }
  0x1e   : > { %2126 = vmatpush3.bf16.msra.mxu1 %v2391_v23  ;;  %2081 = vmatprep.subr.bf16.mxu0 %v2392_v24  ;;  %v2419_v23 = vld [vmem:[%s2960_s1 + $0x190] sm:$0xff]   ;;  %v393_v24 = vsel %vm361_vm0, %v388_v10, %v392_v11  ;;  %v408_v32 = vrot.slane %v406_v21, 1  ;;  %v890_v62 = vshll.u32 %v1938_v53, 16  ;;  %v888_v2 = vshrl.u32 %v1938_v53, 16  ;;  %v2439_v10 = vld [vmem:[%s2960_s1 + $0x1f8] sm:$0xff]  }
  0x1f   : > { %2127 = vmatprep.subr.bf16.mxu1 %v2393_v25  ;;  %v416_v25 = vrot.slane %v414_v20, 1 }
  0x20   : > { %v420_v57 = vor.u32 %v418_v46, %v408_v32 }
  0x21   : > { %2082 = vmatpush3.bf16.msra.mxu0 %v2394_v26  ;;  %v2420_v26 = vld [vmem:[%s2960_s1 + $0x158] sm:$0xff]  }
  0x22   : > { %2128 = vmatpush3.bf16.msra.mxu1 %v2395_v27  ;;  %2083 = vmatprep.subr.bf16.mxu0 %v2396_v28  ;;  %v2421_v27 = vld [vmem:[%s2960_s1 + $0x1d8] sm:$0xff]   ;;  %v417_v28 = vsel %vm361_vm0, %v412_v19, %v416_v25 }
  0x23   : > { %2129 = vmatprep.subr.bf16.mxu1 %v2397_v29  ;;  %v2422_v29 = vld [vmem:[%s2960_s1 + $0x118] sm:$0xff]  }
  0x25   : > { %2084 = vmatpush3.bf16.msra.mxu0 %v2398_v30  ;;  %v426_v30 = vshrl.u32 %v1870_v14, 16 }
  0x26   : > { %2130 = vmatpush3.bf16.msra.mxu1 %v2399_v31  ;;  %2161 = vmatprep.subr.bf16.mxu0 %v2406_v44  ;;  %v404_v31 = vor.u32 %v402_v17, %v392_v11  ;;  %v1939_v11 = vcombine.low %v2644_v35, %v2649_v38  ;;  %v2441_v17 = vld [vmem:[%s2960_s1 + $0x1b8] sm:$0xff]  }
  0x27   : > { %2207 = vmatprep.subr.bf16.mxu1 %v2407_v56  ;;  %v428_v44 = vor.u32 %v426_v30, %v416_v25  ;;  %v876_v25 = vshrl.u32 %v1937_v1, 16 }
  0x28   : > { %579 = vmatmul.mubr.bf16.vlgmr.msra.gmra.mrb[0].mxu0 %v373_v3  ;;  %v409_v47 = vsel %vm361_vm0, %v404_v31, %v408_v32  ;;  %v1225_v19 = vrot.slane %v1939_v11, 1 }
  0x29   : > { %757 = vmatmul.mubr.bf16.vlgmr.msra.gmra.mrb[0].mxu1 %v1863_v37  ;;  %586 = vmatprep.mubr.bf16.mxu0 %v401_v5  ;;  %v2731_v37 = vld [vmem:[%s2628_s12 + $0x40] sm:$0xff]  ;;  %v2436_v5 = vld [vmem:[%s2960_s1 + $0x130] sm:$0xff]  }
  0x2a   : > { %764 = vmatprep.mubr.bf16.mxu1 %v1866_v40  ;;  %2208 = vmatpush3.bf16.msra.mxu1 %v2409_v60  ;;  %v1872_v40 = vcombine.high %v2731_v37, %v2731_v37  ;;  %v2767_v60 = vcombine.high %v2644_v35, %v2649_v38  ;;  %v1140_v38 = vld [vmem:[%s2628_s12 + $0x8] sm:$0xee] }
  0x2b   : > { %2209 = vmatprep.subr.bf16.mxu1 %v2411_v4  ;;  %2162 = vmatpush3.bf16.msra.mxu0 %v2408_v0  ;;  %v2435_v0 = vld [vmem:[%s2960_s1 + $0x1f0] sm:$0xff]   ;;  %v1995_v20 = vcombine.low %v1140_v38, %v2641_v34  ;;  %v1996_v21 = vcombine.high %v1140_v38, %v2641_v34 }
  0x2c   : > { %2163 = vmatprep.subr.bf16.mxu0 %v2410_v6  ;;  %v430_v45 = vshll.u32 %v1872_v40, 16  ;;  %v437_v56 = vshrl.u32 %v1872_v40, 16  ;;  %v895_v6 = vshll.u32 %v2767_v60, 16  ;;  %v907_v31 = vshrl.u32 %v2767_v60, 16 }
  0x2e   : > { %2210 = vmatpush3.bf16.msra.mxu1 %v2413_v8  ;;  %v432_v50 = vrot.slane %v430_v45, 1  ;;  %v892_v8 = vrot.slane %v890_v62, 1  ;;  %v897_v35 = vrot.slane %v895_v6, 1 }
  0x2f   : > { %2211 = vmatprep.subr.bf16.mxu1 %v2417_v18  ;;  %2164 = vmatpush3.bf16.msra.mxu0 %v2412_v7  ;;  %v2437_v7 = vld [vmem:[%s2960_s1 + $0x1b0] sm:$0xff]  }
  0x30   : > { %2165 = vmatprep.subr.bf16.mxu0 %v2416_v16  ;;  %587 = vmatmul.mubr.bf16.gmra.mrb[4].mxu0 %v393_v24  ;;  %v433_v54 = vsel %vm361_vm0, %v428_v44, %v432_v50  ;;  %v439_v4 = vor.u32 %v437_v56, %v432_v50  ;;  %v2440_v16 = vld [vmem:[%s2960_s1 + $0x138] sm:$0xff]   ;;  %v893_v18 = vor.u32 %v892_v8, %v888_v2  ;;  %v1149_v50 = vld [vmem:[%s2628_s12 + $0x50] sm:$0x11] }
  0x31   : > { %765 = vmatmul.mubr.bf16.gmra.mrb[4].mxu1 %v1865_v41  ;;  %594 = vmatprep.mubr.bf16.mxu0 %v417_v28  ;;  %v2737_v41 = vcombine.low %v2731_v37, %v2731_v37  ;;  %v1224_v28 = vrot.slane %v1995_v20, 1  ;;  %v1944_v44 = vcombine.high %v2696_v13, %v2731_v37  ;;  %v909_v45 = vor.u32 %v907_v31, %v897_v35 }
  0x32   : > { %772 = vmatprep.mubr.bf16.mxu1 %v1868_v42  ;;  %2212 = vmatpush3.bf16.msra.mxu1 %v2419_v23  ;;  %v2426_v42 = vld [vmem:[%s2960_s1 + $0x160] sm:$0xff]   ;;  %v898_v30 = vsel %vm361_vm0, %v893_v18, %v897_v35 }
  0x33   : > { %2213 = vmatprep.subr.bf16.mxu1 %v2421_v27  ;;  %2166 = vmatpush3.bf16.msra.mxu0 %v2418_v22  ;;  %v422_v48 = vshll.u32 %v2737_v41, 16  ;;  %v434_v9 = vshrl.u32 %v2737_v41, 16  ;;  %v1228_v22 = vrot.slane %v2767_v60, 1  ;;  %v883_v27 = vshll.u32 %v1939_v11, 16 }
  0x34   : > { %2167 = vmatprep.subr.bf16.mxu0 %v2420_v26  ;;  %v1226_v34 = vsel %vm1223_vm1, %v1224_v28, %v1225_v19 }
  0x35   : > { %v424_v58 = vrot.slane %v422_v48, 1  ;;  %v1236_v48 = vrot.slane %v1944_v44, 1 }
  0x36   : > { %2214 = vmatpush3.bf16.msra.mxu1 %v2423_v36 }
  0x37   : > { %2168 = vmatpush3.bf16.msra.mxu0 %v2422_v29  ;;  %v425_v3 = vsel %vm361_vm0, %v420_v57, %v424_v58  ;;  %v436_v24 = vor.u32 %v434_v9, %v424_v58  ;;  %v1227_v29 = vrot.slane %v1996_v21, 1  ;;  %v1943_v58 = vcombine.low %v2696_v13, %v2731_v37 }
  0x38   : > { %2169 = vmatprep.subr.bf16.mxu0 %v2426_v42  ;;  %595 = vmatmul.mubr.bf16.gmra.mrb[8].mxu0 %v409_v47  ;;  %v885_v42 = vrot.slane %v883_v27, 1  ;;  %v2484_v27 = vmov 0.0  }
  0x39   : > { %773 = vmatmul.mubr.bf16.gmra.mrb[8].mxu1 %v2662_v43  ;;  %v2427_v43 = vld [vmem:[%s2960_s1 + $0x1e0] sm:$0xff]   ;;  %602 = vmatprep.mubr.bf16.mxu0 %v433_v54  ;;  %v1229_v36 = vsel %vm1223_vm1, %v1227_v29, %v1228_v22  ;;  %v927_v54 = vshll.u32 %v1944_v44, 16 }
  0x3a   : > { %780 = vmatprep.mubr.bf16.mxu1 %v1870_v14  ;;  %2215 = vmatprep.subr.bf16.mxu1 %v2427_v43  ;;  %v878_v14 = vshll.u32 %v1937_v1, 16  ;;  %v1941_v43 = vcombine.low %v2652_v39, %v2693_v12 }
  0x3b   : > { %2216 = vmatpush3.bf16.msra.mxu1 %v2429_v51  ;;  %2170 = vmatpush3.bf16.msra.mxu0 %v2428_v49  ;;  %v899_v51 = vshrl.u32 %v1939_v11, 16  ;;  %v929_v62 = vrot.slane %v927_v54, 1 }
  0x3c   : > { %2217 = vmatprep.subr.bf16.mxu1 %v2431_v55  ;;  %2171 = vmatprep.subr.bf16.mxu0 %v2430_v52  ;;  %v880_v26 = vrot.slane %v878_v14, 1  ;;  %v1230_v47 = vrot.slane %v1941_v43, 1  ;;  %v903_v52 = vshll.u32 %v1941_v43, 16  ;;  %v804_v55 = vld [vmem:[%s2628_s12 + $0x48] sm:$0xff] }
  0x3d   : > { %v2004_v57 = vcombine.high %v804_v55, %v1149_v50  ;;  %v2003_v37 = vcombine.low %v804_v55, %v1149_v50 }
  0x3e   : > { %v905_v60 = vrot.slane %v903_v52, 1 }
  0x3f   : > { %2218 = vmatpush3.bf16.msra.mxu1 %v2433_v61  ;;  %2172 = vmatpush3.bf16.msra.mxu0 %v2432_v59  ;;  %v901_v59 = vor.u32 %v899_v51, %v885_v42  ;;  %v1240_v1 = vrot.slane %v2004_v57, 1 }
  0x40   : > { %2219 = vmatprep.subr.bf16.mxu1 %v2435_v0  ;;  %2173 = vmatprep.subr.bf16.mxu0 %v2434_v63  ;;  %v1234_v63 = vrot.slane %v1943_v58, 1  ;;  %v1946_v0 = vcombine.high %v804_v55, %v804_v55 }
  0x41   : > { %781 = vmatmul.mubr.bf16.gmra.mrb[12].mxu1 %v1869_v15  ;;  %603 = vmatmul.mubr.bf16.gmra.mrb[12].mxu0 %v425_v3  ;;  %v1942_v15 = vcombine.high %v2652_v39, %v2693_v12  ;;  %v1231_v12 = vsel %vm1223_vm1, %v1225_v19, %v1230_v47  ;;  %v906_v2 = vsel %vm361_vm0, %v901_v59, %v905_v60 }
  0x42   : > { %788 = vmatprep.mubr.bf16.mxu1 %v1872_v40  ;;  %610 = vmatprep.mubr.bf16.mxu0 %v439_v4  ;;  %v915_v4 = vshrl.u32 %v1941_v43, 16  ;;  %v1235_v6 = vsel %vm1223_vm1, %v1230_v47, %v1234_v63  ;;  %v943_v13 = vshll.u32 %v1946_v0, 16  ;;  %v1241_v8 = vsel %vm1223_vm1, %v1236_v48, %v1240_v1 }
  0x43   : > { %2220 = vmatpush3.bf16.msra.mxu1 %v2437_v7  ;;  %2174 = vmatpush3.bf16.msra.mxu0 %v2436_v5  ;;  %v1232_v23 = vrot.slane %v1942_v15, 1  ;;  %v911_v32 = vshll.u32 %v1942_v15, 16  ;;  %v923_v53 = vshrl.u32 %v1942_v15, 16  ;;  %v919_v5 = vshll.u32 %v1943_v58, 16 }
  0x44   : > { %2221 = vmatprep.subr.bf16.mxu1 %v2439_v10  ;;  %2175 = vmatprep.subr.bf16.mxu0 %v2438_v33  ;;  %v939_v7 = vshrl.u32 %v1944_v44, 16  ;;  %v917_v9 = vor.u32 %v915_v4, %v905_v60  ;;  %v1945_v10 = vcombine.low %v804_v55, %v804_v55  ;;  %v945_v14 = vrot.slane %v943_v13, 1 }
  0x45   : > { %v1233_v40 = vsel %vm1223_vm1, %v1228_v22, %v1232_v23  ;;  %v913_v46 = vrot.slane %v911_v32, 1  ;;  %v1237_v56 = vsel %vm1223_vm1, %v1232_v23, %v1236_v48  ;;  %v921_v33 = vrot.slane %v919_v5, 1 }
  0x46   : > { %v941_v11 = vor.u32 %v939_v7, %v929_v62  ;;  %v1238_v15 = vrot.slane %v2003_v37, 1  ;;  %v935_v18 = vshll.u32 %v1945_v10, 16  ;;  %v950_v21 = vshrl.u32 %v1946_v0, 16 }
  0x47   : > { %2222 = vmatpush3.bf16.msra.mxu1 %v2441_v17  ;;  %2176 = vmatpush3.bf16.msra.mxu0 %v2440_v16  ;;  %v914_v39 = vsel %vm361_vm0, %v909_v45, %v913_v46  ;;  %v925_v61 = vor.u32 %v923_v53, %v913_v46  ;;  %v922_v16 = vsel %vm361_vm0, %v917_v9, %v921_v33  ;;  %v931_v17 = vshrl.u32 %v1943_v58, 16 }
  0x48   : > { %v946_v35 = vsel %vm361_vm0, %v941_v11, %v945_v14  ;;  %v1239_v38 = vsel %vm1223_vm1, %v1234_v63, %v1238_v15  ;;  %v937_v20 = vrot.slane %v935_v18, 1  ;;  %v952_v23 = vor.u32 %v950_v21, %v945_v14 }
  0x49   : > { %789 = vmatmul.mubr.bf16.gmra.mrb[16].mxu1 %v2737_v41  ;;  %611 = vmatmul.mubr.bf16.gmra.mrb[16].mxu0 %v436_v24  ;;  %v881_v41 = vor.u32 %v880_v26, %v876_v25  ;;  %v930_v3 = vsel %vm361_vm0, %v925_v61, %v929_v62  ;;  %v933_v19 = vor.u32 %v931_v17, %v921_v33  ;;  %v947_v24 = vshrl.u32 %v1945_v10, 16 }
  0x4a   : > { %1380 = vmatprep.mubr.bf16.mxu1 %v1229_v36  ;;  %1091 = vmatprep.mubr.bf16.mxu0 %v898_v30  ;;  %v2482_v26 = vmov 0.0|0.0  }
  0x4b   : > { %v886_v49 = vsel %vm361_vm0, %v881_v41, %v885_v42  ;;  %v938_v22 = vsel %vm361_vm0, %v933_v19, %v937_v20  ;;  %v949_v25 = vor.u32 %v947_v24, %v937_v20  ;;  %2315 = vmatprep.subr.bf16.mxu0 %v2482_v26  ;;  %2327 = vmatprep.subr.bf16.mxu1 %v2482_v26 }
  0x51   : > { %1381 = vmatmul.mubr.bf16.vlgmr.msra.gmra.mrb[20].mxu1 %v1226_v34  ;;  %1092 = vmatmul.mubr.bf16.vlgmr.msra.gmra.mrb[20].mxu0 %v886_v49 }
  0x52   : > { %1388 = vmatprep.mubr.bf16.mxu1 %v1233_v40  ;;  %1099 = vmatprep.mubr.bf16.mxu0 %v914_v39 }
  0x59   : > { %1389 = vmatmul.mubr.bf16.gmra.mrb[24].mxu1 %v1231_v12  ;;  %1100 = vmatmul.mubr.bf16.gmra.mrb[24].mxu0 %v906_v2 }
  0x5a   : > { %1396 = vmatprep.mubr.bf16.mxu1 %v1237_v56  ;;  %1107 = vmatprep.mubr.bf16.mxu0 %v930_v3 }
  0x61   : > { %1397 = vmatmul.mubr.bf16.gmra.mrb[28].mxu1 %v1235_v6  ;;  %1108 = vmatmul.mubr.bf16.gmra.mrb[28].mxu0 %v922_v16 }
  0x62   : > { %1404 = vmatprep.mubr.bf16.mxu1 %v1241_v8  ;;  %1115 = vmatprep.mubr.bf16.mxu0 %v946_v35 }
  0x69   : > { %1405 = vmatmul.mubr.bf16.gmra.mrb[32].mxu1 %v1239_v38  ;;  %1116 = vmatmul.mubr.bf16.gmra.mrb[32].mxu0 %v938_v22 }
  0x6a   : > { %1412 = vmatprep.mubr.bf16.mxu1 %v1240_v1  ;;  %1123 = vmatprep.mubr.bf16.mxu0 %v952_v23 }
  0x71   : > { %1413 = vmatmul.mubr.bf16.gmra.mrb[36].mxu1 %v1238_v15  ;;  %1124 = vmatmul.mubr.bf16.gmra.mrb[36].mxu0 %v949_v25 }
  0x72   : > { %2291 = vmatprep.mubr.msk.f32.mxu0 %vm2483_vm2, %v2484_v27  ;;  %2312 = vmatprep.mubr.msk.f32.mxu1 %vm2483_vm2, %v2484_v27 }
  0xfb   : > { %v2085_v34 = vpop.f32.mrb[0].mxu0 }
  0xfc   : > { %v2131_v28 = vpop.f32.mrb[0].mxu1  ;;  %v2086_v40 = vpop.f32.mrb[1].mxu0 }
  0xfd   : > { %v2132_v29 = vpop.f32.mrb[1].mxu1  ;;  %v2087_v42 = vadd.f32 %v2086_v40, %v2085_v34  ;;  %v2088_v43 = vpop.f32.mrb[2].mxu0 }
  0xfe   : > { %v2133_v30 = vadd.f32 %v2132_v29, %v2131_v28  ;;  %v2134_v31 = vpop.f32.mrb[2].mxu1  ;;  %v2089_v45 = vpop.f32.mrb[3].mxu0 }
  0xff   : > { %v2135_v32 = vpop.f32.mrb[3].mxu1  ;;  %v2090_v49 = vadd.f32 %v2089_v45, %v2088_v43 }
 0x100   : > { %v2136_v36 = vadd.f32 %v2135_v32, %v2134_v31  ;;  %v2839_v48 = vadd.f32 %v2133_v30, %v2087_v42 }
 0x102   : > { %v2841_v52 = vadd.f32 %v2136_v36, %v2090_v49 }
 0x103   : > { %v2091_v53 = vpop.f32.mrb[4].mxu0 }
 0x104   : > { %v2137_v41 = vpop.f32.mrb[4].mxu1  ;;  %v2092_v54 = vpop.f32.mrb[5].mxu0 }
 0x105   : > { %v2138_v44 = vpop.f32.mrb[5].mxu1  ;;  %v2093_v12 = vadd.f32 %v2092_v54, %v2091_v53  ;;  %v2094_v55 = vpop.f32.mrb[6].mxu0 }
 0x106   : > { %v2139_v46 = vadd.f32 %v2138_v44, %v2137_v41  ;;  %v2140_v47 = vpop.f32.mrb[6].mxu1  ;;  %v2095_v57 = vpop.f32.mrb[7].mxu0 }
 0x107   : > { %v2141_v50 = vpop.f32.mrb[7].mxu1  ;;  %v2096_v61 = vadd.f32 %v2095_v57, %v2094_v55 }
 0x108   : > { %v2142_v51 = vadd.f32 %v2141_v50, %v2140_v47  ;;  %v2843_v60 = vadd.f32 %v2139_v46, %v2093_v12 }
 0x10a   : > { %v2845_v0 = vadd.f32 %v2142_v51, %v2096_v61 }
 0x10b   : > { %v2097_v1 = vpop.f32.mrb[8].mxu0 }
 0x10c   : > { %v2143_v39 = vpop.f32.mrb[8].mxu1  ;;  %v2098_v2 = vpop.f32.mrb[9].mxu0 }
 0x10d   : > { %v2144_v56 = vpop.f32.mrb[9].mxu1  ;;  %v2099_v4 = vadd.f32 %v2098_v2, %v2097_v1  ;;  %v2100_v5 = vpop.f32.mrb[10].mxu0 }
 0x10e   : > { %v2145_v58 = vadd.f32 %v2144_v56, %v2143_v39  ;;  %v2146_v59 = vpop.f32.mrb[10].mxu1  ;;  %v2101_v7 = vpop.f32.mrb[11].mxu0  ;;  %v2861_v56 = vld [vmem:[%s2961_s2] ss:$0 sm:$0xff] }
 0x10f   : > { %v2147_v62 = vpop.f32.mrb[11].mxu1  ;;  %v2102_v9 = vadd.f32 %v2101_v7, %v2100_v5 }
 0x110   : > { %v2148_v63 = vadd.f32 %v2147_v62, %v2146_v59  ;;  %v2847_v8 = vadd.f32 %v2145_v58, %v2099_v4 }
 0x112   : > { %v2849_v11 = vadd.f32 %v2148_v63, %v2102_v9 }
 0x114   : > { %v2149_v3 = vpop.f32.mrb[12].mxu1  ;;  %v2103_v14 = vpop.f32.mrb[12].mxu0 }
 0x115   : > { %v2150_v6 = vpop.f32.mrb[13].mxu1  ;;  %v2104_v15 = vpop.f32.mrb[13].mxu0 }
 0x116   : > { %v2151_v13 = vadd.f32 %v2150_v6, %v2149_v3  ;;  %v2152_v37 = vpop.f32.mrb[14].mxu1  ;;  %v2105_v17 = vadd.f32 %v2104_v15, %v2103_v14  ;;  %v2106_v18 = vpop.f32.mrb[14].mxu0 }
 0x117   : > { %v2153_v33 = vpop.f32.mrb[15].mxu1  ;;  %v2107_v38 = vpop.f32.mrb[15].mxu0 }
 0x118   : > { %v2154_v10 = vadd.f32 %v2153_v33, %v2152_v37  ;;  %v2851_v21 = vadd.f32 %v2151_v13, %v2105_v17  ;;  %v2108_v22 = vadd.f32 %v2107_v38, %v2106_v18 }
 0x11a   : > { %v2853_v24 = vadd.f32 %v2154_v10, %v2108_v22 }
 0x11c   : > { %v2155_v16 = vpop.f32.mrb[16].mxu1  ;;  %v2109_v25 = vpop.f32.mrb[16].mxu0 }
 0x11d   : > { %v2156_v35 = vpop.f32.mrb[17].mxu1  ;;  %v2110_v28 = vpop.f32.mrb[17].mxu0 }
 0x11e   : > { %v2157_v19 = vadd.f32 %v2156_v35, %v2155_v16  ;;  %v2158_v20 = vpop.f32.mrb[18].mxu1  ;;  %v2111_v30 = vadd.f32 %v2110_v28, %v2109_v25  ;;  %v2112_v31 = vpop.f32.mrb[18].mxu0 }
 0x11f   : > { %v2159_v23 = vpop.f32.mrb[19].mxu1  ;;  %v2113_v36 = vpop.f32.mrb[19].mxu0 }
 0x120   : > { %v2855_v41 = vadd.f32 %v2157_v19, %v2111_v30 }
 0x124   : > { %v2223_v29 = vpop.f32.mrb[20].mxu1  ;;  %v2177_v44 = vpop.f32.mrb[20].mxu0 }
 0x125   : > { %v2224_v32 = vpop.f32.mrb[21].mxu1  ;;  %v2178_v45 = vpop.f32.mrb[21].mxu0 }
 0x126   : > { %v2225_v34 = vadd.f32 %v2224_v32, %v2223_v29  ;;  %v2226_v40 = vpop.f32.mrb[22].mxu1  ;;  %v2179_v47 = vadd.f32 %v2178_v45, %v2177_v44  ;;  %v2180_v49 = vpop.f32.mrb[22].mxu0 }
 0x127   : > { %v2227_v42 = vpop.f32.mrb[23].mxu1  ;;  %v2181_v51 = vpop.f32.mrb[23].mxu0 }
 0x128   : > { %v2228_v43 = vadd.f32 %v2227_v42, %v2226_v40  ;;  %v1131_v39 = vadd.f32 %v2179_v47, %v2839_v48  ;;  %v2182_v12 = vadd.f32 %v2181_v51, %v2180_v49 }
 0x12a   : > { %v1420_v58 = vadd.f32 %v2225_v34, %v1131_v39  ;;  %v1132_v59 = vadd.f32 %v2182_v12, %v2841_v52 }
 0x12c   : > { %v2229_v46 = vpop.f32.mrb[24].mxu1  ;;  %v2865_v61 = vadd.f32 %v2861_v56, %v1420_v58  ;;  %v1421_v62 = vadd.f32 %v2228_v43, %v1132_v59  ;;  %v2183_v63 = vpop.f32.mrb[24].mxu0 }
 0x12d   : > { %v2230_v50 = vpop.f32.mrb[25].mxu1  ;;  %v2184_v1 = vpop.f32.mrb[25].mxu0 }
 0x12e   : > { %v2231_v53 = vadd.f32 %v2230_v50, %v2229_v46  ;;  %v2232_v54 = vpop.f32.mrb[26].mxu1  ;;  %v2868_v48 = vadd.f32 %v2861_v56, %v1421_v62  ;;  %v2185_v3 = vadd.f32 %v2184_v1, %v2183_v63  ;;  %v2186_v4 = vpop.f32.mrb[26].mxu0  ;;  %v1525_v6 = vmul.f32 %v2865_v61, %v2865_v61 }
 0x12f   : > { %v2233_v55 = vpop.f32.mrb[27].mxu1  ;;  %v2187_v7 = vpop.f32.mrb[27].mxu0 }
 0x130   : > { %v2234_v57 = vadd.f32 %v2233_v55, %v2232_v54  ;;  %v1526_v52 = vmul.f32 %v2868_v48, %v2868_v48  ;;  %v1133_v9 = vadd.f32 %v2185_v3, %v2843_v60  ;;  %v2188_v33 = vadd.f32 %v2187_v7, %v2186_v4 }
 0x131   : > { %v2316_v10 = vpack.c.bf16 %v2868_v48, %v2865_v61 }
 0x132   : > { %v1422_v16 = vadd.f32 %v2231_v53, %v1133_v9  ;;  %v1134_v17 = vadd.f32 %v2188_v33, %v2845_v0  ;;  %v2328_v18 = vpack.c.bf16 %v1526_v52, %v1525_v6 }
 0x133   : > { %2317 = vmatpush3.bf16.msra.mxu0 %v2316_v10 }
 0x134   : > { %v2235_v2 = vpop.f32.mrb[28].mxu1  ;;  %2318 = vmatprep.subr.bf16.mxu0 %v2482_v26  ;;  %v2880_v35 = vadd.f32 %v2861_v56, %v1422_v16  ;;  %v1423_v38 = vadd.f32 %v2234_v57, %v1134_v17  ;;  %v2189_v19 = vpop.f32.mrb[28].mxu0  ;;  %2329 = vmatpush3.bf16.msra.mxu1 %v2328_v18  ;;  %v1445_v18 = vld [vmem:[%s2962_s3] sm:$0x1] }
 0x135   : > { %v2236_v5 = vpop.f32.mrb[29].mxu1  ;;  %v2190_v60 = vpop.f32.mrb[29].mxu0  ;;  %2330 = vmatprep.subr.bf16.mxu1 %v2482_v26 }
 0x136   : > { %v2237_v13 = vadd.f32 %v2236_v5, %v2235_v2  ;;  %v2238_v37 = vpop.f32.mrb[30].mxu1  ;;  %v2884_v22 = vadd.f32 %v2861_v56, %v1423_v38  ;;  %v2191_v23 = vadd.f32 %v2190_v60, %v2189_v19  ;;  %v2192_v25 = vpop.f32.mrb[30].mxu0  ;;  %v1527_v28 = vmul.f32 %v2880_v35, %v2880_v35 }
 0x137   : > { %v2239_v14 = vpop.f32.mrb[31].mxu1  ;;  %v2193_v29 = vpop.f32.mrb[31].mxu0 }
 0x138   : > { %v2240_v15 = vadd.f32 %v2239_v14, %v2238_v37  ;;  %v1528_v32 = vmul.f32 %v2884_v22, %v2884_v22  ;;  %v1135_v36 = vadd.f32 %v2191_v23, %v2847_v8  ;;  %v2194_v34 = vadd.f32 %v2193_v29, %v2192_v25 }
 0x139   : > { %v2319_v40 = vpack.c.bf16 %v2884_v22, %v2880_v35 }
 0x13a   : > { %v1424_v44 = vadd.f32 %v2237_v13, %v1135_v36  ;;  %v1136_v45 = vadd.f32 %v2194_v34, %v2849_v11  ;;  %v2331_v46 = vpack.c.bf16 %v1528_v32, %v1527_v28 }
 0x13b   : > { %2320 = vmatpush3.bf16.msra.mxu0 %v2319_v40 }
 0x13c   : > { %v2241_v20 = vpop.f32.mrb[32].mxu1  ;;  %2321 = vmatprep.subr.bf16.mxu0 %v2482_v26  ;;  %v2896_v47 = vadd.f32 %v2861_v56, %v1424_v44  ;;  %v1425_v49 = vadd.f32 %v2240_v15, %v1136_v45  ;;  %v2195_v50 = vpop.f32.mrb[32].mxu0  ;;  %2332 = vmatpush3.bf16.msra.mxu1 %v2331_v46 }
 0x13d   : > { %v2242_v0 = vpop.f32.mrb[33].mxu1  ;;  %v2196_v8 = vpop.f32.mrb[33].mxu0  ;;  %2333 = vmatprep.subr.bf16.mxu1 %v2482_v26 }
 0x13e   : > { %v2243_v30 = vadd.f32 %v2242_v0, %v2241_v20  ;;  %v2244_v31 = vpop.f32.mrb[34].mxu1  ;;  %v2900_v53 = vadd.f32 %v2861_v56, %v1425_v49  ;;  %v2197_v54 = vadd.f32 %v2196_v8, %v2195_v50  ;;  %v2198_v39 = vpop.f32.mrb[34].mxu0  ;;  %v1529_v12 = vmul.f32 %v2896_v47, %v2896_v47 }
 0x13f   : > { %v2245_v42 = vpop.f32.mrb[35].mxu1  ;;  %v2199_v55 = vpop.f32.mrb[35].mxu0  ;;  %v1611_v0 = vlaneseq }
 0x140   : > { %v2246_v43 = vadd.f32 %v2245_v42, %v2244_v31  ;;  %v1530_v59 = vmul.f32 %v2900_v53, %v2900_v53  ;;  %v1137_v62 = vadd.f32 %v2197_v54, %v2851_v21  ;;  %v2200_v63 = vadd.f32 %v2199_v55, %v2198_v39 }
 0x141   : > { %v2322_v1 = vpack.c.bf16 %v2900_v53, %v2896_v47 }
 0x142   : > { %v1426_v3 = vadd.f32 %v2243_v30, %v1137_v62  ;;  %v1138_v4 = vadd.f32 %v2200_v63, %v2853_v24  ;;  %v2334_v5 = vpack.c.bf16 %v1530_v59, %v1529_v12  ;;  %v1612_v30 = vshrl.u32 %v1611_v0, 7 }
 0x143   : > { %2323 = vmatpush3.bf16.msra.mxu0 %v2322_v1 }
 0x144   : > { %v2247_v51 = vpop.f32.mrb[36].mxu1  ;;  %2324 = vmatprep.subr.bf16.mxu0 %v2482_v26  ;;  %v2912_v6 = vadd.f32 %v2861_v56, %v1426_v3  ;;  %v1427_v7 = vadd.f32 %v2246_v43, %v1138_v4  ;;  %v2201_v13 = vpop.f32.mrb[36].mxu0  ;;  %2335 = vmatpush3.bf16.msra.mxu1 %v2334_v5 }
 0x145   : > { %v2248_v11 = vpop.f32.mrb[37].mxu1  ;;  %v2202_v37 = vpop.f32.mrb[37].mxu0  ;;  %2336 = vmatprep.subr.bf16.mxu1 %v2482_v26 }
 0x146   : > { %v2249_v57 = vadd.f32 %v2248_v11, %v2247_v51  ;;  %v2250_v58 = vpop.f32.mrb[38].mxu1  ;;  %v1443_v21 = vadd.f32 %v2861_v56, %v1427_v7  ;;  %v2203_v52 = vadd.f32 %v2202_v37, %v2201_v13  ;;  %v2204_v9 = vpop.f32.mrb[38].mxu0  ;;  %v1531_v24 = vmul.f32 %v2912_v6, %v2912_v6 }
 0x147   : > { %v2251_v2 = vpop.f32.mrb[39].mxu1  ;;  %v2205_v33 = vpop.f32.mrb[39].mxu0 }
 0x148   : > { %v1532_v10 = vmul.f32 %v1443_v21, %v1443_v21  ;;  %v1139_v14 = vadd.f32 %v2203_v52, %v2855_v41  ;;  %v2325_v15 = vpack.c.bf16 %v1443_v21, %v2912_v6 }
 0x14a   : > { %v1428_v16 = vadd.f32 %v2249_v57, %v1139_v14  ;;  %2326 = vmatpush3.bf16.msra.mxu0 %v2325_v15  ;;  %v2337_v17 = vpack.c.bf16 %v1532_v10, %v1531_v24  ;;  %v1714_v24 = vld [vmem:[%s248_s28 + $0x20] sm:$0xf] }
 0x14b   : > { %2289 = vmatprep.subr.mxu0 %v2484_v27 }
 0x14c   : > { %v1444_v26 = vadd.f32 %v2861_v56, %v1428_v16  ;;  %2338 = vmatpush3.bf16.msra.mxu1 %v2337_v17 }
 0x14d   : > { %2310 = vmatprep.subr.mxu1 %v2484_v27  ;;  %v1613_v27 = vsub.s32 0, %v1612_v30 }
 0x14e   : > { %v1533_v38 = vmul.f32 %v1444_v26, %v1444_v26  ;;  %2290 = vmatpush3.msk.msra.mxu0 %vm1223_vm1, %v1444_v26 }
 0x14f   : > { %2292 = vmatmul.mubr.msk.f32.vlgmr.msra.gmra.mrb[40].mxu0 %vm1446_vm3, %v1445_v18 }
 0x150   : > { %2311 = vmatpush3.msk.msra.mxu1 %vm1223_vm1, %v1533_v38 }
 0x151   : > { %2313 = vmatmul.mubr.msk.f32.vlgmr.msra.gmra.mrb[40].mxu1 %vm1446_vm3, %v1445_v18 }
 0x222   : > { %v1520_v41 = vpop.f32.mrb[40].mxu0 }
 0x223   : > { %v1524_v19 = vmul.f32 0.015625, %v1520_v41  ;;  %v2293_v60 = vpop.f32.mrb[41].mxu0 }
 0x224   : > { %v1603_v20 = vpop.f32.mrb[40].mxu1 }
 0x225   : > { %v1608_v56 = vmul.f32 %v1524_v19, %v1524_v19  ;;  %v1607_v23 = vmul.f32 0.015625, %v1603_v20  ;;  %v2314_v25 = vpop.f32.mrb[41].mxu1  ;;  %v1614_v32 = vrot.slane %v1524_v19, %v1613_v27 }
 0x227   : > { %v1609_v28 = vsub.f32 %v1607_v23, %v1608_v56  ;;  %v1615_v34 = vsub.f32 %v2865_v61, %v1614_v32  ;;  %v1616_v40 = vsub.f32 %v2868_v48, %v1614_v32  ;;  %v1617_v42 = vsub.f32 %v2880_v35, %v1614_v32 }
 0x228   : > { %v1618_v43 = vsub.f32 %v2884_v22, %v1614_v32  ;;  %v1619_v44 = vsub.f32 %v2896_v47, %v1614_v32  ;;  %v1620_v46 = vsub.f32 %v2900_v53, %v1614_v32  ;;  %v1621_v49 = vsub.f32 %v2912_v6, %v1614_v32 }
 0x229   : > { %v1610_v29 = vmax.f32 %v1609_v28, 0.0  ;;  %v1622_v50 = vsub.f32 %v1443_v21, %v1614_v32  ;;  %v1623_v8 = vsub.f32 %v1444_v26, %v1614_v32 }
 0x22b   : > { %v1624_v31 = vadd.f32 1e-05, %v1610_v29 }
 0x22d   : > { %2456 = vrsqrt.f32 %v1624_v31 }
 0x237   : > { %v2457_v36 = vpop.eup %2456 }
 0x238   : > { %v1629_v45 = vrot.slane %v2457_v36, %v1613_v27 }
 0x23a   : > { %v1630_v51 = vmul.f32 %v1629_v45, %v1615_v34  ;;  %v1631_v61 = vmul.f32 %v1629_v45, %v1616_v40  ;;  %v1632_v54 = vmul.f32 %v1629_v45, %v1617_v42  ;;  %v1633_v48 = vmul.f32 %v1629_v45, %v1618_v43 }
 0x23b   : > { %v1634_v39 = vmul.f32 %v1629_v45, %v1619_v44  ;;  %v1635_v35 = vmul.f32 %v1629_v45, %v1620_v46  ;;  %v1636_v11 = vmul.f32 %v1629_v45, %v1621_v49  ;;  %v1637_v22 = vmul.f32 %v1629_v45, %v1622_v50 }
 0x23c   : > { %v1638_v47 = vmul.f32 %v1629_v45, %v1623_v8  ;;  %vm1639_vm6 = vcmp.ge.f32.partialorder %v1630_v51, 0.0  ;;  %vm1640_vm7 = vcmp.ge.f32.partialorder %v1631_v61, 0.0  ;;  %vm1641_vm8 = vcmp.ge.f32.partialorder %v1632_v54, 0.0 }
 0x23d   : > { %vm1642_vm9 = vcmp.ge.f32.partialorder %v1633_v48, 0.0  ;;  %vm1643_vm10 = vcmp.ge.f32.partialorder %v1634_v39, 0.0  ;;  %vm1644_vm11 = vcmp.ge.f32.partialorder %v1635_v35, 0.0  ;;  %vm1645_vm12 = vcmp.ge.f32.partialorder %v1636_v11, 0.0 }
 0x23e   : > { %vm1646_vm13 = vcmp.ge.f32.partialorder %v1637_v22, 0.0  ;;  %vm1647_vm14 = vcmp.ge.f32.partialorder %v1638_v47, 0.0  ;;  %v1648_v53 = vmul.f32 0.2, %v1630_v51  ;;  %v1649_v12 = vmul.f32 0.2, %v1631_v61 }
 0x23f   : > { %v1650_v55 = vmul.f32 0.2, %v1632_v54  ;;  %v1651_v57 = vmul.f32 0.2, %v1633_v48  ;;  %v1652_v58 = vmul.f32 0.2, %v1634_v39 }
 0x240   : > { %v1653_v59 = vmul.f32 0.2, %v1635_v35  ;;  %v1654_v62 = vmul.f32 0.2, %v1636_v11  ;;  %v1655_v63 = vmul.f32 0.2, %v1637_v22  ;;  %v1657_v1 = vsel %vm1639_vm6, %v1630_v51, %v1648_v53 }
 0x241   : > { %v1656_v2 = vmul.f32 0.2, %v1638_v47  ;;  %v1658_v3 = vsel %vm1640_vm7, %v1631_v61, %v1649_v12  ;;  %v1659_v4 = vsel %vm1641_vm8, %v1632_v54, %v1650_v55  ;;  %v1660_v5 = vsel %vm1642_vm9, %v1633_v48, %v1651_v57 }
 0x242   : > { %v1661_v6 = vsel %vm1643_vm10, %v1634_v39, %v1652_v58  ;;  %v1662_v7 = vsel %vm1644_vm11, %v1635_v35, %v1653_v59  ;;  %v1663_v13 = vsel %vm1645_vm12, %v1636_v11, %v1654_v62  ;;  %v1664_v37 = vsel %vm1646_vm13, %v1637_v22, %v1655_v63 }
 0x243   : > { %v1665_v21 = vsel %vm1647_vm14, %v1638_v47, %v1656_v2  ;;  %v2049_v52 = vpack.c.bf16 %v1658_v3, %v1657_v1  ;;  %v2054_v9 = vpack.c.bf16 %v1660_v5, %v1659_v4  ;;  %v2059_v33 = vpack.c.bf16 %v1662_v7, %v1661_v6 }
 0x244   : > { %v2045_v10 = vpack.c.bf16 %v1665_v21, %v1665_v21  ;;  %v2064_v14 = vpack.c.bf16 %v1664_v37, %v1663_v13 }
 0x245   : > { %2050 = vst [vmem:[%s248_s28] sm:$0xff] %v2049_v52   ;;  %2066 = vst [vmem:[%s248_s28 + $0x8] sm:$0xff] %v2054_v9  }
 0x246   : > { %2067 = vst [vmem:[%s248_s28 + $0x10] sm:$0xff] %v2059_v33   ;;  %2068 = vst [vmem:[%s248_s28 + $0x18] sm:$0xff] %v2064_v14   ;;  %v1715_v15 = vsel %vm1713_vm15, %v2045_v10, %v1714_v24 }
 0x247   : > { %1716 = vst [vmem:[%s248_s28 + $0x20] sm:$0xf] %v1715_v15 }
 0x248 PF: > { %s14_s17 = sadd.s32 1, %s2480_s17   ;;  %s2964_s15 = smov %s2476_s16 }
 0x249   : > { %p11_p5 = scmp.ge.s32.totalorder %s14_s17, 4   ;;  %s2965_s16 = smov %s2967_s18 }
 0x24b   :  { %13 = sbr.rel (!%p11_p5) target bundleno = 2 (0x2), region = 75 }

// kernel: discriminator_forward.6
= control target key start
LH: loop header
LB: loop body
LE: loop exit
PB: predicated region body
PF: predicated region fallthrough
CT: control target
= control target key end

     0   :  { %s4318_s15 = smov 0   ;;  %s4320_s16 = smov 0   ;;  %s5197_s0 = inlined_call_operand.vmem [shape: bf16[2,25,512], index: 0, kind: input, shape index: {}]   ;;  %s5198_s1 = inlined_call_operand.vmem [shape: bf16[4,512,256], index: 1, kind: input, shape index: {}]   ;;  %s5199_s2 = inlined_call_operand.vmem [shape: f32[1,256], index: 2, kind: input, shape index: {}]   ;;  %s5200_s3 = inlined_call_operand.vmem [shape: f32[1,19], index: 3, kind: input, shape index: {}]   ;;  %s5201_s4 = inlined_call_operand.vmem [shape: bf16[2,19,256], index: 4, kind: output, shape index: {}]  }
   0x1   :  { %s4322_s17 = smov 0   ;;  %s4324_s18 = smov 0  }
   0x2   :  { %s4326_s19 = smov 0   ;;  %s4328_s20 = smov 0  }
   0x3   :  { %s4330_s21 = smov 0   ;;  %s4332_s22 = smov 0  }
   0x4   :  { %s4334_s23 = smov 0  }
   0x5 LB: > { %s3355_s24 = sadd.s32 4294967295, %s4288_s23   ;;  %s23_s25 = sadd.s32 1, %s4280_s21  ;;  %s4288_s23 = sphi %s4334_s23, %s14_s23   ;;  %s4284_s22 = sphi %s4332_s22, %s5210_s22   ;;  %s4280_s21 = sphi %s4330_s21, %s5209_s21   ;;  %s4276_s20 = sphi %s4328_s20, %s5208_s20   ;;  %s4272_s19 = sphi %s4326_s19, %s5207_s19   ;;  %s4268_s18 = sphi %s4324_s18, %s5206_s18   ;;  %s4264_s17 = sphi %s4322_s17, %s5205_s17   ;;  %s4260_s16 = sphi %s4320_s16, %s5204_s16   ;;  %s4256_s15 = sphi %s4318_s15, %s5203_s15  }
   0x6   : > { %p24_p0 = scmp.ge.s32.totalorder %s23_s25, 2  ;;  %s26_s26 = sadd.s32 1, %s4284_s22 }
   0x7   : > { %s59_s27 = sadd.s32 1, %s4268_s18  ;;  %p66_p1 = scmp.ne.s32.totalorder %s4268_s18, %s4264_s17 }
   0x8   : > { %s5212_s25 = smov (%p24_p0, %s23_s25), 0  ;;  %s5214_s26 = smov (!%p24_p0, %s26_s26), %s4284_s22 }
   0x9   : > { %s56_s28 = ssub.s32 %s4280_s21, %s5212_s25  ;;  %p67_p2 = scmp.eq.s32.totalorder %s4288_s23, 0 }
   0xa   : > { %p28_p3 = scmp.ge.s32.totalorder %s5214_s26, 2  ;;  %p57_p4 = scmp.eq.s32.totalorder %s56_s28, 0 }
   0xb   : > { %p68_p5 = por %p67_p2, %p66_p1  ;;  %s134_s29 = sadd.s32 1, %s4260_s16 }
   0xc   : > { %s5216_s26 = smov (%p28_p3, %s5214_s26), 0  ;;  %p144_p6 = scmp.ne.s32.totalorder %s4260_s16, %s4256_s15 }
   0xd   : > { %s4379_s30 = scalar_select %p57_p4, %s4268_s18, %s59_s27  }
   0xe   : > { %s129_s5 = ssub.s32 %s4284_s22, %s5216_s26  ;;  %p145_p7 = scmp.eq.s32.totalorder %s3355_s24, 3 }
   0xf   : > { %s131_s6 = sor.u32 %s129_s5, %s56_s28  ;;  %p3358_p10 = scmp.ge.s32.totalorder %s4288_s23, 4 }
  0x10   : > { %p132_p8 = scmp.eq.s32.totalorder %s131_s6, 0  ;;  %p4385_p9 = por %p145_p7, %p144_p6 }
  0x11   : > { %170 = sbr.rel (%p3358_p10) target bundleno = 198 (0xc6), region = 20 }
  0x12   : > { %s4390_s8 = scalar_select %p132_p8, %s4260_s16, %s134_s29  }
  0x18   : > { %181 = sbr.rel (!%p68_p5) target bundleno = 198 (0xc6), region = 28  ;;  %s183_s9 = sand.u32 (%p68_p5), 1, %s4268_s18  }
  0x19   : > { %s3360_s10 = sshll.u32 (%p68_p5), %s4280_s21, 2  ;;  %s3359_s11 = sshll.u32 (%p68_p5), %s183_s9, 10 }
  0x1a   : > { %s4398_s14 = scalar_lea.vmem (%p68_p5), %s5198_s1, %s3360_s10  ;;  %s4402_s24 = scalar_lea.vmem (%p68_p5), [#allocation2], %s3359_s11 }
  0x1b   : > { %v203_v0 = vld [vmem:[%s4398_s14] sm:$0xf] (%p68_p5)  ;;  %v205_v1 = vld [vmem:[%s4398_s14 + $0x8] sm:$0xf] (%p68_p5)  ;;  %v207_v2 = vld [vmem:[%s4398_s14 + $0x10] sm:$0xf] (%p68_p5) }
  0x1c   : > { %204 = vst [vmem:[%s4402_s24] sm:$0xf] (%p68_p5), %v203_v0  ;;  %206 = vst [vmem:[%s4402_s24 + $0x4] sm:$0xf] (%p68_p5), %v205_v1  ;;  %v209_v3 = vld [vmem:[%s4398_s14 + $0x18] sm:$0xf] (%p68_p5) }
  0x1d   : > { %v211_v4 = vld [vmem:[%s4398_s14 + $0x20] sm:$0xf] (%p68_p5)  ;;  %208 = vst [vmem:[%s4402_s24 + $0x8] sm:$0xf] (%p68_p5), %v207_v2  ;;  %210 = vst [vmem:[%s4402_s24 + $0xc] sm:$0xf] (%p68_p5), %v209_v3 }
  0x1e   : > { %212 = vst [vmem:[%s4402_s24 + $0x10] sm:$0xf] (%p68_p5), %v211_v4  ;;  %v213_v5 = vld [vmem:[%s4398_s14 + $0x28] sm:$0xf] (%p68_p5)  ;;  %v215_v6 = vld [vmem:[%s4398_s14 + $0x30] sm:$0xf] (%p68_p5) }
  0x1f   : > { %v217_v7 = vld [vmem:[%s4398_s14 + $0x38] sm:$0xf]  ;;  %214 = vst [vmem:[%s4402_s24 + $0x14] sm:$0xf] %v213_v5  ;;  %216 = vst [vmem:[%s4402_s24 + $0x18] sm:$0xf] %v215_v6 }
  0x20   : > { %218 = vst [vmem:[%s4402_s24 + $0x1c] sm:$0xf] %v217_v7  ;;  %v219_v8 = vld [vmem:[%s4398_s14 + $0x40] sm:$0xf]  ;;  %v221_v9 = vld [vmem:[%s4398_s14 + $0x48] sm:$0xf] }
  0x21   : > { %v223_v10 = vld [vmem:[%s4398_s14 + $0x50] sm:$0xf]  ;;  %220 = vst [vmem:[%s4402_s24 + $0x20] sm:$0xf] %v219_v8  ;;  %222 = vst [vmem:[%s4402_s24 + $0x24] sm:$0xf] %v221_v9 }
  0x22   : > { %224 = vst [vmem:[%s4402_s24 + $0x28] sm:$0xf] %v223_v10  ;;  %v225_v11 = vld [vmem:[%s4398_s14 + $0x58] sm:$0xf]  ;;  %v227_v12 = vld [vmem:[%s4398_s14 + $0x60] sm:$0xf] }
  0x23   : > { %v229_v13 = vld [vmem:[%s4398_s14 + $0x68] sm:$0xf]  ;;  %226 = vst [vmem:[%s4402_s24 + $0x2c] sm:$0xf] %v225_v11  ;;  %228 = vst [vmem:[%s4402_s24 + $0x30] sm:$0xf] %v227_v12 }
  0x24   : > { %230 = vst [vmem:[%s4402_s24 + $0x34] sm:$0xf] %v229_v13  ;;  %v231_v14 = vld [vmem:[%s4398_s14 + $0x70] sm:$0xf]  ;;  %v233_v15 = vld [vmem:[%s4398_s14 + $0x78] sm:$0xf] }
  0x25   : > { %v235_v16 = vld [vmem:[%s4398_s14 + $0x80] sm:$0xf]  ;;  %232 = vst [vmem:[%s4402_s24 + $0x38] sm:$0xf] %v231_v14  ;;  %234 = vst [vmem:[%s4402_s24 + $0x3c] sm:$0xf] %v233_v15 }
  0x26   : > { %236 = vst [vmem:[%s4402_s24 + $0x40] sm:$0xf] %v235_v16  ;;  %v237_v17 = vld [vmem:[%s4398_s14 + $0x88] sm:$0xf]  ;;  %v239_v18 = vld [vmem:[%s4398_s14 + $0x90] sm:$0xf] }
  0x27   : > { %v241_v19 = vld [vmem:[%s4398_s14 + $0x98] sm:$0xf]  ;;  %238 = vst [vmem:[%s4402_s24 + $0x44] sm:$0xf] %v237_v17  ;;  %240 = vst [vmem:[%s4402_s24 + $0x48] sm:$0xf] %v239_v18 }
  0x28   : > { %242 = vst [vmem:[%s4402_s24 + $0x4c] sm:$0xf] %v241_v19  ;;  %v243_v20 = vld [vmem:[%s4398_s14 + $0xa0] sm:$0xf]  ;;  %v245_v21 = vld [vmem:[%s4398_s14 + $0xa8] sm:$0xf] }
  0x29   : > { %v247_v22 = vld [vmem:[%s4398_s14 + $0xb0] sm:$0xf]  ;;  %244 = vst [vmem:[%s4402_s24 + $0x50] sm:$0xf] %v243_v20  ;;  %246 = vst [vmem:[%s4402_s24 + $0x54] sm:$0xf] %v245_v21 }
  0x2a   : > { %248 = vst [vmem:[%s4402_s24 + $0x58] sm:$0xf] %v247_v22  ;;  %v249_v23 = vld [vmem:[%s4398_s14 + $0xb8] sm:$0xf]  ;;  %v251_v24 = vld [vmem:[%s4398_s14 + $0xc0] sm:$0xf] }
  0x2b   : > { %v253_v25 = vld [vmem:[%s4398_s14 + $0xc8] sm:$0xf]  ;;  %250 = vst [vmem:[%s4402_s24 + $0x5c] sm:$0xf] %v249_v23  ;;  %252 = vst [vmem:[%s4402_s24 + $0x60] sm:$0xf] %v251_v24 }
  0x2c   : > { %254 = vst [vmem:[%s4402_s24 + $0x64] sm:$0xf] %v253_v25  ;;  %v255_v26 = vld [vmem:[%s4398_s14 + $0xd0] sm:$0xf]  ;;  %v257_v27 = vld [vmem:[%s4398_s14 + $0xd8] sm:$0xf] }
  0x2d   : > { %v259_v28 = vld [vmem:[%s4398_s14 + $0xe0] sm:$0xf]  ;;  %256 = vst [vmem:[%s4402_s24 + $0x68] sm:$0xf] %v255_v26  ;;  %258 = vst [vmem:[%s4402_s24 + $0x6c] sm:$0xf] %v257_v27 }
  0x2e   : > { %260 = vst [vmem:[%s4402_s24 + $0x70] sm:$0xf] %v259_v28  ;;  %v261_v29 = vld [vmem:[%s4398_s14 + $0xe8] sm:$0xf]  ;;  %v263_v30 = vld [vmem:[%s4398_s14 + $0xf0] sm:$0xf] }
  0x2f   : > { %v265_v31 = vld [vmem:[%s4398_s14 + $0xf8] sm:$0xf]  ;;  %262 = vst [vmem:[%s4402_s24 + $0x74] sm:$0xf] %v261_v29  ;;  %264 = vst [vmem:[%s4402_s24 + $0x78] sm:$0xf] %v263_v30 }
  0x30   : > { %266 = vst [vmem:[%s4402_s24 + $0x7c] sm:$0xf] %v265_v31  ;;  %v267_v32 = vld [vmem:[%s4398_s14 + $0x100] sm:$0xf]  ;;  %v269_v33 = vld [vmem:[%s4398_s14 + $0x108] sm:$0xf] }
  0x31   : > { %v271_v34 = vld [vmem:[%s4398_s14 + $0x110] sm:$0xf]  ;;  %268 = vst [vmem:[%s4402_s24 + $0x80] sm:$0xf] %v267_v32  ;;  %270 = vst [vmem:[%s4402_s24 + $0x84] sm:$0xf] %v269_v33 }
  0x32   : > { %272 = vst [vmem:[%s4402_s24 + $0x88] sm:$0xf] %v271_v34  ;;  %v273_v35 = vld [vmem:[%s4398_s14 + $0x118] sm:$0xf]  ;;  %v275_v36 = vld [vmem:[%s4398_s14 + $0x120] sm:$0xf] }
  0x33   : > { %v277_v37 = vld [vmem:[%s4398_s14 + $0x128] sm:$0xf]  ;;  %274 = vst [vmem:[%s4402_s24 + $0x8c] sm:$0xf] %v273_v35  ;;  %276 = vst [vmem:[%s4402_s24 + $0x90] sm:$0xf] %v275_v36 }
  0x34   : > { %278 = vst [vmem:[%s4402_s24 + $0x94] sm:$0xf] %v277_v37  ;;  %v279_v38 = vld [vmem:[%s4398_s14 + $0x130] sm:$0xf]  ;;  %v281_v39 = vld [vmem:[%s4398_s14 + $0x138] sm:$0xf] }
  0x35   : > { %v283_v40 = vld [vmem:[%s4398_s14 + $0x140] sm:$0xf]  ;;  %280 = vst [vmem:[%s4402_s24 + $0x98] sm:$0xf] %v279_v38  ;;  %282 = vst [vmem:[%s4402_s24 + $0x9c] sm:$0xf] %v281_v39 }
  0x36   : > { %284 = vst [vmem:[%s4402_s24 + $0xa0] sm:$0xf] %v283_v40  ;;  %v285_v41 = vld [vmem:[%s4398_s14 + $0x148] sm:$0xf]  ;;  %v287_v42 = vld [vmem:[%s4398_s14 + $0x150] sm:$0xf] }
  0x37   : > { %v289_v43 = vld [vmem:[%s4398_s14 + $0x158] sm:$0xf]  ;;  %286 = vst [vmem:[%s4402_s24 + $0xa4] sm:$0xf] %v285_v41  ;;  %288 = vst [vmem:[%s4402_s24 + $0xa8] sm:$0xf] %v287_v42 }
  0x38   : > { %290 = vst [vmem:[%s4402_s24 + $0xac] sm:$0xf] %v289_v43  ;;  %v291_v44 = vld [vmem:[%s4398_s14 + $0x160] sm:$0xf]  ;;  %v293_v45 = vld [vmem:[%s4398_s14 + $0x168] sm:$0xf] }
  0x39   : > { %v295_v46 = vld [vmem:[%s4398_s14 + $0x170] sm:$0xf]  ;;  %292 = vst [vmem:[%s4402_s24 + $0xb0] sm:$0xf] %v291_v44  ;;  %294 = vst [vmem:[%s4402_s24 + $0xb4] sm:$0xf] %v293_v45 }
  0x3a   : > { %296 = vst [vmem:[%s4402_s24 + $0xb8] sm:$0xf] %v295_v46  ;;  %v297_v47 = vld [vmem:[%s4398_s14 + $0x178] sm:$0xf]  ;;  %v299_v48 = vld [vmem:[%s4398_s14 + $0x180] sm:$0xf] }
  0x3b   : > { %v301_v49 = vld [vmem:[%s4398_s14 + $0x188] sm:$0xf]  ;;  %298 = vst [vmem:[%s4402_s24 + $0xbc] sm:$0xf] %v297_v47  ;;  %300 = vst [vmem:[%s4402_s24 + $0xc0] sm:$0xf] %v299_v48 }
  0x3c   : > { %302 = vst [vmem:[%s4402_s24 + $0xc4] sm:$0xf] %v301_v49  ;;  %v303_v50 = vld [vmem:[%s4398_s14 + $0x190] sm:$0xf]  ;;  %v305_v51 = vld [vmem:[%s4398_s14 + $0x198] sm:$0xf] }
  0x3d   : > { %v307_v52 = vld [vmem:[%s4398_s14 + $0x1a0] sm:$0xf]  ;;  %304 = vst [vmem:[%s4402_s24 + $0xc8] sm:$0xf] %v303_v50  ;;  %306 = vst [vmem:[%s4402_s24 + $0xcc] sm:$0xf] %v305_v51 }
  0x3e   : > { %308 = vst [vmem:[%s4402_s24 + $0xd0] sm:$0xf] %v307_v52  ;;  %v309_v53 = vld [vmem:[%s4398_s14 + $0x1a8] sm:$0xf]  ;;  %v311_v54 = vld [vmem:[%s4398_s14 + $0x1b0] sm:$0xf] }
  0x3f   : > { %v313_v55 = vld [vmem:[%s4398_s14 + $0x1b8] sm:$0xf]  ;;  %310 = vst [vmem:[%s4402_s24 + $0xd4] sm:$0xf] %v309_v53  ;;  %312 = vst [vmem:[%s4402_s24 + $0xd8] sm:$0xf] %v311_v54 }
  0x40   : > { %314 = vst [vmem:[%s4402_s24 + $0xdc] sm:$0xf] %v313_v55  ;;  %v315_v56 = vld [vmem:[%s4398_s14 + $0x1c0] sm:$0xf]  ;;  %v317_v57 = vld [vmem:[%s4398_s14 + $0x1c8] sm:$0xf] }
  0x41   : > { %v319_v58 = vld [vmem:[%s4398_s14 + $0x1d0] sm:$0xf]  ;;  %316 = vst [vmem:[%s4402_s24 + $0xe0] sm:$0xf] %v315_v56  ;;  %318 = vst [vmem:[%s4402_s24 + $0xe4] sm:$0xf] %v317_v57 }
  0x42   : > { %320 = vst [vmem:[%s4402_s24 + $0xe8] sm:$0xf] %v319_v58  ;;  %v321_v59 = vld [vmem:[%s4398_s14 + $0x1d8] sm:$0xf]  ;;  %v323_v60 = vld [vmem:[%s4398_s14 + $0x1e0] sm:$0xf] }
  0x43   : > { %v325_v61 = vld [vmem:[%s4398_s14 + $0x1e8] sm:$0xf]  ;;  %322 = vst [vmem:[%s4402_s24 + $0xec] sm:$0xf] %v321_v59  ;;  %324 = vst [vmem:[%s4402_s24 + $0xf0] sm:$0xf] %v323_v60 }
  0x44   : > { %326 = vst [vmem:[%s4402_s24 + $0xf4] sm:$0xf] %v325_v61  ;;  %v327_v62 = vld [vmem:[%s4398_s14 + $0x1f0] sm:$0xf]  ;;  %v329_v63 = vld [vmem:[%s4398_s14 + $0x1f8] sm:$0xf] }
  0x45   : > { %v331_v0 = vld [vmem:[%s4398_s14 + $0x200] sm:$0xf]  ;;  %328 = vst [vmem:[%s4402_s24 + $0xf8] sm:$0xf] %v327_v62  ;;  %330 = vst [vmem:[%s4402_s24 + $0xfc] sm:$0xf] %v329_v63 }
  0x46   : > { %332 = vst [vmem:[%s4402_s24 + $0x100] sm:$0xf] %v331_v0  ;;  %v333_v1 = vld [vmem:[%s4398_s14 + $0x208] sm:$0xf]  ;;  %v335_v2 = vld [vmem:[%s4398_s14 + $0x210] sm:$0xf] }
  0x47   : > { %v337_v3 = vld [vmem:[%s4398_s14 + $0x218] sm:$0xf]  ;;  %334 = vst [vmem:[%s4402_s24 + $0x104] sm:$0xf] %v333_v1  ;;  %336 = vst [vmem:[%s4402_s24 + $0x108] sm:$0xf] %v335_v2 }
  0x48   : > { %338 = vst [vmem:[%s4402_s24 + $0x10c] sm:$0xf] %v337_v3  ;;  %v339_v4 = vld [vmem:[%s4398_s14 + $0x220] sm:$0xf]  ;;  %v341_v5 = vld [vmem:[%s4398_s14 + $0x228] sm:$0xf] }
  0x49   : > { %v343_v6 = vld [vmem:[%s4398_s14 + $0x230] sm:$0xf]  ;;  %340 = vst [vmem:[%s4402_s24 + $0x110] sm:$0xf] %v339_v4  ;;  %342 = vst [vmem:[%s4402_s24 + $0x114] sm:$0xf] %v341_v5 }
  0x4a   : > { %344 = vst [vmem:[%s4402_s24 + $0x118] sm:$0xf] %v343_v6  ;;  %v345_v7 = vld [vmem:[%s4398_s14 + $0x238] sm:$0xf]  ;;  %v347_v8 = vld [vmem:[%s4398_s14 + $0x240] sm:$0xf] }
  0x4b   : > { %v349_v9 = vld [vmem:[%s4398_s14 + $0x248] sm:$0xf]  ;;  %346 = vst [vmem:[%s4402_s24 + $0x11c] sm:$0xf] %v345_v7  ;;  %348 = vst [vmem:[%s4402_s24 + $0x120] sm:$0xf] %v347_v8 }
  0x4c   : > { %350 = vst [vmem:[%s4402_s24 + $0x124] sm:$0xf] %v349_v9  ;;  %v351_v10 = vld [vmem:[%s4398_s14 + $0x250] sm:$0xf]  ;;  %v353_v11 = vld [vmem:[%s4398_s14 + $0x258] sm:$0xf] }
  0x4d   : > { %v355_v12 = vld [vmem:[%s4398_s14 + $0x260] sm:$0xf]  ;;  %352 = vst [vmem:[%s4402_s24 + $0x128] sm:$0xf] %v351_v10  ;;  %354 = vst [vmem:[%s4402_s24 + $0x12c] sm:$0xf] %v353_v11 }
  0x4e   : > { %356 = vst [vmem:[%s4402_s24 + $0x130] sm:$0xf] %v355_v12  ;;  %v357_v13 = vld [vmem:[%s4398_s14 + $0x268] sm:$0xf]  ;;  %v359_v14 = vld [vmem:[%s4398_s14 + $0x270] sm:$0xf] }
  0x4f   : > { %v361_v15 = vld [vmem:[%s4398_s14 + $0x278] sm:$0xf]  ;;  %358 = vst [vmem:[%s4402_s24 + $0x134] sm:$0xf] %v357_v13  ;;  %360 = vst [vmem:[%s4402_s24 + $0x138] sm:$0xf] %v359_v14 }
  0x50   : > { %362 = vst [vmem:[%s4402_s24 + $0x13c] sm:$0xf] %v361_v15  ;;  %v363_v16 = vld [vmem:[%s4398_s14 + $0x280] sm:$0xf]  ;;  %v365_v17 = vld [vmem:[%s4398_s14 + $0x288] sm:$0xf] }
  0x51   : > { %v367_v18 = vld [vmem:[%s4398_s14 + $0x290] sm:$0xf]  ;;  %364 = vst [vmem:[%s4402_s24 + $0x140] sm:$0xf] %v363_v16  ;;  %366 = vst [vmem:[%s4402_s24 + $0x144] sm:$0xf] %v365_v17 }
  0x52   : > { %368 = vst [vmem:[%s4402_s24 + $0x148] sm:$0xf] %v367_v18  ;;  %v369_v19 = vld [vmem:[%s4398_s14 + $0x298] sm:$0xf]  ;;  %v371_v20 = vld [vmem:[%s4398_s14 + $0x2a0] sm:$0xf] }
  0x53   : > { %v373_v21 = vld [vmem:[%s4398_s14 + $0x2a8] sm:$0xf]  ;;  %370 = vst [vmem:[%s4402_s24 + $0x14c] sm:$0xf] %v369_v19  ;;  %372 = vst [vmem:[%s4402_s24 + $0x150] sm:$0xf] %v371_v20 }
  0x54   : > { %374 = vst [vmem:[%s4402_s24 + $0x154] sm:$0xf] %v373_v21  ;;  %v375_v22 = vld [vmem:[%s4398_s14 + $0x2b0] sm:$0xf]  ;;  %v377_v23 = vld [vmem:[%s4398_s14 + $0x2b8] sm:$0xf] }
  0x55   : > { %v379_v24 = vld [vmem:[%s4398_s14 + $0x2c0] sm:$0xf]  ;;  %376 = vst [vmem:[%s4402_s24 + $0x158] sm:$0xf] %v375_v22  ;;  %378 = vst [vmem:[%s4402_s24 + $0x15c] sm:$0xf] %v377_v23 }
  0x56   : > { %380 = vst [vmem:[%s4402_s24 + $0x160] sm:$0xf] %v379_v24  ;;  %v381_v25 = vld [vmem:[%s4398_s14 + $0x2c8] sm:$0xf]  ;;  %v383_v26 = vld [vmem:[%s4398_s14 + $0x2d0] sm:$0xf] }
  0x57   : > { %v385_v27 = vld [vmem:[%s4398_s14 + $0x2d8] sm:$0xf]  ;;  %382 = vst [vmem:[%s4402_s24 + $0x164] sm:$0xf] %v381_v25  ;;  %384 = vst [vmem:[%s4402_s24 + $0x168] sm:$0xf] %v383_v26 }
  0x58   : > { %386 = vst [vmem:[%s4402_s24 + $0x16c] sm:$0xf] %v385_v27  ;;  %v387_v28 = vld [vmem:[%s4398_s14 + $0x2e0] sm:$0xf]  ;;  %v389_v29 = vld [vmem:[%s4398_s14 + $0x2e8] sm:$0xf] }
  0x59   : > { %v391_v30 = vld [vmem:[%s4398_s14 + $0x2f0] sm:$0xf]  ;;  %388 = vst [vmem:[%s4402_s24 + $0x170] sm:$0xf] %v387_v28  ;;  %390 = vst [vmem:[%s4402_s24 + $0x174] sm:$0xf] %v389_v29 }
  0x5a   : > { %392 = vst [vmem:[%s4402_s24 + $0x178] sm:$0xf] %v391_v30  ;;  %v393_v31 = vld [vmem:[%s4398_s14 + $0x2f8] sm:$0xf]  ;;  %v395_v32 = vld [vmem:[%s4398_s14 + $0x300] sm:$0xf] }
  0x5b   : > { %v397_v33 = vld [vmem:[%s4398_s14 + $0x308] sm:$0xf]  ;;  %394 = vst [vmem:[%s4402_s24 + $0x17c] sm:$0xf] %v393_v31  ;;  %396 = vst [vmem:[%s4402_s24 + $0x180] sm:$0xf] %v395_v32 }
  0x5c   : > { %398 = vst [vmem:[%s4402_s24 + $0x184] sm:$0xf] %v397_v33  ;;  %v399_v34 = vld [vmem:[%s4398_s14 + $0x310] sm:$0xf]  ;;  %v401_v35 = vld [vmem:[%s4398_s14 + $0x318] sm:$0xf] }
  0x5d   : > { %v403_v36 = vld [vmem:[%s4398_s14 + $0x320] sm:$0xf]  ;;  %400 = vst [vmem:[%s4402_s24 + $0x188] sm:$0xf] %v399_v34  ;;  %402 = vst [vmem:[%s4402_s24 + $0x18c] sm:$0xf] %v401_v35 }
  0x5e   : > { %404 = vst [vmem:[%s4402_s24 + $0x190] sm:$0xf] %v403_v36  ;;  %v405_v37 = vld [vmem:[%s4398_s14 + $0x328] sm:$0xf]  ;;  %v407_v38 = vld [vmem:[%s4398_s14 + $0x330] sm:$0xf] }
  0x5f   : > { %v409_v39 = vld [vmem:[%s4398_s14 + $0x338] sm:$0xf]  ;;  %406 = vst [vmem:[%s4402_s24 + $0x194] sm:$0xf] %v405_v37  ;;  %408 = vst [vmem:[%s4402_s24 + $0x198] sm:$0xf] %v407_v38 }
  0x60   : > { %410 = vst [vmem:[%s4402_s24 + $0x19c] sm:$0xf] %v409_v39  ;;  %v411_v40 = vld [vmem:[%s4398_s14 + $0x340] sm:$0xf]  ;;  %v413_v41 = vld [vmem:[%s4398_s14 + $0x348] sm:$0xf] }
  0x61   : > { %v415_v42 = vld [vmem:[%s4398_s14 + $0x350] sm:$0xf]  ;;  %412 = vst [vmem:[%s4402_s24 + $0x1a0] sm:$0xf] %v411_v40  ;;  %414 = vst [vmem:[%s4402_s24 + $0x1a4] sm:$0xf] %v413_v41 }
  0x62   : > { %416 = vst [vmem:[%s4402_s24 + $0x1a8] sm:$0xf] %v415_v42  ;;  %v417_v43 = vld [vmem:[%s4398_s14 + $0x358] sm:$0xf]  ;;  %v419_v44 = vld [vmem:[%s4398_s14 + $0x360] sm:$0xf] }
  0x63   : > { %v421_v45 = vld [vmem:[%s4398_s14 + $0x368] sm:$0xf]  ;;  %418 = vst [vmem:[%s4402_s24 + $0x1ac] sm:$0xf] %v417_v43  ;;  %420 = vst [vmem:[%s4402_s24 + $0x1b0] sm:$0xf] %v419_v44 }
  0x64   : > { %422 = vst [vmem:[%s4402_s24 + $0x1b4] sm:$0xf] %v421_v45  ;;  %v423_v46 = vld [vmem:[%s4398_s14 + $0x370] sm:$0xf]  ;;  %v425_v47 = vld [vmem:[%s4398_s14 + $0x378] sm:$0xf] }
  0x65   : > { %v427_v48 = vld [vmem:[%s4398_s14 + $0x380] sm:$0xf]  ;;  %424 = vst [vmem:[%s4402_s24 + $0x1b8] sm:$0xf] %v423_v46  ;;  %426 = vst [vmem:[%s4402_s24 + $0x1bc] sm:$0xf] %v425_v47 }
  0x66   : > { %428 = vst [vmem:[%s4402_s24 + $0x1c0] sm:$0xf] %v427_v48  ;;  %v429_v49 = vld [vmem:[%s4398_s14 + $0x388] sm:$0xf]  ;;  %v431_v50 = vld [vmem:[%s4398_s14 + $0x390] sm:$0xf] }
  0x67   : > { %v433_v51 = vld [vmem:[%s4398_s14 + $0x398] sm:$0xf]  ;;  %430 = vst [vmem:[%s4402_s24 + $0x1c4] sm:$0xf] %v429_v49  ;;  %432 = vst [vmem:[%s4402_s24 + $0x1c8] sm:$0xf] %v431_v50 }
  0x68   : > { %434 = vst [vmem:[%s4402_s24 + $0x1cc] sm:$0xf] %v433_v51  ;;  %v435_v52 = vld [vmem:[%s4398_s14 + $0x3a0] sm:$0xf]  ;;  %v437_v53 = vld [vmem:[%s4398_s14 + $0x3a8] sm:$0xf] }
  0x69   : > { %v439_v54 = vld [vmem:[%s4398_s14 + $0x3b0] sm:$0xf]  ;;  %436 = vst [vmem:[%s4402_s24 + $0x1d0] sm:$0xf] %v435_v52  ;;  %438 = vst [vmem:[%s4402_s24 + $0x1d4] sm:$0xf] %v437_v53 }
  0x6a   : > { %440 = vst [vmem:[%s4402_s24 + $0x1d8] sm:$0xf] %v439_v54  ;;  %v441_v55 = vld [vmem:[%s4398_s14 + $0x3b8] sm:$0xf]  ;;  %v443_v56 = vld [vmem:[%s4398_s14 + $0x3c0] sm:$0xf] }
  0x6b   : > { %v445_v57 = vld [vmem:[%s4398_s14 + $0x3c8] sm:$0xf]  ;;  %442 = vst [vmem:[%s4402_s24 + $0x1dc] sm:$0xf] %v441_v55  ;;  %444 = vst [vmem:[%s4402_s24 + $0x1e0] sm:$0xf] %v443_v56 }
  0x6c   : > { %446 = vst [vmem:[%s4402_s24 + $0x1e4] sm:$0xf] %v445_v57  ;;  %v447_v58 = vld [vmem:[%s4398_s14 + $0x3d0] sm:$0xf]  ;;  %v449_v59 = vld [vmem:[%s4398_s14 + $0x3d8] sm:$0xf] }
  0x6d   : > { %v451_v60 = vld [vmem:[%s4398_s14 + $0x3e0] sm:$0xf]  ;;  %448 = vst [vmem:[%s4402_s24 + $0x1e8] sm:$0xf] %v447_v58  ;;  %450 = vst [vmem:[%s4402_s24 + $0x1ec] sm:$0xf] %v449_v59 }
  0x6e   : > { %452 = vst [vmem:[%s4402_s24 + $0x1f0] sm:$0xf] %v451_v60  ;;  %v453_v61 = vld [vmem:[%s4398_s14 + $0x3e8] sm:$0xf]  ;;  %v455_v62 = vld [vmem:[%s4398_s14 + $0x3f0] sm:$0xf] }
  0x6f   : > { %v457_v63 = vld [vmem:[%s4398_s14 + $0x3f8] sm:$0xf]  ;;  %454 = vst [vmem:[%s4402_s24 + $0x1f4] sm:$0xf] %v453_v61  ;;  %456 = vst [vmem:[%s4402_s24 + $0x1f8] sm:$0xf] %v455_v62 }
  0x70   : > { %458 = vst [vmem:[%s4402_s24 + $0x1fc] sm:$0xf] %v457_v63  ;;  %v459_v0 = vld [vmem:[%s4398_s14 + $0x400] sm:$0xf]  ;;  %v461_v1 = vld [vmem:[%s4398_s14 + $0x408] sm:$0xf] }
  0x71   : > { %v463_v2 = vld [vmem:[%s4398_s14 + $0x410] sm:$0xf]  ;;  %460 = vst [vmem:[%s4402_s24 + $0x200] sm:$0xf] %v459_v0  ;;  %462 = vst [vmem:[%s4402_s24 + $0x204] sm:$0xf] %v461_v1 }
  0x72   : > { %464 = vst [vmem:[%s4402_s24 + $0x208] sm:$0xf] %v463_v2  ;;  %v465_v3 = vld [vmem:[%s4398_s14 + $0x418] sm:$0xf]  ;;  %v467_v4 = vld [vmem:[%s4398_s14 + $0x420] sm:$0xf] }
  0x73   : > { %v469_v5 = vld [vmem:[%s4398_s14 + $0x428] sm:$0xf]  ;;  %466 = vst [vmem:[%s4402_s24 + $0x20c] sm:$0xf] %v465_v3  ;;  %468 = vst [vmem:[%s4402_s24 + $0x210] sm:$0xf] %v467_v4 }
  0x74   : > { %470 = vst [vmem:[%s4402_s24 + $0x214] sm:$0xf] %v469_v5  ;;  %v471_v6 = vld [vmem:[%s4398_s14 + $0x430] sm:$0xf]  ;;  %v473_v7 = vld [vmem:[%s4398_s14 + $0x438] sm:$0xf] }
  0x75   : > { %v475_v8 = vld [vmem:[%s4398_s14 + $0x440] sm:$0xf]  ;;  %472 = vst [vmem:[%s4402_s24 + $0x218] sm:$0xf] %v471_v6  ;;  %474 = vst [vmem:[%s4402_s24 + $0x21c] sm:$0xf] %v473_v7 }
  0x76   : > { %476 = vst [vmem:[%s4402_s24 + $0x220] sm:$0xf] %v475_v8  ;;  %v477_v9 = vld [vmem:[%s4398_s14 + $0x448] sm:$0xf]  ;;  %v479_v10 = vld [vmem:[%s4398_s14 + $0x450] sm:$0xf] }
  0x77   : > { %v481_v11 = vld [vmem:[%s4398_s14 + $0x458] sm:$0xf]  ;;  %478 = vst [vmem:[%s4402_s24 + $0x224] sm:$0xf] %v477_v9  ;;  %480 = vst [vmem:[%s4402_s24 + $0x228] sm:$0xf] %v479_v10 }
  0x78   : > { %482 = vst [vmem:[%s4402_s24 + $0x22c] sm:$0xf] %v481_v11  ;;  %v483_v12 = vld [vmem:[%s4398_s14 + $0x460] sm:$0xf]  ;;  %v485_v13 = vld [vmem:[%s4398_s14 + $0x468] sm:$0xf] }
  0x79   : > { %v487_v14 = vld [vmem:[%s4398_s14 + $0x470] sm:$0xf]  ;;  %484 = vst [vmem:[%s4402_s24 + $0x230] sm:$0xf] %v483_v12  ;;  %486 = vst [vmem:[%s4402_s24 + $0x234] sm:$0xf] %v485_v13 }
  0x7a   : > { %488 = vst [vmem:[%s4402_s24 + $0x238] sm:$0xf] %v487_v14  ;;  %v489_v15 = vld [vmem:[%s4398_s14 + $0x478] sm:$0xf]  ;;  %v491_v16 = vld [vmem:[%s4398_s14 + $0x480] sm:$0xf] }
  0x7b   : > { %v493_v17 = vld [vmem:[%s4398_s14 + $0x488] sm:$0xf]  ;;  %490 = vst [vmem:[%s4402_s24 + $0x23c] sm:$0xf] %v489_v15  ;;  %492 = vst [vmem:[%s4402_s24 + $0x240] sm:$0xf] %v491_v16 }
  0x7c   : > { %494 = vst [vmem:[%s4402_s24 + $0x244] sm:$0xf] %v493_v17  ;;  %v495_v18 = vld [vmem:[%s4398_s14 + $0x490] sm:$0xf]  ;;  %v497_v19 = vld [vmem:[%s4398_s14 + $0x498] sm:$0xf] }
  0x7d   : > { %v499_v20 = vld [vmem:[%s4398_s14 + $0x4a0] sm:$0xf]  ;;  %496 = vst [vmem:[%s4402_s24 + $0x248] sm:$0xf] %v495_v18  ;;  %498 = vst [vmem:[%s4402_s24 + $0x24c] sm:$0xf] %v497_v19 }
  0x7e   : > { %500 = vst [vmem:[%s4402_s24 + $0x250] sm:$0xf] %v499_v20  ;;  %v501_v21 = vld [vmem:[%s4398_s14 + $0x4a8] sm:$0xf]  ;;  %v503_v22 = vld [vmem:[%s4398_s14 + $0x4b0] sm:$0xf] }
  0x7f   : > { %v505_v23 = vld [vmem:[%s4398_s14 + $0x4b8] sm:$0xf]  ;;  %502 = vst [vmem:[%s4402_s24 + $0x254] sm:$0xf] %v501_v21  ;;  %504 = vst [vmem:[%s4402_s24 + $0x258] sm:$0xf] %v503_v22 }
  0x80   : > { %506 = vst [vmem:[%s4402_s24 + $0x25c] sm:$0xf] %v505_v23  ;;  %v507_v24 = vld [vmem:[%s4398_s14 + $0x4c0] sm:$0xf]  ;;  %v509_v25 = vld [vmem:[%s4398_s14 + $0x4c8] sm:$0xf] }
  0x81   : > { %v511_v26 = vld [vmem:[%s4398_s14 + $0x4d0] sm:$0xf]  ;;  %508 = vst [vmem:[%s4402_s24 + $0x260] sm:$0xf] %v507_v24  ;;  %510 = vst [vmem:[%s4402_s24 + $0x264] sm:$0xf] %v509_v25 }
  0x82   : > { %512 = vst [vmem:[%s4402_s24 + $0x268] sm:$0xf] %v511_v26  ;;  %v513_v27 = vld [vmem:[%s4398_s14 + $0x4d8] sm:$0xf]  ;;  %v515_v28 = vld [vmem:[%s4398_s14 + $0x4e0] sm:$0xf] }
  0x83   : > { %v517_v29 = vld [vmem:[%s4398_s14 + $0x4e8] sm:$0xf]  ;;  %514 = vst [vmem:[%s4402_s24 + $0x26c] sm:$0xf] %v513_v27  ;;  %516 = vst [vmem:[%s4402_s24 + $0x270] sm:$0xf] %v515_v28 }
  0x84   : > { %518 = vst [vmem:[%s4402_s24 + $0x274] sm:$0xf] %v517_v29  ;;  %v519_v30 = vld [vmem:[%s4398_s14 + $0x4f0] sm:$0xf]  ;;  %v521_v31 = vld [vmem:[%s4398_s14 + $0x4f8] sm:$0xf] }
  0x85   : > { %v523_v32 = vld [vmem:[%s4398_s14 + $0x500] sm:$0xf]  ;;  %520 = vst [vmem:[%s4402_s24 + $0x278] sm:$0xf] %v519_v30  ;;  %522 = vst [vmem:[%s4402_s24 + $0x27c] sm:$0xf] %v521_v31 }
  0x86   : > { %524 = vst [vmem:[%s4402_s24 + $0x280] sm:$0xf] %v523_v32  ;;  %v525_v33 = vld [vmem:[%s4398_s14 + $0x508] sm:$0xf]  ;;  %v527_v34 = vld [vmem:[%s4398_s14 + $0x510] sm:$0xf] }
  0x87   : > { %v529_v35 = vld [vmem:[%s4398_s14 + $0x518] sm:$0xf]  ;;  %526 = vst [vmem:[%s4402_s24 + $0x284] sm:$0xf] %v525_v33  ;;  %528 = vst [vmem:[%s4402_s24 + $0x288] sm:$0xf] %v527_v34 }
  0x88   : > { %530 = vst [vmem:[%s4402_s24 + $0x28c] sm:$0xf] %v529_v35  ;;  %v531_v36 = vld [vmem:[%s4398_s14 + $0x520] sm:$0xf]  ;;  %v533_v37 = vld [vmem:[%s4398_s14 + $0x528] sm:$0xf] }
  0x89   : > { %v535_v38 = vld [vmem:[%s4398_s14 + $0x530] sm:$0xf]  ;;  %532 = vst [vmem:[%s4402_s24 + $0x290] sm:$0xf] %v531_v36  ;;  %534 = vst [vmem:[%s4402_s24 + $0x294] sm:$0xf] %v533_v37 }
  0x8a   : > { %536 = vst [vmem:[%s4402_s24 + $0x298] sm:$0xf] %v535_v38  ;;  %v537_v39 = vld [vmem:[%s4398_s14 + $0x538] sm:$0xf]  ;;  %v539_v40 = vld [vmem:[%s4398_s14 + $0x540] sm:$0xf] }
  0x8b   : > { %v541_v41 = vld [vmem:[%s4398_s14 + $0x548] sm:$0xf]  ;;  %538 = vst [vmem:[%s4402_s24 + $0x29c] sm:$0xf] %v537_v39  ;;  %540 = vst [vmem:[%s4402_s24 + $0x2a0] sm:$0xf] %v539_v40 }
  0x8c   : > { %542 = vst [vmem:[%s4402_s24 + $0x2a4] sm:$0xf] %v541_v41  ;;  %v543_v42 = vld [vmem:[%s4398_s14 + $0x550] sm:$0xf]  ;;  %v545_v43 = vld [vmem:[%s4398_s14 + $0x558] sm:$0xf] }
  0x8d   : > { %v547_v44 = vld [vmem:[%s4398_s14 + $0x560] sm:$0xf]  ;;  %544 = vst [vmem:[%s4402_s24 + $0x2a8] sm:$0xf] %v543_v42  ;;  %546 = vst [vmem:[%s4402_s24 + $0x2ac] sm:$0xf] %v545_v43 }
  0x8e   : > { %548 = vst [vmem:[%s4402_s24 + $0x2b0] sm:$0xf] %v547_v44  ;;  %v549_v45 = vld [vmem:[%s4398_s14 + $0x568] sm:$0xf]  ;;  %v551_v46 = vld [vmem:[%s4398_s14 + $0x570] sm:$0xf] }
  0x8f   : > { %v553_v47 = vld [vmem:[%s4398_s14 + $0x578] sm:$0xf]  ;;  %550 = vst [vmem:[%s4402_s24 + $0x2b4] sm:$0xf] %v549_v45  ;;  %552 = vst [vmem:[%s4402_s24 + $0x2b8] sm:$0xf] %v551_v46 }
  0x90   : > { %554 = vst [vmem:[%s4402_s24 + $0x2bc] sm:$0xf] %v553_v47  ;;  %v555_v48 = vld [vmem:[%s4398_s14 + $0x580] sm:$0xf]  ;;  %v557_v49 = vld [vmem:[%s4398_s14 + $0x588] sm:$0xf] }
  0x91   : > { %v559_v50 = vld [vmem:[%s4398_s14 + $0x590] sm:$0xf]  ;;  %556 = vst [vmem:[%s4402_s24 + $0x2c0] sm:$0xf] %v555_v48  ;;  %558 = vst [vmem:[%s4402_s24 + $0x2c4] sm:$0xf] %v557_v49 }
  0x92   : > { %560 = vst [vmem:[%s4402_s24 + $0x2c8] sm:$0xf] %v559_v50  ;;  %v561_v51 = vld [vmem:[%s4398_s14 + $0x598] sm:$0xf]  ;;  %v563_v52 = vld [vmem:[%s4398_s14 + $0x5a0] sm:$0xf] }
  0x93   : > { %v565_v53 = vld [vmem:[%s4398_s14 + $0x5a8] sm:$0xf]  ;;  %562 = vst [vmem:[%s4402_s24 + $0x2cc] sm:$0xf] %v561_v51  ;;  %564 = vst [vmem:[%s4402_s24 + $0x2d0] sm:$0xf] %v563_v52 }
  0x94   : > { %566 = vst [vmem:[%s4402_s24 + $0x2d4] sm:$0xf] %v565_v53  ;;  %v567_v54 = vld [vmem:[%s4398_s14 + $0x5b0] sm:$0xf]  ;;  %v569_v55 = vld [vmem:[%s4398_s14 + $0x5b8] sm:$0xf] }
  0x95   : > { %v571_v56 = vld [vmem:[%s4398_s14 + $0x5c0] sm:$0xf]  ;;  %568 = vst [vmem:[%s4402_s24 + $0x2d8] sm:$0xf] %v567_v54  ;;  %570 = vst [vmem:[%s4402_s24 + $0x2dc] sm:$0xf] %v569_v55 }
  0x96   : > { %572 = vst [vmem:[%s4402_s24 + $0x2e0] sm:$0xf] %v571_v56  ;;  %v573_v57 = vld [vmem:[%s4398_s14 + $0x5c8] sm:$0xf]  ;;  %v575_v58 = vld [vmem:[%s4398_s14 + $0x5d0] sm:$0xf] }
  0x97   : > { %v577_v59 = vld [vmem:[%s4398_s14 + $0x5d8] sm:$0xf]  ;;  %574 = vst [vmem:[%s4402_s24 + $0x2e4] sm:$0xf] %v573_v57  ;;  %576 = vst [vmem:[%s4402_s24 + $0x2e8] sm:$0xf] %v575_v58 }
  0x98   : > { %578 = vst [vmem:[%s4402_s24 + $0x2ec] sm:$0xf] %v577_v59  ;;  %v579_v60 = vld [vmem:[%s4398_s14 + $0x5e0] sm:$0xf]  ;;  %v581_v61 = vld [vmem:[%s4398_s14 + $0x5e8] sm:$0xf] }
  0x99   : > { %v583_v62 = vld [vmem:[%s4398_s14 + $0x5f0] sm:$0xf]  ;;  %580 = vst [vmem:[%s4402_s24 + $0x2f0] sm:$0xf] %v579_v60  ;;  %582 = vst [vmem:[%s4402_s24 + $0x2f4] sm:$0xf] %v581_v61 }
  0x9a   : > { %584 = vst [vmem:[%s4402_s24 + $0x2f8] sm:$0xf] %v583_v62  ;;  %v585_v63 = vld [vmem:[%s4398_s14 + $0x5f8] sm:$0xf]  ;;  %v587_v0 = vld [vmem:[%s4398_s14 + $0x600] sm:$0xf] }
  0x9b   : > { %v589_v1 = vld [vmem:[%s4398_s14 + $0x608] sm:$0xf]  ;;  %586 = vst [vmem:[%s4402_s24 + $0x2fc] sm:$0xf] %v585_v63  ;;  %588 = vst [vmem:[%s4402_s24 + $0x300] sm:$0xf] %v587_v0 }
  0x9c   : > { %590 = vst [vmem:[%s4402_s24 + $0x304] sm:$0xf] %v589_v1  ;;  %v591_v2 = vld [vmem:[%s4398_s14 + $0x610] sm:$0xf]  ;;  %v593_v3 = vld [vmem:[%s4398_s14 + $0x618] sm:$0xf] }
  0x9d   : > { %v595_v4 = vld [vmem:[%s4398_s14 + $0x620] sm:$0xf]  ;;  %592 = vst [vmem:[%s4402_s24 + $0x308] sm:$0xf] %v591_v2  ;;  %594 = vst [vmem:[%s4402_s24 + $0x30c] sm:$0xf] %v593_v3 }
  0x9e   : > { %596 = vst [vmem:[%s4402_s24 + $0x310] sm:$0xf] %v595_v4  ;;  %v597_v5 = vld [vmem:[%s4398_s14 + $0x628] sm:$0xf]  ;;  %v599_v6 = vld [vmem:[%s4398_s14 + $0x630] sm:$0xf] }
  0x9f   : > { %v601_v7 = vld [vmem:[%s4398_s14 + $0x638] sm:$0xf]  ;;  %598 = vst [vmem:[%s4402_s24 + $0x314] sm:$0xf] %v597_v5  ;;  %600 = vst [vmem:[%s4402_s24 + $0x318] sm:$0xf] %v599_v6 }
  0xa0   : > { %602 = vst [vmem:[%s4402_s24 + $0x31c] sm:$0xf] %v601_v7  ;;  %v603_v8 = vld [vmem:[%s4398_s14 + $0x640] sm:$0xf]  ;;  %v605_v9 = vld [vmem:[%s4398_s14 + $0x648] sm:$0xf] }
  0xa1   : > { %v607_v10 = vld [vmem:[%s4398_s14 + $0x650] sm:$0xf]  ;;  %604 = vst [vmem:[%s4402_s24 + $0x320] sm:$0xf] %v603_v8  ;;  %606 = vst [vmem:[%s4402_s24 + $0x324] sm:$0xf] %v605_v9 }
  0xa2   : > { %608 = vst [vmem:[%s4402_s24 + $0x328] sm:$0xf] %v607_v10  ;;  %v609_v11 = vld [vmem:[%s4398_s14 + $0x658] sm:$0xf]  ;;  %v611_v12 = vld [vmem:[%s4398_s14 + $0x660] sm:$0xf] }
  0xa3   : > { %v613_v13 = vld [vmem:[%s4398_s14 + $0x668] sm:$0xf]  ;;  %610 = vst [vmem:[%s4402_s24 + $0x32c] sm:$0xf] %v609_v11  ;;  %612 = vst [vmem:[%s4402_s24 + $0x330] sm:$0xf] %v611_v12 }
  0xa4   : > { %614 = vst [vmem:[%s4402_s24 + $0x334] sm:$0xf] %v613_v13  ;;  %v615_v14 = vld [vmem:[%s4398_s14 + $0x670] sm:$0xf]  ;;  %v617_v15 = vld [vmem:[%s4398_s14 + $0x678] sm:$0xf] }
  0xa5   : > { %v619_v16 = vld [vmem:[%s4398_s14 + $0x680] sm:$0xf]  ;;  %616 = vst [vmem:[%s4402_s24 + $0x338] sm:$0xf] %v615_v14  ;;  %618 = vst [vmem:[%s4402_s24 + $0x33c] sm:$0xf] %v617_v15 }
  0xa6   : > { %620 = vst [vmem:[%s4402_s24 + $0x340] sm:$0xf] %v619_v16  ;;  %v621_v17 = vld [vmem:[%s4398_s14 + $0x688] sm:$0xf]  ;;  %v623_v18 = vld [vmem:[%s4398_s14 + $0x690] sm:$0xf] }
  0xa7   : > { %v625_v19 = vld [vmem:[%s4398_s14 + $0x698] sm:$0xf]  ;;  %622 = vst [vmem:[%s4402_s24 + $0x344] sm:$0xf] %v621_v17  ;;  %624 = vst [vmem:[%s4402_s24 + $0x348] sm:$0xf] %v623_v18 }
  0xa8   : > { %626 = vst [vmem:[%s4402_s24 + $0x34c] sm:$0xf] %v625_v19  ;;  %v627_v20 = vld [vmem:[%s4398_s14 + $0x6a0] sm:$0xf]  ;;  %v629_v21 = vld [vmem:[%s4398_s14 + $0x6a8] sm:$0xf] }
  0xa9   : > { %v631_v22 = vld [vmem:[%s4398_s14 + $0x6b0] sm:$0xf]  ;;  %628 = vst [vmem:[%s4402_s24 + $0x350] sm:$0xf] %v627_v20  ;;  %630 = vst [vmem:[%s4402_s24 + $0x354] sm:$0xf] %v629_v21 }
  0xaa   : > { %632 = vst [vmem:[%s4402_s24 + $0x358] sm:$0xf] %v631_v22  ;;  %v633_v23 = vld [vmem:[%s4398_s14 + $0x6b8] sm:$0xf]  ;;  %v635_v24 = vld [vmem:[%s4398_s14 + $0x6c0] sm:$0xf] }
  0xab   : > { %v637_v25 = vld [vmem:[%s4398_s14 + $0x6c8] sm:$0xf]  ;;  %634 = vst [vmem:[%s4402_s24 + $0x35c] sm:$0xf] %v633_v23  ;;  %636 = vst [vmem:[%s4402_s24 + $0x360] sm:$0xf] %v635_v24 }
  0xac   : > { %638 = vst [vmem:[%s4402_s24 + $0x364] sm:$0xf] %v637_v25  ;;  %v639_v26 = vld [vmem:[%s4398_s14 + $0x6d0] sm:$0xf]  ;;  %v641_v27 = vld [vmem:[%s4398_s14 + $0x6d8] sm:$0xf] }
  0xad   : > { %v643_v28 = vld [vmem:[%s4398_s14 + $0x6e0] sm:$0xf]  ;;  %640 = vst [vmem:[%s4402_s24 + $0x368] sm:$0xf] %v639_v26  ;;  %642 = vst [vmem:[%s4402_s24 + $0x36c] sm:$0xf] %v641_v27 }
  0xae   : > { %644 = vst [vmem:[%s4402_s24 + $0x370] sm:$0xf] %v643_v28  ;;  %v645_v29 = vld [vmem:[%s4398_s14 + $0x6e8] sm:$0xf]  ;;  %v647_v30 = vld [vmem:[%s4398_s14 + $0x6f0] sm:$0xf] }
  0xaf   : > { %v649_v31 = vld [vmem:[%s4398_s14 + $0x6f8] sm:$0xf]  ;;  %646 = vst [vmem:[%s4402_s24 + $0x374] sm:$0xf] %v645_v29  ;;  %648 = vst [vmem:[%s4402_s24 + $0x378] sm:$0xf] %v647_v30 }
  0xb0   : > { %650 = vst [vmem:[%s4402_s24 + $0x37c] sm:$0xf] %v649_v31  ;;  %v651_v32 = vld [vmem:[%s4398_s14 + $0x700] sm:$0xf]  ;;  %v653_v33 = vld [vmem:[%s4398_s14 + $0x708] sm:$0xf] }
  0xb1   : > { %v655_v34 = vld [vmem:[%s4398_s14 + $0x710] sm:$0xf]  ;;  %652 = vst [vmem:[%s4402_s24 + $0x380] sm:$0xf] %v651_v32  ;;  %654 = vst [vmem:[%s4402_s24 + $0x384] sm:$0xf] %v653_v33 }
  0xb2   : > { %656 = vst [vmem:[%s4402_s24 + $0x388] sm:$0xf] %v655_v34  ;;  %v657_v35 = vld [vmem:[%s4398_s14 + $0x718] sm:$0xf]  ;;  %v659_v36 = vld [vmem:[%s4398_s14 + $0x720] sm:$0xf] }
  0xb3   : > { %v661_v37 = vld [vmem:[%s4398_s14 + $0x728] sm:$0xf]  ;;  %658 = vst [vmem:[%s4402_s24 + $0x38c] sm:$0xf] %v657_v35  ;;  %660 = vst [vmem:[%s4402_s24 + $0x390] sm:$0xf] %v659_v36 }
  0xb4   : > { %662 = vst [vmem:[%s4402_s24 + $0x394] sm:$0xf] %v661_v37  ;;  %v663_v38 = vld [vmem:[%s4398_s14 + $0x730] sm:$0xf]  ;;  %v665_v39 = vld [vmem:[%s4398_s14 + $0x738] sm:$0xf] }
  0xb5   : > { %v667_v40 = vld [vmem:[%s4398_s14 + $0x740] sm:$0xf]  ;;  %664 = vst [vmem:[%s4402_s24 + $0x398] sm:$0xf] %v663_v38  ;;  %666 = vst [vmem:[%s4402_s24 + $0x39c] sm:$0xf] %v665_v39 }
  0xb6   : > { %668 = vst [vmem:[%s4402_s24 + $0x3a0] sm:$0xf] %v667_v40  ;;  %v669_v41 = vld [vmem:[%s4398_s14 + $0x748] sm:$0xf]  ;;  %v671_v42 = vld [vmem:[%s4398_s14 + $0x750] sm:$0xf] }
  0xb7   : > { %v673_v43 = vld [vmem:[%s4398_s14 + $0x758] sm:$0xf]  ;;  %670 = vst [vmem:[%s4402_s24 + $0x3a4] sm:$0xf] %v669_v41  ;;  %672 = vst [vmem:[%s4402_s24 + $0x3a8] sm:$0xf] %v671_v42 }
  0xb8   : > { %674 = vst [vmem:[%s4402_s24 + $0x3ac] sm:$0xf] %v673_v43  ;;  %v675_v44 = vld [vmem:[%s4398_s14 + $0x760] sm:$0xf]  ;;  %v677_v45 = vld [vmem:[%s4398_s14 + $0x768] sm:$0xf] }
  0xb9   : > { %v679_v46 = vld [vmem:[%s4398_s14 + $0x770] sm:$0xf]  ;;  %676 = vst [vmem:[%s4402_s24 + $0x3b0] sm:$0xf] %v675_v44  ;;  %678 = vst [vmem:[%s4402_s24 + $0x3b4] sm:$0xf] %v677_v45 }
  0xba   : > { %680 = vst [vmem:[%s4402_s24 + $0x3b8] sm:$0xf] %v679_v46  ;;  %v681_v47 = vld [vmem:[%s4398_s14 + $0x778] sm:$0xf]  ;;  %v683_v48 = vld [vmem:[%s4398_s14 + $0x780] sm:$0xf] }
  0xbb   : > { %v685_v49 = vld [vmem:[%s4398_s14 + $0x788] sm:$0xf]  ;;  %682 = vst [vmem:[%s4402_s24 + $0x3bc] sm:$0xf] %v681_v47  ;;  %684 = vst [vmem:[%s4402_s24 + $0x3c0] sm:$0xf] %v683_v48 }
  0xbc   : > { %686 = vst [vmem:[%s4402_s24 + $0x3c4] sm:$0xf] %v685_v49  ;;  %v687_v50 = vld [vmem:[%s4398_s14 + $0x790] sm:$0xf]  ;;  %v689_v51 = vld [vmem:[%s4398_s14 + $0x798] sm:$0xf] }
  0xbd   : > { %v691_v52 = vld [vmem:[%s4398_s14 + $0x7a0] sm:$0xf]  ;;  %688 = vst [vmem:[%s4402_s24 + $0x3c8] sm:$0xf] %v687_v50  ;;  %690 = vst [vmem:[%s4402_s24 + $0x3cc] sm:$0xf] %v689_v51 }
  0xbe   : > { %692 = vst [vmem:[%s4402_s24 + $0x3d0] sm:$0xf] %v691_v52  ;;  %v693_v53 = vld [vmem:[%s4398_s14 + $0x7a8] sm:$0xf]  ;;  %v695_v54 = vld [vmem:[%s4398_s14 + $0x7b0] sm:$0xf] }
  0xbf   : > { %v697_v55 = vld [vmem:[%s4398_s14 + $0x7b8] sm:$0xf]  ;;  %694 = vst [vmem:[%s4402_s24 + $0x3d4] sm:$0xf] %v693_v53  ;;  %696 = vst [vmem:[%s4402_s24 + $0x3d8] sm:$0xf] %v695_v54 }
  0xc0   : > { %698 = vst [vmem:[%s4402_s24 + $0x3dc] sm:$0xf] %v697_v55  ;;  %v699_v56 = vld [vmem:[%s4398_s14 + $0x7c0] sm:$0xf]  ;;  %v701_v57 = vld [vmem:[%s4398_s14 + $0x7c8] sm:$0xf] }
  0xc1   : > { %v703_v58 = vld [vmem:[%s4398_s14 + $0x7d0] sm:$0xf]  ;;  %700 = vst [vmem:[%s4402_s24 + $0x3e0] sm:$0xf] %v699_v56  ;;  %702 = vst [vmem:[%s4402_s24 + $0x3e4] sm:$0xf] %v701_v57 }
  0xc2   : > { %704 = vst [vmem:[%s4402_s24 + $0x3e8] sm:$0xf] %v703_v58  ;;  %v705_v59 = vld [vmem:[%s4398_s14 + $0x7d8] sm:$0xf]  ;;  %v707_v60 = vld [vmem:[%s4398_s14 + $0x7e0] sm:$0xf] }
  0xc3   : > { %v709_v61 = vld [vmem:[%s4398_s14 + $0x7e8] sm:$0xf]  ;;  %706 = vst [vmem:[%s4402_s24 + $0x3ec] sm:$0xf] %v705_v59  ;;  %708 = vst [vmem:[%s4402_s24 + $0x3f0] sm:$0xf] %v707_v60 }
  0xc4   : > { %710 = vst [vmem:[%s4402_s24 + $0x3f4] sm:$0xf] %v709_v61  ;;  %v711_v62 = vld [vmem:[%s4398_s14 + $0x7f0] sm:$0xf]  ;;  %v713_v63 = vld [vmem:[%s4398_s14 + $0x7f8] sm:$0xf] }
  0xc5   : > { %712 = vst [vmem:[%s4402_s24 + $0x3f8] sm:$0xf] %v711_v62  ;;  %714 = vst [vmem:[%s4402_s24 + $0x3fc] sm:$0xf] %v713_v63 }
  0xc6 PF: > { %p3361_p11 = scmp.ge.s32.totalorder %s4288_s23, 1  ;;  %p1254_p12 = scmp.lt.s32.totalorder %s4288_s23, 5 }
  0xc8   : > { %p1255_p13 = pnand %p3361_p11, %p1254_p12 }
  0xc9   : > { %s1261_s27 = sand.u32 (!%p1255_p13), 1, %s4264_s17   ;;  %p1293_p0 = scmp.lt.s32.totalorder (!%p1255_p13), %s4276_s20, 1  ;;  %vm1463_vm0 = vsmask.f32 (!%p1255_p13), 7424  ;;  %vm2205_vm1 = vsmask.f32 (!%p1255_p13), 5376 }
  0xca   : > { %1258 = sbr.rel (%p1255_p13) target bundleno = 819 (0x333), region = 73  ;;  %s3362_s28 = sshll.u32 (!%p1255_p13), %s1261_s27, 10  ;;  %vm2678_vm2 = vcmask (!%p1255_p13), 1044480   ;;  %vm4291_vm3 = vmmov (!%p1255_p13), 0   ;;  %vm3005_vm4 = vcmask (!%p1255_p13), 1042432   ;;  %vm3001_vm5 = vcmask (!%p1255_p13), 154624  }
  0xcb   : > { %s4917_s29 = scalar_lea.vmem (!%p1255_p13), [#allocation2], %s3362_s28  ;;  %p1298_p1 = scmp.lt.s32.totalorder (!%p1255_p13), %s4272_s19, 1  ;;  %vm3200_vm6 = vcmask (!%p1255_p13), 1041408   ;;  %vm3201_vm7 = vsmask.f32 (!%p1255_p13), 1280 }
  0xcc   : > { %v4062_v0 = vld [vmem:[%s4917_s29 + $0x140] sm:$0xff] (!%p1255_p13)   ;;  %v4066_v4 = vld [vmem:[%s4917_s29 + $0x148] sm:$0xff] (!%p1255_p13)   ;;  %v4070_v8 = vld [vmem:[%s4917_s29 + $0x150] sm:$0xff] (!%p1255_p13)   ;;  %s1290_s28 = sand.u32 (!%p1255_p13), 1, %s4256_s15  }
  0xcd   : > { %v4063_v1 = vld [vmem:[%s4917_s29 + $0x1c0] sm:$0xff] (!%p1255_p13)   ;;  %3729 = vmatprep.subr.bf16.mxu0 (!%p1255_p13), %v4062_v0  ;;  %v4067_v5 = vld [vmem:[%s4917_s29 + $0x1c8] sm:$0xff] (!%p1255_p13)   ;;  %v4071_v9 = vld [vmem:[%s4917_s29 + $0x1d0] sm:$0xff] (!%p1255_p13)  }
  0xce   : > { %v4064_v2 = vld [vmem:[%s4917_s29 + $0x100] sm:$0xff] (!%p1255_p13)   ;;  %3757 = vmatprep.subr.bf16.mxu1 (!%p1255_p13), %v4063_v1  ;;  %v4068_v6 = vld [vmem:[%s4917_s29 + $0x108] sm:$0xff] (!%p1255_p13)   ;;  %v4072_v10 = vld [vmem:[%s4917_s29 + $0x110] sm:$0xff] (!%p1255_p13)  }
  0xcf   : > { %v4065_v3 = vld [vmem:[%s4917_s29 + $0x180] sm:$0xff] (!%p1255_p13)   ;;  %3730 = vmatpush3.bf16.msra.mxu0 (!%p1255_p13), %v4064_v2  ;;  %v4069_v7 = vld [vmem:[%s4917_s29 + $0x188] sm:$0xff] (!%p1255_p13)   ;;  %v4073_v11 = vld [vmem:[%s4917_s29 + $0x190] sm:$0xff] (!%p1255_p13)  }
  0xd0   : > { %3758 = vmatpush3.bf16.msra.mxu1 (!%p1255_p13), %v4065_v3  ;;  %3731 = vmatprep.subr.bf16.mxu0 (!%p1255_p13), %v4066_v4  ;;  %v4074_v12 = vld [vmem:[%s4917_s29 + $0x158] sm:$0xff] (!%p1255_p13)   ;;  %v4078_v16 = vld [vmem:[%s4917_s29 + $0x160] sm:$0xff] (!%p1255_p13)   ;;  %v4082_v20 = vld [vmem:[%s4917_s29 + $0x168] sm:$0xff] (!%p1255_p13)  }
  0xd1   : > { %3759 = vmatprep.subr.bf16.mxu1 %v4067_v5  ;;  %v4075_v13 = vld [vmem:[%s4917_s29 + $0x1d8] sm:$0xff]   ;;  %v4079_v17 = vld [vmem:[%s4917_s29 + $0x1e0] sm:$0xff]   ;;  %v4083_v21 = vld [vmem:[%s4917_s29 + $0x1e8] sm:$0xff]   ;;  %s1294_s17 = scalar_select %p1293_p0, %s4276_s20, 1 }
  0xd2   : > { %v4076_v14 = vld [vmem:[%s4917_s29 + $0x118] sm:$0xff]   ;;  %v4080_v18 = vld [vmem:[%s4917_s29 + $0x120] sm:$0xff]   ;;  %v4084_v22 = vld [vmem:[%s4917_s29 + $0x128] sm:$0xff]   ;;  %s1299_s11 = scalar_select %p1298_p1, %s4272_s19, 1 }
  0xd3   : > { %3732 = vmatpush3.bf16.msra.mxu0 %v4068_v6  ;;  %v4077_v15 = vld [vmem:[%s4917_s29 + $0x198] sm:$0xff]   ;;  %v4081_v19 = vld [vmem:[%s4917_s29 + $0x1a0] sm:$0xff]   ;;  %v4085_v23 = vld [vmem:[%s4917_s29 + $0x1a8] sm:$0xff]   ;;  %s3720_s5 = sshll.u32 %s1294_s17, 6  ;;  %s3986_s17 = smul.u32 (%p4385_p9), 6, %s4276_s20 }
  0xd4   : > { %3760 = vmatpush3.bf16.msra.mxu1 %v4069_v7  ;;  %3733 = vmatprep.subr.bf16.mxu0 %v4070_v8  ;;  %v4086_v24 = vld [vmem:[%s4917_s29 + $0x170] sm:$0xff]   ;;  %v4090_v28 = vld [vmem:[%s4917_s29 + $0x178] sm:$0xff]   ;;  %s4954_s10 = scalar_lea.vmem %s5197_s0, %s3720_s5  ;;  %v4102_v46 = vld [vmem:[%s4917_s29 + $0x40] sm:$0xff]   ;;  %s1300_s14 = scalar_lea.vmem %s5199_s2, %s1299_s11 }
  0xd5   : > { %3761 = vmatprep.subr.bf16.mxu1 %v4071_v9  ;;  %v4087_v25 = vld [vmem:[%s4917_s29 + $0x1f0] sm:$0xff]   ;;  %v4091_v29 = vld [vmem:[%s4917_s29 + $0x1f8] sm:$0xff]   ;;  %v1302_v32 = vld [vmem:[%s4954_s10] sm:$0xff]  ;;  %s3214_s5 = sadd.s32 (%p4385_p9), %s4272_s19, %s3986_s17 }
  0xd6   : > { %v4088_v26 = vld [vmem:[%s4917_s29 + $0x130] sm:$0xff]   ;;  %v4092_v30 = vld [vmem:[%s4917_s29 + $0x138] sm:$0xff]   ;;  %v1306_v34 = vld [vmem:[%s4954_s10 + $0x20] sm:$0x33]  ;;  %s3717_s6 = sshll.u32 (%p4385_p9), %s3214_s5, 2 }
  0xd7   : > { %3734 = vmatpush3.bf16.msra.mxu0 %v4072_v10  ;;  %v4089_v27 = vld [vmem:[%s4917_s29 + $0x1b0] sm:$0xff]   ;;  %v4093_v31 = vld [vmem:[%s4917_s29 + $0x1b8] sm:$0xff]   ;;  %v4966_v36 = vcombine.high %v1306_v34, %v1306_v34  ;;  %v1303_v37 = vld [vmem:[%s4954_s10 + $0x8] sm:$0xff]  ;;  %v4976_v41 = vcombine.low %v1306_v34, %v1306_v34  ;;  %s3216_s11 = scalar_lea.vmem (%p4385_p9), %s5201_s4, %s3717_s6 }
  0xd8   : > { %3762 = vmatpush3.bf16.msra.mxu1 %v4073_v11  ;;  %3735 = vmatprep.subr.bf16.mxu0 %v4074_v12  ;;  %v4960_v33 = vld [vmem:[%s4954_s10 + $0x10] sm:$0xff]  ;;  %v4970_v38 = vld [vmem:[%s4954_s10 + $0x18] sm:$0xff]  ;;  %v1307_v39 = vld [vmem:[%s4954_s10 + $0x28] sm:$0x33] }
  0xd9   : > { %3763 = vmatprep.subr.bf16.mxu1 %v4075_v13  ;;  %v4964_v35 = vcombine.high %v1302_v32, %v4960_v33  ;;  %v4974_v40 = vcombine.low %v1302_v32, %v4960_v33  ;;  %v4979_v42 = vcombine.high %v1303_v37, %v4970_v38  ;;  %v4981_v43 = vcombine.high %v1307_v39, %v1307_v39  ;;  %v4103_v59 = vld [vmem:[%s4917_s29 + $0xc0] sm:$0xff]   ;;  %v4106_v10 = vld [vmem:[%s4917_s29 + $0x48] sm:$0xff]   ;;  %v4116_v32 = vld [vmem:[%s4917_s29 + $0x18] sm:$0xff]  }
  0xda   : > { %v4984_v44 = vcombine.low %v1303_v37, %v4970_v38  ;;  %v4986_v45 = vcombine.low %v1307_v39, %v1307_v39  ;;  %v1484_v49 = vshll.u32 %v4966_v36, 16  ;;  %v1472_v57 = vshll.u32 %v4976_v41, 16  ;;  %v4104_v0 = vld [vmem:[%s4917_s29] sm:$0xff]   ;;  %v4117_v34 = vld [vmem:[%s4917_s29 + $0x98] sm:$0xff]   ;;  %vm3202_vm11 = vmand %vm3200_vm6, %vm3201_vm7 }
  0xdb   : > { %3736 = vmatpush3.bf16.msra.mxu0 %v4076_v14  ;;  %v1477_v47 = vshrl.u32 %v4964_v35, 16  ;;  %v1479_v48 = vshll.u32 %v4964_v35, 16  ;;  %v1465_v50 = vshrl.u32 %v4974_v40, 16  ;;  %v1501_v51 = vshrl.u32 %v4979_v42, 16  ;;  %v4105_v7 = vld [vmem:[%s4917_s29 + $0x80] sm:$0xff]   ;;  %v4107_v14 = vld [vmem:[%s4917_s29 + $0xc8] sm:$0xff]  }
  0xdc   : > { %3764 = vmatpush3.bf16.msra.mxu1 %v4077_v15  ;;  %3737 = vmatprep.subr.bf16.mxu0 %v4078_v16  ;;  %v1503_v52 = vshll.u32 %v4979_v42, 16  ;;  %v1508_v53 = vshll.u32 %v4981_v43, 16  ;;  %v1467_v54 = vshll.u32 %v4974_v40, 16  ;;  %v1486_v56 = vrot.slane %v1484_v49, 1  ;;  %v4108_v16 = vld [vmem:[%s4917_s29 + $0x8] sm:$0xff]   ;;  %v4118_v37 = vld [vmem:[%s4917_s29 + $0x60] sm:$0xff]  }
  0xdd   : > { %3765 = vmatprep.subr.bf16.mxu1 %v4079_v17  ;;  %v1481_v55 = vrot.slane %v1479_v48, 1  ;;  %v1489_v58 = vshrl.u32 %v4984_v44, 16  ;;  %v1491_v63 = vshll.u32 %v4984_v44, 16  ;;  %v1474_v2 = vrot.slane %v1472_v57, 1  ;;  %v4119_v39 = vld [vmem:[%s4917_s29 + $0xe0] sm:$0xff]   ;;  %v4122_v48 = vld [vmem:[%s4917_s29 + $0x68] sm:$0xff]  }
  0xde   : > { %v1505_v60 = vrot.slane %v1503_v52, 1  ;;  %v1510_v61 = vrot.slane %v1508_v53, 1  ;;  %v1469_v62 = vrot.slane %v1467_v54, 1  ;;  %v1496_v3 = vshll.u32 %v4986_v45, 16  ;;  %v4124_v49 = vld [vmem:[%s4917_s29 + $0x28] sm:$0xff]   ;;  %v4128_v52 = vld [vmem:[%s4917_s29 + $0x30] sm:$0xff]  }
  0xdf   : > { %3738 = vmatpush3.bf16.msra.mxu0 %v4080_v18  ;;  %v1482_v1 = vor.u32 %v1481_v55, %v1477_v47  ;;  %v1493_v6 = vrot.slane %v1491_v63, 1  ;;  %v1515_v15 = vshrl.u32 %v4966_v36, 16  ;;  %v1521_v17 = vshrl.u32 %v4981_v43, 16  ;;  %v4121_v47 = vld [vmem:[%s4917_s29 + $0xa0] sm:$0xff]   ;;  %v4129_v53 = vld [vmem:[%s4917_s29 + $0xb0] sm:$0xff]   ;;  %v4130_v54 = vld [vmem:[%s4917_s29 + $0x78] sm:$0xff]  }
  0xe0   : > { %3766 = vmatpush3.bf16.msra.mxu1 %v4081_v19  ;;  %3739 = vmatprep.subr.bf16.mxu0 %v4082_v20  ;;  %v1506_v4 = vor.u32 %v1505_v60, %v1501_v51  ;;  %v1470_v5 = vor.u32 %v1469_v62, %v1465_v50  ;;  %v1498_v9 = vrot.slane %v1496_v3, 1  ;;  %v4109_v19 = vld [vmem:[%s4917_s29 + $0x88] sm:$0xff]   ;;  %v4127_v51 = vld [vmem:[%s4917_s29 + $0xf0] sm:$0xff]   ;;  %v4131_v55 = vld [vmem:[%s4917_s29 + $0xf8] sm:$0xff]  }
  0xe1   : > { %3767 = vmatprep.subr.bf16.mxu1 %v4083_v21  ;;  %v1487_v8 = vsel %vm1463_vm0, %v1482_v1, %v1486_v56  ;;  %v1494_v13 = vor.u32 %v1493_v6, %v1489_v58  ;;  %v1517_v20 = vor.u32 %v1515_v15, %v1486_v56  ;;  %v1512_v21 = vshrl.u32 %v4976_v41, 16  ;;  %v4125_v50 = vld [vmem:[%s4917_s29 + $0xa8] sm:$0xff]   ;;  %v4132_v56 = vld [vmem:[%s4917_s29 + $0x38] sm:$0xff]   ;;  %v4134_v58 = vld [vmem:[%s4917_s29 + $0x240] sm:$0xff]  }
  0xe2   : > { %1756 = vmatprep.mubr.bf16.mxu0 %v1487_v8  ;;  %v1511_v11 = vsel %vm1463_vm0, %v1506_v4, %v1510_v61  ;;  %v1475_v12 = vsel %vm1463_vm0, %v1470_v5, %v1474_v2  ;;  %v4133_v57 = vld [vmem:[%s4917_s29 + $0xb8] sm:$0xff]   ;;  %v4136_v60 = vld [vmem:[%s4917_s29 + $0x200] sm:$0xff]   ;;  %v4138_v62 = vld [vmem:[%s4917_s29 + $0x248] sm:$0xff]  }
  0xe3   : > { %3740 = vmatpush3.bf16.msra.mxu0 %v4084_v22  ;;  %1804 = vmatprep.mubr.bf16.mxu1 %v1511_v11  ;;  %v1499_v18 = vsel %vm1463_vm0, %v1494_v13, %v1498_v9  ;;  %v4110_v22 = vld [vmem:[%s4917_s29 + $0x50] sm:$0xff]   ;;  %v4139_v63 = vld [vmem:[%s4917_s29 + $0x2c8] sm:$0xff]   ;;  %v4146_v5 = vld [vmem:[%s4917_s29 + $0x258] sm:$0xff]  }
  0xe4   : > { %3768 = vmatpush3.bf16.msra.mxu1 %v4085_v23  ;;  %3741 = vmatprep.subr.bf16.mxu0 %v4086_v24  ;;  %v1523_v23 = vor.u32 %v1521_v17, %v1510_v61  ;;  %v1518_v24 = vshrl.u32 %v4986_v45, 16  ;;  %v4137_v61 = vld [vmem:[%s4917_s29 + $0x280] sm:$0xff]   ;;  %v4141_v1 = vld [vmem:[%s4917_s29 + $0x288] sm:$0xff]   ;;  %v4143_v3 = vld [vmem:[%s4917_s29 + $0x2d0] sm:$0xff]  }
  0xe5   : > { %3769 = vmatprep.subr.bf16.mxu1 %v4087_v25  ;;  %v4111_v25 = vld [vmem:[%s4917_s29 + $0xd0] sm:$0xff]   ;;  %v4150_v6 = vld [vmem:[%s4917_s29 + $0x260] sm:$0xff]   ;;  %v4157_v11 = vld [vmem:[%s4917_s29 + $0x2a8] sm:$0xff]  }
  0xe6   : > { %v4145_v4 = vld [vmem:[%s4917_s29 + $0x290] sm:$0xff]   ;;  %v4152_v8 = vld [vmem:[%s4917_s29 + $0x220] sm:$0xff]   ;;  %v4163_v17 = vld [vmem:[%s4917_s29 + $0x2f8] sm:$0xff]  }
  0xe7   : > { %3742 = vmatpush3.bf16.msra.mxu0 %v4088_v26  ;;  %v4112_v26 = vld [vmem:[%s4917_s29 + $0x10] sm:$0xff]  }
  0xe8   : > { %3770 = vmatpush3.bf16.msra.mxu1 %v4089_v27  ;;  %3743 = vmatprep.subr.bf16.mxu0 %v4090_v28  ;;  %v1514_v27 = vor.u32 %v1512_v21, %v1474_v2  ;;  %v4113_v28 = vld [vmem:[%s4917_s29 + $0x90] sm:$0xff]   ;;  %v5082_v21 = vld [vmem:[%s4954_s10 + $0x20] sm:$0xff] }
  0xe9   : > { %3771 = vmatprep.subr.bf16.mxu1 %v4091_v29  ;;  %v4114_v29 = vld [vmem:[%s4917_s29 + $0x58] sm:$0xff]   ;;  %v4142_v2 = vld [vmem:[%s4917_s29 + $0x250] sm:$0xff]  }
  0xea   : > { %v4159_v13 = vld [vmem:[%s4917_s29 + $0x2f0] sm:$0xff]  }
  0xeb   : > { %3744 = vmatpush3.bf16.msra.mxu0 %v4092_v30  ;;  %v1520_v30 = vor.u32 %v1518_v24, %v1498_v9  ;;  %v4154_v9 = vld [vmem:[%s4917_s29 + $0x268] sm:$0xff]   ;;  %v4161_v15 = vld [vmem:[%s4917_s29 + $0x2b0] sm:$0xff]  }
  0xec   : > { %3772 = vmatpush3.bf16.msra.mxu1 %v4093_v31  ;;  %3785 = vmatprep.subr.bf16.mxu0 %v4102_v46  ;;  %v4115_v31 = vld [vmem:[%s4917_s29 + $0xd8] sm:$0xff]   ;;  %v4120_v46 = vld [vmem:[%s4917_s29 + $0x20] sm:$0xff]   ;;  %v2117_v24 = vld [vmem:[%s4954_s10 + $0x8] sm:$0xcc] }
  0xed   : > { %3813 = vmatprep.subr.bf16.mxu1 %v4103_v59  ;;  %v4135_v59 = vld [vmem:[%s4917_s29 + $0x2c0] sm:$0xff]  }
  0xee   : > { %1757 = vmatmul.mubr.bf16.vlgmr.msra.gmra.mrb[0].mxu0 %v1475_v12  ;;  %v4158_v12 = vld [vmem:[%s4917_s29 + $0x270] sm:$0xff]  }
  0xef   : > { %3786 = vmatpush3.bf16.msra.mxu0 %v4104_v0  ;;  %1805 = vmatmul.mubr.bf16.vlgmr.msra.gmra.mrb[0].mxu1 %v1499_v18  ;;  %v4140_v0 = vld [vmem:[%s4917_s29 + $0x208] sm:$0xff]   ;;  %v4164_v18 = vld [vmem:[%s4917_s29 + $0x238] sm:$0xff]  }
  0xf0   : > { %3787 = vmatprep.subr.bf16.mxu0 %v4106_v10  ;;  %3814 = vmatpush3.bf16.msra.mxu1 %v4105_v7  ;;  %v4151_v7 = vld [vmem:[%s4917_s29 + $0x2e0] sm:$0xff]   ;;  %v4155_v10 = vld [vmem:[%s4917_s29 + $0x2e8] sm:$0xff]  }
  0xf1   : > { %1764 = vmatprep.mubr.bf16.mxu0 %v1517_v20  ;;  %3815 = vmatprep.subr.bf16.mxu1 %v4107_v14  ;;  %v4160_v14 = vld [vmem:[%s4917_s29 + $0x230] sm:$0xff]   ;;  %v2116_v20 = vld [vmem:[%s4954_s10] sm:$0xcc] }
  0xf2   : > { %1812 = vmatprep.mubr.bf16.mxu1 %v1523_v23  ;;  %v3566_v23 = vcombine.high %v2116_v20, %v4960_v33 }
  0xf3   : > { %3788 = vmatpush3.bf16.msra.mxu0 %v4108_v16  ;;  %v4162_v16 = vld [vmem:[%s4917_s29 + $0x278] sm:$0xff]  }
  0xf4   : > { %3789 = vmatprep.subr.bf16.mxu0 %v4110_v22  ;;  %3816 = vmatpush3.bf16.msra.mxu1 %v4109_v19  ;;  %v4165_v19 = vld [vmem:[%s4917_s29 + $0x2b8] sm:$0xff]   ;;  %v3565_v22 = vcombine.low %v2116_v20, %v4960_v33  ;;  %v2227_v33 = vshll.u32 %v3566_v23, 16  ;;  %v4181_v20 = vld [vmem:[%s4917_s29 + $0x388] sm:$0xff]  }
  0xf5   : > { %3817 = vmatprep.subr.bf16.mxu1 %v4111_v25  ;;  %v5088_v25 = vld [vmem:[%s4954_s10 + $0x28] sm:$0xff] }
  0xf6   : > { %1765 = vmatmul.mubr.bf16.gmra.mrb[4].mxu0 %v1514_v27  ;;  %v3570_v27 = vcombine.high %v5082_v21, %v5082_v21 }
  0xf7   : > { %3790 = vmatpush3.bf16.msra.mxu0 %v4112_v26  ;;  %2052 = vmatprep.mubr.bf16.mxu0 %v4964_v35  ;;  %v4123_v35 = vld [vmem:[%s4917_s29 + $0xe8] sm:$0xff]   ;;  %v3569_v26 = vcombine.low %v5082_v21, %v5082_v21 }
  0xf8   : > { %3791 = vmatprep.subr.bf16.mxu0 %v4114_v29  ;;  %1813 = vmatmul.mubr.bf16.gmra.mrb[4].mxu1 %v1520_v30  ;;  %v3568_v29 = vcombine.high %v2117_v24, %v4970_v38  ;;  %v4174_v30 = vld [vmem:[%s4917_s29 + $0x340] sm:$0xff]  }
  0xf9   : > { %3818 = vmatpush3.bf16.msra.mxu1 %v4113_v28  ;;  %2100 = vmatprep.mubr.bf16.mxu1 %v4979_v42  ;;  %v4126_v42 = vld [vmem:[%s4917_s29 + $0x70] sm:$0xff]   ;;  %v3567_v28 = vcombine.low %v2117_v24, %v4970_v38  ;;  %v4186_v24 = vld [vmem:[%s4917_s29 + $0x358] sm:$0xff]  }
  0xfa   : > { %3819 = vmatprep.subr.bf16.mxu1 %v4115_v31  ;;  %v2224_v31 = vshrl.u32 %v3566_v23, 16  ;;  %v4184_v23 = vld [vmem:[%s4917_s29 + $0x310] sm:$0xff]  }
  0xfb   : > { %3792 = vmatpush3.bf16.msra.mxu0 %v4116_v32  ;;  %v3571_v32 = vcombine.low %v5088_v25, %v5088_v25 }
  0xfc   : > { %3793 = vmatprep.subr.bf16.mxu0 %v4118_v37  ;;  %v2232_v37 = vshrl.u32 %v3570_v27, 16 }
  0xfd   : > { %3820 = vmatpush3.bf16.msra.mxu1 %v4117_v34  ;;  %v3572_v34 = vcombine.high %v5088_v25, %v5088_v25 }
  0xfe   : > { %3821 = vmatprep.subr.bf16.mxu1 %v4119_v39  ;;  %v2235_v39 = vshll.u32 %v3570_v27, 16  ;;  %v4187_v27 = vld [vmem:[%s4917_s29 + $0x3d8] sm:$0xff]  }
  0xff   : > { %3794 = vmatpush3.bf16.msra.mxu0 %v4120_v46  ;;  %v2258_v46 = vshrl.u32 %v3568_v29, 16  ;;  %v2269_v38 = vshll.u32 %v3572_v34, 16 }
 0x100   : > { %3795 = vmatprep.subr.bf16.mxu0 %v4122_v48  ;;  %v4175_v48 = vld [vmem:[%s4917_s29 + $0x3c0] sm:$0xff]  }
 0x101   : > { %3822 = vmatpush3.bf16.msra.mxu1 %v4121_v47  ;;  %v2261_v47 = vshll.u32 %v3568_v29, 16  ;;  %v4190_v29 = vld [vmem:[%s4917_s29 + $0x360] sm:$0xff]  }
 0x102   : > { %3823 = vmatprep.subr.bf16.mxu1 %v4123_v35  ;;  %v2226_v35 = vrot.slane %v2224_v31, 2  ;;  %v4191_v31 = vld [vmem:[%s4917_s29 + $0x3e0] sm:$0xff]  }
 0x103   : > { %3796 = vmatpush3.bf16.msra.mxu0 %v4124_v49  ;;  %v2229_v49 = vrot.slane %v2227_v33, 3  ;;  %v4192_v33 = vld [vmem:[%s4917_s29 + $0x320] sm:$0xff]  }
 0x104   : > { %3797 = vmatprep.subr.bf16.mxu0 %v4126_v42  ;;  %v2234_v42 = vrot.slane %v2232_v37, 2  ;;  %v4195_v37 = vld [vmem:[%s4917_s29 + $0x3e8] sm:$0xff]  }
 0x105   : > { %3824 = vmatpush3.bf16.msra.mxu1 %v4125_v50  ;;  %v2266_v50 = vshrl.u32 %v3572_v34, 16  ;;  %v4193_v34 = vld [vmem:[%s4917_s29 + $0x3a0] sm:$0xff]  }
 0x106   : > { %3825 = vmatprep.subr.bf16.mxu1 %v4127_v51  ;;  %v2237_v51 = vrot.slane %v2235_v39, 3  ;;  %v4196_v39 = vld [vmem:[%s4917_s29 + $0x328] sm:$0xff]  }
 0x107   : > { %3798 = vmatpush3.bf16.msra.mxu0 %v4128_v52  ;;  %v2260_v52 = vrot.slane %v2258_v46, 2  ;;  %v4197_v46 = vld [vmem:[%s4917_s29 + $0x3a8] sm:$0xff]  }
 0x108   : > { %3799 = vmatprep.subr.bf16.mxu0 %v4130_v54  ;;  %v2230_v54 = vor.u32 %v2229_v49, %v2226_v35  ;;  %v4200_v35 = vld [vmem:[%s4917_s29 + $0x330] sm:$0xff]   ;;  %v4202_v49 = vld [vmem:[%s4917_s29 + $0x378] sm:$0xff]  }
 0x109   : > { %3826 = vmatpush3.bf16.msra.mxu1 %v4129_v53  ;;  %v2263_v53 = vrot.slane %v2261_v47, 3  ;;  %v4198_v47 = vld [vmem:[%s4917_s29 + $0x370] sm:$0xff]  }
 0x10a   : > { %3827 = vmatprep.subr.bf16.mxu1 %v4131_v55  ;;  %v2268_v55 = vrot.slane %v2266_v50, 2  ;;  %v4201_v50 = vld [vmem:[%s4917_s29 + $0x3b0] sm:$0xff]  }
 0x10b   : > { %3800 = vmatpush3.bf16.msra.mxu0 %v4132_v56  ;;  %v2271_v56 = vrot.slane %v2269_v38, 3  ;;  %v2579_v38 = vld [vmem:[%s4954_s10 + $0x30] sm:$0x11] }
 0x10c   : > { %3841 = vmatprep.subr.bf16.mxu0 %v4134_v58  ;;  %v2238_v58 = vor.u32 %v2237_v51, %v2234_v42  ;;  %v4206_v42 = vld [vmem:[%s4954_s10] ss:$16 sps:$4 sm:$0xf8]   ;;  %v4208_v51 = vld [vmem:[%s4954_s10 + $0x4] ss:$16 sps:$4 sm:$0xf8]  }
 0x10d   : > { %3828 = vmatpush3.bf16.msra.mxu1 %v4133_v57  ;;  %v2207_v57 = vshrl.u32 %v3565_v22, 16 }
 0x10e   : > { %2053 = vmatmul.mubr.bf16.vlgmr.msra.gmra.mrb[8].mxu0 %v4974_v40  ;;  %3869 = vmatprep.subr.bf16.mxu1 %v4135_v59  ;;  %v4144_v40 = vld [vmem:[%s4917_s29 + $0x210] sm:$0xff]   ;;  %v2264_v59 = vor.u32 %v2263_v53, %v2260_v52  ;;  %v3673_v52 = vcombine.low %v5082_v21, %v2579_v38  ;;  %v3674_v53 = vcombine.high %v5082_v21, %v2579_v38 }
 0x10f   : > { %3842 = vmatpush3.bf16.msra.mxu0 %v4136_v60  ;;  %2060 = vmatprep.mubr.bf16.mxu0 %v4966_v36  ;;  %v4147_v36 = vld [vmem:[%s4917_s29 + $0x2d8] sm:$0xff]   ;;  %v2210_v60 = vshll.u32 %v3565_v22, 16  ;;  %v4183_v22 = vld [vmem:[%s4917_s29 + $0x3d0] sm:$0xff]  }
 0x110   : > { %2101 = vmatmul.mubr.bf16.vlgmr.msra.gmra.mrb[8].mxu1 %v4984_v44  ;;  %3843 = vmatprep.subr.bf16.mxu0 %v4138_v62  ;;  %v4148_v44 = vld [vmem:[%s4917_s29 + $0x218] sm:$0xff]   ;;  %v2272_v62 = vor.u32 %v2271_v56, %v2268_v55 }
 0x111   : > { %3870 = vmatpush3.bf16.msra.mxu1 %v4137_v61  ;;  %2108 = vmatprep.mubr.bf16.mxu1 %v4981_v43  ;;  %v4149_v43 = vld [vmem:[%s4917_s29 + $0x298] sm:$0xff]   ;;  %v2215_v61 = vshrl.u32 %v3569_v26, 16 }
 0x112   : > { %3871 = vmatprep.subr.bf16.mxu1 %v4139_v63  ;;  %v2209_v63 = vrot.slane %v2207_v57, 2  ;;  %v4203_v55 = vld [vmem:[%s4917_s29 + $0x3f8] sm:$0xff]   ;;  %v2679_v57 = vrot.slane %v4206_v42, 3 }
 0x113   : > { %3844 = vmatpush3.bf16.msra.mxu0 %v4140_v0  ;;  %v2218_v0 = vshll.u32 %v3569_v26, 16  ;;  %v4185_v26 = vld [vmem:[%s4917_s29 + $0x390] sm:$0xff]   ;;  %v4204_v56 = vld [vmem:[%s4917_s29 + $0x338] sm:$0xff]  }
 0x114   : > { %3845 = vmatprep.subr.bf16.mxu0 %v4142_v2  ;;  %v2239_v2 = vsel %vm2205_vm1, %v2230_v54, %v2238_v58  ;;  %v2580_v54 = vld [vmem:[%s4954_s10 + $0x38] sm:$0x11] }
 0x115   : > { %3872 = vmatpush3.bf16.msra.mxu1 %v4141_v1  ;;  %v2241_v1 = vshrl.u32 %v3567_v28, 16 }
 0x116   : > { %2061 = vmatmul.mubr.bf16.gmra.mrb[12].mxu0 %v4976_v41  ;;  %3873 = vmatprep.subr.bf16.mxu1 %v4143_v3  ;;  %v4153_v41 = vld [vmem:[%s4917_s29 + $0x2a0] sm:$0xff]   ;;  %v2212_v3 = vrot.slane %v2210_v60, 3  ;;  %v2683_v60 = vrot.slane %v3674_v53, 3 }
 0x117   : > { %3846 = vmatpush3.bf16.msra.mxu0 %v4144_v40  ;;  %v2217_v40 = vrot.slane %v2215_v61, 2  ;;  %2506 = vmatprep.mubr.bf16.mxu0 %v2239_v2  ;;  %v4211_v61 = vld [vmem:[%s4954_s10 + $0x8] ss:$16 sps:$4 sm:$0xf8]  }
 0x118   : > { %2109 = vmatmul.mubr.bf16.gmra.mrb[12].mxu1 %v4986_v45  ;;  %3847 = vmatprep.subr.bf16.mxu0 %v4146_v5  ;;  %v4156_v45 = vld [vmem:[%s4917_s29 + $0x228] sm:$0xff]   ;;  %v2273_v5 = vsel %vm2205_vm1, %v2264_v59, %v2272_v62  ;;  %v2682_v59 = vrot.slane %v4208_v51, 3  ;;  %v2685_v2 = vrot.slane %v4211_v61, 3 }
 0x119   : > { %3874 = vmatpush3.bf16.msra.mxu1 %v4145_v4  ;;  %v2244_v4 = vshll.u32 %v3567_v28, 16  ;;  %2554 = vmatprep.mubr.bf16.mxu1 %v2273_v5  ;;  %v4188_v28 = vld [vmem:[%s4917_s29 + $0x318] sm:$0xff]  }
 0x11a   : > { %3875 = vmatprep.subr.bf16.mxu1 %v4147_v36  ;;  %v2220_v36 = vrot.slane %v2218_v0, 3  ;;  %v3676_v0 = vcombine.high %v5088_v25, %v2580_v54  ;;  %v2684_v21 = vsel %vm2678_vm2, %v2682_v59, %v2683_v60 }
 0x11b   : > { %3848 = vmatpush3.bf16.msra.mxu0 %v4148_v44  ;;  %v2243_v44 = vrot.slane %v2241_v1, 2  ;;  %v4205_v1 = vld [vmem:[%s4917_s29 + $0x3b8] sm:$0xff]  }
 0x11c   : > { %3849 = vmatprep.subr.bf16.mxu0 %v4150_v6  ;;  %v2213_v6 = vor.u32 %v2212_v3, %v2209_v63  ;;  %v3675_v63 = vcombine.low %v5088_v25, %v2580_v54 }
 0x11d   : > { %3876 = vmatpush3.bf16.msra.mxu1 %v4149_v43  ;;  %v2249_v43 = vshrl.u32 %v3571_v32, 16 }
 0x11e   : > { %3877 = vmatprep.subr.bf16.mxu1 %v4151_v7  ;;  %v2246_v7 = vrot.slane %v2244_v4, 3  ;;  %v2686_v3 = vrot.slane %v3675_v63, 3  ;;  %v2689_v4 = vrot.slane %v3676_v0, 3 }
 0x11f   : > { %3850 = vmatpush3.bf16.msra.mxu0 %v4152_v8  ;;  %v2252_v8 = vshll.u32 %v3571_v32, 16  ;;  %v4194_v32 = vld [vmem:[%s4917_s29 + $0x368] sm:$0xff]  }
 0x120   : > { %3851 = vmatprep.subr.bf16.mxu0 %v4154_v9  ;;  %v2251_v9 = vrot.slane %v2249_v43, 2  ;;  %v2687_v25 = vsel %vm2678_vm2, %v2685_v2, %v2686_v3  ;;  %v4292_v43 = vmov 0.0  }
 0x121   : > { %3878 = vmatpush3.bf16.msra.mxu1 %v4153_v41  ;;  %v2221_v41 = vor.u32 %v2220_v36, %v2217_v40 }
 0x122   : > { %3879 = vmatprep.subr.bf16.mxu1 %v4155_v10  ;;  %v4176_v10 = vld [vmem:[%s4917_s29 + $0x300] sm:$0xff]  }
 0x123   : > { %3852 = vmatpush3.bf16.msra.mxu0 %v4156_v45  ;;  %v2247_v45 = vor.u32 %v2246_v7, %v2243_v44  ;;  %v4290_v44 = vmov 0.0|0.0  }
 0x124   : > { %3853 = vmatprep.subr.bf16.mxu0 %v4158_v12  ;;  %v4178_v12 = vld [vmem:[%s4917_s29 + $0x348] sm:$0xff]  }
 0x125   : > { %3880 = vmatpush3.bf16.msra.mxu1 %v4157_v11  ;;  %v2254_v11 = vrot.slane %v2252_v8, 3 }
 0x126   : > { %3881 = vmatprep.subr.bf16.mxu1 %v4159_v13  ;;  %v2222_v13 = vsel %vm2205_vm1, %v2213_v6, %v2221_v41 }
 0x127   : > { %3854 = vmatpush3.bf16.msra.mxu0 %v4160_v14  ;;  %v4177_v14 = vld [vmem:[%s4917_s29 + $0x380] sm:$0xff]  }
 0x128   : > { %3855 = vmatprep.subr.bf16.mxu0 %v4162_v16  ;;  %v4179_v16 = vld [vmem:[%s4917_s29 + $0x3c8] sm:$0xff]  }
 0x129   : > { %3882 = vmatpush3.bf16.msra.mxu1 %v4161_v15  ;;  %v2255_v15 = vor.u32 %v2254_v11, %v2251_v9 }
 0x12a   : > { %3883 = vmatprep.subr.bf16.mxu1 %v4163_v17  ;;  %v4180_v17 = vld [vmem:[%s4917_s29 + $0x308] sm:$0xff]  }
 0x12b   : > { %3856 = vmatpush3.bf16.msra.mxu0 %v4164_v18  ;;  %v2256_v18 = vsel %vm2205_vm1, %v2247_v45, %v2255_v15 }
 0x12c   : > { %3897 = vmatprep.subr.bf16.mxu0 %v4174_v30  ;;  %v4189_v30 = vld [vmem:[%s4917_s29 + $0x398] sm:$0xff]  }
 0x12d   : > { %3884 = vmatpush3.bf16.msra.mxu1 %v4165_v19  ;;  %v4182_v19 = vld [vmem:[%s4917_s29 + $0x350] sm:$0xff]  }
 0x12e   : > { %3925 = vmatprep.subr.bf16.mxu1 %v4175_v48  ;;  %2507 = vmatmul.mubr.bf16.vlgmr.msra.gmra.mrb[16].mxu0 %v2222_v13  ;;  %v4199_v48 = vld [vmem:[%s4917_s29 + $0x3f0] sm:$0xff]   ;;  %s3985_s29 = smul.u32 12, %s1290_s28 }
 0x12f   : > { %3898 = vmatpush3.bf16.msra.mxu0 %v4176_v10  ;;  %2514 = vmatprep.mubr.bf16.mxu0 %v2238_v58  ;;  %v2680_v58 = vrot.slane %v3673_v52, 3 }
 0x130   : > { %3899 = vmatprep.subr.bf16.mxu0 %v4178_v12  ;;  %2555 = vmatmul.mubr.bf16.vlgmr.msra.gmra.mrb[16].mxu1 %v2256_v18  ;;  %s1292_s15 = scalar_lea.vmem [#allocation3], %s3985_s29 }
 0x131   : > { %3926 = vmatpush3.bf16.msra.mxu1 %v4177_v14  ;;  %2562 = vmatprep.mubr.bf16.mxu1 %v2272_v62  ;;  %v4213_v62 = vld [vmem:[%s4954_s10 + $0xc] ss:$16 sps:$4 sm:$0xf8]   ;;  %v2681_v5 = vsel %vm2678_vm2, %v2679_v57, %v2680_v58 }
 0x132   : > { %3927 = vmatprep.subr.bf16.mxu1 %v4179_v16  ;;  %v2688_v40 = vrot.slane %v4213_v62, 3 }
 0x133   : > { %3900 = vmatpush3.bf16.msra.mxu0 %v4180_v17 }
 0x134   : > { %3901 = vmatprep.subr.bf16.mxu0 %v4182_v19  ;;  %v2690_v36 = vsel %vm2678_vm2, %v2688_v40, %v2689_v4 }
 0x135   : > { %3928 = vmatpush3.bf16.msra.mxu1 %v4181_v20 }
 0x136   : > { %2515 = vmatmul.mubr.bf16.gmra.mrb[20].mxu0 %v2221_v41  ;;  %3929 = vmatprep.subr.bf16.mxu1 %v4183_v22 }
 0x137   : > { %3902 = vmatpush3.bf16.msra.mxu0 %v4184_v23  ;;  %2923 = vmatprep.mubr.bf16.mxu0 %v2684_v21 }
 0x138   : > { %3903 = vmatprep.subr.bf16.mxu0 %v4186_v24  ;;  %2563 = vmatmul.mubr.bf16.gmra.mrb[20].mxu1 %v2255_v15 }
 0x139   : > { %3930 = vmatpush3.bf16.msra.mxu1 %v4185_v26  ;;  %2971 = vmatprep.mubr.bf16.mxu1 %v2690_v36 }
 0x13a   : > { %3931 = vmatprep.subr.bf16.mxu1 %v4187_v27 }
 0x13b   : > { %3904 = vmatpush3.bf16.msra.mxu0 %v4188_v28 }
 0x13c   : > { %3905 = vmatprep.subr.bf16.mxu0 %v4190_v29 }
 0x13d   : > { %3932 = vmatpush3.bf16.msra.mxu1 %v4189_v30 }
 0x13e   : > { %3933 = vmatprep.subr.bf16.mxu1 %v4191_v31 }
 0x13f   : > { %3906 = vmatpush3.bf16.msra.mxu0 %v4192_v33 }
 0x140   : > { %3907 = vmatprep.subr.bf16.mxu0 %v4194_v32 }
 0x141   : > { %3934 = vmatpush3.bf16.msra.mxu1 %v4193_v34 }
 0x142   : > { %3935 = vmatprep.subr.bf16.mxu1 %v4195_v37 }
 0x143   : > { %3908 = vmatpush3.bf16.msra.mxu0 %v4196_v39 }
 0x144   : > { %3909 = vmatprep.subr.bf16.mxu0 %v4198_v47 }
 0x145   : > { %3936 = vmatpush3.bf16.msra.mxu1 %v4197_v46 }
 0x146   : > { %3937 = vmatprep.subr.bf16.mxu1 %v4199_v48 }
 0x147   : > { %3910 = vmatpush3.bf16.msra.mxu0 %v4200_v35 }
 0x148   : > { %3911 = vmatprep.subr.bf16.mxu0 %v4202_v49 }
 0x149   : > { %3938 = vmatpush3.bf16.msra.mxu1 %v4201_v50 }
 0x14a   : > { %3939 = vmatprep.subr.bf16.mxu1 %v4203_v55 }
 0x14b   : > { %3912 = vmatpush3.bf16.msra.mxu0 %v4204_v56 }
 0x14c   : > { %3979 = vmatprep.subr.bf16.mxu0 %v4290_v44 }
 0x14d   : > { %3940 = vmatpush3.bf16.msra.mxu1 %v4205_v1 }
 0x14e   : > { %2924 = vmatmul.mubr.bf16.vlgmr.msra.gmra.mrb[24].mxu0 %v2681_v5  ;;  %3982 = vmatprep.subr.bf16.mxu1 %v4290_v44 }
 0x14f   : > { %2931 = vmatprep.mubr.bf16.mxu0 %v2683_v60 }
 0x150   : > { %2972 = vmatmul.mubr.bf16.vlgmr.msra.gmra.mrb[24].mxu1 %v2687_v25 }
 0x151   : > { %2979 = vmatprep.mubr.bf16.mxu1 %v2689_v4 }
 0x156   : > { %2932 = vmatmul.mubr.bf16.gmra.mrb[28].mxu0 %v2680_v58 }
 0x157   : > { %3967 = vmatprep.mubr.msk.f32.mxu0 %vm4291_vm3, %v4292_v43 }
 0x158   : > { %2980 = vmatmul.mubr.bf16.gmra.mrb[28].mxu1 %v2686_v3 }
 0x159   : > { %3976 = vmatprep.mubr.msk.f32.mxu1 %vm4291_vm3, %v4292_v43 }
 0x1c1   : > { %v3745_v6 = vpop.f32.mrb[0].mxu0 }
 0x1c2   : > { %v3746_v7 = vpop.f32.mrb[1].mxu0  ;;  %v3773_v8 = vpop.f32.mrb[0].mxu1 }
 0x1c3   : > { %v3747_v41 = vadd.f32 %v3746_v7, %v3745_v6  ;;  %v3748_v9 = vpop.f32.mrb[2].mxu0  ;;  %v3774_v10 = vpop.f32.mrb[1].mxu1 }
 0x1c4   : > { %v3749_v45 = vpop.f32.mrb[3].mxu0  ;;  %v3775_v11 = vadd.f32 %v3774_v10, %v3773_v8  ;;  %v3776_v12 = vpop.f32.mrb[2].mxu1 }
 0x1c5   : > { %v3750_v13 = vadd.f32 %v3749_v45, %v3748_v9  ;;  %v3777_v14 = vpop.f32.mrb[3].mxu1 }
 0x1c6   : > { %v1807_v15 = vadd.f32 %v3775_v11, %v3747_v41  ;;  %v3778_v16 = vadd.f32 %v3777_v14, %v3776_v12 }
 0x1c8   : > { %v1810_v17 = vadd.f32 %v3778_v16, %v3750_v13 }
 0x1c9   : > { %v3751_v18 = vpop.f32.mrb[4].mxu0 }
 0x1ca   : > { %v3752_v19 = vpop.f32.mrb[5].mxu0 }
 0x1cb   : > { %v3779_v20 = vpop.f32.mrb[4].mxu1  ;;  %v3753_v22 = vadd.f32 %v3752_v19, %v3751_v18  ;;  %v3754_v23 = vpop.f32.mrb[6].mxu0 }
 0x1cc   : > { %v3780_v24 = vpop.f32.mrb[5].mxu1  ;;  %v3755_v26 = vpop.f32.mrb[7].mxu0 }
 0x1cd   : > { %v3781_v27 = vadd.f32 %v3780_v24, %v3779_v20  ;;  %v3782_v28 = vpop.f32.mrb[6].mxu1 }
 0x1ce   : > { %v3783_v29 = vpop.f32.mrb[7].mxu1 }
 0x1cf   : > { %v1815_v30 = vadd.f32 %v3781_v27, %v3753_v22 }
 0x1e1   : > { %v3801_v31 = vpop.f32.mrb[8].mxu0 }
 0x1e2   : > { %v3802_v33 = vpop.f32.mrb[9].mxu0 }
 0x1e3   : > { %v3829_v32 = vpop.f32.mrb[8].mxu1  ;;  %v3803_v34 = vadd.f32 %v3802_v33, %v3801_v31  ;;  %v3804_v37 = vpop.f32.mrb[10].mxu0 }
 0x1e4   : > { %v3830_v39 = vpop.f32.mrb[9].mxu1  ;;  %v3805_v46 = vpop.f32.mrb[11].mxu0 }
 0x1e5   : > { %v2055_v47 = vadd.f32 %v3803_v34, %v1807_v15  ;;  %v3831_v48 = vadd.f32 %v3830_v39, %v3829_v32  ;;  %v3832_v35 = vpop.f32.mrb[10].mxu1  ;;  %v3806_v49 = vadd.f32 %v3805_v46, %v3804_v37  ;;  %v3709_v46 = vld [vmem:[%s1300_s14] ss:$0 sm:$0xff] }
 0x1e6   : > { %v3833_v50 = vpop.f32.mrb[11].mxu1 }
 0x1e7   : > { %v2103_v38 = vadd.f32 %v3831_v48, %v2055_v47  ;;  %v2058_v42 = vadd.f32 %v3806_v49, %v1810_v17  ;;  %v3834_v51 = vadd.f32 %v3833_v50, %v3832_v35 }
 0x1e9   : > { %v2106_v52 = vadd.f32 %v3834_v51, %v2058_v42  ;;  %v3807_v53 = vpop.f32.mrb[12].mxu0 }
 0x1ea   : > { %v3808_v54 = vpop.f32.mrb[13].mxu0 }
 0x1eb   : > { %v3809_v55 = vadd.f32 %v3808_v54, %v3807_v53  ;;  %v3835_v56 = vpop.f32.mrb[12].mxu1  ;;  %v3810_v57 = vpop.f32.mrb[14].mxu0 }
 0x1ec   : > { %v3836_v58 = vpop.f32.mrb[13].mxu1  ;;  %v3811_v59 = vpop.f32.mrb[15].mxu0 }
 0x1ed   : > { %v2063_v60 = vadd.f32 %v3809_v55, %v1815_v30  ;;  %v3837_v61 = vadd.f32 %v3836_v58, %v3835_v56  ;;  %v3838_v62 = vpop.f32.mrb[14].mxu1 }
 0x1ee   : > { %v3839_v63 = vpop.f32.mrb[15].mxu1 }
 0x1ef   : > { %v2111_v0 = vadd.f32 %v3837_v61, %v2063_v60 }
 0x201   : > { %v3857_v21 = vpop.f32.mrb[16].mxu0 }
 0x202   : > { %v3858_v1 = vpop.f32.mrb[17].mxu0 }
 0x203   : > { %v3859_v2 = vadd.f32 %v3858_v1, %v3857_v21  ;;  %v3860_v3 = vpop.f32.mrb[18].mxu0  ;;  %v3885_v40 = vpop.f32.mrb[16].mxu1  ;;  %v3000_v1 = vld [vmem:[%s5200_s3] sm:$0x1] }
 0x204   : > { %v3861_v4 = vpop.f32.mrb[19].mxu0  ;;  %v3886_v5 = vpop.f32.mrb[17].mxu1 }
 0x205   : > { %v3862_v36 = vadd.f32 %v3861_v4, %v3860_v3  ;;  %v3887_v25 = vadd.f32 %v3886_v5, %v3885_v40  ;;  %v3888_v44 = vpop.f32.mrb[18].mxu1 }
 0x206   : > { %v3889_v6 = vpop.f32.mrb[19].mxu1 }
 0x207   : > { %v2557_v7 = vadd.f32 %v3887_v25, %v3859_v2  ;;  %v3890_v8 = vadd.f32 %v3889_v6, %v3888_v44 }
 0x209   : > { %v3863_v41 = vpop.f32.mrb[20].mxu0  ;;  %v2570_v9 = vadd.f32 %v2557_v7, %v2103_v38  ;;  %v2560_v10 = vadd.f32 %v3890_v8, %v3862_v36  ;;  %v3160_v7 = vlaneseq }
 0x20a   : > { %v3864_v45 = vpop.f32.mrb[21].mxu0 }
 0x20b   : > { %v3865_v11 = vadd.f32 %v3864_v45, %v3863_v41  ;;  %v3866_v12 = vpop.f32.mrb[22].mxu0  ;;  %v2571_v13 = vadd.f32 %v2560_v10, %v2106_v52  ;;  %v3891_v14 = vpop.f32.mrb[20].mxu1 }
 0x20c   : > { %v3867_v15 = vpop.f32.mrb[23].mxu0  ;;  %v3892_v16 = vpop.f32.mrb[21].mxu1 }
 0x20d   : > { %v3893_v17 = vadd.f32 %v3892_v16, %v3891_v14  ;;  %v3894_v18 = vpop.f32.mrb[22].mxu1 }
 0x20e   : > { %v3895_v19 = vpop.f32.mrb[23].mxu1 }
 0x20f   : > { %v2565_v20 = vadd.f32 %v3893_v17, %v3865_v11 }
 0x211   : > { %v2572_v22 = vadd.f32 %v2565_v20, %v2111_v0 }
 0x221   : > { %v3913_v23 = vpop.f32.mrb[24].mxu0 }
 0x222   : > { %v3914_v24 = vpop.f32.mrb[25].mxu0 }
 0x223   : > { %v3915_v26 = vadd.f32 %v3914_v24, %v3913_v23  ;;  %v3916_v27 = vpop.f32.mrb[26].mxu0  ;;  %v3941_v28 = vpop.f32.mrb[24].mxu1 }
 0x224   : > { %v3917_v29 = vpop.f32.mrb[27].mxu0  ;;  %v3942_v30 = vpop.f32.mrb[25].mxu1 }
 0x225   : > { %v3918_v31 = vadd.f32 %v3917_v29, %v3916_v27  ;;  %v3943_v33 = vadd.f32 %v3942_v30, %v3941_v28  ;;  %v3944_v32 = vpop.f32.mrb[26].mxu1 }
 0x226   : > { %v3945_v34 = vpop.f32.mrb[27].mxu1 }
 0x227   : > { %v2974_v37 = vadd.f32 %v3943_v33, %v3915_v26  ;;  %v3946_v39 = vadd.f32 %v3945_v34, %v3944_v32  ;;  %v3203_v26 = vld [vmem:[%s1292_s15 + $0x8] sm:$0x3] }
 0x229   : > { %v3919_v47 = vpop.f32.mrb[28].mxu0  ;;  %v2987_v48 = vadd.f32 %v2974_v37, %v2570_v9  ;;  %v2977_v35 = vadd.f32 %v3946_v39, %v3918_v31  ;;  %v3161_v9 = vshrl.u32 %v3160_v7, 7 }
 0x22a   : > { %v3920_v49 = vpop.f32.mrb[29].mxu0 }
 0x22b   : > { %v3921_v50 = vadd.f32 %v3920_v49, %v3919_v47  ;;  %v3922_v38 = vpop.f32.mrb[30].mxu0  ;;  %v2997_v42 = vadd.f32 %v3709_v46, %v2987_v48  ;;  %v2988_v51 = vadd.f32 %v2977_v35, %v2571_v13  ;;  %v3947_v52 = vpop.f32.mrb[28].mxu1 }
 0x22c   : > { %v3923_v53 = vpop.f32.mrb[31].mxu0  ;;  %v3948_v54 = vpop.f32.mrb[29].mxu1 }
 0x22d   : > { %v2998_v55 = vadd.f32 %v3709_v46, %v2988_v51  ;;  %v3949_v56 = vadd.f32 %v3948_v54, %v3947_v52  ;;  %v3950_v57 = vpop.f32.mrb[30].mxu1  ;;  %v3080_v61 = vmul.f32 %v2997_v42, %v2997_v42 }
 0x22e   : > { %v3951_v58 = vpop.f32.mrb[31].mxu1 }
 0x22f   : > { %v2982_v59 = vadd.f32 %v3949_v56, %v3921_v50  ;;  %v3980_v60 = vpack.c.bf16 %v2998_v55, %v2997_v42  ;;  %v3081_v62 = vmul.f32 %v2998_v55, %v2998_v55 }
 0x231   : > { %v2989_v63 = vadd.f32 %v2982_v59, %v2572_v22  ;;  %3981 = vmatpush3.bf16.msra.mxu0 %v3980_v60  ;;  %v3983_v0 = vpack.c.bf16 %v3081_v62, %v3080_v61 }
 0x232   : > { %3965 = vmatprep.subr.mxu0 %v4292_v43 }
 0x233   : > { %v2999_v21 = vadd.f32 %v3709_v46, %v2989_v63  ;;  %3984 = vmatpush3.bf16.msra.mxu1 %v3983_v0 }
 0x234   : > { %3974 = vmatprep.subr.mxu1 %v4292_v43  ;;  %v3162_v43 = vsub.s32 0, %v3161_v9 }
 0x235   : > { %v3082_v2 = vmul.f32 %v2999_v21, %v2999_v21  ;;  %3966 = vmatpush3.msk.msra.mxu0 %vm3005_vm4, %v2999_v21 }
 0x236   : > { %3968 = vmatmul.mubr.msk.f32.vlgmr.msra.gmra.mrb[32].mxu0 %vm3001_vm5, %v3000_v1 }
 0x237   : > { %3975 = vmatpush3.msk.msra.mxu1 %vm3005_vm4, %v3082_v2 }
 0x238   : > { %3977 = vmatmul.mubr.msk.f32.vlgmr.msra.gmra.mrb[32].mxu1 %vm3001_vm5, %v3000_v1 }
 0x309   : > { %v3075_v3 = vpop.f32.mrb[32].mxu0 }
 0x30a   : > { %v3079_v40 = vmul.f32 0.0625, %v3075_v3  ;;  %v3969_v4 = vpop.f32.mrb[33].mxu0 }
 0x30b   : > { %v3152_v5 = vpop.f32.mrb[32].mxu1 }
 0x30c   : > { %v3157_v36 = vmul.f32 %v3079_v40, %v3079_v40  ;;  %v3156_v25 = vmul.f32 0.0625, %v3152_v5  ;;  %v3978_v44 = vpop.f32.mrb[33].mxu1  ;;  %v3163_v10 = vrot.slane %v3079_v40, %v3162_v43 }
 0x30e   : > { %v3158_v6 = vsub.f32 %v3156_v25, %v3157_v36  ;;  %v3164_v11 = vsub.f32 %v2997_v42, %v3163_v10  ;;  %v3165_v12 = vsub.f32 %v2998_v55, %v3163_v10  ;;  %v3166_v13 = vsub.f32 %v2999_v21, %v3163_v10 }
 0x310   : > { %v3159_v8 = vmax.f32 %v3158_v6, 0.0 }
 0x312   : > { %v3167_v41 = vadd.f32 1e-05, %v3159_v8 }
 0x314   : > { %4216 = vrsqrt.f32 %v3167_v41 }
 0x31e   : > { %v4217_v45 = vpop.eup %4216 }
 0x31f   : > { %v3172_v14 = vrot.slane %v4217_v45, %v3162_v43 }
 0x321   : > { %v3173_v15 = vmul.f32 %v3172_v14, %v3164_v11  ;;  %v3174_v16 = vmul.f32 %v3172_v14, %v3165_v12  ;;  %v3175_v17 = vmul.f32 %v3172_v14, %v3166_v13 }
 0x323   : > { %vm3176_vm8 = vcmp.ge.f32.partialorder %v3173_v15, 0.0  ;;  %vm3177_vm9 = vcmp.ge.f32.partialorder %v3174_v16, 0.0  ;;  %vm3178_vm10 = vcmp.ge.f32.partialorder %v3175_v17, 0.0  ;;  %v3179_v18 = vmul.f32 0.2, %v3173_v15 }
 0x324   : > { %v3180_v19 = vmul.f32 0.2, %v3174_v16  ;;  %v3181_v20 = vmul.f32 0.2, %v3175_v17  ;;  %3212 = sbr.rel (!%p4385_p9) target bundleno = 819 (0x333), region = 81 }
 0x325   : > { %v3182_v22 = vsel %vm3176_vm8, %v3173_v15, %v3179_v18 }
 0x326   : > { %v3183_v23 = vsel %vm3177_vm9, %v3174_v16, %v3180_v19  ;;  %v3184_v24 = vsel %vm3178_vm10, %v3175_v17, %v3181_v20 }
 0x327   : > { %v3723_v27 = vpack.c.bf16 %v3184_v24, %v3184_v24  ;;  %v3727_v28 = vpack.c.bf16 %v3183_v23, %v3182_v22 }
 0x329   : > { %3728 = vst [vmem:[%s1292_s15] sm:$0xff] %v3727_v28   ;;  %v3204_v29 = vsel %vm3202_vm11, %v3723_v27, %v3203_v26 }
 0x32a   : > { %3205 = vst [vmem:[%s1292_s15 + $0x8] sm:$0x3] %v3204_v29 }
 0x330   : > { %v3232_v30 = vld [vmem:[%s1292_s15] sm:$0xf]  ;;  %v3234_v31 = vld [vmem:[%s1292_s15 + $0x4] sm:$0xf] }
 0x331   : > { %v3236_v33 = vld [vmem:[%s1292_s15 + $0x8] sm:$0xf]  ;;  %3233 = vst [vmem:[%s3216_s11] sm:$0xf] %v3232_v30  ;;  %3235 = vst [vmem:[%s3216_s11 + $0x8] sm:$0xf] %v3234_v31 }
 0x332   : > { %3237 = vst [vmem:[%s3216_s11 + $0x10] sm:$0xf] %v3236_v33 }
 0x333 PF: > { %s14_s23 = sadd.s32 1, %s4288_s23   ;;  %s5203_s15 = smov %s4260_s16 }
 0x334   : > { %p11_p2 = scmp.ge.s32.totalorder %s14_s23, 6   ;;  %s5204_s16 = smov %s4390_s8 }
 0x335   : > { %s5205_s17 = smov %s4268_s18  ;;  %s5206_s18 = smov %s4379_s30 }
 0x336   : > { %s5207_s19 = smov %s4280_s21  ;;  %s5208_s20 = smov %s4284_s22 }
 0x337   : > { %s5209_s21 = smov %s5212_s25  ;;  %s5210_s22 = smov %s5216_s26 }
 0x338   :  { %13 = sbr.rel (!%p11_p2) target bundleno = 5 (0x5), region = 162 }

// kernel: discriminator_forward.7
= control target key start
LH: loop header
LB: loop body
LE: loop exit
PB: predicated region body
PF: predicated region fallthrough
CT: control target
= control target key end

     0   :  { %s9521_s15 = smov 0   ;;  %s9523_s16 = smov 0   ;;  %s11011_s0 = inlined_call_operand.vmem [shape: bf16[2,36,256], index: 0, kind: input, shape index: {}]   ;;  %s11012_s1 = inlined_call_operand.vmem [shape: bf16[16,256,512], index: 1, kind: input, shape index: {}]   ;;  %s11013_s2 = inlined_call_operand.vmem [shape: f32[1,512], index: 2, kind: input, shape index: {}]   ;;  %s11014_s3 = inlined_call_operand.vmem [shape: f32[1,15], index: 3, kind: input, shape index: {}]   ;;  %s11015_s4 = inlined_call_operand.vmem [shape: f32[2,15,512], index: 4, kind: output, shape index: {}]  }
   0x1   :  { %s9525_s17 = smov 0   ;;  %s9527_s18 = smov 0  }
   0x2   :  { %s9529_s19 = smov 0   ;;  %s9531_s20 = smov 0  }
   0x3   :  { %s9533_s21 = smov 0   ;;  %s9535_s22 = smov 0  }
   0x4   :  { %s9537_s23 = smov 0  }
   0x5 LB: > { %s7893_s24 = sadd.s32 4294967295, %s9490_s23   ;;  %s23_s25 = sadd.s32 1, %s9482_s21  ;;  %s9490_s23 = sphi %s9537_s23, %s14_s23   ;;  %s9486_s22 = sphi %s9535_s22, %s11024_s22   ;;  %s9482_s21 = sphi %s9533_s21, %s11023_s21   ;;  %s9478_s20 = sphi %s9531_s20, %s11022_s20   ;;  %s9474_s19 = sphi %s9529_s19, %s11021_s19   ;;  %s9470_s18 = sphi %s9527_s18, %s11020_s18   ;;  %s9466_s17 = sphi %s9525_s17, %s11019_s17   ;;  %s9462_s16 = sphi %s9523_s16, %s11018_s16   ;;  %s9458_s15 = sphi %s9521_s15, %s11017_s15  }
   0x6   : > { %p24_p0 = scmp.ge.s32.totalorder %s23_s25, 4  ;;  %s26_s26 = sadd.s32 1, %s9486_s22 }
   0x7   : > { %s59_s27 = sadd.s32 1, %s9470_s18  ;;  %p66_p1 = scmp.ne.s32.totalorder %s9470_s18, %s9466_s17 }
   0x8   : > { %s11026_s25 = smov (%p24_p0, %s23_s25), 0  ;;  %s11028_s26 = smov (!%p24_p0, %s26_s26), %s9486_s22 }
   0x9   : > { %s56_s28 = ssub.s32 %s9482_s21, %s11026_s25  ;;  %p67_p2 = scmp.eq.s32.totalorder %s9490_s23, 0 }
   0xa   : > { %p28_p3 = scmp.ge.s32.totalorder %s11028_s26, 2  ;;  %p57_p4 = scmp.eq.s32.totalorder %s56_s28, 0 }
   0xb   : > { %p68_p5 = por %p67_p2, %p66_p1  ;;  %s134_s29 = sadd.s32 1, %s9462_s16 }
   0xc   : > { %s11030_s26 = smov (%p28_p3, %s11028_s26), 0  ;;  %p144_p6 = scmp.ne.s32.totalorder %s9462_s16, %s9458_s15 }
   0xd   : > { %s9582_s30 = scalar_select %p57_p4, %s9470_s18, %s59_s27  }
   0xe   : > { %s129_s5 = ssub.s32 %s9486_s22, %s11030_s26  ;;  %p145_p7 = scmp.eq.s32.totalorder %s7893_s24, 7 }
   0xf   : > { %s131_s6 = sor.u32 %s129_s5, %s56_s28  ;;  %p7896_p10 = scmp.ge.s32.totalorder %s9490_s23, 8 }
  0x10   : > { %p132_p8 = scmp.eq.s32.totalorder %s131_s6, 0  ;;  %p9588_p9 = por %p145_p7, %p144_p6 }
  0x11   : > { %170 = sbr.rel (%p7896_p10) target bundleno = 369 (0x171), region = 20 }
  0x12   : > { %s9593_s8 = scalar_select %p132_p8, %s9462_s16, %s134_s29  }
  0x18   : > { %181 = sbr.rel (!%p68_p5) target bundleno = 369 (0x171), region = 28  ;;  %s183_s9 = sand.u32 (%p68_p5), 1, %s9470_s18  }
  0x19   : > { %s7898_s10 = sshll.u32 (%p68_p5), %s9482_s21, 2  ;;  %s7897_s11 = sshll.u32 (%p68_p5), %s183_s9, 11 }
  0x1a   : > { %s9601_s14 = scalar_lea.vmem (%p68_p5), %s11012_s1, %s7898_s10  ;;  %s9605_s24 = scalar_lea.vmem (%p68_p5), [#allocation2], %s7897_s11 }
  0x1b   : > { %v203_v0 = vld [vmem:[%s9601_s14] sm:$0xf] (%p68_p5)  ;;  %v205_v1 = vld [vmem:[%s9601_s14 + $0x10] sm:$0xf] (%p68_p5) }
  0x1c   : > { %204 = vst [vmem:[%s9605_s24] sm:$0xf] (%p68_p5), %v203_v0  ;;  %206 = vst [vmem:[%s9605_s24 + $0x4] sm:$0xf] (%p68_p5), %v205_v1  ;;  %v207_v2 = vld [vmem:[%s9601_s14 + $0x20] sm:$0xf] (%p68_p5) }
  0x1d   : > { %v209_v3 = vld [vmem:[%s9601_s14 + $0x30] sm:$0xf] (%p68_p5)  ;;  %v211_v4 = vld [vmem:[%s9601_s14 + $0x40] sm:$0xf] (%p68_p5)  ;;  %208 = vst [vmem:[%s9605_s24 + $0x8] sm:$0xf] (%p68_p5), %v207_v2 }
  0x1e   : > { %210 = vst [vmem:[%s9605_s24 + $0xc] sm:$0xf] (%p68_p5), %v209_v3  ;;  %212 = vst [vmem:[%s9605_s24 + $0x10] sm:$0xf] (%p68_p5), %v211_v4  ;;  %v213_v5 = vld [vmem:[%s9601_s14 + $0x50] sm:$0xf] (%p68_p5) }
  0x1f   : > { %v215_v6 = vld [vmem:[%s9601_s14 + $0x60] sm:$0xf]  ;;  %v217_v7 = vld [vmem:[%s9601_s14 + $0x70] sm:$0xf]  ;;  %214 = vst [vmem:[%s9605_s24 + $0x14] sm:$0xf] %v213_v5 }
  0x20   : > { %216 = vst [vmem:[%s9605_s24 + $0x18] sm:$0xf] %v215_v6  ;;  %218 = vst [vmem:[%s9605_s24 + $0x1c] sm:$0xf] %v217_v7  ;;  %v219_v8 = vld [vmem:[%s9601_s14 + $0x80] sm:$0xf] }
  0x21   : > { %v221_v9 = vld [vmem:[%s9601_s14 + $0x90] sm:$0xf]  ;;  %v223_v10 = vld [vmem:[%s9601_s14 + $0xa0] sm:$0xf]  ;;  %220 = vst [vmem:[%s9605_s24 + $0x20] sm:$0xf] %v219_v8 }
  0x22   : > { %222 = vst [vmem:[%s9605_s24 + $0x24] sm:$0xf] %v221_v9  ;;  %224 = vst [vmem:[%s9605_s24 + $0x28] sm:$0xf] %v223_v10  ;;  %v225_v11 = vld [vmem:[%s9601_s14 + $0xb0] sm:$0xf] }
  0x23   : > { %v227_v12 = vld [vmem:[%s9601_s14 + $0xc0] sm:$0xf]  ;;  %v229_v13 = vld [vmem:[%s9601_s14 + $0xd0] sm:$0xf]  ;;  %226 = vst [vmem:[%s9605_s24 + $0x2c] sm:$0xf] %v225_v11 }
  0x24   : > { %228 = vst [vmem:[%s9605_s24 + $0x30] sm:$0xf] %v227_v12  ;;  %230 = vst [vmem:[%s9605_s24 + $0x34] sm:$0xf] %v229_v13  ;;  %v231_v14 = vld [vmem:[%s9601_s14 + $0xe0] sm:$0xf] }
  0x25   : > { %v233_v15 = vld [vmem:[%s9601_s14 + $0xf0] sm:$0xf]  ;;  %v235_v16 = vld [vmem:[%s9601_s14 + $0x100] sm:$0xf]  ;;  %232 = vst [vmem:[%s9605_s24 + $0x38] sm:$0xf] %v231_v14 }
  0x26   : > { %234 = vst [vmem:[%s9605_s24 + $0x3c] sm:$0xf] %v233_v15  ;;  %236 = vst [vmem:[%s9605_s24 + $0x40] sm:$0xf] %v235_v16  ;;  %v237_v17 = vld [vmem:[%s9601_s14 + $0x110] sm:$0xf] }
  0x27   : > { %v239_v18 = vld [vmem:[%s9601_s14 + $0x120] sm:$0xf]  ;;  %v241_v19 = vld [vmem:[%s9601_s14 + $0x130] sm:$0xf]  ;;  %238 = vst [vmem:[%s9605_s24 + $0x44] sm:$0xf] %v237_v17 }
  0x28   : > { %240 = vst [vmem:[%s9605_s24 + $0x48] sm:$0xf] %v239_v18  ;;  %242 = vst [vmem:[%s9605_s24 + $0x4c] sm:$0xf] %v241_v19  ;;  %v243_v20 = vld [vmem:[%s9601_s14 + $0x140] sm:$0xf] }
  0x29   : > { %v245_v21 = vld [vmem:[%s9601_s14 + $0x150] sm:$0xf]  ;;  %v247_v22 = vld [vmem:[%s9601_s14 + $0x160] sm:$0xf]  ;;  %244 = vst [vmem:[%s9605_s24 + $0x50] sm:$0xf] %v243_v20 }
  0x2a   : > { %246 = vst [vmem:[%s9605_s24 + $0x54] sm:$0xf] %v245_v21  ;;  %248 = vst [vmem:[%s9605_s24 + $0x58] sm:$0xf] %v247_v22  ;;  %v249_v23 = vld [vmem:[%s9601_s14 + $0x170] sm:$0xf] }
  0x2b   : > { %v251_v24 = vld [vmem:[%s9601_s14 + $0x180] sm:$0xf]  ;;  %v253_v25 = vld [vmem:[%s9601_s14 + $0x190] sm:$0xf]  ;;  %250 = vst [vmem:[%s9605_s24 + $0x5c] sm:$0xf] %v249_v23 }
  0x2c   : > { %252 = vst [vmem:[%s9605_s24 + $0x60] sm:$0xf] %v251_v24  ;;  %254 = vst [vmem:[%s9605_s24 + $0x64] sm:$0xf] %v253_v25  ;;  %v255_v26 = vld [vmem:[%s9601_s14 + $0x1a0] sm:$0xf] }
  0x2d   : > { %v257_v27 = vld [vmem:[%s9601_s14 + $0x1b0] sm:$0xf]  ;;  %v259_v28 = vld [vmem:[%s9601_s14 + $0x1c0] sm:$0xf]  ;;  %256 = vst [vmem:[%s9605_s24 + $0x68] sm:$0xf] %v255_v26 }
  0x2e   : > { %258 = vst [vmem:[%s9605_s24 + $0x6c] sm:$0xf] %v257_v27  ;;  %260 = vst [vmem:[%s9605_s24 + $0x70] sm:$0xf] %v259_v28  ;;  %v261_v29 = vld [vmem:[%s9601_s14 + $0x1d0] sm:$0xf] }
  0x2f   : > { %v263_v30 = vld [vmem:[%s9601_s14 + $0x1e0] sm:$0xf]  ;;  %v265_v31 = vld [vmem:[%s9601_s14 + $0x1f0] sm:$0xf]  ;;  %262 = vst [vmem:[%s9605_s24 + $0x74] sm:$0xf] %v261_v29 }
  0x30   : > { %264 = vst [vmem:[%s9605_s24 + $0x78] sm:$0xf] %v263_v30  ;;  %266 = vst [vmem:[%s9605_s24 + $0x7c] sm:$0xf] %v265_v31  ;;  %v267_v32 = vld [vmem:[%s9601_s14 + $0x200] sm:$0xf] }
  0x31   : > { %v269_v33 = vld [vmem:[%s9601_s14 + $0x210] sm:$0xf]  ;;  %v271_v34 = vld [vmem:[%s9601_s14 + $0x220] sm:$0xf]  ;;  %268 = vst [vmem:[%s9605_s24 + $0x80] sm:$0xf] %v267_v32 }
  0x32   : > { %270 = vst [vmem:[%s9605_s24 + $0x84] sm:$0xf] %v269_v33  ;;  %272 = vst [vmem:[%s9605_s24 + $0x88] sm:$0xf] %v271_v34  ;;  %v273_v35 = vld [vmem:[%s9601_s14 + $0x230] sm:$0xf] }
  0x33   : > { %v275_v36 = vld [vmem:[%s9601_s14 + $0x240] sm:$0xf]  ;;  %v277_v37 = vld [vmem:[%s9601_s14 + $0x250] sm:$0xf]  ;;  %274 = vst [vmem:[%s9605_s24 + $0x8c] sm:$0xf] %v273_v35 }
  0x34   : > { %276 = vst [vmem:[%s9605_s24 + $0x90] sm:$0xf] %v275_v36  ;;  %278 = vst [vmem:[%s9605_s24 + $0x94] sm:$0xf] %v277_v37  ;;  %v279_v38 = vld [vmem:[%s9601_s14 + $0x260] sm:$0xf] }
  0x35   : > { %v281_v39 = vld [vmem:[%s9601_s14 + $0x270] sm:$0xf]  ;;  %v283_v40 = vld [vmem:[%s9601_s14 + $0x280] sm:$0xf]  ;;  %280 = vst [vmem:[%s9605_s24 + $0x98] sm:$0xf] %v279_v38 }
  0x36   : > { %282 = vst [vmem:[%s9605_s24 + $0x9c] sm:$0xf] %v281_v39  ;;  %284 = vst [vmem:[%s9605_s24 + $0xa0] sm:$0xf] %v283_v40  ;;  %v285_v41 = vld [vmem:[%s9601_s14 + $0x290] sm:$0xf] }
  0x37   : > { %v287_v42 = vld [vmem:[%s9601_s14 + $0x2a0] sm:$0xf]  ;;  %v289_v43 = vld [vmem:[%s9601_s14 + $0x2b0] sm:$0xf]  ;;  %286 = vst [vmem:[%s9605_s24 + $0xa4] sm:$0xf] %v285_v41 }
  0x38   : > { %288 = vst [vmem:[%s9605_s24 + $0xa8] sm:$0xf] %v287_v42  ;;  %290 = vst [vmem:[%s9605_s24 + $0xac] sm:$0xf] %v289_v43  ;;  %v291_v44 = vld [vmem:[%s9601_s14 + $0x2c0] sm:$0xf] }
  0x39   : > { %v293_v45 = vld [vmem:[%s9601_s14 + $0x2d0] sm:$0xf]  ;;  %v295_v46 = vld [vmem:[%s9601_s14 + $0x2e0] sm:$0xf]  ;;  %292 = vst [vmem:[%s9605_s24 + $0xb0] sm:$0xf] %v291_v44 }
  0x3a   : > { %294 = vst [vmem:[%s9605_s24 + $0xb4] sm:$0xf] %v293_v45  ;;  %296 = vst [vmem:[%s9605_s24 + $0xb8] sm:$0xf] %v295_v46  ;;  %v297_v47 = vld [vmem:[%s9601_s14 + $0x2f0] sm:$0xf] }
  0x3b   : > { %v299_v48 = vld [vmem:[%s9601_s14 + $0x300] sm:$0xf]  ;;  %v301_v49 = vld [vmem:[%s9601_s14 + $0x310] sm:$0xf]  ;;  %298 = vst [vmem:[%s9605_s24 + $0xbc] sm:$0xf] %v297_v47 }
  0x3c   : > { %300 = vst [vmem:[%s9605_s24 + $0xc0] sm:$0xf] %v299_v48  ;;  %302 = vst [vmem:[%s9605_s24 + $0xc4] sm:$0xf] %v301_v49  ;;  %v303_v50 = vld [vmem:[%s9601_s14 + $0x320] sm:$0xf] }
  0x3d   : > { %v305_v51 = vld [vmem:[%s9601_s14 + $0x330] sm:$0xf]  ;;  %v307_v52 = vld [vmem:[%s9601_s14 + $0x340] sm:$0xf]  ;;  %304 = vst [vmem:[%s9605_s24 + $0xc8] sm:$0xf] %v303_v50 }
  0x3e   : > { %306 = vst [vmem:[%s9605_s24 + $0xcc] sm:$0xf] %v305_v51  ;;  %308 = vst [vmem:[%s9605_s24 + $0xd0] sm:$0xf] %v307_v52  ;;  %v309_v53 = vld [vmem:[%s9601_s14 + $0x350] sm:$0xf] }
  0x3f   : > { %v311_v54 = vld [vmem:[%s9601_s14 + $0x360] sm:$0xf]  ;;  %v313_v55 = vld [vmem:[%s9601_s14 + $0x370] sm:$0xf]  ;;  %310 = vst [vmem:[%s9605_s24 + $0xd4] sm:$0xf] %v309_v53 }
  0x40   : > { %312 = vst [vmem:[%s9605_s24 + $0xd8] sm:$0xf] %v311_v54  ;;  %314 = vst [vmem:[%s9605_s24 + $0xdc] sm:$0xf] %v313_v55  ;;  %v315_v56 = vld [vmem:[%s9601_s14 + $0x380] sm:$0xf] }
  0x41   : > { %v317_v57 = vld [vmem:[%s9601_s14 + $0x390] sm:$0xf]  ;;  %v319_v58 = vld [vmem:[%s9601_s14 + $0x3a0] sm:$0xf]  ;;  %316 = vst [vmem:[%s9605_s24 + $0xe0] sm:$0xf] %v315_v56 }
  0x42   : > { %318 = vst [vmem:[%s9605_s24 + $0xe4] sm:$0xf] %v317_v57  ;;  %320 = vst [vmem:[%s9605_s24 + $0xe8] sm:$0xf] %v319_v58  ;;  %v321_v59 = vld [vmem:[%s9601_s14 + $0x3b0] sm:$0xf] }
  0x43   : > { %v323_v60 = vld [vmem:[%s9601_s14 + $0x3c0] sm:$0xf]  ;;  %v325_v61 = vld [vmem:[%s9601_s14 + $0x3d0] sm:$0xf]  ;;  %322 = vst [vmem:[%s9605_s24 + $0xec] sm:$0xf] %v321_v59 }
  0x44   : > { %324 = vst [vmem:[%s9605_s24 + $0xf0] sm:$0xf] %v323_v60  ;;  %326 = vst [vmem:[%s9605_s24 + $0xf4] sm:$0xf] %v325_v61  ;;  %v327_v62 = vld [vmem:[%s9601_s14 + $0x3e0] sm:$0xf] }
  0x45   : > { %v329_v63 = vld [vmem:[%s9601_s14 + $0x3f0] sm:$0xf]  ;;  %v331_v0 = vld [vmem:[%s9601_s14 + $0x400] sm:$0xf]  ;;  %328 = vst [vmem:[%s9605_s24 + $0xf8] sm:$0xf] %v327_v62 }
  0x46   : > { %330 = vst [vmem:[%s9605_s24 + $0xfc] sm:$0xf] %v329_v63  ;;  %332 = vst [vmem:[%s9605_s24 + $0x100] sm:$0xf] %v331_v0  ;;  %v333_v1 = vld [vmem:[%s9601_s14 + $0x410] sm:$0xf] }
  0x47   : > { %v335_v2 = vld [vmem:[%s9601_s14 + $0x420] sm:$0xf]  ;;  %v337_v3 = vld [vmem:[%s9601_s14 + $0x430] sm:$0xf]  ;;  %334 = vst [vmem:[%s9605_s24 + $0x104] sm:$0xf] %v333_v1 }
  0x48   : > { %336 = vst [vmem:[%s9605_s24 + $0x108] sm:$0xf] %v335_v2  ;;  %338 = vst [vmem:[%s9605_s24 + $0x10c] sm:$0xf] %v337_v3  ;;  %v339_v4 = vld [vmem:[%s9601_s14 + $0x440] sm:$0xf] }
  0x49   : > { %v341_v5 = vld [vmem:[%s9601_s14 + $0x450] sm:$0xf]  ;;  %v343_v6 = vld [vmem:[%s9601_s14 + $0x460] sm:$0xf]  ;;  %340 = vst [vmem:[%s9605_s24 + $0x110] sm:$0xf] %v339_v4 }
  0x4a   : > { %342 = vst [vmem:[%s9605_s24 + $0x114] sm:$0xf] %v341_v5  ;;  %344 = vst [vmem:[%s9605_s24 + $0x118] sm:$0xf] %v343_v6  ;;  %v345_v7 = vld [vmem:[%s9601_s14 + $0x470] sm:$0xf] }
  0x4b   : > { %v347_v8 = vld [vmem:[%s9601_s14 + $0x480] sm:$0xf]  ;;  %v349_v9 = vld [vmem:[%s9601_s14 + $0x490] sm:$0xf]  ;;  %346 = vst [vmem:[%s9605_s24 + $0x11c] sm:$0xf] %v345_v7 }
  0x4c   : > { %348 = vst [vmem:[%s9605_s24 + $0x120] sm:$0xf] %v347_v8  ;;  %350 = vst [vmem:[%s9605_s24 + $0x124] sm:$0xf] %v349_v9  ;;  %v351_v10 = vld [vmem:[%s9601_s14 + $0x4a0] sm:$0xf] }
  0x4d   : > { %v353_v11 = vld [vmem:[%s9601_s14 + $0x4b0] sm:$0xf]  ;;  %v355_v12 = vld [vmem:[%s9601_s14 + $0x4c0] sm:$0xf]  ;;  %352 = vst [vmem:[%s9605_s24 + $0x128] sm:$0xf] %v351_v10 }
  0x4e   : > { %354 = vst [vmem:[%s9605_s24 + $0x12c] sm:$0xf] %v353_v11  ;;  %356 = vst [vmem:[%s9605_s24 + $0x130] sm:$0xf] %v355_v12  ;;  %v357_v13 = vld [vmem:[%s9601_s14 + $0x4d0] sm:$0xf] }
  0x4f   : > { %v359_v14 = vld [vmem:[%s9601_s14 + $0x4e0] sm:$0xf]  ;;  %v361_v15 = vld [vmem:[%s9601_s14 + $0x4f0] sm:$0xf]  ;;  %358 = vst [vmem:[%s9605_s24 + $0x134] sm:$0xf] %v357_v13 }
  0x50   : > { %360 = vst [vmem:[%s9605_s24 + $0x138] sm:$0xf] %v359_v14  ;;  %362 = vst [vmem:[%s9605_s24 + $0x13c] sm:$0xf] %v361_v15  ;;  %v363_v16 = vld [vmem:[%s9601_s14 + $0x500] sm:$0xf] }
  0x51   : > { %v365_v17 = vld [vmem:[%s9601_s14 + $0x510] sm:$0xf]  ;;  %v367_v18 = vld [vmem:[%s9601_s14 + $0x520] sm:$0xf]  ;;  %364 = vst [vmem:[%s9605_s24 + $0x140] sm:$0xf] %v363_v16 }
  0x52   : > { %366 = vst [vmem:[%s9605_s24 + $0x144] sm:$0xf] %v365_v17  ;;  %368 = vst [vmem:[%s9605_s24 + $0x148] sm:$0xf] %v367_v18  ;;  %v369_v19 = vld [vmem:[%s9601_s14 + $0x530] sm:$0xf] }
  0x53   : > { %v371_v20 = vld [vmem:[%s9601_s14 + $0x540] sm:$0xf]  ;;  %v373_v21 = vld [vmem:[%s9601_s14 + $0x550] sm:$0xf]  ;;  %370 = vst [vmem:[%s9605_s24 + $0x14c] sm:$0xf] %v369_v19 }
  0x54   : > { %372 = vst [vmem:[%s9605_s24 + $0x150] sm:$0xf] %v371_v20  ;;  %374 = vst [vmem:[%s9605_s24 + $0x154] sm:$0xf] %v373_v21  ;;  %v375_v22 = vld [vmem:[%s9601_s14 + $0x560] sm:$0xf] }
  0x55   : > { %v377_v23 = vld [vmem:[%s9601_s14 + $0x570] sm:$0xf]  ;;  %v379_v24 = vld [vmem:[%s9601_s14 + $0x580] sm:$0xf]  ;;  %376 = vst [vmem:[%s9605_s24 + $0x158] sm:$0xf] %v375_v22 }
  0x56   : > { %378 = vst [vmem:[%s9605_s24 + $0x15c] sm:$0xf] %v377_v23  ;;  %380 = vst [vmem:[%s9605_s24 + $0x160] sm:$0xf] %v379_v24  ;;  %v381_v25 = vld [vmem:[%s9601_s14 + $0x590] sm:$0xf] }
  0x57   : > { %v383_v26 = vld [vmem:[%s9601_s14 + $0x5a0] sm:$0xf]  ;;  %v385_v27 = vld [vmem:[%s9601_s14 + $0x5b0] sm:$0xf]  ;;  %382 = vst [vmem:[%s9605_s24 + $0x164] sm:$0xf] %v381_v25 }
  0x58   : > { %384 = vst [vmem:[%s9605_s24 + $0x168] sm:$0xf] %v383_v26  ;;  %386 = vst [vmem:[%s9605_s24 + $0x16c] sm:$0xf] %v385_v27  ;;  %v387_v28 = vld [vmem:[%s9601_s14 + $0x5c0] sm:$0xf] }
  0x59   : > { %v389_v29 = vld [vmem:[%s9601_s14 + $0x5d0] sm:$0xf]  ;;  %v391_v30 = vld [vmem:[%s9601_s14 + $0x5e0] sm:$0xf]  ;;  %388 = vst [vmem:[%s9605_s24 + $0x170] sm:$0xf] %v387_v28 }
  0x5a   : > { %390 = vst [vmem:[%s9605_s24 + $0x174] sm:$0xf] %v389_v29  ;;  %392 = vst [vmem:[%s9605_s24 + $0x178] sm:$0xf] %v391_v30  ;;  %v393_v31 = vld [vmem:[%s9601_s14 + $0x5f0] sm:$0xf] }
  0x5b   : > { %v395_v32 = vld [vmem:[%s9601_s14 + $0x600] sm:$0xf]  ;;  %v397_v33 = vld [vmem:[%s9601_s14 + $0x610] sm:$0xf]  ;;  %394 = vst [vmem:[%s9605_s24 + $0x17c] sm:$0xf] %v393_v31 }
  0x5c   : > { %396 = vst [vmem:[%s9605_s24 + $0x180] sm:$0xf] %v395_v32  ;;  %398 = vst [vmem:[%s9605_s24 + $0x184] sm:$0xf] %v397_v33  ;;  %v399_v34 = vld [vmem:[%s9601_s14 + $0x620] sm:$0xf] }
  0x5d   : > { %v401_v35 = vld [vmem:[%s9601_s14 + $0x630] sm:$0xf]  ;;  %v403_v36 = vld [vmem:[%s9601_s14 + $0x640] sm:$0xf]  ;;  %400 = vst [vmem:[%s9605_s24 + $0x188] sm:$0xf] %v399_v34 }
  0x5e   : > { %402 = vst [vmem:[%s9605_s24 + $0x18c] sm:$0xf] %v401_v35  ;;  %404 = vst [vmem:[%s9605_s24 + $0x190] sm:$0xf] %v403_v36  ;;  %v405_v37 = vld [vmem:[%s9601_s14 + $0x650] sm:$0xf] }
  0x5f   : > { %v407_v38 = vld [vmem:[%s9601_s14 + $0x660] sm:$0xf]  ;;  %v409_v39 = vld [vmem:[%s9601_s14 + $0x670] sm:$0xf]  ;;  %406 = vst [vmem:[%s9605_s24 + $0x194] sm:$0xf] %v405_v37 }
  0x60   : > { %408 = vst [vmem:[%s9605_s24 + $0x198] sm:$0xf] %v407_v38  ;;  %410 = vst [vmem:[%s9605_s24 + $0x19c] sm:$0xf] %v409_v39  ;;  %v411_v40 = vld [vmem:[%s9601_s14 + $0x680] sm:$0xf] }
  0x61   : > { %v413_v41 = vld [vmem:[%s9601_s14 + $0x690] sm:$0xf]  ;;  %v415_v42 = vld [vmem:[%s9601_s14 + $0x6a0] sm:$0xf]  ;;  %412 = vst [vmem:[%s9605_s24 + $0x1a0] sm:$0xf] %v411_v40 }
  0x62   : > { %414 = vst [vmem:[%s9605_s24 + $0x1a4] sm:$0xf] %v413_v41  ;;  %416 = vst [vmem:[%s9605_s24 + $0x1a8] sm:$0xf] %v415_v42  ;;  %v417_v43 = vld [vmem:[%s9601_s14 + $0x6b0] sm:$0xf] }
  0x63   : > { %v419_v44 = vld [vmem:[%s9601_s14 + $0x6c0] sm:$0xf]  ;;  %v421_v45 = vld [vmem:[%s9601_s14 + $0x6d0] sm:$0xf]  ;;  %418 = vst [vmem:[%s9605_s24 + $0x1ac] sm:$0xf] %v417_v43 }
  0x64   : > { %420 = vst [vmem:[%s9605_s24 + $0x1b0] sm:$0xf] %v419_v44  ;;  %422 = vst [vmem:[%s9605_s24 + $0x1b4] sm:$0xf] %v421_v45  ;;  %v423_v46 = vld [vmem:[%s9601_s14 + $0x6e0] sm:$0xf] }
  0x65   : > { %v425_v47 = vld [vmem:[%s9601_s14 + $0x6f0] sm:$0xf]  ;;  %v427_v48 = vld [vmem:[%s9601_s14 + $0x700] sm:$0xf]  ;;  %424 = vst [vmem:[%s9605_s24 + $0x1b8] sm:$0xf] %v423_v46 }
  0x66   : > { %426 = vst [vmem:[%s9605_s24 + $0x1bc] sm:$0xf] %v425_v47  ;;  %428 = vst [vmem:[%s9605_s24 + $0x1c0] sm:$0xf] %v427_v48  ;;  %v429_v49 = vld [vmem:[%s9601_s14 + $0x710] sm:$0xf] }
  0x67   : > { %v431_v50 = vld [vmem:[%s9601_s14 + $0x720] sm:$0xf]  ;;  %v433_v51 = vld [vmem:[%s9601_s14 + $0x730] sm:$0xf]  ;;  %430 = vst [vmem:[%s9605_s24 + $0x1c4] sm:$0xf] %v429_v49 }
  0x68   : > { %432 = vst [vmem:[%s9605_s24 + $0x1c8] sm:$0xf] %v431_v50  ;;  %434 = vst [vmem:[%s9605_s24 + $0x1cc] sm:$0xf] %v433_v51  ;;  %v435_v52 = vld [vmem:[%s9601_s14 + $0x740] sm:$0xf] }
  0x69   : > { %v437_v53 = vld [vmem:[%s9601_s14 + $0x750] sm:$0xf]  ;;  %v439_v54 = vld [vmem:[%s9601_s14 + $0x760] sm:$0xf]  ;;  %436 = vst [vmem:[%s9605_s24 + $0x1d0] sm:$0xf] %v435_v52 }
  0x6a   : > { %438 = vst [vmem:[%s9605_s24 + $0x1d4] sm:$0xf] %v437_v53  ;;  %440 = vst [vmem:[%s9605_s24 + $0x1d8] sm:$0xf] %v439_v54  ;;  %v441_v55 = vld [vmem:[%s9601_s14 + $0x770] sm:$0xf] }
  0x6b   : > { %v443_v56 = vld [vmem:[%s9601_s14 + $0x780] sm:$0xf]  ;;  %v445_v57 = vld [vmem:[%s9601_s14 + $0x790] sm:$0xf]  ;;  %442 = vst [vmem:[%s9605_s24 + $0x1dc] sm:$0xf] %v441_v55 }
  0x6c   : > { %444 = vst [vmem:[%s9605_s24 + $0x1e0] sm:$0xf] %v443_v56  ;;  %446 = vst [vmem:[%s9605_s24 + $0x1e4] sm:$0xf] %v445_v57  ;;  %v447_v58 = vld [vmem:[%s9601_s14 + $0x7a0] sm:$0xf] }
  0x6d   : > { %v449_v59 = vld [vmem:[%s9601_s14 + $0x7b0] sm:$0xf]  ;;  %v451_v60 = vld [vmem:[%s9601_s14 + $0x7c0] sm:$0xf]  ;;  %448 = vst [vmem:[%s9605_s24 + $0x1e8] sm:$0xf] %v447_v58 }
  0x6e   : > { %450 = vst [vmem:[%s9605_s24 + $0x1ec] sm:$0xf] %v449_v59  ;;  %452 = vst [vmem:[%s9605_s24 + $0x1f0] sm:$0xf] %v451_v60  ;;  %v453_v61 = vld [vmem:[%s9601_s14 + $0x7d0] sm:$0xf] }
  0x6f   : > { %v455_v62 = vld [vmem:[%s9601_s14 + $0x7e0] sm:$0xf]  ;;  %v457_v63 = vld [vmem:[%s9601_s14 + $0x7f0] sm:$0xf]  ;;  %454 = vst [vmem:[%s9605_s24 + $0x1f4] sm:$0xf] %v453_v61 }
  0x70   : > { %456 = vst [vmem:[%s9605_s24 + $0x1f8] sm:$0xf] %v455_v62  ;;  %458 = vst [vmem:[%s9605_s24 + $0x1fc] sm:$0xf] %v457_v63  ;;  %v459_v0 = vld [vmem:[%s9601_s14 + $0x800] sm:$0xf] }
  0x71   : > { %v461_v1 = vld [vmem:[%s9601_s14 + $0x810] sm:$0xf]  ;;  %v463_v2 = vld [vmem:[%s9601_s14 + $0x820] sm:$0xf]  ;;  %460 = vst [vmem:[%s9605_s24 + $0x200] sm:$0xf] %v459_v0 }
  0x72   : > { %462 = vst [vmem:[%s9605_s24 + $0x204] sm:$0xf] %v461_v1  ;;  %464 = vst [vmem:[%s9605_s24 + $0x208] sm:$0xf] %v463_v2  ;;  %v465_v3 = vld [vmem:[%s9601_s14 + $0x830] sm:$0xf] }
  0x73   : > { %v467_v4 = vld [vmem:[%s9601_s14 + $0x840] sm:$0xf]  ;;  %v469_v5 = vld [vmem:[%s9601_s14 + $0x850] sm:$0xf]  ;;  %466 = vst [vmem:[%s9605_s24 + $0x20c] sm:$0xf] %v465_v3 }
  0x74   : > { %468 = vst [vmem:[%s9605_s24 + $0x210] sm:$0xf] %v467_v4  ;;  %470 = vst [vmem:[%s9605_s24 + $0x214] sm:$0xf] %v469_v5  ;;  %v471_v6 = vld [vmem:[%s9601_s14 + $0x860] sm:$0xf] }
  0x75   : > { %v473_v7 = vld [vmem:[%s9601_s14 + $0x870] sm:$0xf]  ;;  %v475_v8 = vld [vmem:[%s9601_s14 + $0x880] sm:$0xf]  ;;  %472 = vst [vmem:[%s9605_s24 + $0x218] sm:$0xf] %v471_v6 }
  0x76   : > { %474 = vst [vmem:[%s9605_s24 + $0x21c] sm:$0xf] %v473_v7  ;;  %476 = vst [vmem:[%s9605_s24 + $0x220] sm:$0xf] %v475_v8  ;;  %v477_v9 = vld [vmem:[%s9601_s14 + $0x890] sm:$0xf] }
  0x77   : > { %v479_v10 = vld [vmem:[%s9601_s14 + $0x8a0] sm:$0xf]  ;;  %v481_v11 = vld [vmem:[%s9601_s14 + $0x8b0] sm:$0xf]  ;;  %478 = vst [vmem:[%s9605_s24 + $0x224] sm:$0xf] %v477_v9 }
  0x78   : > { %480 = vst [vmem:[%s9605_s24 + $0x228] sm:$0xf] %v479_v10  ;;  %482 = vst [vmem:[%s9605_s24 + $0x22c] sm:$0xf] %v481_v11  ;;  %v483_v12 = vld [vmem:[%s9601_s14 + $0x8c0] sm:$0xf] }
  0x79   : > { %v485_v13 = vld [vmem:[%s9601_s14 + $0x8d0] sm:$0xf]  ;;  %v487_v14 = vld [vmem:[%s9601_s14 + $0x8e0] sm:$0xf]  ;;  %484 = vst [vmem:[%s9605_s24 + $0x230] sm:$0xf] %v483_v12 }
  0x7a   : > { %486 = vst [vmem:[%s9605_s24 + $0x234] sm:$0xf] %v485_v13  ;;  %488 = vst [vmem:[%s9605_s24 + $0x238] sm:$0xf] %v487_v14  ;;  %v489_v15 = vld [vmem:[%s9601_s14 + $0x8f0] sm:$0xf] }
  0x7b   : > { %v491_v16 = vld [vmem:[%s9601_s14 + $0x900] sm:$0xf]  ;;  %v493_v17 = vld [vmem:[%s9601_s14 + $0x910] sm:$0xf]  ;;  %490 = vst [vmem:[%s9605_s24 + $0x23c] sm:$0xf] %v489_v15 }
  0x7c   : > { %492 = vst [vmem:[%s9605_s24 + $0x240] sm:$0xf] %v491_v16  ;;  %494 = vst [vmem:[%s9605_s24 + $0x244] sm:$0xf] %v493_v17  ;;  %v495_v18 = vld [vmem:[%s9601_s14 + $0x920] sm:$0xf] }
  0x7d   : > { %v497_v19 = vld [vmem:[%s9601_s14 + $0x930] sm:$0xf]  ;;  %v499_v20 = vld [vmem:[%s9601_s14 + $0x940] sm:$0xf]  ;;  %496 = vst [vmem:[%s9605_s24 + $0x248] sm:$0xf] %v495_v18 }
  0x7e   : > { %498 = vst [vmem:[%s9605_s24 + $0x24c] sm:$0xf] %v497_v19  ;;  %500 = vst [vmem:[%s9605_s24 + $0x250] sm:$0xf] %v499_v20  ;;  %v501_v21 = vld [vmem:[%s9601_s14 + $0x950] sm:$0xf] }
  0x7f   : > { %v503_v22 = vld [vmem:[%s9601_s14 + $0x960] sm:$0xf]  ;;  %v505_v23 = vld [vmem:[%s9601_s14 + $0x970] sm:$0xf]  ;;  %502 = vst [vmem:[%s9605_s24 + $0x254] sm:$0xf] %v501_v21 }
  0x80   : > { %504 = vst [vmem:[%s9605_s24 + $0x258] sm:$0xf] %v503_v22  ;;  %506 = vst [vmem:[%s9605_s24 + $0x25c] sm:$0xf] %v505_v23  ;;  %v507_v24 = vld [vmem:[%s9601_s14 + $0x980] sm:$0xf] }
  0x81   : > { %v509_v25 = vld [vmem:[%s9601_s14 + $0x990] sm:$0xf]  ;;  %v511_v26 = vld [vmem:[%s9601_s14 + $0x9a0] sm:$0xf]  ;;  %508 = vst [vmem:[%s9605_s24 + $0x260] sm:$0xf] %v507_v24 }
  0x82   : > { %510 = vst [vmem:[%s9605_s24 + $0x264] sm:$0xf] %v509_v25  ;;  %512 = vst [vmem:[%s9605_s24 + $0x268] sm:$0xf] %v511_v26  ;;  %v513_v27 = vld [vmem:[%s9601_s14 + $0x9b0] sm:$0xf] }
  0x83   : > { %v515_v28 = vld [vmem:[%s9601_s14 + $0x9c0] sm:$0xf]  ;;  %v517_v29 = vld [vmem:[%s9601_s14 + $0x9d0] sm:$0xf]  ;;  %514 = vst [vmem:[%s9605_s24 + $0x26c] sm:$0xf] %v513_v27 }
  0x84   : > { %516 = vst [vmem:[%s9605_s24 + $0x270] sm:$0xf] %v515_v28  ;;  %518 = vst [vmem:[%s9605_s24 + $0x274] sm:$0xf] %v517_v29  ;;  %v519_v30 = vld [vmem:[%s9601_s14 + $0x9e0] sm:$0xf] }
  0x85   : > { %v521_v31 = vld [vmem:[%s9601_s14 + $0x9f0] sm:$0xf]  ;;  %v523_v32 = vld [vmem:[%s9601_s14 + $0xa00] sm:$0xf]  ;;  %520 = vst [vmem:[%s9605_s24 + $0x278] sm:$0xf] %v519_v30 }
  0x86   : > { %522 = vst [vmem:[%s9605_s24 + $0x27c] sm:$0xf] %v521_v31  ;;  %524 = vst [vmem:[%s9605_s24 + $0x280] sm:$0xf] %v523_v32  ;;  %v525_v33 = vld [vmem:[%s9601_s14 + $0xa10] sm:$0xf] }
  0x87   : > { %v527_v34 = vld [vmem:[%s9601_s14 + $0xa20] sm:$0xf]  ;;  %v529_v35 = vld [vmem:[%s9601_s14 + $0xa30] sm:$0xf]  ;;  %526 = vst [vmem:[%s9605_s24 + $0x284] sm:$0xf] %v525_v33 }
  0x88   : > { %528 = vst [vmem:[%s9605_s24 + $0x288] sm:$0xf] %v527_v34  ;;  %530 = vst [vmem:[%s9605_s24 + $0x28c] sm:$0xf] %v529_v35  ;;  %v531_v36 = vld [vmem:[%s9601_s14 + $0xa40] sm:$0xf] }
  0x89   : > { %v533_v37 = vld [vmem:[%s9601_s14 + $0xa50] sm:$0xf]  ;;  %v535_v38 = vld [vmem:[%s9601_s14 + $0xa60] sm:$0xf]  ;;  %532 = vst [vmem:[%s9605_s24 + $0x290] sm:$0xf] %v531_v36 }
  0x8a   : > { %534 = vst [vmem:[%s9605_s24 + $0x294] sm:$0xf] %v533_v37  ;;  %536 = vst [vmem:[%s9605_s24 + $0x298] sm:$0xf] %v535_v38  ;;  %v537_v39 = vld [vmem:[%s9601_s14 + $0xa70] sm:$0xf] }
  0x8b   : > { %v539_v40 = vld [vmem:[%s9601_s14 + $0xa80] sm:$0xf]  ;;  %v541_v41 = vld [vmem:[%s9601_s14 + $0xa90] sm:$0xf]  ;;  %538 = vst [vmem:[%s9605_s24 + $0x29c] sm:$0xf] %v537_v39 }
  0x8c   : > { %540 = vst [vmem:[%s9605_s24 + $0x2a0] sm:$0xf] %v539_v40  ;;  %542 = vst [vmem:[%s9605_s24 + $0x2a4] sm:$0xf] %v541_v41  ;;  %v543_v42 = vld [vmem:[%s9601_s14 + $0xaa0] sm:$0xf] }
  0x8d   : > { %v545_v43 = vld [vmem:[%s9601_s14 + $0xab0] sm:$0xf]  ;;  %v547_v44 = vld [vmem:[%s9601_s14 + $0xac0] sm:$0xf]  ;;  %544 = vst [vmem:[%s9605_s24 + $0x2a8] sm:$0xf] %v543_v42 }
  0x8e   : > { %546 = vst [vmem:[%s9605_s24 + $0x2ac] sm:$0xf] %v545_v43  ;;  %548 = vst [vmem:[%s9605_s24 + $0x2b0] sm:$0xf] %v547_v44  ;;  %v549_v45 = vld [vmem:[%s9601_s14 + $0xad0] sm:$0xf] }
  0x8f   : > { %v551_v46 = vld [vmem:[%s9601_s14 + $0xae0] sm:$0xf]  ;;  %v553_v47 = vld [vmem:[%s9601_s14 + $0xaf0] sm:$0xf]  ;;  %550 = vst [vmem:[%s9605_s24 + $0x2b4] sm:$0xf] %v549_v45 }
  0x90   : > { %552 = vst [vmem:[%s9605_s24 + $0x2b8] sm:$0xf] %v551_v46  ;;  %554 = vst [vmem:[%s9605_s24 + $0x2bc] sm:$0xf] %v553_v47  ;;  %v555_v48 = vld [vmem:[%s9601_s14 + $0xb00] sm:$0xf] }
  0x91   : > { %v557_v49 = vld [vmem:[%s9601_s14 + $0xb10] sm:$0xf]  ;;  %v559_v50 = vld [vmem:[%s9601_s14 + $0xb20] sm:$0xf]  ;;  %556 = vst [vmem:[%s9605_s24 + $0x2c0] sm:$0xf] %v555_v48 }
  0x92   : > { %558 = vst [vmem:[%s9605_s24 + $0x2c4] sm:$0xf] %v557_v49  ;;  %560 = vst [vmem:[%s9605_s24 + $0x2c8] sm:$0xf] %v559_v50  ;;  %v561_v51 = vld [vmem:[%s9601_s14 + $0xb30] sm:$0xf] }
  0x93   : > { %v563_v52 = vld [vmem:[%s9601_s14 + $0xb40] sm:$0xf]  ;;  %v565_v53 = vld [vmem:[%s9601_s14 + $0xb50] sm:$0xf]  ;;  %562 = vst [vmem:[%s9605_s24 + $0x2cc] sm:$0xf] %v561_v51 }
  0x94   : > { %564 = vst [vmem:[%s9605_s24 + $0x2d0] sm:$0xf] %v563_v52  ;;  %566 = vst [vmem:[%s9605_s24 + $0x2d4] sm:$0xf] %v565_v53  ;;  %v567_v54 = vld [vmem:[%s9601_s14 + $0xb60] sm:$0xf] }
  0x95   : > { %v569_v55 = vld [vmem:[%s9601_s14 + $0xb70] sm:$0xf]  ;;  %v571_v56 = vld [vmem:[%s9601_s14 + $0xb80] sm:$0xf]  ;;  %568 = vst [vmem:[%s9605_s24 + $0x2d8] sm:$0xf] %v567_v54 }
  0x96   : > { %570 = vst [vmem:[%s9605_s24 + $0x2dc] sm:$0xf] %v569_v55  ;;  %572 = vst [vmem:[%s9605_s24 + $0x2e0] sm:$0xf] %v571_v56  ;;  %v573_v57 = vld [vmem:[%s9601_s14 + $0xb90] sm:$0xf] }
  0x97   : > { %v575_v58 = vld [vmem:[%s9601_s14 + $0xba0] sm:$0xf]  ;;  %v577_v59 = vld [vmem:[%s9601_s14 + $0xbb0] sm:$0xf]  ;;  %574 = vst [vmem:[%s9605_s24 + $0x2e4] sm:$0xf] %v573_v57 }
  0x98   : > { %576 = vst [vmem:[%s9605_s24 + $0x2e8] sm:$0xf] %v575_v58  ;;  %578 = vst [vmem:[%s9605_s24 + $0x2ec] sm:$0xf] %v577_v59  ;;  %v579_v60 = vld [vmem:[%s9601_s14 + $0xbc0] sm:$0xf] }
  0x99   : > { %v581_v61 = vld [vmem:[%s9601_s14 + $0xbd0] sm:$0xf]  ;;  %v583_v62 = vld [vmem:[%s9601_s14 + $0xbe0] sm:$0xf]  ;;  %580 = vst [vmem:[%s9605_s24 + $0x2f0] sm:$0xf] %v579_v60 }
  0x9a   : > { %582 = vst [vmem:[%s9605_s24 + $0x2f4] sm:$0xf] %v581_v61  ;;  %584 = vst [vmem:[%s9605_s24 + $0x2f8] sm:$0xf] %v583_v62  ;;  %v585_v63 = vld [vmem:[%s9601_s14 + $0xbf0] sm:$0xf] }
  0x9b   : > { %v587_v0 = vld [vmem:[%s9601_s14 + $0xc00] sm:$0xf]  ;;  %v589_v1 = vld [vmem:[%s9601_s14 + $0xc10] sm:$0xf]  ;;  %586 = vst [vmem:[%s9605_s24 + $0x2fc] sm:$0xf] %v585_v63 }
  0x9c   : > { %588 = vst [vmem:[%s9605_s24 + $0x300] sm:$0xf] %v587_v0  ;;  %590 = vst [vmem:[%s9605_s24 + $0x304] sm:$0xf] %v589_v1  ;;  %v591_v2 = vld [vmem:[%s9601_s14 + $0xc20] sm:$0xf] }
  0x9d   : > { %v593_v3 = vld [vmem:[%s9601_s14 + $0xc30] sm:$0xf]  ;;  %v595_v4 = vld [vmem:[%s9601_s14 + $0xc40] sm:$0xf]  ;;  %592 = vst [vmem:[%s9605_s24 + $0x308] sm:$0xf] %v591_v2 }
  0x9e   : > { %594 = vst [vmem:[%s9605_s24 + $0x30c] sm:$0xf] %v593_v3  ;;  %596 = vst [vmem:[%s9605_s24 + $0x310] sm:$0xf] %v595_v4  ;;  %v597_v5 = vld [vmem:[%s9601_s14 + $0xc50] sm:$0xf] }
  0x9f   : > { %v599_v6 = vld [vmem:[%s9601_s14 + $0xc60] sm:$0xf]  ;;  %v601_v7 = vld [vmem:[%s9601_s14 + $0xc70] sm:$0xf]  ;;  %598 = vst [vmem:[%s9605_s24 + $0x314] sm:$0xf] %v597_v5 }
  0xa0   : > { %600 = vst [vmem:[%s9605_s24 + $0x318] sm:$0xf] %v599_v6  ;;  %602 = vst [vmem:[%s9605_s24 + $0x31c] sm:$0xf] %v601_v7  ;;  %v603_v8 = vld [vmem:[%s9601_s14 + $0xc80] sm:$0xf] }
  0xa1   : > { %v605_v9 = vld [vmem:[%s9601_s14 + $0xc90] sm:$0xf]  ;;  %v607_v10 = vld [vmem:[%s9601_s14 + $0xca0] sm:$0xf]  ;;  %604 = vst [vmem:[%s9605_s24 + $0x320] sm:$0xf] %v603_v8 }
  0xa2   : > { %606 = vst [vmem:[%s9605_s24 + $0x324] sm:$0xf] %v605_v9  ;;  %608 = vst [vmem:[%s9605_s24 + $0x328] sm:$0xf] %v607_v10  ;;  %v609_v11 = vld [vmem:[%s9601_s14 + $0xcb0] sm:$0xf] }
  0xa3   : > { %v611_v12 = vld [vmem:[%s9601_s14 + $0xcc0] sm:$0xf]  ;;  %v613_v13 = vld [vmem:[%s9601_s14 + $0xcd0] sm:$0xf]  ;;  %610 = vst [vmem:[%s9605_s24 + $0x32c] sm:$0xf] %v609_v11 }
  0xa4   : > { %612 = vst [vmem:[%s9605_s24 + $0x330] sm:$0xf] %v611_v12  ;;  %614 = vst [vmem:[%s9605_s24 + $0x334] sm:$0xf] %v613_v13  ;;  %v615_v14 = vld [vmem:[%s9601_s14 + $0xce0] sm:$0xf] }
  0xa5   : > { %v617_v15 = vld [vmem:[%s9601_s14 + $0xcf0] sm:$0xf]  ;;  %v619_v16 = vld [vmem:[%s9601_s14 + $0xd00] sm:$0xf]  ;;  %616 = vst [vmem:[%s9605_s24 + $0x338] sm:$0xf] %v615_v14 }
  0xa6   : > { %618 = vst [vmem:[%s9605_s24 + $0x33c] sm:$0xf] %v617_v15  ;;  %620 = vst [vmem:[%s9605_s24 + $0x340] sm:$0xf] %v619_v16  ;;  %v621_v17 = vld [vmem:[%s9601_s14 + $0xd10] sm:$0xf] }
  0xa7   : > { %v623_v18 = vld [vmem:[%s9601_s14 + $0xd20] sm:$0xf]  ;;  %v625_v19 = vld [vmem:[%s9601_s14 + $0xd30] sm:$0xf]  ;;  %622 = vst [vmem:[%s9605_s24 + $0x344] sm:$0xf] %v621_v17 }
  0xa8   : > { %624 = vst [vmem:[%s9605_s24 + $0x348] sm:$0xf] %v623_v18  ;;  %626 = vst [vmem:[%s9605_s24 + $0x34c] sm:$0xf] %v625_v19  ;;  %v627_v20 = vld [vmem:[%s9601_s14 + $0xd40] sm:$0xf] }
  0xa9   : > { %v629_v21 = vld [vmem:[%s9601_s14 + $0xd50] sm:$0xf]  ;;  %v631_v22 = vld [vmem:[%s9601_s14 + $0xd60] sm:$0xf]  ;;  %628 = vst [vmem:[%s9605_s24 + $0x350] sm:$0xf] %v627_v20 }
  0xaa   : > { %630 = vst [vmem:[%s9605_s24 + $0x354] sm:$0xf] %v629_v21  ;;  %632 = vst [vmem:[%s9605_s24 + $0x358] sm:$0xf] %v631_v22  ;;  %v633_v23 = vld [vmem:[%s9601_s14 + $0xd70] sm:$0xf] }
  0xab   : > { %v635_v24 = vld [vmem:[%s9601_s14 + $0xd80] sm:$0xf]  ;;  %v637_v25 = vld [vmem:[%s9601_s14 + $0xd90] sm:$0xf]  ;;  %634 = vst [vmem:[%s9605_s24 + $0x35c] sm:$0xf] %v633_v23 }
  0xac   : > { %636 = vst [vmem:[%s9605_s24 + $0x360] sm:$0xf] %v635_v24  ;;  %638 = vst [vmem:[%s9605_s24 + $0x364] sm:$0xf] %v637_v25  ;;  %v639_v26 = vld [vmem:[%s9601_s14 + $0xda0] sm:$0xf] }
  0xad   : > { %v641_v27 = vld [vmem:[%s9601_s14 + $0xdb0] sm:$0xf]  ;;  %v643_v28 = vld [vmem:[%s9601_s14 + $0xdc0] sm:$0xf]  ;;  %640 = vst [vmem:[%s9605_s24 + $0x368] sm:$0xf] %v639_v26 }
  0xae   : > { %642 = vst [vmem:[%s9605_s24 + $0x36c] sm:$0xf] %v641_v27  ;;  %644 = vst [vmem:[%s9605_s24 + $0x370] sm:$0xf] %v643_v28  ;;  %v645_v29 = vld [vmem:[%s9601_s14 + $0xdd0] sm:$0xf] }
  0xaf   : > { %v647_v30 = vld [vmem:[%s9601_s14 + $0xde0] sm:$0xf]  ;;  %v649_v31 = vld [vmem:[%s9601_s14 + $0xdf0] sm:$0xf]  ;;  %646 = vst [vmem:[%s9605_s24 + $0x374] sm:$0xf] %v645_v29 }
  0xb0   : > { %648 = vst [vmem:[%s9605_s24 + $0x378] sm:$0xf] %v647_v30  ;;  %650 = vst [vmem:[%s9605_s24 + $0x37c] sm:$0xf] %v649_v31  ;;  %v651_v32 = vld [vmem:[%s9601_s14 + $0xe00] sm:$0xf] }
  0xb1   : > { %v653_v33 = vld [vmem:[%s9601_s14 + $0xe10] sm:$0xf]  ;;  %v655_v34 = vld [vmem:[%s9601_s14 + $0xe20] sm:$0xf]  ;;  %652 = vst [vmem:[%s9605_s24 + $0x380] sm:$0xf] %v651_v32 }
  0xb2   : > { %654 = vst [vmem:[%s9605_s24 + $0x384] sm:$0xf] %v653_v33  ;;  %656 = vst [vmem:[%s9605_s24 + $0x388] sm:$0xf] %v655_v34  ;;  %v657_v35 = vld [vmem:[%s9601_s14 + $0xe30] sm:$0xf] }
  0xb3   : > { %v659_v36 = vld [vmem:[%s9601_s14 + $0xe40] sm:$0xf]  ;;  %v661_v37 = vld [vmem:[%s9601_s14 + $0xe50] sm:$0xf]  ;;  %658 = vst [vmem:[%s9605_s24 + $0x38c] sm:$0xf] %v657_v35 }
  0xb4   : > { %660 = vst [vmem:[%s9605_s24 + $0x390] sm:$0xf] %v659_v36  ;;  %662 = vst [vmem:[%s9605_s24 + $0x394] sm:$0xf] %v661_v37  ;;  %v663_v38 = vld [vmem:[%s9601_s14 + $0xe60] sm:$0xf] }
  0xb5   : > { %v665_v39 = vld [vmem:[%s9601_s14 + $0xe70] sm:$0xf]  ;;  %v667_v40 = vld [vmem:[%s9601_s14 + $0xe80] sm:$0xf]  ;;  %664 = vst [vmem:[%s9605_s24 + $0x398] sm:$0xf] %v663_v38 }
  0xb6   : > { %666 = vst [vmem:[%s9605_s24 + $0x39c] sm:$0xf] %v665_v39  ;;  %668 = vst [vmem:[%s9605_s24 + $0x3a0] sm:$0xf] %v667_v40  ;;  %v669_v41 = vld [vmem:[%s9601_s14 + $0xe90] sm:$0xf] }
  0xb7   : > { %v671_v42 = vld [vmem:[%s9601_s14 + $0xea0] sm:$0xf]  ;;  %v673_v43 = vld [vmem:[%s9601_s14 + $0xeb0] sm:$0xf]  ;;  %670 = vst [vmem:[%s9605_s24 + $0x3a4] sm:$0xf] %v669_v41 }
  0xb8   : > { %672 = vst [vmem:[%s9605_s24 + $0x3a8] sm:$0xf] %v671_v42  ;;  %674 = vst [vmem:[%s9605_s24 + $0x3ac] sm:$0xf] %v673_v43  ;;  %v675_v44 = vld [vmem:[%s9601_s14 + $0xec0] sm:$0xf] }
  0xb9   : > { %v677_v45 = vld [vmem:[%s9601_s14 + $0xed0] sm:$0xf]  ;;  %v679_v46 = vld [vmem:[%s9601_s14 + $0xee0] sm:$0xf]  ;;  %676 = vst [vmem:[%s9605_s24 + $0x3b0] sm:$0xf] %v675_v44 }
  0xba   : > { %678 = vst [vmem:[%s9605_s24 + $0x3b4] sm:$0xf] %v677_v45  ;;  %680 = vst [vmem:[%s9605_s24 + $0x3b8] sm:$0xf] %v679_v46  ;;  %v681_v47 = vld [vmem:[%s9601_s14 + $0xef0] sm:$0xf] }
  0xbb   : > { %v683_v48 = vld [vmem:[%s9601_s14 + $0xf00] sm:$0xf]  ;;  %v685_v49 = vld [vmem:[%s9601_s14 + $0xf10] sm:$0xf]  ;;  %682 = vst [vmem:[%s9605_s24 + $0x3bc] sm:$0xf] %v681_v47 }
  0xbc   : > { %684 = vst [vmem:[%s9605_s24 + $0x3c0] sm:$0xf] %v683_v48  ;;  %686 = vst [vmem:[%s9605_s24 + $0x3c4] sm:$0xf] %v685_v49  ;;  %v687_v50 = vld [vmem:[%s9601_s14 + $0xf20] sm:$0xf] }
  0xbd   : > { %v689_v51 = vld [vmem:[%s9601_s14 + $0xf30] sm:$0xf]  ;;  %v691_v52 = vld [vmem:[%s9601_s14 + $0xf40] sm:$0xf]  ;;  %688 = vst [vmem:[%s9605_s24 + $0x3c8] sm:$0xf] %v687_v50 }
  0xbe   : > { %690 = vst [vmem:[%s9605_s24 + $0x3cc] sm:$0xf] %v689_v51  ;;  %692 = vst [vmem:[%s9605_s24 + $0x3d0] sm:$0xf] %v691_v52  ;;  %v693_v53 = vld [vmem:[%s9601_s14 + $0xf50] sm:$0xf] }
  0xbf   : > { %v695_v54 = vld [vmem:[%s9601_s14 + $0xf60] sm:$0xf]  ;;  %v697_v55 = vld [vmem:[%s9601_s14 + $0xf70] sm:$0xf]  ;;  %694 = vst [vmem:[%s9605_s24 + $0x3d4] sm:$0xf] %v693_v53 }
  0xc0   : > { %696 = vst [vmem:[%s9605_s24 + $0x3d8] sm:$0xf] %v695_v54  ;;  %698 = vst [vmem:[%s9605_s24 + $0x3dc] sm:$0xf] %v697_v55  ;;  %v699_v56 = vld [vmem:[%s9601_s14 + $0xf80] sm:$0xf] }
  0xc1   : > { %v701_v57 = vld [vmem:[%s9601_s14 + $0xf90] sm:$0xf]  ;;  %v703_v58 = vld [vmem:[%s9601_s14 + $0xfa0] sm:$0xf]  ;;  %700 = vst [vmem:[%s9605_s24 + $0x3e0] sm:$0xf] %v699_v56 }
  0xc2   : > { %702 = vst [vmem:[%s9605_s24 + $0x3e4] sm:$0xf] %v701_v57  ;;  %704 = vst [vmem:[%s9605_s24 + $0x3e8] sm:$0xf] %v703_v58  ;;  %v705_v59 = vld [vmem:[%s9601_s14 + $0xfb0] sm:$0xf] }
  0xc3   : > { %v707_v60 = vld [vmem:[%s9601_s14 + $0xfc0] sm:$0xf]  ;;  %v709_v61 = vld [vmem:[%s9601_s14 + $0xfd0] sm:$0xf]  ;;  %706 = vst [vmem:[%s9605_s24 + $0x3ec] sm:$0xf] %v705_v59 }
  0xc4   : > { %708 = vst [vmem:[%s9605_s24 + $0x3f0] sm:$0xf] %v707_v60  ;;  %710 = vst [vmem:[%s9605_s24 + $0x3f4] sm:$0xf] %v709_v61  ;;  %v711_v62 = vld [vmem:[%s9601_s14 + $0xfe0] sm:$0xf] }
  0xc5   : > { %v713_v63 = vld [vmem:[%s9601_s14 + $0xff0] sm:$0xf]  ;;  %v715_v0 = vld [vmem:[%s9601_s14 + $0x1000] sm:$0xf]  ;;  %712 = vst [vmem:[%s9605_s24 + $0x3f8] sm:$0xf] %v711_v62 }
  0xc6   : > { %714 = vst [vmem:[%s9605_s24 + $0x3fc] sm:$0xf] %v713_v63  ;;  %716 = vst [vmem:[%s9605_s24 + $0x400] sm:$0xf] %v715_v0  ;;  %v717_v1 = vld [vmem:[%s9601_s14 + $0x1010] sm:$0xf] }
  0xc7   : > { %v719_v2 = vld [vmem:[%s9601_s14 + $0x1020] sm:$0xf]  ;;  %v721_v3 = vld [vmem:[%s9601_s14 + $0x1030] sm:$0xf]  ;;  %718 = vst [vmem:[%s9605_s24 + $0x404] sm:$0xf] %v717_v1 }
  0xc8   : > { %720 = vst [vmem:[%s9605_s24 + $0x408] sm:$0xf] %v719_v2  ;;  %722 = vst [vmem:[%s9605_s24 + $0x40c] sm:$0xf] %v721_v3  ;;  %v723_v4 = vld [vmem:[%s9601_s14 + $0x1040] sm:$0xf] }
  0xc9   : > { %v725_v5 = vld [vmem:[%s9601_s14 + $0x1050] sm:$0xf]  ;;  %v727_v6 = vld [vmem:[%s9601_s14 + $0x1060] sm:$0xf]  ;;  %724 = vst [vmem:[%s9605_s24 + $0x410] sm:$0xf] %v723_v4 }
  0xca   : > { %726 = vst [vmem:[%s9605_s24 + $0x414] sm:$0xf] %v725_v5  ;;  %728 = vst [vmem:[%s9605_s24 + $0x418] sm:$0xf] %v727_v6  ;;  %v729_v7 = vld [vmem:[%s9601_s14 + $0x1070] sm:$0xf] }
  0xcb   : > { %v731_v8 = vld [vmem:[%s9601_s14 + $0x1080] sm:$0xf]  ;;  %v733_v9 = vld [vmem:[%s9601_s14 + $0x1090] sm:$0xf]  ;;  %730 = vst [vmem:[%s9605_s24 + $0x41c] sm:$0xf] %v729_v7 }
  0xcc   : > { %732 = vst [vmem:[%s9605_s24 + $0x420] sm:$0xf] %v731_v8  ;;  %734 = vst [vmem:[%s9605_s24 + $0x424] sm:$0xf] %v733_v9  ;;  %v735_v10 = vld [vmem:[%s9601_s14 + $0x10a0] sm:$0xf] }
  0xcd   : > { %v737_v11 = vld [vmem:[%s9601_s14 + $0x10b0] sm:$0xf]  ;;  %v739_v12 = vld [vmem:[%s9601_s14 + $0x10c0] sm:$0xf]  ;;  %736 = vst [vmem:[%s9605_s24 + $0x428] sm:$0xf] %v735_v10 }
  0xce   : > { %738 = vst [vmem:[%s9605_s24 + $0x42c] sm:$0xf] %v737_v11  ;;  %740 = vst [vmem:[%s9605_s24 + $0x430] sm:$0xf] %v739_v12  ;;  %v741_v13 = vld [vmem:[%s9601_s14 + $0x10d0] sm:$0xf] }
  0xcf   : > { %v743_v14 = vld [vmem:[%s9601_s14 + $0x10e0] sm:$0xf]  ;;  %v745_v15 = vld [vmem:[%s9601_s14 + $0x10f0] sm:$0xf]  ;;  %742 = vst [vmem:[%s9605_s24 + $0x434] sm:$0xf] %v741_v13 }
  0xd0   : > { %744 = vst [vmem:[%s9605_s24 + $0x438] sm:$0xf] %v743_v14  ;;  %746 = vst [vmem:[%s9605_s24 + $0x43c] sm:$0xf] %v745_v15  ;;  %v747_v16 = vld [vmem:[%s9601_s14 + $0x1100] sm:$0xf] }
  0xd1   : > { %v749_v17 = vld [vmem:[%s9601_s14 + $0x1110] sm:$0xf]  ;;  %v751_v18 = vld [vmem:[%s9601_s14 + $0x1120] sm:$0xf]  ;;  %748 = vst [vmem:[%s9605_s24 + $0x440] sm:$0xf] %v747_v16 }
  0xd2   : > { %750 = vst [vmem:[%s9605_s24 + $0x444] sm:$0xf] %v749_v17  ;;  %752 = vst [vmem:[%s9605_s24 + $0x448] sm:$0xf] %v751_v18  ;;  %v753_v19 = vld [vmem:[%s9601_s14 + $0x1130] sm:$0xf] }
  0xd3   : > { %v755_v20 = vld [vmem:[%s9601_s14 + $0x1140] sm:$0xf]  ;;  %v757_v21 = vld [vmem:[%s9601_s14 + $0x1150] sm:$0xf]  ;;  %754 = vst [vmem:[%s9605_s24 + $0x44c] sm:$0xf] %v753_v19 }
  0xd4   : > { %756 = vst [vmem:[%s9605_s24 + $0x450] sm:$0xf] %v755_v20  ;;  %758 = vst [vmem:[%s9605_s24 + $0x454] sm:$0xf] %v757_v21  ;;  %v759_v22 = vld [vmem:[%s9601_s14 + $0x1160] sm:$0xf] }
  0xd5   : > { %v761_v23 = vld [vmem:[%s9601_s14 + $0x1170] sm:$0xf]  ;;  %v763_v24 = vld [vmem:[%s9601_s14 + $0x1180] sm:$0xf]  ;;  %760 = vst [vmem:[%s9605_s24 + $0x458] sm:$0xf] %v759_v22 }
  0xd6   : > { %762 = vst [vmem:[%s9605_s24 + $0x45c] sm:$0xf] %v761_v23  ;;  %764 = vst [vmem:[%s9605_s24 + $0x460] sm:$0xf] %v763_v24  ;;  %v765_v25 = vld [vmem:[%s9601_s14 + $0x1190] sm:$0xf] }
  0xd7   : > { %v767_v26 = vld [vmem:[%s9601_s14 + $0x11a0] sm:$0xf]  ;;  %v769_v27 = vld [vmem:[%s9601_s14 + $0x11b0] sm:$0xf]  ;;  %766 = vst [vmem:[%s9605_s24 + $0x464] sm:$0xf] %v765_v25 }
  0xd8   : > { %768 = vst [vmem:[%s9605_s24 + $0x468] sm:$0xf] %v767_v26  ;;  %770 = vst [vmem:[%s9605_s24 + $0x46c] sm:$0xf] %v769_v27  ;;  %v771_v28 = vld [vmem:[%s9601_s14 + $0x11c0] sm:$0xf] }
  0xd9   : > { %v773_v29 = vld [vmem:[%s9601_s14 + $0x11d0] sm:$0xf]  ;;  %v775_v30 = vld [vmem:[%s9601_s14 + $0x11e0] sm:$0xf]  ;;  %772 = vst [vmem:[%s9605_s24 + $0x470] sm:$0xf] %v771_v28 }
  0xda   : > { %774 = vst [vmem:[%s9605_s24 + $0x474] sm:$0xf] %v773_v29  ;;  %776 = vst [vmem:[%s9605_s24 + $0x478] sm:$0xf] %v775_v30  ;;  %v777_v31 = vld [vmem:[%s9601_s14 + $0x11f0] sm:$0xf] }
  0xdb   : > { %v779_v32 = vld [vmem:[%s9601_s14 + $0x1200] sm:$0xf]  ;;  %v781_v33 = vld [vmem:[%s9601_s14 + $0x1210] sm:$0xf]  ;;  %778 = vst [vmem:[%s9605_s24 + $0x47c] sm:$0xf] %v777_v31 }
  0xdc   : > { %780 = vst [vmem:[%s9605_s24 + $0x480] sm:$0xf] %v779_v32  ;;  %782 = vst [vmem:[%s9605_s24 + $0x484] sm:$0xf] %v781_v33  ;;  %v783_v34 = vld [vmem:[%s9601_s14 + $0x1220] sm:$0xf] }
  0xdd   : > { %v785_v35 = vld [vmem:[%s9601_s14 + $0x1230] sm:$0xf]  ;;  %v787_v36 = vld [vmem:[%s9601_s14 + $0x1240] sm:$0xf]  ;;  %784 = vst [vmem:[%s9605_s24 + $0x488] sm:$0xf] %v783_v34 }
  0xde   : > { %786 = vst [vmem:[%s9605_s24 + $0x48c] sm:$0xf] %v785_v35  ;;  %788 = vst [vmem:[%s9605_s24 + $0x490] sm:$0xf] %v787_v36  ;;  %v789_v37 = vld [vmem:[%s9601_s14 + $0x1250] sm:$0xf] }
  0xdf   : > { %v791_v38 = vld [vmem:[%s9601_s14 + $0x1260] sm:$0xf]  ;;  %v793_v39 = vld [vmem:[%s9601_s14 + $0x1270] sm:$0xf]  ;;  %790 = vst [vmem:[%s9605_s24 + $0x494] sm:$0xf] %v789_v37 }
  0xe0   : > { %792 = vst [vmem:[%s9605_s24 + $0x498] sm:$0xf] %v791_v38  ;;  %794 = vst [vmem:[%s9605_s24 + $0x49c] sm:$0xf] %v793_v39  ;;  %v795_v40 = vld [vmem:[%s9601_s14 + $0x1280] sm:$0xf] }
  0xe1   : > { %v797_v41 = vld [vmem:[%s9601_s14 + $0x1290] sm:$0xf]  ;;  %v799_v42 = vld [vmem:[%s9601_s14 + $0x12a0] sm:$0xf]  ;;  %796 = vst [vmem:[%s9605_s24 + $0x4a0] sm:$0xf] %v795_v40 }
  0xe2   : > { %798 = vst [vmem:[%s9605_s24 + $0x4a4] sm:$0xf] %v797_v41  ;;  %800 = vst [vmem:[%s9605_s24 + $0x4a8] sm:$0xf] %v799_v42  ;;  %v801_v43 = vld [vmem:[%s9601_s14 + $0x12b0] sm:$0xf] }
  0xe3   : > { %v803_v44 = vld [vmem:[%s9601_s14 + $0x12c0] sm:$0xf]  ;;  %v805_v45 = vld [vmem:[%s9601_s14 + $0x12d0] sm:$0xf]  ;;  %802 = vst [vmem:[%s9605_s24 + $0x4ac] sm:$0xf] %v801_v43 }
  0xe4   : > { %804 = vst [vmem:[%s9605_s24 + $0x4b0] sm:$0xf] %v803_v44  ;;  %806 = vst [vmem:[%s9605_s24 + $0x4b4] sm:$0xf] %v805_v45  ;;  %v807_v46 = vld [vmem:[%s9601_s14 + $0x12e0] sm:$0xf] }
  0xe5   : > { %v809_v47 = vld [vmem:[%s9601_s14 + $0x12f0] sm:$0xf]  ;;  %v811_v48 = vld [vmem:[%s9601_s14 + $0x1300] sm:$0xf]  ;;  %808 = vst [vmem:[%s9605_s24 + $0x4b8] sm:$0xf] %v807_v46 }
  0xe6   : > { %810 = vst [vmem:[%s9605_s24 + $0x4bc] sm:$0xf] %v809_v47  ;;  %812 = vst [vmem:[%s9605_s24 + $0x4c0] sm:$0xf] %v811_v48  ;;  %v813_v49 = vld [vmem:[%s9601_s14 + $0x1310] sm:$0xf] }
  0xe7   : > { %v815_v50 = vld [vmem:[%s9601_s14 + $0x1320] sm:$0xf]  ;;  %v817_v51 = vld [vmem:[%s9601_s14 + $0x1330] sm:$0xf]  ;;  %814 = vst [vmem:[%s9605_s24 + $0x4c4] sm:$0xf] %v813_v49 }
  0xe8   : > { %816 = vst [vmem:[%s9605_s24 + $0x4c8] sm:$0xf] %v815_v50  ;;  %818 = vst [vmem:[%s9605_s24 + $0x4cc] sm:$0xf] %v817_v51  ;;  %v819_v52 = vld [vmem:[%s9601_s14 + $0x1340] sm:$0xf] }
  0xe9   : > { %v821_v53 = vld [vmem:[%s9601_s14 + $0x1350] sm:$0xf]  ;;  %v823_v54 = vld [vmem:[%s9601_s14 + $0x1360] sm:$0xf]  ;;  %820 = vst [vmem:[%s9605_s24 + $0x4d0] sm:$0xf] %v819_v52 }
  0xea   : > { %822 = vst [vmem:[%s9605_s24 + $0x4d4] sm:$0xf] %v821_v53  ;;  %824 = vst [vmem:[%s9605_s24 + $0x4d8] sm:$0xf] %v823_v54  ;;  %v825_v55 = vld [vmem:[%s9601_s14 + $0x1370] sm:$0xf] }
  0xeb   : > { %v827_v56 = vld [vmem:[%s9601_s14 + $0x1380] sm:$0xf]  ;;  %v829_v57 = vld [vmem:[%s9601_s14 + $0x1390] sm:$0xf]  ;;  %826 = vst [vmem:[%s9605_s24 + $0x4dc] sm:$0xf] %v825_v55 }
  0xec   : > { %828 = vst [vmem:[%s9605_s24 + $0x4e0] sm:$0xf] %v827_v56  ;;  %830 = vst [vmem:[%s9605_s24 + $0x4e4] sm:$0xf] %v829_v57  ;;  %v831_v58 = vld [vmem:[%s9601_s14 + $0x13a0] sm:$0xf] }
  0xed   : > { %v833_v59 = vld [vmem:[%s9601_s14 + $0x13b0] sm:$0xf]  ;;  %v835_v60 = vld [vmem:[%s9601_s14 + $0x13c0] sm:$0xf]  ;;  %832 = vst [vmem:[%s9605_s24 + $0x4e8] sm:$0xf] %v831_v58 }
  0xee   : > { %834 = vst [vmem:[%s9605_s24 + $0x4ec] sm:$0xf] %v833_v59  ;;  %836 = vst [vmem:[%s9605_s24 + $0x4f0] sm:$0xf] %v835_v60  ;;  %v837_v61 = vld [vmem:[%s9601_s14 + $0x13d0] sm:$0xf] }
  0xef   : > { %v839_v62 = vld [vmem:[%s9601_s14 + $0x13e0] sm:$0xf]  ;;  %v841_v63 = vld [vmem:[%s9601_s14 + $0x13f0] sm:$0xf]  ;;  %838 = vst [vmem:[%s9605_s24 + $0x4f4] sm:$0xf] %v837_v61 }
  0xf0   : > { %840 = vst [vmem:[%s9605_s24 + $0x4f8] sm:$0xf] %v839_v62  ;;  %842 = vst [vmem:[%s9605_s24 + $0x4fc] sm:$0xf] %v841_v63  ;;  %v843_v0 = vld [vmem:[%s9601_s14 + $0x1400] sm:$0xf] }
  0xf1   : > { %v845_v1 = vld [vmem:[%s9601_s14 + $0x1410] sm:$0xf]  ;;  %v847_v2 = vld [vmem:[%s9601_s14 + $0x1420] sm:$0xf]  ;;  %844 = vst [vmem:[%s9605_s24 + $0x500] sm:$0xf] %v843_v0 }
  0xf2   : > { %846 = vst [vmem:[%s9605_s24 + $0x504] sm:$0xf] %v845_v1  ;;  %848 = vst [vmem:[%s9605_s24 + $0x508] sm:$0xf] %v847_v2  ;;  %v849_v3 = vld [vmem:[%s9601_s14 + $0x1430] sm:$0xf] }
  0xf3   : > { %v851_v4 = vld [vmem:[%s9601_s14 + $0x1440] sm:$0xf]  ;;  %v853_v5 = vld [vmem:[%s9601_s14 + $0x1450] sm:$0xf]  ;;  %850 = vst [vmem:[%s9605_s24 + $0x50c] sm:$0xf] %v849_v3 }
  0xf4   : > { %852 = vst [vmem:[%s9605_s24 + $0x510] sm:$0xf] %v851_v4  ;;  %854 = vst [vmem:[%s9605_s24 + $0x514] sm:$0xf] %v853_v5  ;;  %v855_v6 = vld [vmem:[%s9601_s14 + $0x1460] sm:$0xf] }
  0xf5   : > { %v857_v7 = vld [vmem:[%s9601_s14 + $0x1470] sm:$0xf]  ;;  %v859_v8 = vld [vmem:[%s9601_s14 + $0x1480] sm:$0xf]  ;;  %856 = vst [vmem:[%s9605_s24 + $0x518] sm:$0xf] %v855_v6 }
  0xf6   : > { %858 = vst [vmem:[%s9605_s24 + $0x51c] sm:$0xf] %v857_v7  ;;  %860 = vst [vmem:[%s9605_s24 + $0x520] sm:$0xf] %v859_v8  ;;  %v861_v9 = vld [vmem:[%s9601_s14 + $0x1490] sm:$0xf] }
  0xf7   : > { %v863_v10 = vld [vmem:[%s9601_s14 + $0x14a0] sm:$0xf]  ;;  %v865_v11 = vld [vmem:[%s9601_s14 + $0x14b0] sm:$0xf]  ;;  %862 = vst [vmem:[%s9605_s24 + $0x524] sm:$0xf] %v861_v9 }
  0xf8   : > { %864 = vst [vmem:[%s9605_s24 + $0x528] sm:$0xf] %v863_v10  ;;  %866 = vst [vmem:[%s9605_s24 + $0x52c] sm:$0xf] %v865_v11  ;;  %v867_v12 = vld [vmem:[%s9601_s14 + $0x14c0] sm:$0xf] }
  0xf9   : > { %v869_v13 = vld [vmem:[%s9601_s14 + $0x14d0] sm:$0xf]  ;;  %v871_v14 = vld [vmem:[%s9601_s14 + $0x14e0] sm:$0xf]  ;;  %868 = vst [vmem:[%s9605_s24 + $0x530] sm:$0xf] %v867_v12 }
  0xfa   : > { %870 = vst [vmem:[%s9605_s24 + $0x534] sm:$0xf] %v869_v13  ;;  %872 = vst [vmem:[%s9605_s24 + $0x538] sm:$0xf] %v871_v14  ;;  %v873_v15 = vld [vmem:[%s9601_s14 + $0x14f0] sm:$0xf] }
  0xfb   : > { %v875_v16 = vld [vmem:[%s9601_s14 + $0x1500] sm:$0xf]  ;;  %v877_v17 = vld [vmem:[%s9601_s14 + $0x1510] sm:$0xf]  ;;  %874 = vst [vmem:[%s9605_s24 + $0x53c] sm:$0xf] %v873_v15 }
  0xfc   : > { %876 = vst [vmem:[%s9605_s24 + $0x540] sm:$0xf] %v875_v16  ;;  %878 = vst [vmem:[%s9605_s24 + $0x544] sm:$0xf] %v877_v17  ;;  %v879_v18 = vld [vmem:[%s9601_s14 + $0x1520] sm:$0xf] }
  0xfd   : > { %v881_v19 = vld [vmem:[%s9601_s14 + $0x1530] sm:$0xf]  ;;  %v883_v20 = vld [vmem:[%s9601_s14 + $0x1540] sm:$0xf]  ;;  %880 = vst [vmem:[%s9605_s24 + $0x548] sm:$0xf] %v879_v18 }
  0xfe   : > { %882 = vst [vmem:[%s9605_s24 + $0x54c] sm:$0xf] %v881_v19  ;;  %884 = vst [vmem:[%s9605_s24 + $0x550] sm:$0xf] %v883_v20  ;;  %v885_v21 = vld [vmem:[%s9601_s14 + $0x1550] sm:$0xf] }
  0xff   : > { %v887_v22 = vld [vmem:[%s9601_s14 + $0x1560] sm:$0xf]  ;;  %v889_v23 = vld [vmem:[%s9601_s14 + $0x1570] sm:$0xf]  ;;  %886 = vst [vmem:[%s9605_s24 + $0x554] sm:$0xf] %v885_v21 }
 0x100   : > { %888 = vst [vmem:[%s9605_s24 + $0x558] sm:$0xf] %v887_v22  ;;  %890 = vst [vmem:[%s9605_s24 + $0x55c] sm:$0xf] %v889_v23  ;;  %v891_v24 = vld [vmem:[%s9601_s14 + $0x1580] sm:$0xf] }
 0x101   : > { %v893_v25 = vld [vmem:[%s9601_s14 + $0x1590] sm:$0xf]  ;;  %v895_v26 = vld [vmem:[%s9601_s14 + $0x15a0] sm:$0xf]  ;;  %892 = vst [vmem:[%s9605_s24 + $0x560] sm:$0xf] %v891_v24 }
 0x102   : > { %894 = vst [vmem:[%s9605_s24 + $0x564] sm:$0xf] %v893_v25  ;;  %896 = vst [vmem:[%s9605_s24 + $0x568] sm:$0xf] %v895_v26  ;;  %v897_v27 = vld [vmem:[%s9601_s14 + $0x15b0] sm:$0xf] }
 0x103   : > { %v899_v28 = vld [vmem:[%s9601_s14 + $0x15c0] sm:$0xf]  ;;  %v901_v29 = vld [vmem:[%s9601_s14 + $0x15d0] sm:$0xf]  ;;  %898 = vst [vmem:[%s9605_s24 + $0x56c] sm:$0xf] %v897_v27 }
 0x104   : > { %900 = vst [vmem:[%s9605_s24 + $0x570] sm:$0xf] %v899_v28  ;;  %902 = vst [vmem:[%s9605_s24 + $0x574] sm:$0xf] %v901_v29  ;;  %v903_v30 = vld [vmem:[%s9601_s14 + $0x15e0] sm:$0xf] }
 0x105   : > { %v905_v31 = vld [vmem:[%s9601_s14 + $0x15f0] sm:$0xf]  ;;  %v907_v32 = vld [vmem:[%s9601_s14 + $0x1600] sm:$0xf]  ;;  %904 = vst [vmem:[%s9605_s24 + $0x578] sm:$0xf] %v903_v30 }
 0x106   : > { %906 = vst [vmem:[%s9605_s24 + $0x57c] sm:$0xf] %v905_v31  ;;  %908 = vst [vmem:[%s9605_s24 + $0x580] sm:$0xf] %v907_v32  ;;  %v909_v33 = vld [vmem:[%s9601_s14 + $0x1610] sm:$0xf] }
 0x107   : > { %v911_v34 = vld [vmem:[%s9601_s14 + $0x1620] sm:$0xf]  ;;  %v913_v35 = vld [vmem:[%s9601_s14 + $0x1630] sm:$0xf]  ;;  %910 = vst [vmem:[%s9605_s24 + $0x584] sm:$0xf] %v909_v33 }
 0x108   : > { %912 = vst [vmem:[%s9605_s24 + $0x588] sm:$0xf] %v911_v34  ;;  %914 = vst [vmem:[%s9605_s24 + $0x58c] sm:$0xf] %v913_v35  ;;  %v915_v36 = vld [vmem:[%s9601_s14 + $0x1640] sm:$0xf] }
 0x109   : > { %v917_v37 = vld [vmem:[%s9601_s14 + $0x1650] sm:$0xf]  ;;  %v919_v38 = vld [vmem:[%s9601_s14 + $0x1660] sm:$0xf]  ;;  %916 = vst [vmem:[%s9605_s24 + $0x590] sm:$0xf] %v915_v36 }
 0x10a   : > { %918 = vst [vmem:[%s9605_s24 + $0x594] sm:$0xf] %v917_v37  ;;  %920 = vst [vmem:[%s9605_s24 + $0x598] sm:$0xf] %v919_v38  ;;  %v921_v39 = vld [vmem:[%s9601_s14 + $0x1670] sm:$0xf] }
 0x10b   : > { %v923_v40 = vld [vmem:[%s9601_s14 + $0x1680] sm:$0xf]  ;;  %v925_v41 = vld [vmem:[%s9601_s14 + $0x1690] sm:$0xf]  ;;  %922 = vst [vmem:[%s9605_s24 + $0x59c] sm:$0xf] %v921_v39 }
 0x10c   : > { %924 = vst [vmem:[%s9605_s24 + $0x5a0] sm:$0xf] %v923_v40  ;;  %926 = vst [vmem:[%s9605_s24 + $0x5a4] sm:$0xf] %v925_v41  ;;  %v927_v42 = vld [vmem:[%s9601_s14 + $0x16a0] sm:$0xf] }
 0x10d   : > { %v929_v43 = vld [vmem:[%s9601_s14 + $0x16b0] sm:$0xf]  ;;  %v931_v44 = vld [vmem:[%s9601_s14 + $0x16c0] sm:$0xf]  ;;  %928 = vst [vmem:[%s9605_s24 + $0x5a8] sm:$0xf] %v927_v42 }
 0x10e   : > { %930 = vst [vmem:[%s9605_s24 + $0x5ac] sm:$0xf] %v929_v43  ;;  %932 = vst [vmem:[%s9605_s24 + $0x5b0] sm:$0xf] %v931_v44  ;;  %v933_v45 = vld [vmem:[%s9601_s14 + $0x16d0] sm:$0xf] }
 0x10f   : > { %v935_v46 = vld [vmem:[%s9601_s14 + $0x16e0] sm:$0xf]  ;;  %v937_v47 = vld [vmem:[%s9601_s14 + $0x16f0] sm:$0xf]  ;;  %934 = vst [vmem:[%s9605_s24 + $0x5b4] sm:$0xf] %v933_v45 }
 0x110   : > { %936 = vst [vmem:[%s9605_s24 + $0x5b8] sm:$0xf] %v935_v46  ;;  %938 = vst [vmem:[%s9605_s24 + $0x5bc] sm:$0xf] %v937_v47  ;;  %v939_v48 = vld [vmem:[%s9601_s14 + $0x1700] sm:$0xf] }
 0x111   : > { %v941_v49 = vld [vmem:[%s9601_s14 + $0x1710] sm:$0xf]  ;;  %v943_v50 = vld [vmem:[%s9601_s14 + $0x1720] sm:$0xf]  ;;  %940 = vst [vmem:[%s9605_s24 + $0x5c0] sm:$0xf] %v939_v48 }
 0x112   : > { %942 = vst [vmem:[%s9605_s24 + $0x5c4] sm:$0xf] %v941_v49  ;;  %944 = vst [vmem:[%s9605_s24 + $0x5c8] sm:$0xf] %v943_v50  ;;  %v945_v51 = vld [vmem:[%s9601_s14 + $0x1730] sm:$0xf] }
 0x113   : > { %v947_v52 = vld [vmem:[%s9601_s14 + $0x1740] sm:$0xf]  ;;  %v949_v53 = vld [vmem:[%s9601_s14 + $0x1750] sm:$0xf]  ;;  %946 = vst [vmem:[%s9605_s24 + $0x5cc] sm:$0xf] %v945_v51 }
 0x114   : > { %948 = vst [vmem:[%s9605_s24 + $0x5d0] sm:$0xf] %v947_v52  ;;  %950 = vst [vmem:[%s9605_s24 + $0x5d4] sm:$0xf] %v949_v53  ;;  %v951_v54 = vld [vmem:[%s9601_s14 + $0x1760] sm:$0xf] }
 0x115   : > { %v953_v55 = vld [vmem:[%s9601_s14 + $0x1770] sm:$0xf]  ;;  %v955_v56 = vld [vmem:[%s9601_s14 + $0x1780] sm:$0xf]  ;;  %952 = vst [vmem:[%s9605_s24 + $0x5d8] sm:$0xf] %v951_v54 }
 0x116   : > { %954 = vst [vmem:[%s9605_s24 + $0x5dc] sm:$0xf] %v953_v55  ;;  %956 = vst [vmem:[%s9605_s24 + $0x5e0] sm:$0xf] %v955_v56  ;;  %v957_v57 = vld [vmem:[%s9601_s14 + $0x1790] sm:$0xf] }
 0x117   : > { %v959_v58 = vld [vmem:[%s9601_s14 + $0x17a0] sm:$0xf]  ;;  %v961_v59 = vld [vmem:[%s9601_s14 + $0x17b0] sm:$0xf]  ;;  %958 = vst [vmem:[%s9605_s24 + $0x5e4] sm:$0xf] %v957_v57 }
 0x118   : > { %960 = vst [vmem:[%s9605_s24 + $0x5e8] sm:$0xf] %v959_v58  ;;  %962 = vst [vmem:[%s9605_s24 + $0x5ec] sm:$0xf] %v961_v59  ;;  %v963_v60 = vld [vmem:[%s9601_s14 + $0x17c0] sm:$0xf] }
 0x119   : > { %v965_v61 = vld [vmem:[%s9601_s14 + $0x17d0] sm:$0xf]  ;;  %v967_v62 = vld [vmem:[%s9601_s14 + $0x17e0] sm:$0xf]  ;;  %964 = vst [vmem:[%s9605_s24 + $0x5f0] sm:$0xf] %v963_v60 }
 0x11a   : > { %966 = vst [vmem:[%s9605_s24 + $0x5f4] sm:$0xf] %v965_v61  ;;  %968 = vst [vmem:[%s9605_s24 + $0x5f8] sm:$0xf] %v967_v62  ;;  %v969_v63 = vld [vmem:[%s9601_s14 + $0x17f0] sm:$0xf] }
 0x11b   : > { %v971_v0 = vld [vmem:[%s9601_s14 + $0x1800] sm:$0xf]  ;;  %v973_v1 = vld [vmem:[%s9601_s14 + $0x1810] sm:$0xf]  ;;  %970 = vst [vmem:[%s9605_s24 + $0x5fc] sm:$0xf] %v969_v63 }
 0x11c   : > { %972 = vst [vmem:[%s9605_s24 + $0x600] sm:$0xf] %v971_v0  ;;  %974 = vst [vmem:[%s9605_s24 + $0x604] sm:$0xf] %v973_v1  ;;  %v975_v2 = vld [vmem:[%s9601_s14 + $0x1820] sm:$0xf] }
 0x11d   : > { %v977_v3 = vld [vmem:[%s9601_s14 + $0x1830] sm:$0xf]  ;;  %v979_v4 = vld [vmem:[%s9601_s14 + $0x1840] sm:$0xf]  ;;  %976 = vst [vmem:[%s9605_s24 + $0x608] sm:$0xf] %v975_v2 }
 0x11e   : > { %978 = vst [vmem:[%s9605_s24 + $0x60c] sm:$0xf] %v977_v3  ;;  %980 = vst [vmem:[%s9605_s24 + $0x610] sm:$0xf] %v979_v4  ;;  %v981_v5 = vld [vmem:[%s9601_s14 + $0x1850] sm:$0xf] }
 0x11f   : > { %v983_v6 = vld [vmem:[%s9601_s14 + $0x1860] sm:$0xf]  ;;  %v985_v7 = vld [vmem:[%s9601_s14 + $0x1870] sm:$0xf]  ;;  %982 = vst [vmem:[%s9605_s24 + $0x614] sm:$0xf] %v981_v5 }
 0x120   : > { %984 = vst [vmem:[%s9605_s24 + $0x618] sm:$0xf] %v983_v6  ;;  %986 = vst [vmem:[%s9605_s24 + $0x61c] sm:$0xf] %v985_v7  ;;  %v987_v8 = vld [vmem:[%s9601_s14 + $0x1880] sm:$0xf] }
 0x121   : > { %v989_v9 = vld [vmem:[%s9601_s14 + $0x1890] sm:$0xf]  ;;  %v991_v10 = vld [vmem:[%s9601_s14 + $0x18a0] sm:$0xf]  ;;  %988 = vst [vmem:[%s9605_s24 + $0x620] sm:$0xf] %v987_v8 }
 0x122   : > { %990 = vst [vmem:[%s9605_s24 + $0x624] sm:$0xf] %v989_v9  ;;  %992 = vst [vmem:[%s9605_s24 + $0x628] sm:$0xf] %v991_v10  ;;  %v993_v11 = vld [vmem:[%s9601_s14 + $0x18b0] sm:$0xf] }
 0x123   : > { %v995_v12 = vld [vmem:[%s9601_s14 + $0x18c0] sm:$0xf]  ;;  %v997_v13 = vld [vmem:[%s9601_s14 + $0x18d0] sm:$0xf]  ;;  %994 = vst [vmem:[%s9605_s24 + $0x62c] sm:$0xf] %v993_v11 }
 0x124   : > { %996 = vst [vmem:[%s9605_s24 + $0x630] sm:$0xf] %v995_v12  ;;  %998 = vst [vmem:[%s9605_s24 + $0x634] sm:$0xf] %v997_v13  ;;  %v999_v14 = vld [vmem:[%s9601_s14 + $0x18e0] sm:$0xf] }
 0x125   : > { %v1001_v15 = vld [vmem:[%s9601_s14 + $0x18f0] sm:$0xf]  ;;  %v1003_v16 = vld [vmem:[%s9601_s14 + $0x1900] sm:$0xf]  ;;  %1000 = vst [vmem:[%s9605_s24 + $0x638] sm:$0xf] %v999_v14 }
 0x126   : > { %1002 = vst [vmem:[%s9605_s24 + $0x63c] sm:$0xf] %v1001_v15  ;;  %1004 = vst [vmem:[%s9605_s24 + $0x640] sm:$0xf] %v1003_v16  ;;  %v1005_v17 = vld [vmem:[%s9601_s14 + $0x1910] sm:$0xf] }
 0x127   : > { %v1007_v18 = vld [vmem:[%s9601_s14 + $0x1920] sm:$0xf]  ;;  %v1009_v19 = vld [vmem:[%s9601_s14 + $0x1930] sm:$0xf]  ;;  %1006 = vst [vmem:[%s9605_s24 + $0x644] sm:$0xf] %v1005_v17 }
 0x128   : > { %1008 = vst [vmem:[%s9605_s24 + $0x648] sm:$0xf] %v1007_v18  ;;  %1010 = vst [vmem:[%s9605_s24 + $0x64c] sm:$0xf] %v1009_v19  ;;  %v1011_v20 = vld [vmem:[%s9601_s14 + $0x1940] sm:$0xf] }
 0x129   : > { %v1013_v21 = vld [vmem:[%s9601_s14 + $0x1950] sm:$0xf]  ;;  %v1015_v22 = vld [vmem:[%s9601_s14 + $0x1960] sm:$0xf]  ;;  %1012 = vst [vmem:[%s9605_s24 + $0x650] sm:$0xf] %v1011_v20 }
 0x12a   : > { %1014 = vst [vmem:[%s9605_s24 + $0x654] sm:$0xf] %v1013_v21  ;;  %1016 = vst [vmem:[%s9605_s24 + $0x658] sm:$0xf] %v1015_v22  ;;  %v1017_v23 = vld [vmem:[%s9601_s14 + $0x1970] sm:$0xf] }
 0x12b   : > { %v1019_v24 = vld [vmem:[%s9601_s14 + $0x1980] sm:$0xf]  ;;  %v1021_v25 = vld [vmem:[%s9601_s14 + $0x1990] sm:$0xf]  ;;  %1018 = vst [vmem:[%s9605_s24 + $0x65c] sm:$0xf] %v1017_v23 }
 0x12c   : > { %1020 = vst [vmem:[%s9605_s24 + $0x660] sm:$0xf] %v1019_v24  ;;  %1022 = vst [vmem:[%s9605_s24 + $0x664] sm:$0xf] %v1021_v25  ;;  %v1023_v26 = vld [vmem:[%s9601_s14 + $0x19a0] sm:$0xf] }
 0x12d   : > { %v1025_v27 = vld [vmem:[%s9601_s14 + $0x19b0] sm:$0xf]  ;;  %v1027_v28 = vld [vmem:[%s9601_s14 + $0x19c0] sm:$0xf]  ;;  %1024 = vst [vmem:[%s9605_s24 + $0x668] sm:$0xf] %v1023_v26 }
 0x12e   : > { %1026 = vst [vmem:[%s9605_s24 + $0x66c] sm:$0xf] %v1025_v27  ;;  %1028 = vst [vmem:[%s9605_s24 + $0x670] sm:$0xf] %v1027_v28  ;;  %v1029_v29 = vld [vmem:[%s9601_s14 + $0x19d0] sm:$0xf] }
 0x12f   : > { %v1031_v30 = vld [vmem:[%s9601_s14 + $0x19e0] sm:$0xf]  ;;  %v1033_v31 = vld [vmem:[%s9601_s14 + $0x19f0] sm:$0xf]  ;;  %1030 = vst [vmem:[%s9605_s24 + $0x674] sm:$0xf] %v1029_v29 }
 0x130   : > { %1032 = vst [vmem:[%s9605_s24 + $0x678] sm:$0xf] %v1031_v30  ;;  %1034 = vst [vmem:[%s9605_s24 + $0x67c] sm:$0xf] %v1033_v31  ;;  %v1035_v32 = vld [vmem:[%s9601_s14 + $0x1a00] sm:$0xf] }
 0x131   : > { %v1037_v33 = vld [vmem:[%s9601_s14 + $0x1a10] sm:$0xf]  ;;  %v1039_v34 = vld [vmem:[%s9601_s14 + $0x1a20] sm:$0xf]  ;;  %1036 = vst [vmem:[%s9605_s24 + $0x680] sm:$0xf] %v1035_v32 }
 0x132   : > { %1038 = vst [vmem:[%s9605_s24 + $0x684] sm:$0xf] %v1037_v33  ;;  %1040 = vst [vmem:[%s9605_s24 + $0x688] sm:$0xf] %v1039_v34  ;;  %v1041_v35 = vld [vmem:[%s9601_s14 + $0x1a30] sm:$0xf] }
 0x133   : > { %v1043_v36 = vld [vmem:[%s9601_s14 + $0x1a40] sm:$0xf]  ;;  %v1045_v37 = vld [vmem:[%s9601_s14 + $0x1a50] sm:$0xf]  ;;  %1042 = vst [vmem:[%s9605_s24 + $0x68c] sm:$0xf] %v1041_v35 }
 0x134   : > { %1044 = vst [vmem:[%s9605_s24 + $0x690] sm:$0xf] %v1043_v36  ;;  %1046 = vst [vmem:[%s9605_s24 + $0x694] sm:$0xf] %v1045_v37  ;;  %v1047_v38 = vld [vmem:[%s9601_s14 + $0x1a60] sm:$0xf] }
 0x135   : > { %v1049_v39 = vld [vmem:[%s9601_s14 + $0x1a70] sm:$0xf]  ;;  %v1051_v40 = vld [vmem:[%s9601_s14 + $0x1a80] sm:$0xf]  ;;  %1048 = vst [vmem:[%s9605_s24 + $0x698] sm:$0xf] %v1047_v38 }
 0x136   : > { %1050 = vst [vmem:[%s9605_s24 + $0x69c] sm:$0xf] %v1049_v39  ;;  %1052 = vst [vmem:[%s9605_s24 + $0x6a0] sm:$0xf] %v1051_v40  ;;  %v1053_v41 = vld [vmem:[%s9601_s14 + $0x1a90] sm:$0xf] }
 0x137   : > { %v1055_v42 = vld [vmem:[%s9601_s14 + $0x1aa0] sm:$0xf]  ;;  %v1057_v43 = vld [vmem:[%s9601_s14 + $0x1ab0] sm:$0xf]  ;;  %1054 = vst [vmem:[%s9605_s24 + $0x6a4] sm:$0xf] %v1053_v41 }
 0x138   : > { %1056 = vst [vmem:[%s9605_s24 + $0x6a8] sm:$0xf] %v1055_v42  ;;  %1058 = vst [vmem:[%s9605_s24 + $0x6ac] sm:$0xf] %v1057_v43  ;;  %v1059_v44 = vld [vmem:[%s9601_s14 + $0x1ac0] sm:$0xf] }
 0x139   : > { %v1061_v45 = vld [vmem:[%s9601_s14 + $0x1ad0] sm:$0xf]  ;;  %v1063_v46 = vld [vmem:[%s9601_s14 + $0x1ae0] sm:$0xf]  ;;  %1060 = vst [vmem:[%s9605_s24 + $0x6b0] sm:$0xf] %v1059_v44 }
 0x13a   : > { %1062 = vst [vmem:[%s9605_s24 + $0x6b4] sm:$0xf] %v1061_v45  ;;  %1064 = vst [vmem:[%s9605_s24 + $0x6b8] sm:$0xf] %v1063_v46  ;;  %v1065_v47 = vld [vmem:[%s9601_s14 + $0x1af0] sm:$0xf] }
 0x13b   : > { %v1067_v48 = vld [vmem:[%s9601_s14 + $0x1b00] sm:$0xf]  ;;  %v1069_v49 = vld [vmem:[%s9601_s14 + $0x1b10] sm:$0xf]  ;;  %1066 = vst [vmem:[%s9605_s24 + $0x6bc] sm:$0xf] %v1065_v47 }
 0x13c   : > { %1068 = vst [vmem:[%s9605_s24 + $0x6c0] sm:$0xf] %v1067_v48  ;;  %1070 = vst [vmem:[%s9605_s24 + $0x6c4] sm:$0xf] %v1069_v49  ;;  %v1071_v50 = vld [vmem:[%s9601_s14 + $0x1b20] sm:$0xf] }
 0x13d   : > { %v1073_v51 = vld [vmem:[%s9601_s14 + $0x1b30] sm:$0xf]  ;;  %v1075_v52 = vld [vmem:[%s9601_s14 + $0x1b40] sm:$0xf]  ;;  %1072 = vst [vmem:[%s9605_s24 + $0x6c8] sm:$0xf] %v1071_v50 }
 0x13e   : > { %1074 = vst [vmem:[%s9605_s24 + $0x6cc] sm:$0xf] %v1073_v51  ;;  %1076 = vst [vmem:[%s9605_s24 + $0x6d0] sm:$0xf] %v1075_v52  ;;  %v1077_v53 = vld [vmem:[%s9601_s14 + $0x1b50] sm:$0xf] }
 0x13f   : > { %v1079_v54 = vld [vmem:[%s9601_s14 + $0x1b60] sm:$0xf]  ;;  %v1081_v55 = vld [vmem:[%s9601_s14 + $0x1b70] sm:$0xf]  ;;  %1078 = vst [vmem:[%s9605_s24 + $0x6d4] sm:$0xf] %v1077_v53 }
 0x140   : > { %1080 = vst [vmem:[%s9605_s24 + $0x6d8] sm:$0xf] %v1079_v54  ;;  %1082 = vst [vmem:[%s9605_s24 + $0x6dc] sm:$0xf] %v1081_v55  ;;  %v1083_v56 = vld [vmem:[%s9601_s14 + $0x1b80] sm:$0xf] }
 0x141   : > { %v1085_v57 = vld [vmem:[%s9601_s14 + $0x1b90] sm:$0xf]  ;;  %v1087_v58 = vld [vmem:[%s9601_s14 + $0x1ba0] sm:$0xf]  ;;  %1084 = vst [vmem:[%s9605_s24 + $0x6e0] sm:$0xf] %v1083_v56 }
 0x142   : > { %1086 = vst [vmem:[%s9605_s24 + $0x6e4] sm:$0xf] %v1085_v57  ;;  %1088 = vst [vmem:[%s9605_s24 + $0x6e8] sm:$0xf] %v1087_v58  ;;  %v1089_v59 = vld [vmem:[%s9601_s14 + $0x1bb0] sm:$0xf] }
 0x143   : > { %v1091_v60 = vld [vmem:[%s9601_s14 + $0x1bc0] sm:$0xf]  ;;  %v1093_v61 = vld [vmem:[%s9601_s14 + $0x1bd0] sm:$0xf]  ;;  %1090 = vst [vmem:[%s9605_s24 + $0x6ec] sm:$0xf] %v1089_v59 }
 0x144   : > { %1092 = vst [vmem:[%s9605_s24 + $0x6f0] sm:$0xf] %v1091_v60  ;;  %1094 = vst [vmem:[%s9605_s24 + $0x6f4] sm:$0xf] %v1093_v61  ;;  %v1095_v62 = vld [vmem:[%s9601_s14 + $0x1be0] sm:$0xf] }
 0x145   : > { %v1097_v63 = vld [vmem:[%s9601_s14 + $0x1bf0] sm:$0xf]  ;;  %v1099_v0 = vld [vmem:[%s9601_s14 + $0x1c00] sm:$0xf]  ;;  %1096 = vst [vmem:[%s9605_s24 + $0x6f8] sm:$0xf] %v1095_v62 }
 0x146   : > { %1098 = vst [vmem:[%s9605_s24 + $0x6fc] sm:$0xf] %v1097_v63  ;;  %1100 = vst [vmem:[%s9605_s24 + $0x700] sm:$0xf] %v1099_v0  ;;  %v1101_v1 = vld [vmem:[%s9601_s14 + $0x1c10] sm:$0xf] }
 0x147   : > { %v1103_v2 = vld [vmem:[%s9601_s14 + $0x1c20] sm:$0xf]  ;;  %v1105_v3 = vld [vmem:[%s9601_s14 + $0x1c30] sm:$0xf]  ;;  %1102 = vst [vmem:[%s9605_s24 + $0x704] sm:$0xf] %v1101_v1 }
 0x148   : > { %1104 = vst [vmem:[%s9605_s24 + $0x708] sm:$0xf] %v1103_v2  ;;  %1106 = vst [vmem:[%s9605_s24 + $0x70c] sm:$0xf] %v1105_v3  ;;  %v1107_v4 = vld [vmem:[%s9601_s14 + $0x1c40] sm:$0xf] }
 0x149   : > { %v1109_v5 = vld [vmem:[%s9601_s14 + $0x1c50] sm:$0xf]  ;;  %v1111_v6 = vld [vmem:[%s9601_s14 + $0x1c60] sm:$0xf]  ;;  %1108 = vst [vmem:[%s9605_s24 + $0x710] sm:$0xf] %v1107_v4 }
 0x14a   : > { %1110 = vst [vmem:[%s9605_s24 + $0x714] sm:$0xf] %v1109_v5  ;;  %1112 = vst [vmem:[%s9605_s24 + $0x718] sm:$0xf] %v1111_v6  ;;  %v1113_v7 = vld [vmem:[%s9601_s14 + $0x1c70] sm:$0xf] }
 0x14b   : > { %v1115_v8 = vld [vmem:[%s9601_s14 + $0x1c80] sm:$0xf]  ;;  %v1117_v9 = vld [vmem:[%s9601_s14 + $0x1c90] sm:$0xf]  ;;  %1114 = vst [vmem:[%s9605_s24 + $0x71c] sm:$0xf] %v1113_v7 }
 0x14c   : > { %1116 = vst [vmem:[%s9605_s24 + $0x720] sm:$0xf] %v1115_v8  ;;  %1118 = vst [vmem:[%s9605_s24 + $0x724] sm:$0xf] %v1117_v9  ;;  %v1119_v10 = vld [vmem:[%s9601_s14 + $0x1ca0] sm:$0xf] }
 0x14d   : > { %v1121_v11 = vld [vmem:[%s9601_s14 + $0x1cb0] sm:$0xf]  ;;  %v1123_v12 = vld [vmem:[%s9601_s14 + $0x1cc0] sm:$0xf]  ;;  %1120 = vst [vmem:[%s9605_s24 + $0x728] sm:$0xf] %v1119_v10 }
 0x14e   : > { %1122 = vst [vmem:[%s9605_s24 + $0x72c] sm:$0xf] %v1121_v11  ;;  %1124 = vst [vmem:[%s9605_s24 + $0x730] sm:$0xf] %v1123_v12  ;;  %v1125_v13 = vld [vmem:[%s9601_s14 + $0x1cd0] sm:$0xf] }
 0x14f   : > { %v1127_v14 = vld [vmem:[%s9601_s14 + $0x1ce0] sm:$0xf]  ;;  %v1129_v15 = vld [vmem:[%s9601_s14 + $0x1cf0] sm:$0xf]  ;;  %1126 = vst [vmem:[%s9605_s24 + $0x734] sm:$0xf] %v1125_v13 }
 0x150   : > { %1128 = vst [vmem:[%s9605_s24 + $0x738] sm:$0xf] %v1127_v14  ;;  %1130 = vst [vmem:[%s9605_s24 + $0x73c] sm:$0xf] %v1129_v15  ;;  %v1131_v16 = vld [vmem:[%s9601_s14 + $0x1d00] sm:$0xf] }
 0x151   : > { %v1133_v17 = vld [vmem:[%s9601_s14 + $0x1d10] sm:$0xf]  ;;  %v1135_v18 = vld [vmem:[%s9601_s14 + $0x1d20] sm:$0xf]  ;;  %1132 = vst [vmem:[%s9605_s24 + $0x740] sm:$0xf] %v1131_v16 }
 0x152   : > { %1134 = vst [vmem:[%s9605_s24 + $0x744] sm:$0xf] %v1133_v17  ;;  %1136 = vst [vmem:[%s9605_s24 + $0x748] sm:$0xf] %v1135_v18  ;;  %v1137_v19 = vld [vmem:[%s9601_s14 + $0x1d30] sm:$0xf] }
 0x153   : > { %v1139_v20 = vld [vmem:[%s9601_s14 + $0x1d40] sm:$0xf]  ;;  %v1141_v21 = vld [vmem:[%s9601_s14 + $0x1d50] sm:$0xf]  ;;  %1138 = vst [vmem:[%s9605_s24 + $0x74c] sm:$0xf] %v1137_v19 }
 0x154   : > { %1140 = vst [vmem:[%s9605_s24 + $0x750] sm:$0xf] %v1139_v20  ;;  %1142 = vst [vmem:[%s9605_s24 + $0x754] sm:$0xf] %v1141_v21  ;;  %v1143_v22 = vld [vmem:[%s9601_s14 + $0x1d60] sm:$0xf] }
 0x155   : > { %v1145_v23 = vld [vmem:[%s9601_s14 + $0x1d70] sm:$0xf]  ;;  %v1147_v24 = vld [vmem:[%s9601_s14 + $0x1d80] sm:$0xf]  ;;  %1144 = vst [vmem:[%s9605_s24 + $0x758] sm:$0xf] %v1143_v22 }
 0x156   : > { %1146 = vst [vmem:[%s9605_s24 + $0x75c] sm:$0xf] %v1145_v23  ;;  %1148 = vst [vmem:[%s9605_s24 + $0x760] sm:$0xf] %v1147_v24  ;;  %v1149_v25 = vld [vmem:[%s9601_s14 + $0x1d90] sm:$0xf] }
 0x157   : > { %v1151_v26 = vld [vmem:[%s9601_s14 + $0x1da0] sm:$0xf]  ;;  %v1153_v27 = vld [vmem:[%s9601_s14 + $0x1db0] sm:$0xf]  ;;  %1150 = vst [vmem:[%s9605_s24 + $0x764] sm:$0xf] %v1149_v25 }
 0x158   : > { %1152 = vst [vmem:[%s9605_s24 + $0x768] sm:$0xf] %v1151_v26  ;;  %1154 = vst [vmem:[%s9605_s24 + $0x76c] sm:$0xf] %v1153_v27  ;;  %v1155_v28 = vld [vmem:[%s9601_s14 + $0x1dc0] sm:$0xf] }
 0x159   : > { %v1157_v29 = vld [vmem:[%s9601_s14 + $0x1dd0] sm:$0xf]  ;;  %v1159_v30 = vld [vmem:[%s9601_s14 + $0x1de0] sm:$0xf]  ;;  %1156 = vst [vmem:[%s9605_s24 + $0x770] sm:$0xf] %v1155_v28 }
 0x15a   : > { %1158 = vst [vmem:[%s9605_s24 + $0x774] sm:$0xf] %v1157_v29  ;;  %1160 = vst [vmem:[%s9605_s24 + $0x778] sm:$0xf] %v1159_v30  ;;  %v1161_v31 = vld [vmem:[%s9601_s14 + $0x1df0] sm:$0xf] }
 0x15b   : > { %v1163_v32 = vld [vmem:[%s9601_s14 + $0x1e00] sm:$0xf]  ;;  %v1165_v33 = vld [vmem:[%s9601_s14 + $0x1e10] sm:$0xf]  ;;  %1162 = vst [vmem:[%s9605_s24 + $0x77c] sm:$0xf] %v1161_v31 }
 0x15c   : > { %1164 = vst [vmem:[%s9605_s24 + $0x780] sm:$0xf] %v1163_v32  ;;  %1166 = vst [vmem:[%s9605_s24 + $0x784] sm:$0xf] %v1165_v33  ;;  %v1167_v34 = vld [vmem:[%s9601_s14 + $0x1e20] sm:$0xf] }
 0x15d   : > { %v1169_v35 = vld [vmem:[%s9601_s14 + $0x1e30] sm:$0xf]  ;;  %v1171_v36 = vld [vmem:[%s9601_s14 + $0x1e40] sm:$0xf]  ;;  %1168 = vst [vmem:[%s9605_s24 + $0x788] sm:$0xf] %v1167_v34 }
 0x15e   : > { %1170 = vst [vmem:[%s9605_s24 + $0x78c] sm:$0xf] %v1169_v35  ;;  %1172 = vst [vmem:[%s9605_s24 + $0x790] sm:$0xf] %v1171_v36  ;;  %v1173_v37 = vld [vmem:[%s9601_s14 + $0x1e50] sm:$0xf] }
 0x15f   : > { %v1175_v38 = vld [vmem:[%s9601_s14 + $0x1e60] sm:$0xf]  ;;  %v1177_v39 = vld [vmem:[%s9601_s14 + $0x1e70] sm:$0xf]  ;;  %1174 = vst [vmem:[%s9605_s24 + $0x794] sm:$0xf] %v1173_v37 }
 0x160   : > { %1176 = vst [vmem:[%s9605_s24 + $0x798] sm:$0xf] %v1175_v38  ;;  %1178 = vst [vmem:[%s9605_s24 + $0x79c] sm:$0xf] %v1177_v39  ;;  %v1179_v40 = vld [vmem:[%s9601_s14 + $0x1e80] sm:$0xf] }
 0x161   : > { %v1181_v41 = vld [vmem:[%s9601_s14 + $0x1e90] sm:$0xf]  ;;  %v1183_v42 = vld [vmem:[%s9601_s14 + $0x1ea0] sm:$0xf]  ;;  %1180 = vst [vmem:[%s9605_s24 + $0x7a0] sm:$0xf] %v1179_v40 }
 0x162   : > { %1182 = vst [vmem:[%s9605_s24 + $0x7a4] sm:$0xf] %v1181_v41  ;;  %1184 = vst [vmem:[%s9605_s24 + $0x7a8] sm:$0xf] %v1183_v42  ;;  %v1185_v43 = vld [vmem:[%s9601_s14 + $0x1eb0] sm:$0xf] }
 0x163   : > { %v1187_v44 = vld [vmem:[%s9601_s14 + $0x1ec0] sm:$0xf]  ;;  %v1189_v45 = vld [vmem:[%s9601_s14 + $0x1ed0] sm:$0xf]  ;;  %1186 = vst [vmem:[%s9605_s24 + $0x7ac] sm:$0xf] %v1185_v43 }
 0x164   : > { %1188 = vst [vmem:[%s9605_s24 + $0x7b0] sm:$0xf] %v1187_v44  ;;  %1190 = vst [vmem:[%s9605_s24 + $0x7b4] sm:$0xf] %v1189_v45  ;;  %v1191_v46 = vld [vmem:[%s9601_s14 + $0x1ee0] sm:$0xf] }
 0x165   : > { %v1193_v47 = vld [vmem:[%s9601_s14 + $0x1ef0] sm:$0xf]  ;;  %v1195_v48 = vld [vmem:[%s9601_s14 + $0x1f00] sm:$0xf]  ;;  %1192 = vst [vmem:[%s9605_s24 + $0x7b8] sm:$0xf] %v1191_v46 }
 0x166   : > { %1194 = vst [vmem:[%s9605_s24 + $0x7bc] sm:$0xf] %v1193_v47  ;;  %1196 = vst [vmem:[%s9605_s24 + $0x7c0] sm:$0xf] %v1195_v48  ;;  %v1197_v49 = vld [vmem:[%s9601_s14 + $0x1f10] sm:$0xf] }
 0x167   : > { %v1199_v50 = vld [vmem:[%s9601_s14 + $0x1f20] sm:$0xf]  ;;  %v1201_v51 = vld [vmem:[%s9601_s14 + $0x1f30] sm:$0xf]  ;;  %1198 = vst [vmem:[%s9605_s24 + $0x7c4] sm:$0xf] %v1197_v49 }
 0x168   : > { %1200 = vst [vmem:[%s9605_s24 + $0x7c8] sm:$0xf] %v1199_v50  ;;  %1202 = vst [vmem:[%s9605_s24 + $0x7cc] sm:$0xf] %v1201_v51  ;;  %v1203_v52 = vld [vmem:[%s9601_s14 + $0x1f40] sm:$0xf] }
 0x169   : > { %v1205_v53 = vld [vmem:[%s9601_s14 + $0x1f50] sm:$0xf]  ;;  %v1207_v54 = vld [vmem:[%s9601_s14 + $0x1f60] sm:$0xf]  ;;  %1204 = vst [vmem:[%s9605_s24 + $0x7d0] sm:$0xf] %v1203_v52 }
 0x16a   : > { %1206 = vst [vmem:[%s9605_s24 + $0x7d4] sm:$0xf] %v1205_v53  ;;  %1208 = vst [vmem:[%s9605_s24 + $0x7d8] sm:$0xf] %v1207_v54  ;;  %v1209_v55 = vld [vmem:[%s9601_s14 + $0x1f70] sm:$0xf] }
 0x16b   : > { %v1211_v56 = vld [vmem:[%s9601_s14 + $0x1f80] sm:$0xf]  ;;  %v1213_v57 = vld [vmem:[%s9601_s14 + $0x1f90] sm:$0xf]  ;;  %1210 = vst [vmem:[%s9605_s24 + $0x7dc] sm:$0xf] %v1209_v55 }
 0x16c   : > { %1212 = vst [vmem:[%s9605_s24 + $0x7e0] sm:$0xf] %v1211_v56  ;;  %1214 = vst [vmem:[%s9605_s24 + $0x7e4] sm:$0xf] %v1213_v57  ;;  %v1215_v58 = vld [vmem:[%s9601_s14 + $0x1fa0] sm:$0xf] }
 0x16d   : > { %v1217_v59 = vld [vmem:[%s9601_s14 + $0x1fb0] sm:$0xf]  ;;  %v1219_v60 = vld [vmem:[%s9601_s14 + $0x1fc0] sm:$0xf]  ;;  %1216 = vst [vmem:[%s9605_s24 + $0x7e8] sm:$0xf] %v1215_v58 }
 0x16e   : > { %1218 = vst [vmem:[%s9605_s24 + $0x7ec] sm:$0xf] %v1217_v59  ;;  %1220 = vst [vmem:[%s9605_s24 + $0x7f0] sm:$0xf] %v1219_v60  ;;  %v1221_v61 = vld [vmem:[%s9601_s14 + $0x1fd0] sm:$0xf] }
 0x16f   : > { %v1223_v62 = vld [vmem:[%s9601_s14 + $0x1fe0] sm:$0xf]  ;;  %v1225_v63 = vld [vmem:[%s9601_s14 + $0x1ff0] sm:$0xf]  ;;  %1222 = vst [vmem:[%s9605_s24 + $0x7f4] sm:$0xf] %v1221_v61 }
 0x170   : > { %1224 = vst [vmem:[%s9605_s24 + $0x7f8] sm:$0xf] %v1223_v62  ;;  %1226 = vst [vmem:[%s9605_s24 + $0x7fc] sm:$0xf] %v1225_v63 }
 0x171 PF: > { %p7899_p11 = scmp.ge.s32.totalorder %s9490_s23, 1  ;;  %p4356_p12 = scmp.lt.s32.totalorder %s9490_s23, 9 }
 0x173   : > { %p4357_p13 = pnand %p7899_p11, %p4356_p12 }
 0x174   : > { %s4363_s27 = sand.u32 (!%p4357_p13), 1, %s9466_s17   ;;  %p4395_p0 = scmp.lt.s32.totalorder (!%p4357_p13), %s9478_s20, 1  ;;  %vm5001_vm0 = vsmask.f32 (!%p4357_p13), 6400  ;;  %vm4820_vm1 = vcmask (!%p4357_p13), 1046528   ;;  %vm5222_vm3 = vcmask (!%p4357_p13), 1044480  }
 0x175   : > { %4360 = sbr.rel (%p4357_p13) target bundleno = 1110 (0x456), region = 84  ;;  %s7900_s28 = sshll.u32 (!%p4357_p13), %s4363_s27, 11  ;;  %vm5403_vm2 = vsmask.f32 (!%p4357_p13), 4352  ;;  %vm6177_vm4 = vsmask.f32 (!%p4357_p13), 5376 }
 0x176   : > { %s10632_s29 = scalar_lea.vmem (!%p4357_p13), [#allocation2], %s7900_s28  ;;  %vm5996_vm5 = vcmask (!%p4357_p13), 1045504   ;;  %vm9493_vm6 = vmmov (!%p4357_p13), 0   ;;  %p4400_p1 = scmp.lt.s32.totalorder (!%p4357_p13), %s9474_s19, 3  ;;  %vm9495_vm7 = vmmov (!%p4357_p13), 1   ;;  %vm7567_vm9 = vcmask (!%p4357_p13), 121856  }
 0x177   : > { %v9134_v0 = vld [vmem:[%s10632_s29 + $0xc0] sm:$0xff] (!%p4357_p13)   ;;  %v9138_v4 = vld [vmem:[%s10632_s29 + $0xc8] sm:$0xff] (!%p4357_p13)   ;;  %v9142_v8 = vld [vmem:[%s10632_s29 + $0xd0] sm:$0xff] (!%p4357_p13)   ;;  %s4392_s28 = sand.u32 (!%p4357_p13), 1, %s9458_s15  }
 0x178   : > { %v9135_v1 = vld [vmem:[%s10632_s29 + $0x40] sm:$0xff] (!%p4357_p13)   ;;  %8677 = vmatprep.subr.bf16.mxu0 (!%p4357_p13), %v9134_v0  ;;  %v9139_v5 = vld [vmem:[%s10632_s29 + $0x48] sm:$0xff] (!%p4357_p13)   ;;  %v9143_v9 = vld [vmem:[%s10632_s29 + $0x50] sm:$0xff] (!%p4357_p13)  }
 0x179   : > { %v9136_v2 = vld [vmem:[%s10632_s29 + $0x80] sm:$0xff] (!%p4357_p13)   ;;  %8699 = vmatprep.subr.bf16.mxu1 (!%p4357_p13), %v9135_v1  ;;  %v9140_v6 = vld [vmem:[%s10632_s29 + $0x88] sm:$0xff] (!%p4357_p13)   ;;  %v9144_v10 = vld [vmem:[%s10632_s29 + $0x90] sm:$0xff] (!%p4357_p13)  }
 0x17a   : > { %v9137_v3 = vld [vmem:[%s10632_s29] sm:$0xff] (!%p4357_p13)   ;;  %8678 = vmatpush3.bf16.msra.mxu0 (!%p4357_p13), %v9136_v2  ;;  %v9141_v7 = vld [vmem:[%s10632_s29 + $0x8] sm:$0xff] (!%p4357_p13)   ;;  %v9145_v11 = vld [vmem:[%s10632_s29 + $0x10] sm:$0xff] (!%p4357_p13)  }
 0x17b   : > { %8700 = vmatpush3.bf16.msra.mxu1 (!%p4357_p13), %v9137_v3  ;;  %8679 = vmatprep.subr.bf16.mxu0 (!%p4357_p13), %v9138_v4  ;;  %v9146_v12 = vld [vmem:[%s10632_s29 + $0xd8] sm:$0xff] (!%p4357_p13)   ;;  %v9150_v16 = vld [vmem:[%s10632_s29 + $0xe0] sm:$0xff] (!%p4357_p13)   ;;  %v9154_v20 = vld [vmem:[%s10632_s29 + $0xe8] sm:$0xff] (!%p4357_p13)  }
 0x17c   : > { %8701 = vmatprep.subr.bf16.mxu1 %v9139_v5  ;;  %v9147_v13 = vld [vmem:[%s10632_s29 + $0x58] sm:$0xff]   ;;  %v9151_v17 = vld [vmem:[%s10632_s29 + $0x60] sm:$0xff]   ;;  %v9155_v21 = vld [vmem:[%s10632_s29 + $0x68] sm:$0xff]   ;;  %s4396_s17 = scalar_select %p4395_p0, %s9478_s20, 1 }
 0x17d   : > { %v9148_v14 = vld [vmem:[%s10632_s29 + $0x98] sm:$0xff]   ;;  %v9152_v18 = vld [vmem:[%s10632_s29 + $0xa0] sm:$0xff]   ;;  %v9156_v22 = vld [vmem:[%s10632_s29 + $0xa8] sm:$0xff]   ;;  %s4401_s11 = scalar_select %p4400_p1, %s9474_s19, 3 }
 0x17e   : > { %8680 = vmatpush3.bf16.msra.mxu0 %v9140_v6  ;;  %v9149_v15 = vld [vmem:[%s10632_s29 + $0x18] sm:$0xff]   ;;  %v9153_v19 = vld [vmem:[%s10632_s29 + $0x20] sm:$0xff]   ;;  %v9157_v23 = vld [vmem:[%s10632_s29 + $0x28] sm:$0xff]   ;;  %s9057_s5 = smul.u32 40, %s4396_s17  ;;  %s8673_s15 = sshll.u32 (%p9588_p9), %s9478_s20, 3 }
 0x17f   : > { %8702 = vmatpush3.bf16.msra.mxu1 %v9141_v7  ;;  %8681 = vmatprep.subr.bf16.mxu0 %v9142_v8  ;;  %v9158_v24 = vld [vmem:[%s10632_s29 + $0xf0] sm:$0xff]   ;;  %v9162_v28 = vld [vmem:[%s10632_s29 + $0xf8] sm:$0xff]   ;;  %v9168_v36 = vld [vmem:[%s10632_s29 + $0x140] sm:$0xff]   ;;  %s4402_s14 = scalar_lea.vmem %s11013_s2, %s4401_s11 }
 0x180   : > { %8703 = vmatprep.subr.bf16.mxu1 %v9143_v9  ;;  %v9159_v25 = vld [vmem:[%s10632_s29 + $0x70] sm:$0xff]   ;;  %v9163_v29 = vld [vmem:[%s10632_s29 + $0x78] sm:$0xff]   ;;  %s10669_s10 = scalar_lea.vmem %s11011_s0, %s9057_s5  ;;  %v9169_v37 = vld [vmem:[%s10632_s29 + $0x1c0] sm:$0xff]   ;;  %s7755_s5 = sadd.s32 (%p9588_p9), %s9474_s19, %s8673_s15 }
 0x181   : > { %v9160_v26 = vld [vmem:[%s10632_s29 + $0xb0] sm:$0xff]   ;;  %v9164_v30 = vld [vmem:[%s10632_s29 + $0xb8] sm:$0xff]   ;;  %v4404_v32 = vld [vmem:[%s10669_s10] sm:$0xff]  ;;  %s8674_s6 = sshll.u32 (%p9588_p9), %s7755_s5, 3 }
 0x182   : > { %8682 = vmatpush3.bf16.msra.mxu0 %v9144_v10  ;;  %v9161_v27 = vld [vmem:[%s10632_s29 + $0x30] sm:$0xff]   ;;  %v9165_v31 = vld [vmem:[%s10632_s29 + $0x38] sm:$0xff]   ;;  %v10675_v33 = vld [vmem:[%s10669_s10 + $0x8] sm:$0xff]  ;;  %s7757_s11 = scalar_lea.vmem (%p9588_p9), %s11015_s4, %s8674_s6 }
 0x183   : > { %8704 = vmatpush3.bf16.msra.mxu1 %v9145_v11  ;;  %8683 = vmatprep.subr.bf16.mxu0 %v9146_v12  ;;  %v7935_v34 = vcombine.low %v4404_v32, %v10675_v33  ;;  %v7936_v35 = vcombine.high %v4404_v32, %v10675_v33  ;;  %v9170_v44 = vld [vmem:[%s10632_s29 + $0x100] sm:$0xff]   ;;  %v9173_v48 = vld [vmem:[%s10632_s29 + $0x1c8] sm:$0xff]   ;;  %v9177_v52 = vld [vmem:[%s10632_s29 + $0x1d0] sm:$0xff]  }
 0x184   : > { %8705 = vmatprep.subr.bf16.mxu1 %v9147_v13  ;;  %v9171_v45 = vld [vmem:[%s10632_s29 + $0x180] sm:$0xff]   ;;  %v9172_v49 = vld [vmem:[%s10632_s29 + $0x148] sm:$0xff]   ;;  %v9176_v53 = vld [vmem:[%s10632_s29 + $0x150] sm:$0xff]  }
 0x185   : > { %v4487_v38 = vshrl.u32 %v7936_v35, 16  ;;  %v4489_v39 = vshll.u32 %v7936_v35, 16  ;;  %4762 = vmatprep.mubr.bf16.mxu1 %v7936_v35  ;;  %v4480_v40 = vshrl.u32 %v7935_v34, 16  ;;  %v4482_v41 = vshll.u32 %v7935_v34, 16  ;;  %v9175_v50 = vld [vmem:[%s10632_s29 + $0x188] sm:$0xff]   ;;  %v9179_v54 = vld [vmem:[%s10632_s29 + $0x190] sm:$0xff]   ;;  %vm9051_vm8 = vmpackc.low %vm4820_vm1, %vm9495_vm7 }
 0x186   : > { %8684 = vmatpush3.bf16.msra.mxu0 %v9148_v14  ;;  %v9174_v51 = vld [vmem:[%s10632_s29 + $0x108] sm:$0xff]   ;;  %v9178_v55 = vld [vmem:[%s10632_s29 + $0x110] sm:$0xff]   ;;  %v9181_v56 = vld [vmem:[%s10632_s29 + $0x1d8] sm:$0xff]  }
 0x187   : > { %8706 = vmatpush3.bf16.msra.mxu1 %v9149_v15  ;;  %8685 = vmatprep.subr.bf16.mxu0 %v9150_v16  ;;  %v4491_v42 = vrot.slane %v4489_v39, 1  ;;  %v4484_v43 = vrot.slane %v4482_v41, 1  ;;  %v9180_v57 = vld [vmem:[%s10632_s29 + $0x158] sm:$0xff]   ;;  %v9185_v60 = vld [vmem:[%s10632_s29 + $0x1e0] sm:$0xff]   ;;  %v9189_v0 = vld [vmem:[%s10632_s29 + $0x1e8] sm:$0xff]  }
 0x188   : > { %8707 = vmatprep.subr.bf16.mxu1 %v9151_v17  ;;  %v9183_v58 = vld [vmem:[%s10632_s29 + $0x198] sm:$0xff]   ;;  %v9184_v61 = vld [vmem:[%s10632_s29 + $0x160] sm:$0xff]   ;;  %v9188_v1 = vld [vmem:[%s10632_s29 + $0x168] sm:$0xff]  }
 0x189   : > { %v4492_v46 = vor.u32 %v4491_v42, %v4487_v38  ;;  %v4485_v47 = vor.u32 %v4484_v43, %v4480_v40  ;;  %v9182_v59 = vld [vmem:[%s10632_s29 + $0x118] sm:$0xff]   ;;  %v9187_v62 = vld [vmem:[%s10632_s29 + $0x1a0] sm:$0xff]   ;;  %v9191_v2 = vld [vmem:[%s10632_s29 + $0x1a8] sm:$0xff]  }
 0x18a   : > { %8686 = vmatpush3.bf16.msra.mxu0 %v9152_v18  ;;  %v9186_v63 = vld [vmem:[%s10632_s29 + $0x120] sm:$0xff]   ;;  %v9190_v3 = vld [vmem:[%s10632_s29 + $0x128] sm:$0xff]   ;;  %v9193_v4 = vld [vmem:[%s10632_s29 + $0x1f0] sm:$0xff]  }
 0x18b   : > { %8708 = vmatpush3.bf16.msra.mxu1 %v9153_v19  ;;  %8687 = vmatprep.subr.bf16.mxu0 %v9154_v20  ;;  %v9192_v5 = vld [vmem:[%s10632_s29 + $0x170] sm:$0xff]   ;;  %v9197_v8 = vld [vmem:[%s10632_s29 + $0x1f8] sm:$0xff]   ;;  %v4771_v12 = vld [vmem:[%s10669_s10] sm:$0xee] }
 0x18c   : > { %8709 = vmatprep.subr.bf16.mxu1 %v9155_v21  ;;  %4623 = vmatprep.mubr.bf16.mxu0 %v4492_v46  ;;  %v9195_v6 = vld [vmem:[%s10632_s29 + $0x1b0] sm:$0xff]   ;;  %v9196_v9 = vld [vmem:[%s10632_s29 + $0x178] sm:$0xff]   ;;  %v8002_v14 = vcombine.high %v4771_v12, %v10675_v33  ;;  %v8001_v16 = vcombine.low %v4771_v12, %v10675_v33  ;;  %v9204_v17 = vld [vmem:[%s10632_s29 + $0x240] sm:$0xff]  }
 0x18d   : > { %v9194_v7 = vld [vmem:[%s10632_s29 + $0x130] sm:$0xff]   ;;  %v9198_v10 = vld [vmem:[%s10632_s29 + $0x138] sm:$0xff]   ;;  %v9205_v19 = vld [vmem:[%s10632_s29 + $0x2c0] sm:$0xff]  }
 0x18e   : > { %8688 = vmatpush3.bf16.msra.mxu0 %v9156_v22  ;;  %v9199_v11 = vld [vmem:[%s10632_s29 + $0x1b8] sm:$0xff]   ;;  %v4773_v13 = vld [vmem:[%s10669_s10 + $0x10] sm:$0x11]  ;;  %v4824_v20 = vrot.slane %v8002_v14, 1  ;;  %v5020_v22 = vshrl.u32 %v8002_v14, 16  ;;  %v9208_v42 = vld [vmem:[%s10632_s29 + $0x248] sm:$0xff]  }
 0x18f   : > { %8710 = vmatpush3.bf16.msra.mxu1 %v9157_v23  ;;  %8689 = vmatprep.subr.bf16.mxu0 %v9158_v24  ;;  %v8004_v15 = vcombine.high %v4773_v13, %v4773_v13  ;;  %v8003_v18 = vcombine.low %v4773_v13, %v4773_v13  ;;  %v5023_v23 = vshll.u32 %v8002_v14, 16  ;;  %v9234_v12 = vld [vmem:[%s10632_s29 + $0x238] sm:$0xff]   ;;  %v5177_v14 = vld [vmem:[%s10669_s10] sm:$0x88] }
 0x190   : > { %8711 = vmatprep.subr.bf16.mxu1 %v9159_v25  ;;  %v9233_v13 = vld [vmem:[%s10632_s29 + $0x2f8] sm:$0xff]  }
 0x191   : > { %v4825_v21 = vrot.slane %v8004_v15, 1  ;;  %v5028_v24 = vshrl.u32 %v8004_v15, 16  ;;  %v5031_v25 = vshll.u32 %v8004_v15, 16  ;;  %v5011_v40 = vshrl.u32 %v8003_v18, 16  ;;  %v5178_v15 = vld [vmem:[%s10669_s10 + $0x10] sm:$0x77] }
 0x192   : > { %8690 = vmatpush3.bf16.msra.mxu0 %v9160_v26  ;;  %v4821_v26 = vrot.slane %v8001_v16, 1  ;;  %v5014_v41 = vshll.u32 %v8003_v18, 16 }
 0x193   : > { %8712 = vmatpush3.bf16.msra.mxu1 %v9161_v27  ;;  %8691 = vmatprep.subr.bf16.mxu0 %v9162_v28  ;;  %v4822_v27 = vrot.slane %v8003_v18, 1  ;;  %v4826_v28 = vsel %vm4820_vm1, %v4824_v20, %v4825_v21  ;;  %v5030_v32 = vrot.slane %v5028_v24, 1  ;;  %v9235_v18 = vld [vmem:[%s10632_s29 + $0x2b8] sm:$0xff]   ;;  %v8103_v20 = vcombine.low %v5178_v15, %v5178_v15  ;;  %v9240_v21 = vld [vmem:[%s10632_s29 + $0x340] sm:$0xff]  }
 0x194   : > { %8713 = vmatprep.subr.bf16.mxu1 %v9163_v29  ;;  %v5022_v29 = vrot.slane %v5020_v22, 1  ;;  %v5016_v46 = vrot.slane %v5014_v41, 2 }
 0x195   : > { %v4823_v35 = vsel %vm4820_vm1, %v4821_v26, %v4822_v27  ;;  %v9241_v26 = vld [vmem:[%s10632_s29 + $0x3c0] sm:$0xff]  }
 0x196   : > { %8692 = vmatpush3.bf16.msra.mxu0 %v9164_v30  ;;  %v5025_v30 = vrot.slane %v5023_v23, 2  ;;  %v9242_v27 = vld [vmem:[%s10632_s29 + $0x300] sm:$0xff]  }
 0x197   : > { %8714 = vmatpush3.bf16.msra.mxu1 %v9165_v31  ;;  %8721 = vmatprep.subr.bf16.mxu0 %v9168_v36  ;;  %v5003_v31 = vshrl.u32 %v8001_v16, 16  ;;  %v5006_v36 = vshll.u32 %v8001_v16, 16  ;;  %v8102_v16 = vcombine.high %v5177_v14, %v10675_v33 }
 0x198   : > { %8743 = vmatprep.subr.bf16.mxu1 %v9169_v37  ;;  %v9206_v37 = vld [vmem:[%s10632_s29 + $0x200] sm:$0xff]   ;;  %v5026_v38 = vor.u32 %v5025_v30, %v5022_v29 }
 0x199   : > { %4624 = vmatmul.mubr.bf16.vlgmr.msra.gmra.mrb[0].mxu0 %v4485_v47  ;;  %v5005_v39 = vrot.slane %v5003_v31, 1  ;;  %v9207_v47 = vld [vmem:[%s10632_s29 + $0x280] sm:$0xff]   ;;  %v5226_v22 = vrot.slane %v8102_v16, 3  ;;  %v5422_v23 = vshrl.u32 %v8102_v16, 16  ;;  %v5425_v24 = vshll.u32 %v8102_v16, 16  ;;  %v10790_v16 = vld [vmem:[%s10669_s10 + $0x10] sm:$0xff] }
 0x19a   : > { %4763 = vmatmul.mubr.bf16.vlgmr.msra.gmra.mrb[0].mxu1 %v7935_v34  ;;  %8722 = vmatpush3.bf16.msra.mxu0 %v9170_v44  ;;  %v5033_v34 = vrot.slane %v5031_v25, 2  ;;  %v5008_v44 = vrot.slane %v5006_v36, 2  ;;  %v5224_v31 = vrot.slane %v8103_v20, 3 }
 0x19b   : > { %8744 = vmatpush3.bf16.msra.mxu1 %v9171_v45  ;;  %8723 = vmatprep.subr.bf16.mxu0 %v9172_v49  ;;  %v5013_v45 = vrot.slane %v5011_v40, 1 }
 0x19c   : > { %8745 = vmatprep.subr.bf16.mxu1 %v9173_v48  ;;  %4957 = vmatprep.mubr.bf16.mxu0 %v4826_v28  ;;  %v5034_v43 = vor.u32 %v5033_v34, %v5030_v32  ;;  %v5009_v49 = vor.u32 %v5008_v44, %v5005_v39  ;;  %v5424_v32 = vrot.slane %v5422_v23, 3  ;;  %v5427_v34 = vrot.slane %v5425_v24, 4 }
 0x19d   : > { %v5413_v44 = vshrl.u32 %v8103_v20, 16 }
 0x19e   : > { %8724 = vmatpush3.bf16.msra.mxu0 %v9174_v51  ;;  %v5035_v48 = vsel %vm5001_vm0, %v5026_v38, %v5034_v43  ;;  %v5017_v51 = vor.u32 %v5016_v46, %v5013_v45  ;;  %v5428_v41 = vor.u32 %v5427_v34, %v5424_v32  ;;  %v5416_v46 = vshll.u32 %v8103_v20, 16  ;;  %v9269_v20 = vld [vmem:[%s10632_s29 + $0x3f8] sm:$0xff]   ;;  %v9280_v34 = vld [vmem:[%s10632_s29 + $0x408] sm:$0xff]  }
 0x19f   : > { %8746 = vmatpush3.bf16.msra.mxu1 %v9175_v50  ;;  %8725 = vmatprep.subr.bf16.mxu0 %v9176_v53  ;;  %v9210_v50 = vld [vmem:[%s10632_s29 + $0x208] sm:$0xff]   ;;  %v9212_v53 = vld [vmem:[%s10632_s29 + $0x250] sm:$0xff]  }
 0x1a0   : > { %8747 = vmatprep.subr.bf16.mxu1 %v9177_v52  ;;  %5166 = vmatprep.mubr.bf16.mxu1 %v5035_v48  ;;  %v9209_v52 = vld [vmem:[%s10632_s29 + $0x2c8] sm:$0xff]   ;;  %v5415_v48 = vrot.slane %v5413_v44, 3  ;;  %v9290_v44 = vld [vmem:[%s10632_s29 + $0x460] sm:$0xff]  }
 0x1a2   : > { %8726 = vmatpush3.bf16.msra.mxu0 %v9178_v55  ;;  %v9211_v55 = vld [vmem:[%s10632_s29 + $0x288] sm:$0xff]  }
 0x1a3   : > { %8748 = vmatpush3.bf16.msra.mxu1 %v9179_v54  ;;  %8727 = vmatprep.subr.bf16.mxu0 %v9180_v57  ;;  %v5018_v54 = vsel %vm5001_vm0, %v5009_v49, %v5017_v51  ;;  %v9213_v57 = vld [vmem:[%s10632_s29 + $0x2d0] sm:$0xff]   ;;  %v5418_v51 = vrot.slane %v5416_v46, 4  ;;  %v9292_v46 = vld [vmem:[%s10632_s29 + $0x420] sm:$0xff]  }
 0x1a4   : > { %8749 = vmatprep.subr.bf16.mxu1 %v9181_v56  ;;  %v9214_v56 = vld [vmem:[%s10632_s29 + $0x210] sm:$0xff]  }
 0x1a6   : > { %8728 = vmatpush3.bf16.msra.mxu0 %v9182_v59  ;;  %v9215_v59 = vld [vmem:[%s10632_s29 + $0x290] sm:$0xff]  }
 0x1a7   : > { %8750 = vmatpush3.bf16.msra.mxu1 %v9183_v58  ;;  %8729 = vmatprep.subr.bf16.mxu0 %v9184_v61  ;;  %v9216_v58 = vld [vmem:[%s10632_s29 + $0x258] sm:$0xff]  }
 0x1a8   : > { %8751 = vmatprep.subr.bf16.mxu1 %v9185_v60  ;;  %v9218_v60 = vld [vmem:[%s10632_s29 + $0x218] sm:$0xff]  }
 0x1a9   : > { %v9217_v61 = vld [vmem:[%s10632_s29 + $0x2d8] sm:$0xff]  }
 0x1aa   : > { %8730 = vmatpush3.bf16.msra.mxu0 %v9186_v63  ;;  %v9219_v63 = vld [vmem:[%s10632_s29 + $0x298] sm:$0xff]  }
 0x1ab   : > { %8752 = vmatpush3.bf16.msra.mxu1 %v9187_v62  ;;  %8731 = vmatprep.subr.bf16.mxu0 %v9188_v1  ;;  %v9220_v62 = vld [vmem:[%s10632_s29 + $0x260] sm:$0xff]  }
 0x1ac   : > { %8753 = vmatprep.subr.bf16.mxu1 %v9189_v0  ;;  %v9222_v0 = vld [vmem:[%s10632_s29 + $0x220] sm:$0xff]  }
 0x1ad   : > { %v9221_v1 = vld [vmem:[%s10632_s29 + $0x2e0] sm:$0xff]  }
 0x1ae   : > { %8732 = vmatpush3.bf16.msra.mxu0 %v9190_v3  ;;  %v9223_v3 = vld [vmem:[%s10632_s29 + $0x2a0] sm:$0xff]  }
 0x1af   : > { %8754 = vmatpush3.bf16.msra.mxu1 %v9191_v2  ;;  %8733 = vmatprep.subr.bf16.mxu0 %v9192_v5  ;;  %v9224_v2 = vld [vmem:[%s10632_s29 + $0x268] sm:$0xff]  }
 0x1b0   : > { %8755 = vmatprep.subr.bf16.mxu1 %v9193_v4  ;;  %v9226_v4 = vld [vmem:[%s10632_s29 + $0x228] sm:$0xff]  }
 0x1b1   : > { %v9225_v5 = vld [vmem:[%s10632_s29 + $0x2e8] sm:$0xff]  }
 0x1b2   : > { %8734 = vmatpush3.bf16.msra.mxu0 %v9194_v7  ;;  %v9227_v7 = vld [vmem:[%s10632_s29 + $0x2a8] sm:$0xff]  }
 0x1b3   : > { %8756 = vmatpush3.bf16.msra.mxu1 %v9195_v6  ;;  %8735 = vmatprep.subr.bf16.mxu0 %v9196_v9  ;;  %v9228_v6 = vld [vmem:[%s10632_s29 + $0x270] sm:$0xff]  }
 0x1b4   : > { %8757 = vmatprep.subr.bf16.mxu1 %v9197_v8  ;;  %v9230_v8 = vld [vmem:[%s10632_s29 + $0x230] sm:$0xff]  }
 0x1b5   : > { %v9229_v9 = vld [vmem:[%s10632_s29 + $0x2f0] sm:$0xff]  }
 0x1b6   : > { %8736 = vmatpush3.bf16.msra.mxu0 %v9198_v10  ;;  %v9232_v10 = vld [vmem:[%s10632_s29 + $0x278] sm:$0xff]  }
 0x1b7   : > { %8758 = vmatpush3.bf16.msra.mxu1 %v9199_v11  ;;  %8765 = vmatprep.subr.bf16.mxu0 %v9204_v17  ;;  %v9231_v11 = vld [vmem:[%s10632_s29 + $0x2b0] sm:$0xff]   ;;  %v8101_v17 = vcombine.low %v5177_v14, %v10675_v33  ;;  %v9270_v14 = vld [vmem:[%s10632_s29 + $0x338] sm:$0xff]  }
 0x1b8   : > { %8787 = vmatprep.subr.bf16.mxu1 %v9205_v19  ;;  %v8104_v19 = vcombine.high %v5178_v15, %v5178_v15  ;;  %v9267_v15 = vld [vmem:[%s10632_s29 + $0x3b0] sm:$0xff]  }
 0x1b9   : > { %4958 = vmatmul.mubr.bf16.vlgmr.msra.gmra.mrb[4].mxu0 %v4823_v35  ;;  %v5223_v25 = vrot.slane %v8101_v17, 3  ;;  %v5405_v35 = vshrl.u32 %v8101_v17, 16  ;;  %v5408_v36 = vshll.u32 %v8101_v17, 16  ;;  %v8201_v17 = vcombine.low %v10675_v33, %v10790_v16 }
 0x1ba   : > { %8766 = vmatpush3.bf16.msra.mxu0 %v9206_v37  ;;  %5167 = vmatmul.mubr.bf16.vlgmr.msra.gmra.mrb[4].mxu1 %v5018_v54  ;;  %v5227_v28 = vrot.slane %v8104_v19, 3  ;;  %v5430_v29 = vshrl.u32 %v8104_v19, 16  ;;  %v5433_v30 = vshll.u32 %v8104_v19, 16  ;;  %v5419_v54 = vor.u32 %v5418_v51, %v5415_v48  ;;  %v9274_v19 = vld [vmem:[%s10632_s29 + $0x440] sm:$0xff]   ;;  %v9294_v48 = vld [vmem:[%s10632_s29 + $0x468] sm:$0xff]  }
 0x1bb   : > { %8767 = vmatprep.subr.bf16.mxu0 %v9208_v42  ;;  %8788 = vmatpush3.bf16.msra.mxu1 %v9207_v47  ;;  %v5225_v40 = vsel %vm5222_vm3, %v5223_v25, %v5224_v31  ;;  %v5407_v42 = vrot.slane %v5405_v35, 3  ;;  %v5410_v43 = vrot.slane %v5408_v36, 4  ;;  %v9244_v47 = vld [vmem:[%s10632_s29 + $0x348] sm:$0xff]   ;;  %v5795_v24 = vshll.u32 %v8201_v17, 16  ;;  %v9277_v31 = vld [vmem:[%s10632_s29 + $0x480] sm:$0xff]   ;;  %v9282_v36 = vld [vmem:[%s10632_s29 + $0x450] sm:$0xff]  }
 0x1bc   : > { %8789 = vmatprep.subr.bf16.mxu1 %v9209_v52  ;;  %v5228_v37 = vsel %vm5222_vm3, %v5226_v22, %v5227_v28  ;;  %v5432_v38 = vrot.slane %v5430_v29, 3  ;;  %v5435_v39 = vrot.slane %v5433_v30, 4  ;;  %v9246_v52 = vld [vmem:[%s10632_s29 + $0x308] sm:$0xff]   ;;  %v5793_v25 = vshrl.u32 %v8201_v17, 16  ;;  %v9275_v28 = vld [vmem:[%s10632_s29 + $0x4c0] sm:$0xff]  }
 0x1bd   : > { %5359 = vmatprep.mubr.bf16.mxu0 %v5228_v37  ;;  %v9278_v29 = vld [vmem:[%s10632_s29 + $0x448] sm:$0xff]  }
 0x1be   : > { %8768 = vmatpush3.bf16.msra.mxu0 %v9210_v50  ;;  %v5436_v45 = vor.u32 %v5435_v39, %v5432_v38  ;;  %v5411_v50 = vor.u32 %v5410_v43, %v5407_v42  ;;  %v9279_v35 = vld [vmem:[%s10632_s29 + $0x4c8] sm:$0xff]   ;;  %v9284_v38 = vld [vmem:[%s10632_s29 + $0x410] sm:$0xff]   ;;  %v9288_v42 = vld [vmem:[%s10632_s29 + $0x418] sm:$0xff]  }
 0x1bf   : > { %8769 = vmatprep.subr.bf16.mxu0 %v9212_v53  ;;  %8790 = vmatpush3.bf16.msra.mxu1 %v9211_v55  ;;  %v9243_v53 = vld [vmem:[%s10632_s29 + $0x380] sm:$0xff]   ;;  %v9248_v55 = vld [vmem:[%s10632_s29 + $0x350] sm:$0xff]   ;;  %v9281_v37 = vld [vmem:[%s10632_s29 + $0x488] sm:$0xff]  }
 0x1c0   : > { %8791 = vmatprep.subr.bf16.mxu1 %v9213_v57  ;;  %v5437_v49 = vsel %vm5403_vm2, %v5428_v41, %v5436_v45  ;;  %v5420_v57 = vsel %vm5403_vm2, %v5411_v50, %v5419_v54  ;;  %v9283_v39 = vld [vmem:[%s10632_s29 + $0x4d0] sm:$0xff]   ;;  %v9287_v43 = vld [vmem:[%s10632_s29 + $0x4d8] sm:$0xff]   ;;  %v9296_v50 = vld [vmem:[%s10632_s29 + $0x428] sm:$0xff]  }
 0x1c1   : > { %5568 = vmatprep.mubr.bf16.mxu1 %v5437_v49  ;;  %v9285_v41 = vld [vmem:[%s10632_s29 + $0x490] sm:$0xff]   ;;  %v9289_v45 = vld [vmem:[%s10632_s29 + $0x498] sm:$0xff]   ;;  %v9293_v49 = vld [vmem:[%s10632_s29 + $0x4a0] sm:$0xff]  }
 0x1c2   : > { %8770 = vmatpush3.bf16.msra.mxu0 %v9214_v56  ;;  %v9245_v56 = vld [vmem:[%s10632_s29 + $0x3c8] sm:$0xff]   ;;  %v9300_v54 = vld [vmem:[%s10632_s29 + $0x430] sm:$0xff]  }
 0x1c3   : > { %8771 = vmatprep.subr.bf16.mxu0 %v9216_v58  ;;  %8792 = vmatpush3.bf16.msra.mxu1 %v9215_v59  ;;  %v9250_v58 = vld [vmem:[%s10632_s29 + $0x310] sm:$0xff]   ;;  %v9247_v59 = vld [vmem:[%s10632_s29 + $0x388] sm:$0xff]  }
 0x1c4   : > { %8793 = vmatprep.subr.bf16.mxu1 %v9217_v61  ;;  %v9249_v61 = vld [vmem:[%s10632_s29 + $0x3d0] sm:$0xff]   ;;  %v9295_v51 = vld [vmem:[%s10632_s29 + $0x4e8] sm:$0xff]  }
 0x1c6   : > { %8772 = vmatpush3.bf16.msra.mxu0 %v9218_v60  ;;  %v9252_v60 = vld [vmem:[%s10632_s29 + $0x358] sm:$0xff]  }
 0x1c7   : > { %8773 = vmatprep.subr.bf16.mxu0 %v9220_v62  ;;  %8794 = vmatpush3.bf16.msra.mxu1 %v9219_v63  ;;  %v9254_v62 = vld [vmem:[%s10632_s29 + $0x318] sm:$0xff]   ;;  %v9251_v63 = vld [vmem:[%s10632_s29 + $0x390] sm:$0xff]  }
 0x1c8   : > { %8795 = vmatprep.subr.bf16.mxu1 %v9221_v1  ;;  %v9253_v1 = vld [vmem:[%s10632_s29 + $0x3d8] sm:$0xff]  }
 0x1ca   : > { %8774 = vmatpush3.bf16.msra.mxu0 %v9222_v0  ;;  %v9256_v0 = vld [vmem:[%s10632_s29 + $0x360] sm:$0xff]  }
 0x1cb   : > { %8775 = vmatprep.subr.bf16.mxu0 %v9224_v2  ;;  %8796 = vmatpush3.bf16.msra.mxu1 %v9223_v3  ;;  %v9258_v2 = vld [vmem:[%s10632_s29 + $0x320] sm:$0xff]   ;;  %v9255_v3 = vld [vmem:[%s10632_s29 + $0x398] sm:$0xff]  }
 0x1cc   : > { %8797 = vmatprep.subr.bf16.mxu1 %v9225_v5  ;;  %v9257_v5 = vld [vmem:[%s10632_s29 + $0x3e0] sm:$0xff]  }
 0x1ce   : > { %8776 = vmatpush3.bf16.msra.mxu0 %v9226_v4  ;;  %v9260_v4 = vld [vmem:[%s10632_s29 + $0x368] sm:$0xff]  }
 0x1cf   : > { %8777 = vmatprep.subr.bf16.mxu0 %v9228_v6  ;;  %8798 = vmatpush3.bf16.msra.mxu1 %v9227_v7  ;;  %v9262_v6 = vld [vmem:[%s10632_s29 + $0x328] sm:$0xff]   ;;  %v9259_v7 = vld [vmem:[%s10632_s29 + $0x3a0] sm:$0xff]  }
 0x1d0   : > { %8799 = vmatprep.subr.bf16.mxu1 %v9229_v9  ;;  %v9261_v9 = vld [vmem:[%s10632_s29 + $0x3e8] sm:$0xff]  }
 0x1d2   : > { %8778 = vmatpush3.bf16.msra.mxu0 %v9230_v8  ;;  %v9264_v8 = vld [vmem:[%s10632_s29 + $0x370] sm:$0xff]  }
 0x1d3   : > { %8779 = vmatprep.subr.bf16.mxu0 %v9232_v10  ;;  %8800 = vmatpush3.bf16.msra.mxu1 %v9231_v11  ;;  %v9266_v10 = vld [vmem:[%s10632_s29 + $0x330] sm:$0xff]   ;;  %v9263_v11 = vld [vmem:[%s10632_s29 + $0x3a8] sm:$0xff]  }
 0x1d4   : > { %8801 = vmatprep.subr.bf16.mxu1 %v9233_v13  ;;  %v9265_v13 = vld [vmem:[%s10632_s29 + $0x3f0] sm:$0xff]  }
 0x1d6   : > { %8780 = vmatpush3.bf16.msra.mxu0 %v9234_v12  ;;  %v9268_v12 = vld [vmem:[%s10632_s29 + $0x378] sm:$0xff]  }
 0x1d7   : > { %8809 = vmatprep.subr.bf16.mxu0 %v9240_v21  ;;  %8802 = vmatpush3.bf16.msra.mxu1 %v9235_v18  ;;  %v8202_v18 = vcombine.high %v10675_v33, %v10790_v16  ;;  %v9271_v21 = vld [vmem:[%s10632_s29 + $0x3b8] sm:$0xff]   ;;  %v5797_v33 = vrot.slane %v5795_v24, 1 }
 0x1d8   : > { %8831 = vmatprep.subr.bf16.mxu1 %v9241_v26  ;;  %v9276_v26 = vld [vmem:[%s10632_s29 + $0x400] sm:$0xff]  }
 0x1d9   : > { %5360 = vmatmul.mubr.bf16.vlgmr.msra.gmra.mrb[8].mxu0 %v5225_v40  ;;  %v5800_v22 = vshrl.u32 %v8202_v18, 16  ;;  %v5802_v23 = vshll.u32 %v8202_v18, 16  ;;  %v5798_v32 = vor.u32 %v5797_v33, %v5793_v25  ;;  %v9286_v40 = vld [vmem:[%s10632_s29 + $0x458] sm:$0xff]  }
 0x1da   : > { %8810 = vmatpush3.bf16.msra.mxu0 %v9242_v27  ;;  %5569 = vmatmul.mubr.bf16.vlgmr.msra.gmra.mrb[8].mxu1 %v5420_v57  ;;  %v9301_v57 = vld [vmem:[%s10632_s29 + $0x4b0] sm:$0xff]  }
 0x1db   : > { %8811 = vmatprep.subr.bf16.mxu0 %v9244_v47  ;;  %8832 = vmatpush3.bf16.msra.mxu1 %v9243_v53  ;;  %v5804_v27 = vrot.slane %v5802_v23, 1  ;;  %v9291_v47 = vld [vmem:[%s10632_s29 + $0x4e0] sm:$0xff]   ;;  %v9297_v53 = vld [vmem:[%s10632_s29 + $0x4a8] sm:$0xff]  }
 0x1dc   : > { %8833 = vmatprep.subr.bf16.mxu1 %v9245_v56  ;;  %5748 = vmatprep.mubr.bf16.mxu0 %v8202_v18  ;;  %v9302_v56 = vld [vmem:[%s10632_s29 + $0x478] sm:$0xff]  }
 0x1dd   : > { %v5805_v30 = vor.u32 %v5804_v27, %v5800_v22 }
 0x1de   : > { %8812 = vmatpush3.bf16.msra.mxu0 %v9246_v52  ;;  %v9298_v52 = vld [vmem:[%s10632_s29 + $0x470] sm:$0xff]  }
 0x1df   : > { %8813 = vmatprep.subr.bf16.mxu0 %v9248_v55  ;;  %8834 = vmatpush3.bf16.msra.mxu1 %v9247_v59  ;;  %v9299_v55 = vld [vmem:[%s10632_s29 + $0x4f0] sm:$0xff]   ;;  %v9303_v59 = vld [vmem:[%s10632_s29 + $0x4f8] sm:$0xff]  }
 0x1e0   : > { %8835 = vmatprep.subr.bf16.mxu1 %v9249_v61  ;;  %5936 = vmatprep.mubr.bf16.mxu1 %v5805_v30  ;;  %v5949_v61 = vld [vmem:[%s10669_s10 + $0x18] sm:$0x33] }
 0x1e2   : > { %8814 = vmatpush3.bf16.msra.mxu0 %v9250_v58  ;;  %v9304_v58 = vld [vmem:[%s10632_s29 + $0x438] sm:$0xff]  }
 0x1e3   : > { %8815 = vmatprep.subr.bf16.mxu0 %v9252_v60  ;;  %8836 = vmatpush3.bf16.msra.mxu1 %v9251_v63  ;;  %v5947_v60 = vld [vmem:[%s10669_s10 + $0x8] sm:$0xcc] }
 0x1e4   : > { %8837 = vmatprep.subr.bf16.mxu1 %v9253_v1  ;;  %v8299_v63 = vcombine.low %v5947_v60, %v10790_v16  ;;  %v8302_v1 = vcombine.high %v5949_v61, %v5949_v61 }
 0x1e6   : > { %8816 = vmatpush3.bf16.msra.mxu0 %v9254_v62  ;;  %v8300_v62 = vcombine.high %v5947_v60, %v10790_v16  ;;  %v6182_v18 = vshll.u32 %v8299_v63, 16  ;;  %v9337_v60 = vld [vmem:[%s10632_s29 + $0x5b0] sm:$0xff]  }
 0x1e7   : > { %8817 = vmatprep.subr.bf16.mxu0 %v9256_v0  ;;  %8838 = vmatpush3.bf16.msra.mxu1 %v9255_v3  ;;  %v9305_v0 = vld [vmem:[%s10632_s29 + $0x4b8] sm:$0xff]   ;;  %v9310_v3 = vld [vmem:[%s10632_s29 + $0x540] sm:$0xff]  }
 0x1e8   : > { %8839 = vmatprep.subr.bf16.mxu1 %v9257_v5  ;;  %v6196_v5 = vshrl.u32 %v8300_v62, 16  ;;  %v6184_v25 = vrot.slane %v6182_v18, 3 }
 0x1ea   : > { %8818 = vmatpush3.bf16.msra.mxu0 %v9258_v2  ;;  %v8301_v2 = vcombine.low %v5949_v61, %v5949_v61  ;;  %v9340_v61 = vld [vmem:[%s10632_s29 + $0x538] sm:$0xff]  }
 0x1eb   : > { %8819 = vmatprep.subr.bf16.mxu0 %v9260_v4  ;;  %8840 = vmatpush3.bf16.msra.mxu1 %v9259_v7  ;;  %v6000_v4 = vrot.slane %v8300_v62, 2  ;;  %v5997_v7 = vrot.slane %v8299_v63, 2 }
 0x1ec   : > { %8841 = vmatprep.subr.bf16.mxu1 %v9261_v9  ;;  %v9312_v9 = vld [vmem:[%s10632_s29 + $0x500] sm:$0xff]   ;;  %v6190_v33 = vshll.u32 %v8301_v2, 16 }
 0x1ee   : > { %8820 = vmatpush3.bf16.msra.mxu0 %v9262_v6  ;;  %v6199_v6 = vshll.u32 %v8300_v62, 16  ;;  %v9339_v62 = vld [vmem:[%s10632_s29 + $0x5f8] sm:$0xff]  }
 0x1ef   : > { %8821 = vmatprep.subr.bf16.mxu0 %v9264_v8  ;;  %8842 = vmatpush3.bf16.msra.mxu1 %v9263_v11  ;;  %v9311_v8 = vld [vmem:[%s10632_s29 + $0x5c0] sm:$0xff]   ;;  %v6204_v11 = vshrl.u32 %v8302_v1, 16 }
 0x1f0   : > { %8843 = vmatprep.subr.bf16.mxu1 %v9265_v13  ;;  %v5998_v13 = vrot.slane %v8301_v2, 2 }
 0x1f2   : > { %8822 = vmatpush3.bf16.msra.mxu0 %v9266_v10  ;;  %v6001_v10 = vrot.slane %v8302_v1, 2  ;;  %v5999_v22 = vsel %vm5996_vm5, %v5997_v7, %v5998_v13 }
 0x1f3   : > { %8823 = vmatprep.subr.bf16.mxu0 %v9268_v12  ;;  %8844 = vmatpush3.bf16.msra.mxu1 %v9267_v15  ;;  %v6207_v12 = vshll.u32 %v8302_v1, 16  ;;  %v6201_v15 = vrot.slane %v6199_v6, 3  ;;  %v9341_v6 = vld [vmem:[%s10632_s29 + $0x5b8] sm:$0xff]  }
 0x1f4   : > { %8845 = vmatprep.subr.bf16.mxu1 %v9269_v20  ;;  %v6206_v20 = vrot.slane %v6204_v11, 2  ;;  %v9348_v11 = vld [vmem:[%s10632_s29 + $0x600] sm:$0xff]  }
 0x1f6   : > { %8824 = vmatpush3.bf16.msra.mxu0 %v9270_v14  ;;  %v6198_v14 = vrot.slane %v6196_v5, 2  ;;  %v9346_v5 = vld [vmem:[%s10632_s29 + $0x640] sm:$0xff]  }
 0x1f7   : > { %8853 = vmatprep.subr.bf16.mxu0 %v9274_v19  ;;  %8846 = vmatpush3.bf16.msra.mxu1 %v9271_v21  ;;  %v6002_v19 = vsel %vm5996_vm5, %v6000_v4, %v6001_v10  ;;  %v6209_v21 = vrot.slane %v6207_v12, 3 }
 0x1f8   : > { %8875 = vmatprep.subr.bf16.mxu1 %v9275_v28  ;;  %v6202_v23 = vor.u32 %v6201_v15, %v6198_v14  ;;  %v9314_v28 = vld [vmem:[%s10632_s29 + $0x548] sm:$0xff]  }
 0x1f9   : > { %5749 = vmatmul.mubr.bf16.vlgmr.msra.gmra.mrb[12].mxu0 %v8201_v17  ;;  %v6179_v17 = vshrl.u32 %v8299_v63, 16  ;;  %v6210_v27 = vor.u32 %v6209_v21, %v6206_v20  ;;  %v6353_v63 = vld [vmem:[%s10669_s10 + $0x8] sm:$0x88] }
 0x1fa   : > { %8854 = vmatpush3.bf16.msra.mxu0 %v9276_v26  ;;  %5937 = vmatmul.mubr.bf16.vlgmr.msra.gmra.mrb[12].mxu1 %v5798_v32  ;;  %v6187_v26 = vshrl.u32 %v8301_v2, 16  ;;  %v6192_v32 = vrot.slane %v6190_v33, 3  ;;  %v8400_v1 = vcombine.high %v6353_v63, %v10790_v16  ;;  %v8399_v2 = vcombine.low %v6353_v63, %v10790_v16  ;;  %v9376_v63 = vld [vmem:[%s10632_s29 + $0x638] sm:$0xff]  }
 0x1fb   : > { %8855 = vmatprep.subr.bf16.mxu0 %v9278_v29  ;;  %8876 = vmatpush3.bf16.msra.mxu1 %v9277_v31  ;;  %v6181_v24 = vrot.slane %v6179_v17, 2  ;;  %v6211_v30 = vsel %vm6177_vm4, %v6202_v23, %v6210_v27  ;;  %v9347_v17 = vld [vmem:[%s10632_s29 + $0x6c0] sm:$0xff]  }
 0x1fc   : > { %8877 = vmatprep.subr.bf16.mxu1 %v9279_v35  ;;  %6133 = vmatprep.mubr.bf16.mxu0 %v6002_v19  ;;  %v6189_v29 = vrot.slane %v6187_v26, 2  ;;  %v9313_v35 = vld [vmem:[%s10632_s29 + $0x580] sm:$0xff]   ;;  %v6401_v7 = vrot.slane %v8400_v1, 3  ;;  %v6398_v10 = vrot.slane %v8399_v2, 3  ;;  %v6579_v19 = vshrl.u32 %v8399_v2, 16 }
 0x1fd   : > { %v6185_v31 = vor.u32 %v6184_v25, %v6181_v24  ;;  %6342 = vmatprep.mubr.bf16.mxu1 %v6211_v30  ;;  %v6582_v20 = vshll.u32 %v8399_v2, 16  ;;  %v9350_v30 = vld [vmem:[%s10632_s29 + $0x648] sm:$0xff]   ;;  %v10911_v2 = vld [vmem:[%s10669_s10 + $0x18] sm:$0xff] }
 0x1fe   : > { %8856 = vmatpush3.bf16.msra.mxu0 %v9280_v34  ;;  %v9316_v34 = vld [vmem:[%s10632_s29 + $0x508] sm:$0xff]   ;;  %v6581_v26 = vrot.slane %v6579_v19, 3  ;;  %v9384_v19 = vld [vmem:[%s10632_s29 + $0x700] sm:$0xff]  }
 0x1ff   : > { %8857 = vmatprep.subr.bf16.mxu0 %v9282_v36  ;;  %8878 = vmatpush3.bf16.msra.mxu1 %v9281_v37  ;;  %v6193_v36 = vor.u32 %v6192_v32, %v6189_v29  ;;  %v9318_v37 = vld [vmem:[%s10632_s29 + $0x550] sm:$0xff]   ;;  %v6584_v27 = vrot.slane %v6582_v20, 4 }
 0x200   : > { %8879 = vmatprep.subr.bf16.mxu1 %v9283_v39 }
 0x201   : > { %v6194_v39 = vsel %vm6177_vm4, %v6185_v31, %v6193_v36  ;;  %v9352_v36 = vld [vmem:[%s10632_s29 + $0x608] sm:$0xff]  }
 0x202   : > { %8858 = vmatpush3.bf16.msra.mxu0 %v9284_v38  ;;  %v9315_v38 = vld [vmem:[%s10632_s29 + $0x5c8] sm:$0xff]  }
 0x203   : > { %8859 = vmatprep.subr.bf16.mxu0 %v9286_v40  ;;  %8880 = vmatpush3.bf16.msra.mxu1 %v9285_v41  ;;  %v9320_v40 = vld [vmem:[%s10632_s29 + $0x510] sm:$0xff]   ;;  %v9317_v41 = vld [vmem:[%s10632_s29 + $0x588] sm:$0xff]  }
 0x204   : > { %8881 = vmatprep.subr.bf16.mxu1 %v9287_v43  ;;  %v9319_v43 = vld [vmem:[%s10632_s29 + $0x5d0] sm:$0xff]  }
 0x206   : > { %8860 = vmatpush3.bf16.msra.mxu0 %v9288_v42  ;;  %v9322_v42 = vld [vmem:[%s10632_s29 + $0x558] sm:$0xff]  }
 0x207   : > { %8861 = vmatprep.subr.bf16.mxu0 %v9290_v44  ;;  %8882 = vmatpush3.bf16.msra.mxu1 %v9289_v45  ;;  %v9324_v44 = vld [vmem:[%s10632_s29 + $0x518] sm:$0xff]   ;;  %v9321_v45 = vld [vmem:[%s10632_s29 + $0x590] sm:$0xff]  }
 0x208   : > { %8883 = vmatprep.subr.bf16.mxu1 %v9291_v47  ;;  %v9323_v47 = vld [vmem:[%s10632_s29 + $0x5d8] sm:$0xff]  }
 0x20a   : > { %8862 = vmatpush3.bf16.msra.mxu0 %v9292_v46  ;;  %v9326_v46 = vld [vmem:[%s10632_s29 + $0x560] sm:$0xff]  }
 0x20b   : > { %8863 = vmatprep.subr.bf16.mxu0 %v9294_v48  ;;  %8884 = vmatpush3.bf16.msra.mxu1 %v9293_v49  ;;  %v9328_v48 = vld [vmem:[%s10632_s29 + $0x520] sm:$0xff]   ;;  %v9325_v49 = vld [vmem:[%s10632_s29 + $0x598] sm:$0xff]  }
 0x20c   : > { %8885 = vmatprep.subr.bf16.mxu1 %v9295_v51  ;;  %v9327_v51 = vld [vmem:[%s10632_s29 + $0x5e0] sm:$0xff]  }
 0x20e   : > { %8864 = vmatpush3.bf16.msra.mxu0 %v9296_v50  ;;  %v9330_v50 = vld [vmem:[%s10632_s29 + $0x568] sm:$0xff]  }
 0x20f   : > { %8865 = vmatprep.subr.bf16.mxu0 %v9298_v52  ;;  %8886 = vmatpush3.bf16.msra.mxu1 %v9297_v53  ;;  %v9332_v52 = vld [vmem:[%s10632_s29 + $0x528] sm:$0xff]   ;;  %v9329_v53 = vld [vmem:[%s10632_s29 + $0x5a0] sm:$0xff]  }
 0x210   : > { %8887 = vmatprep.subr.bf16.mxu1 %v9299_v55  ;;  %v9331_v55 = vld [vmem:[%s10632_s29 + $0x5e8] sm:$0xff]  }
 0x212   : > { %8866 = vmatpush3.bf16.msra.mxu0 %v9300_v54  ;;  %v9334_v54 = vld [vmem:[%s10632_s29 + $0x570] sm:$0xff]  }
 0x213   : > { %8867 = vmatprep.subr.bf16.mxu0 %v9302_v56  ;;  %8888 = vmatpush3.bf16.msra.mxu1 %v9301_v57  ;;  %v9336_v56 = vld [vmem:[%s10632_s29 + $0x530] sm:$0xff]   ;;  %v9333_v57 = vld [vmem:[%s10632_s29 + $0x5a8] sm:$0xff]  }
 0x214   : > { %8889 = vmatprep.subr.bf16.mxu1 %v9303_v59  ;;  %v9335_v59 = vld [vmem:[%s10632_s29 + $0x5f0] sm:$0xff]  }
 0x216   : > { %8868 = vmatpush3.bf16.msra.mxu0 %v9304_v58  ;;  %v9338_v58 = vld [vmem:[%s10632_s29 + $0x578] sm:$0xff]  }
 0x217   : > { %8897 = vmatprep.subr.bf16.mxu0 %v9310_v3  ;;  %8890 = vmatpush3.bf16.msra.mxu1 %v9305_v0  ;;  %v6354_v0 = vld [vmem:[%s10669_s10 + $0x18] sm:$0x77] }
 0x218   : > { %8919 = vmatprep.subr.bf16.mxu1 %v9311_v8  ;;  %v8402_v3 = vcombine.high %v6354_v0, %v6354_v0  ;;  %v8401_v4 = vcombine.low %v6354_v0, %v6354_v0  ;;  %v6596_v8 = vshrl.u32 %v8400_v1, 16  ;;  %v9375_v0 = vld [vmem:[%s10632_s29 + $0x6f8] sm:$0xff]  }
 0x219   : > { %6134 = vmatmul.mubr.bf16.vlgmr.msra.gmra.mrb[16].mxu0 %v5999_v22 }
 0x21a   : > { %8898 = vmatpush3.bf16.msra.mxu0 %v9312_v9  ;;  %6343 = vmatmul.mubr.bf16.vlgmr.msra.gmra.mrb[16].mxu1 %v6194_v39  ;;  %v6599_v9 = vshll.u32 %v8400_v1, 16  ;;  %v6402_v12 = vrot.slane %v8402_v3, 3  ;;  %v6604_v13 = vshrl.u32 %v8402_v3, 16  ;;  %v6607_v14 = vshll.u32 %v8402_v3, 16  ;;  %v9354_v39 = vld [vmem:[%s10632_s29 + $0x650] sm:$0xff]  }
 0x21b   : > { %8899 = vmatprep.subr.bf16.mxu0 %v9314_v28  ;;  %8920 = vmatpush3.bf16.msra.mxu1 %v9313_v35  ;;  %v6399_v15 = vrot.slane %v8401_v4, 3  ;;  %v6598_v16 = vrot.slane %v6596_v8, 3  ;;  %v6587_v33 = vshrl.u32 %v8401_v4, 16  ;;  %v6590_v29 = vshll.u32 %v8401_v4, 16  ;;  %v6753_v1 = vld [vmem:[%s10669_s10 + $0x10] sm:$0xee] }
 0x21c   : > { %8921 = vmatprep.subr.bf16.mxu1 %v9315_v38  ;;  %v6601_v18 = vrot.slane %v6599_v9, 4  ;;  %v6403_v21 = vsel %vm5222_vm3, %v6401_v7, %v6402_v12  ;;  %v6606_v22 = vrot.slane %v6604_v13, 3  ;;  %v6609_v23 = vrot.slane %v6607_v14, 4  ;;  %v6755_v3 = vld [vmem:[%s10669_s10 + $0x20] sm:$0x11]  ;;  %v9377_v8 = vld [vmem:[%s10632_s29 + $0x6b8] sm:$0xff]  }
 0x21d   : > { %v6400_v24 = vsel %vm5222_vm3, %v6398_v10, %v6399_v15  ;;  %6534 = vmatprep.mubr.bf16.mxu0 %v6403_v21  ;;  %v6589_v31 = vrot.slane %v6587_v33, 3  ;;  %v6592_v35 = vrot.slane %v6590_v29, 4  ;;  %v8500_v4 = vcombine.high %v6753_v1, %v10911_v2  ;;  %v9382_v7 = vld [vmem:[%s10632_s29 + $0x740] sm:$0xff]  }
 0x21e   : > { %8900 = vmatpush3.bf16.msra.mxu0 %v9316_v34  ;;  %v6602_v25 = vor.u32 %v6601_v18, %v6598_v16  ;;  %v6610_v28 = vor.u32 %v6609_v23, %v6606_v22  ;;  %v6585_v34 = vor.u32 %v6584_v27, %v6581_v26  ;;  %v8501_v9 = vcombine.low %v6755_v3, %v6755_v3  ;;  %v9383_v18 = vld [vmem:[%s10632_s29 + $0x7c0] sm:$0xff]  }
 0x21f   : > { %8901 = vmatprep.subr.bf16.mxu0 %v9318_v37  ;;  %8922 = vmatpush3.bf16.msra.mxu1 %v9317_v41  ;;  %v9349_v37 = vld [vmem:[%s10632_s29 + $0x680] sm:$0xff]   ;;  %v6593_v38 = vor.u32 %v6592_v35, %v6589_v31  ;;  %v6805_v10 = vrot.slane %v8500_v4, 1  ;;  %v7000_v12 = vshrl.u32 %v8500_v4, 16  ;;  %v7003_v13 = vshll.u32 %v8500_v4, 16  ;;  %v9388_v35 = vld [vmem:[%s10632_s29 + $0x708] sm:$0xff]  }
 0x220   : > { %8923 = vmatprep.subr.bf16.mxu1 %v9319_v43  ;;  %v6611_v32 = vsel %vm5403_vm2, %v6602_v25, %v6610_v28  ;;  %v9353_v43 = vld [vmem:[%s10632_s29 + $0x688] sm:$0xff]   ;;  %v6803_v16 = vrot.slane %v8501_v9, 1  ;;  %v6994_v31 = vshll.u32 %v8501_v9, 16 }
 0x221   : > { %6742 = vmatprep.mubr.bf16.mxu1 %v6611_v32  ;;  %v6594_v41 = vsel %vm5403_vm2, %v6585_v34, %v6593_v38  ;;  %v7002_v21 = vrot.slane %v7000_v12, 1  ;;  %v7005_v22 = vrot.slane %v7003_v13, 2  ;;  %v9385_v38 = vld [vmem:[%s10632_s29 + $0x780] sm:$0xff]   ;;  %v9408_v12 = vld [vmem:[%s10632_s29 + $0x730] sm:$0xff]   ;;  %v9405_v13 = vld [vmem:[%s10632_s29 + $0x7a8] sm:$0xff]  }
 0x222   : > { %8902 = vmatpush3.bf16.msra.mxu0 %v9320_v40  ;;  %v9351_v40 = vld [vmem:[%s10632_s29 + $0x6c8] sm:$0xff]  }
 0x223   : > { %8903 = vmatprep.subr.bf16.mxu0 %v9322_v42  ;;  %8924 = vmatpush3.bf16.msra.mxu1 %v9321_v45  ;;  %v9356_v42 = vld [vmem:[%s10632_s29 + $0x610] sm:$0xff]   ;;  %v7006_v28 = vor.u32 %v7005_v22, %v7002_v21 }
 0x224   : > { %8925 = vmatprep.subr.bf16.mxu1 %v9323_v47  ;;  %v9355_v45 = vld [vmem:[%s10632_s29 + $0x6d0] sm:$0xff]  }
 0x225   : > { %v9357_v47 = vld [vmem:[%s10632_s29 + $0x690] sm:$0xff]  }
 0x226   : > { %8904 = vmatpush3.bf16.msra.mxu0 %v9324_v44  ;;  %v9358_v44 = vld [vmem:[%s10632_s29 + $0x658] sm:$0xff]  }
 0x227   : > { %8905 = vmatprep.subr.bf16.mxu0 %v9326_v46  ;;  %8926 = vmatpush3.bf16.msra.mxu1 %v9325_v49  ;;  %v9360_v46 = vld [vmem:[%s10632_s29 + $0x618] sm:$0xff]  }
 0x228   : > { %8927 = vmatprep.subr.bf16.mxu1 %v9327_v51  ;;  %v9359_v49 = vld [vmem:[%s10632_s29 + $0x6d8] sm:$0xff]  }
 0x229   : > { %v9361_v51 = vld [vmem:[%s10632_s29 + $0x698] sm:$0xff]  }
 0x22a   : > { %8906 = vmatpush3.bf16.msra.mxu0 %v9328_v48  ;;  %v9362_v48 = vld [vmem:[%s10632_s29 + $0x660] sm:$0xff]  }
 0x22b   : > { %8907 = vmatprep.subr.bf16.mxu0 %v9330_v50  ;;  %8928 = vmatpush3.bf16.msra.mxu1 %v9329_v53  ;;  %v9364_v50 = vld [vmem:[%s10632_s29 + $0x620] sm:$0xff]  }
 0x22c   : > { %8929 = vmatprep.subr.bf16.mxu1 %v9331_v55  ;;  %v9363_v53 = vld [vmem:[%s10632_s29 + $0x6e0] sm:$0xff]  }
 0x22d   : > { %v9365_v55 = vld [vmem:[%s10632_s29 + $0x6a0] sm:$0xff]  }
 0x22e   : > { %8908 = vmatpush3.bf16.msra.mxu0 %v9332_v52  ;;  %v9366_v52 = vld [vmem:[%s10632_s29 + $0x668] sm:$0xff]  }
 0x22f   : > { %8909 = vmatprep.subr.bf16.mxu0 %v9334_v54  ;;  %8930 = vmatpush3.bf16.msra.mxu1 %v9333_v57  ;;  %v9368_v54 = vld [vmem:[%s10632_s29 + $0x628] sm:$0xff]  }
 0x230   : > { %8931 = vmatprep.subr.bf16.mxu1 %v9335_v59  ;;  %v9367_v57 = vld [vmem:[%s10632_s29 + $0x6e8] sm:$0xff]  }
 0x231   : > { %v9369_v59 = vld [vmem:[%s10632_s29 + $0x6a8] sm:$0xff]  }
 0x232   : > { %8910 = vmatpush3.bf16.msra.mxu0 %v9336_v56  ;;  %v9370_v56 = vld [vmem:[%s10632_s29 + $0x670] sm:$0xff]  }
 0x233   : > { %8911 = vmatprep.subr.bf16.mxu0 %v9338_v58  ;;  %8932 = vmatpush3.bf16.msra.mxu1 %v9337_v60  ;;  %v9372_v58 = vld [vmem:[%s10632_s29 + $0x630] sm:$0xff]   ;;  %v9374_v60 = vld [vmem:[%s10632_s29 + $0x678] sm:$0xff]  }
 0x234   : > { %8933 = vmatprep.subr.bf16.mxu1 %v9339_v62  ;;  %v9373_v62 = vld [vmem:[%s10632_s29 + $0x6b0] sm:$0xff]  }
 0x236   : > { %8912 = vmatpush3.bf16.msra.mxu0 %v9340_v61  ;;  %v9371_v61 = vld [vmem:[%s10632_s29 + $0x6f0] sm:$0xff]  }
 0x237   : > { %8941 = vmatprep.subr.bf16.mxu0 %v9346_v5  ;;  %8934 = vmatpush3.bf16.msra.mxu1 %v9341_v6  ;;  %v8502_v5 = vcombine.high %v6755_v3, %v6755_v3  ;;  %v8499_v6 = vcombine.low %v6753_v1, %v10911_v2  ;;  %v9395_v1 = vld [vmem:[%s10632_s29 + $0x7d8] sm:$0xff]   ;;  %v9400_v3 = vld [vmem:[%s10632_s29 + $0x720] sm:$0xff]  }
 0x238   : > { %8963 = vmatprep.subr.bf16.mxu1 %v9347_v17 }
 0x239   : > { %6535 = vmatmul.mubr.bf16.vlgmr.msra.gmra.mrb[20].mxu0 %v6400_v24  ;;  %v7008_v14 = vshrl.u32 %v8502_v5, 16  ;;  %v7011_v15 = vshll.u32 %v8502_v5, 16  ;;  %v6802_v17 = vrot.slane %v8499_v6, 1  ;;  %v6983_v23 = vshrl.u32 %v8499_v6, 16  ;;  %v9386_v24 = vld [vmem:[%s10632_s29 + $0x748] sm:$0xff]  }
 0x23a   : > { %8942 = vmatpush3.bf16.msra.mxu0 %v9348_v11  ;;  %6743 = vmatmul.mubr.bf16.vlgmr.msra.gmra.mrb[20].mxu1 %v6594_v41  ;;  %v6806_v11 = vrot.slane %v8502_v5, 1  ;;  %v6986_v33 = vshll.u32 %v8499_v6, 16  ;;  %v9397_v5 = vld [vmem:[%s10632_s29 + $0x798] sm:$0xff]   ;;  %v9402_v6 = vld [vmem:[%s10632_s29 + $0x768] sm:$0xff]  }
 0x23b   : > { %8943 = vmatprep.subr.bf16.mxu0 %v9350_v30  ;;  %8964 = vmatpush3.bf16.msra.mxu1 %v9349_v37  ;;  %v7010_v25 = vrot.slane %v7008_v14, 1  ;;  %v7013_v26 = vrot.slane %v7011_v15, 2  ;;  %v6804_v27 = vsel %vm4820_vm1, %v6802_v17, %v6803_v16  ;;  %v6985_v29 = vrot.slane %v6983_v23, 1  ;;  %v9410_v14 = vld [vmem:[%s10632_s29 + $0x778] sm:$0xff]   ;;  %v9407_v15 = vld [vmem:[%s10632_s29 + $0x7f0] sm:$0xff]  }
 0x23c   : > { %8965 = vmatprep.subr.bf16.mxu1 %v9351_v40  ;;  %v6807_v20 = vsel %vm4820_vm1, %v6805_v10, %v6806_v11  ;;  %v6991_v30 = vshrl.u32 %v8501_v9, 16  ;;  %v6988_v34 = vrot.slane %v6986_v33, 2  ;;  %v6996_v37 = vrot.slane %v6994_v31, 2  ;;  %v9401_v9 = vld [vmem:[%s10632_s29 + $0x7a0] sm:$0xff]   ;;  %v9406_v10 = vld [vmem:[%s10632_s29 + $0x770] sm:$0xff]   ;;  %v9403_v11 = vld [vmem:[%s10632_s29 + $0x7e8] sm:$0xff]  }
 0x23d   : > { %6938 = vmatprep.mubr.bf16.mxu0 %v6807_v20  ;;  %v7014_v32 = vor.u32 %v7013_v26, %v7010_v25  ;;  %v9412_v17 = vld [vmem:[%s10632_s29 + $0x738] sm:$0xff]   ;;  %v9409_v16 = vld [vmem:[%s10632_s29 + $0x7b0] sm:$0xff]  }
 0x23e   : > { %8944 = vmatpush3.bf16.msra.mxu0 %v9352_v36  ;;  %v6993_v36 = vrot.slane %v6991_v30, 1  ;;  %v6989_v40 = vor.u32 %v6988_v34, %v6985_v29  ;;  %v9411_v20 = vld [vmem:[%s10632_s29 + $0x7f8] sm:$0xff]  }
 0x23f   : > { %8945 = vmatprep.subr.bf16.mxu0 %v9354_v39  ;;  %8966 = vmatpush3.bf16.msra.mxu1 %v9353_v43  ;;  %v7015_v39 = vsel %vm5001_vm0, %v7006_v28, %v7014_v32  ;;  %v9413_v28 = vld [vmem:[%s10632_s29 + $0x7b8] sm:$0xff]  }
 0x240   : > { %8967 = vmatprep.subr.bf16.mxu1 %v9355_v45  ;;  %7146 = vmatprep.mubr.bf16.mxu1 %v7015_v39  ;;  %v6997_v41 = vor.u32 %v6996_v37, %v6993_v36 }
 0x242   : > { %8946 = vmatpush3.bf16.msra.mxu0 %v9356_v42  ;;  %v9390_v42 = vld [vmem:[%s10632_s29 + $0x750] sm:$0xff]  }
 0x243   : > { %8947 = vmatprep.subr.bf16.mxu0 %v9358_v44  ;;  %8968 = vmatpush3.bf16.msra.mxu1 %v9357_v47  ;;  %v9387_v44 = vld [vmem:[%s10632_s29 + $0x7c8] sm:$0xff]   ;;  %v9392_v47 = vld [vmem:[%s10632_s29 + $0x710] sm:$0xff]  }
 0x244   : > { %8969 = vmatprep.subr.bf16.mxu1 %v9359_v49 }
 0x246   : > { %8948 = vmatpush3.bf16.msra.mxu0 %v9360_v46  ;;  %v6998_v46 = vsel %vm5001_vm0, %v6989_v40, %v6997_v41 }
 0x247   : > { %8949 = vmatprep.subr.bf16.mxu0 %v9362_v48  ;;  %8970 = vmatpush3.bf16.msra.mxu1 %v9361_v51 }
 0x248   : > { %8971 = vmatprep.subr.bf16.mxu1 %v9363_v53 }
 0x24a   : > { %8950 = vmatpush3.bf16.msra.mxu0 %v9364_v50  ;;  %v9389_v50 = vld [vmem:[%s10632_s29 + $0x788] sm:$0xff]  }
 0x24b   : > { %8951 = vmatprep.subr.bf16.mxu0 %v9366_v52  ;;  %8972 = vmatpush3.bf16.msra.mxu1 %v9365_v55  ;;  %v9394_v52 = vld [vmem:[%s10632_s29 + $0x758] sm:$0xff]  }
 0x24c   : > { %8973 = vmatprep.subr.bf16.mxu1 %v9367_v57  ;;  %v9396_v57 = vld [vmem:[%s10632_s29 + $0x718] sm:$0xff]  }
 0x24e   : > { %8952 = vmatpush3.bf16.msra.mxu0 %v9368_v54  ;;  %v9391_v54 = vld [vmem:[%s10632_s29 + $0x7d0] sm:$0xff]  }
 0x24f   : > { %8953 = vmatprep.subr.bf16.mxu0 %v9370_v56  ;;  %8974 = vmatpush3.bf16.msra.mxu1 %v9369_v59  ;;  %v9393_v59 = vld [vmem:[%s10632_s29 + $0x790] sm:$0xff]  }
 0x250   : > { %8975 = vmatprep.subr.bf16.mxu1 %v9371_v61 }
 0x252   : > { %8954 = vmatpush3.bf16.msra.mxu0 %v9372_v58 }
 0x253   : > { %8955 = vmatprep.subr.bf16.mxu0 %v9374_v60  ;;  %8976 = vmatpush3.bf16.msra.mxu1 %v9373_v62 }
 0x254   : > { %8977 = vmatprep.subr.bf16.mxu1 %v9375_v0 }
 0x256   : > { %8956 = vmatpush3.bf16.msra.mxu0 %v9376_v63  ;;  %v9398_v63 = vld [vmem:[%s10632_s29 + $0x760] sm:$0xff]  }
 0x257   : > { %8985 = vmatprep.subr.bf16.mxu0 %v9382_v7  ;;  %8978 = vmatpush3.bf16.msra.mxu1 %v9377_v8  ;;  %v9399_v7 = vld [vmem:[%s10632_s29 + $0x7e0] sm:$0xff]   ;;  %v9404_v8 = vld [vmem:[%s10632_s29 + $0x728] sm:$0xff]   ;;  %s7901_s29 = sshll.u32 %s4392_s28, 4 }
 0x258   : > { %9007 = vmatprep.subr.bf16.mxu1 %v9383_v18  ;;  %v7157_v18 = vld [vmem:[%s10669_s10 + $0x10] sm:$0xcc]  ;;  %s4394_s17 = scalar_lea.vmem [#allocation3], %s7901_s29 }
 0x259   : > { %6939 = vmatmul.mubr.bf16.vlgmr.msra.gmra.mrb[24].mxu0 %v6804_v27  ;;  %v8600_v21 = vcombine.high %v7157_v18, %v10911_v2  ;;  %v8599_v23 = vcombine.low %v7157_v18, %v10911_v2 }
 0x25a   : > { %8986 = vmatpush3.bf16.msra.mxu0 %v9384_v19  ;;  %7147 = vmatmul.mubr.bf16.vlgmr.msra.gmra.mrb[24].mxu1 %v6998_v46  ;;  %v7158_v19 = vld [vmem:[%s10669_s10 + $0x20] sm:$0x33] }
 0x25b   : > { %8987 = vmatprep.subr.bf16.mxu0 %v9386_v24  ;;  %9008 = vmatpush3.bf16.msra.mxu1 %v9385_v38  ;;  %v8602_v22 = vcombine.high %v7158_v19, %v7158_v19  ;;  %v8601_v24 = vcombine.low %v7158_v19, %v7158_v19  ;;  %v7205_v25 = vrot.slane %v8600_v21, 2  ;;  %v7400_v27 = vshrl.u32 %v8600_v21, 16 }
 0x25c   : > { %9009 = vmatprep.subr.bf16.mxu1 %v9387_v44  ;;  %v7403_v33 = vshll.u32 %v8600_v21, 16  ;;  %v7202_v31 = vrot.slane %v8599_v23, 2  ;;  %v7383_v37 = vshrl.u32 %v8599_v23, 16  ;;  %v7386_v40 = vshll.u32 %v8599_v23, 16 }
 0x25d   : > { %v7206_v26 = vrot.slane %v8602_v22, 2  ;;  %v7408_v29 = vshrl.u32 %v8602_v22, 16  ;;  %v7411_v30 = vshll.u32 %v8602_v22, 16  ;;  %v7203_v32 = vrot.slane %v8601_v24, 2 }
 0x25e   : > { %8988 = vmatpush3.bf16.msra.mxu0 %v9388_v35  ;;  %v7402_v35 = vrot.slane %v7400_v27, 2  ;;  %v7405_v36 = vrot.slane %v7403_v33, 3  ;;  %v7394_v44 = vshll.u32 %v8601_v24, 16  ;;  %v7388_v46 = vrot.slane %v7386_v40, 3 }
 0x25f   : > { %8989 = vmatprep.subr.bf16.mxu0 %v9390_v42  ;;  %9010 = vmatpush3.bf16.msra.mxu1 %v9389_v50  ;;  %v7207_v34 = vsel %vm5996_vm5, %v7205_v25, %v7206_v26  ;;  %v7410_v38 = vrot.slane %v7408_v29, 2  ;;  %v7413_v2 = vrot.slane %v7411_v30, 3  ;;  %v7204_v39 = vsel %vm5996_vm5, %v7202_v31, %v7203_v32 }
 0x260   : > { %9011 = vmatprep.subr.bf16.mxu1 %v9391_v54  ;;  %7338 = vmatprep.mubr.bf16.mxu0 %v7207_v34  ;;  %v7406_v41 = vor.u32 %v7405_v36, %v7402_v35  ;;  %v7385_v42 = vrot.slane %v7383_v37, 2 }
 0x262   : > { %8990 = vmatpush3.bf16.msra.mxu0 %v9392_v47  ;;  %v7389_v50 = vor.u32 %v7388_v46, %v7385_v42 }
 0x263   : > { %8991 = vmatprep.subr.bf16.mxu0 %v9394_v52  ;;  %9012 = vmatpush3.bf16.msra.mxu1 %v9393_v59 }
 0x264   : > { %9013 = vmatprep.subr.bf16.mxu1 %v9395_v1 }
 0x266   : > { %8992 = vmatpush3.bf16.msra.mxu0 %v9396_v57 }
 0x267   : > { %8993 = vmatprep.subr.bf16.mxu0 %v9398_v63  ;;  %9014 = vmatpush3.bf16.msra.mxu1 %v9397_v5 }
 0x268   : > { %9015 = vmatprep.subr.bf16.mxu1 %v9399_v7 }
 0x26a   : > { %8994 = vmatpush3.bf16.msra.mxu0 %v9400_v3 }
 0x26b   : > { %8995 = vmatprep.subr.bf16.mxu0 %v9402_v6  ;;  %9016 = vmatpush3.bf16.msra.mxu1 %v9401_v9 }
 0x26c   : > { %v8693_v51 = vpop.f32.mrb[0].mxu0  ;;  %9017 = vmatprep.subr.bf16.mxu1 %v9403_v11 }
 0x26d   : > { %v8715_v43 = vpop.f32.mrb[0].mxu1  ;;  %v8694_v53 = vpop.f32.mrb[1].mxu0 }
 0x26e   : > { %v8716_v45 = vpop.f32.mrb[1].mxu1  ;;  %v8695_v55 = vadd.f32 %v8694_v53, %v8693_v51  ;;  %v8696_v56 = vpop.f32.mrb[2].mxu0  ;;  %8996 = vmatpush3.bf16.msra.mxu0 %v9404_v8 }
 0x26f   : > { %v8717_v48 = vadd.f32 %v8716_v45, %v8715_v43  ;;  %v8718_v49 = vpop.f32.mrb[2].mxu1  ;;  %v8697_v58 = vpop.f32.mrb[3].mxu0  ;;  %8997 = vmatprep.subr.bf16.mxu0 %v9406_v10  ;;  %9018 = vmatpush3.bf16.msra.mxu1 %v9405_v13  ;;  %v7391_v43 = vshrl.u32 %v8601_v24, 16  ;;  %v7414_v45 = vor.u32 %v7413_v2, %v7410_v38  ;;  %v9492_v38 = vmov 0.0|0.0  }
 0x270   : > { %v8698_v61 = vadd.f32 %v8697_v58, %v8696_v56  ;;  %v8719_v62 = vpop.f32.mrb[3].mxu1  ;;  %9019 = vmatprep.subr.bf16.mxu1 %v9407_v15  ;;  %v9494_v2 = vmov 0.0  }
 0x271   : > { %v10935_v60 = vadd.f32 %v8717_v48, %v8695_v55  ;;  %v8720_v0 = vadd.f32 %v8719_v62, %v8718_v49  ;;  %v7393_v47 = vrot.slane %v7391_v43, 2  ;;  %v7396_v48 = vrot.slane %v7394_v44, 3 }
 0x272   : > { %8998 = vmatpush3.bf16.msra.mxu0 %v9408_v12  ;;  %v7415_v49 = vsel %vm6177_vm4, %v7406_v41, %v7414_v45 }
 0x273   : > { %v10940_v4 = vadd.f32 %v8720_v0, %v8698_v61  ;;  %8999 = vmatprep.subr.bf16.mxu0 %v9410_v14  ;;  %9020 = vmatpush3.bf16.msra.mxu1 %v9409_v16  ;;  %v7397_v51 = vor.u32 %v7396_v48, %v7393_v47 }
 0x274   : > { %9021 = vmatprep.subr.bf16.mxu1 %v9411_v20  ;;  %7546 = vmatprep.mubr.bf16.mxu1 %v7415_v49 }
 0x275   : > { %v7398_v54 = vsel %vm6177_vm4, %v7389_v50, %v7397_v51 }
 0x276   : > { %9000 = vmatpush3.bf16.msra.mxu0 %v9412_v17 }
 0x277   : > { %9022 = vmatpush3.bf16.msra.mxu1 %v9413_v28  ;;  %9049 = vmatprep.subr.bf16.mxu0 %v9492_v38 }
 0x278   : > { %9053 = vmatprep.subr.bf16.mxu1 %v9492_v38 }
 0x279   : > { %7339 = vmatmul.mubr.bf16.vlgmr.msra.gmra.mrb[28].mxu0 %v7204_v39 }
 0x27a   : > { %7547 = vmatmul.mubr.bf16.vlgmr.msra.gmra.mrb[28].mxu1 %v7398_v54  ;;  %9039 = vmatprep.mubr.msk.f32.mxu0 %vm9493_vm6, %v9494_v2 }
 0x27b   : > { %9046 = vmatprep.mubr.msk.f32.mxu1 %vm9493_vm6, %v9494_v2 }
 0x28c   : > { %v8737_v52 = vpop.f32.mrb[4].mxu0 }
 0x28d   : > { %v8738_v53 = vpop.f32.mrb[5].mxu0  ;;  %v8759_v61 = vpop.f32.mrb[4].mxu1 }
 0x28e   : > { %v8739_v55 = vadd.f32 %v8738_v53, %v8737_v52  ;;  %v8740_v56 = vpop.f32.mrb[6].mxu0  ;;  %v8760_v62 = vpop.f32.mrb[5].mxu1 }
 0x28f   : > { %v8741_v57 = vpop.f32.mrb[7].mxu0  ;;  %v8761_v0 = vadd.f32 %v8760_v62, %v8759_v61  ;;  %v8762_v1 = vpop.f32.mrb[6].mxu1 }
 0x290   : > { %v4966_v58 = vadd.f32 %v8739_v55, %v10935_v60  ;;  %v8742_v59 = vadd.f32 %v8741_v57, %v8740_v56  ;;  %v8763_v3 = vpop.f32.mrb[7].mxu1 }
 0x291   : > { %v8764_v6 = vadd.f32 %v8763_v3, %v8762_v1 }
 0x292   : > { %v4967_v63 = vadd.f32 %v8742_v59, %v10940_v4  ;;  %v5175_v5 = vadd.f32 %v8761_v0, %v4966_v58 }
 0x294   : > { %v5176_v7 = vadd.f32 %v8764_v6, %v4967_v63 }
 0x2ac   : > { %v8781_v8 = vpop.f32.mrb[8].mxu0 }
 0x2ad   : > { %v8782_v9 = vpop.f32.mrb[9].mxu0  ;;  %v8803_v60 = vpop.f32.mrb[8].mxu1 }
 0x2ae   : > { %v8783_v10 = vadd.f32 %v8782_v9, %v8781_v8  ;;  %v8784_v11 = vpop.f32.mrb[10].mxu0  ;;  %v8804_v17 = vpop.f32.mrb[9].mxu1 }
 0x2af   : > { %v8785_v12 = vpop.f32.mrb[11].mxu0  ;;  %v8805_v16 = vadd.f32 %v8804_v17, %v8803_v60  ;;  %v8806_v18 = vpop.f32.mrb[10].mxu1 }
 0x2b0   : > { %v5368_v13 = vadd.f32 %v8783_v10, %v5175_v5  ;;  %v8786_v14 = vadd.f32 %v8785_v12, %v8784_v11  ;;  %v8807_v19 = vpop.f32.mrb[11].mxu1 }
 0x2b1   : > { %v8808_v20 = vadd.f32 %v8807_v19, %v8806_v18 }
 0x2b2   : > { %v5369_v15 = vadd.f32 %v8786_v14, %v5176_v7  ;;  %v5577_v4 = vadd.f32 %v8805_v16, %v5368_v13 }
 0x2b4   : > { %v5578_v21 = vadd.f32 %v8808_v20, %v5369_v15 }
 0x2cc   : > { %v8825_v22 = vpop.f32.mrb[12].mxu0 }
 0x2cd   : > { %v8826_v23 = vpop.f32.mrb[13].mxu0  ;;  %v8847_v29 = vpop.f32.mrb[12].mxu1 }
 0x2ce   : > { %v8827_v24 = vadd.f32 %v8826_v23, %v8825_v22  ;;  %v8828_v25 = vpop.f32.mrb[14].mxu0  ;;  %v8848_v30 = vpop.f32.mrb[13].mxu1 }
 0x2cf   : > { %v8829_v26 = vpop.f32.mrb[15].mxu0  ;;  %v8849_v31 = vadd.f32 %v8848_v30, %v8847_v29  ;;  %v8850_v32 = vpop.f32.mrb[14].mxu1 }
 0x2d0   : > { %v5757_v27 = vadd.f32 %v8827_v24, %v5577_v4  ;;  %v8830_v33 = vadd.f32 %v8829_v26, %v8828_v25  ;;  %v8851_v34 = vpop.f32.mrb[15].mxu1 }
 0x2d1   : > { %v8852_v36 = vadd.f32 %v8851_v34, %v8850_v32 }
 0x2d2   : > { %v5758_v28 = vadd.f32 %v8830_v33, %v5578_v21  ;;  %v5945_v35 = vadd.f32 %v8849_v31, %v5757_v27 }
 0x2d4   : > { %v5946_v37 = vadd.f32 %v8852_v36, %v5758_v28  ;;  %v8667_v36 = vld [vmem:[%s4402_s14] ss:$0 sm:$0xff] }
 0x2ec   : > { %v8869_v39 = vpop.f32.mrb[16].mxu0 }
 0x2ed   : > { %v8870_v40 = vpop.f32.mrb[17].mxu0  ;;  %v8891_v47 = vpop.f32.mrb[16].mxu1 }
 0x2ee   : > { %v8871_v41 = vadd.f32 %v8870_v40, %v8869_v39  ;;  %v8872_v42 = vpop.f32.mrb[18].mxu0  ;;  %v8892_v48 = vpop.f32.mrb[17].mxu1 }
 0x2ef   : > { %v8873_v43 = vpop.f32.mrb[19].mxu0  ;;  %v8893_v49 = vadd.f32 %v8892_v48, %v8891_v47  ;;  %v8894_v50 = vpop.f32.mrb[18].mxu1 }
 0x2f0   : > { %v6142_v44 = vadd.f32 %v8871_v41, %v5945_v35  ;;  %v8874_v45 = vadd.f32 %v8873_v43, %v8872_v42  ;;  %v8895_v51 = vpop.f32.mrb[19].mxu1 }
 0x2f1   : > { %v8896_v53 = vadd.f32 %v8895_v51, %v8894_v50 }
 0x2f2   : > { %v6143_v46 = vadd.f32 %v8874_v45, %v5946_v37  ;;  %v6351_v52 = vadd.f32 %v8893_v49, %v6142_v44 }
 0x2f4   : > { %v6352_v54 = vadd.f32 %v8896_v53, %v6143_v46  ;;  %v7566_v46 = vld [vmem:[%s11014_s3] sm:$0x1] }
 0x30c   : > { %v8913_v55 = vpop.f32.mrb[20].mxu0 }
 0x30d   : > { %v8914_v56 = vpop.f32.mrb[21].mxu0  ;;  %v8935_v0 = vpop.f32.mrb[20].mxu1 }
 0x30e   : > { %v8915_v57 = vadd.f32 %v8914_v56, %v8913_v55  ;;  %v8916_v58 = vpop.f32.mrb[22].mxu0  ;;  %v8936_v1 = vpop.f32.mrb[21].mxu1  ;;  %v7725_v55 = vlaneseq }
 0x30f   : > { %v8917_v59 = vpop.f32.mrb[23].mxu0  ;;  %v8937_v3 = vadd.f32 %v8936_v1, %v8935_v0  ;;  %v8938_v5 = vpop.f32.mrb[22].mxu1 }
 0x310   : > { %v6543_v61 = vadd.f32 %v8915_v57, %v6351_v52  ;;  %v8918_v62 = vadd.f32 %v8917_v59, %v8916_v58  ;;  %v8939_v6 = vpop.f32.mrb[23].mxu1  ;;  %v7726_v58 = vshrl.u32 %v7725_v55, 7 }
 0x311   : > { %v8940_v8 = vadd.f32 %v8939_v6, %v8938_v5 }
 0x312   : > { %v6544_v63 = vadd.f32 %v8918_v62, %v6352_v54  ;;  %v6751_v7 = vadd.f32 %v8937_v3, %v6543_v61  ;;  %v7727_v59 = vsub.s32 0, %v7726_v58 }
 0x314   : > { %v6752_v9 = vadd.f32 %v8940_v8, %v6544_v63 }
 0x32c   : > { %v8957_v10 = vpop.f32.mrb[24].mxu0 }
 0x32d   : > { %v8958_v11 = vpop.f32.mrb[25].mxu0  ;;  %v8979_v16 = vpop.f32.mrb[24].mxu1 }
 0x32e   : > { %v8959_v12 = vadd.f32 %v8958_v11, %v8957_v10  ;;  %v8960_v13 = vpop.f32.mrb[26].mxu0  ;;  %v8980_v18 = vpop.f32.mrb[25].mxu1 }
 0x32f   : > { %v8961_v14 = vpop.f32.mrb[27].mxu0  ;;  %v8981_v19 = vadd.f32 %v8980_v18, %v8979_v16  ;;  %v8982_v4 = vpop.f32.mrb[26].mxu1 }
 0x330   : > { %v6947_v15 = vadd.f32 %v8959_v12, %v6751_v7  ;;  %v8962_v60 = vadd.f32 %v8961_v14, %v8960_v13  ;;  %v8983_v20 = vpop.f32.mrb[27].mxu1 }
 0x331   : > { %v8984_v22 = vadd.f32 %v8983_v20, %v8982_v4 }
 0x332   : > { %v6948_v17 = vadd.f32 %v8962_v60, %v6752_v9  ;;  %v7155_v21 = vadd.f32 %v8981_v19, %v6947_v15 }
 0x334   : > { %v7156_v23 = vadd.f32 %v8984_v22, %v6948_v17 }
 0x34c   : > { %v9001_v24 = vpop.f32.mrb[28].mxu0 }
 0x34d   : > { %v9002_v25 = vpop.f32.mrb[29].mxu0  ;;  %v9023_v31 = vpop.f32.mrb[28].mxu1 }
 0x34e   : > { %v9003_v26 = vadd.f32 %v9002_v25, %v9001_v24  ;;  %v9004_v27 = vpop.f32.mrb[30].mxu0  ;;  %v9024_v32 = vpop.f32.mrb[29].mxu1 }
 0x34f   : > { %v9005_v33 = vpop.f32.mrb[31].mxu0  ;;  %v9025_v34 = vadd.f32 %v9024_v32, %v9023_v31  ;;  %v9026_v35 = vpop.f32.mrb[30].mxu1 }
 0x350   : > { %v7347_v28 = vadd.f32 %v9003_v26, %v7155_v21  ;;  %v9006_v29 = vadd.f32 %v9005_v33, %v9004_v27  ;;  %v9027_v37 = vpop.f32.mrb[31].mxu1 }
 0x351   : > { %v9028_v2 = vadd.f32 %v9027_v37, %v9026_v35 }
 0x352   : > { %v7348_v30 = vadd.f32 %v9006_v29, %v7156_v23  ;;  %v7555_v38 = vadd.f32 %v9025_v34, %v7347_v28 }
 0x354   : > { %v7564_v39 = vadd.f32 %v8667_v36, %v7555_v38  ;;  %v7556_v40 = vadd.f32 %v9028_v2, %v7348_v30 }
 0x356   : > { %v7565_v41 = vadd.f32 %v8667_v36, %v7556_v40  ;;  %v7646_v42 = vmul.f32 %v7564_v39, %v7564_v39 }
 0x358   : > { %v9050_v43 = vpack.c.bf16 %v7565_v41, %v7564_v39  ;;  %v7647_v44 = vmul.f32 %v7565_v41, %v7565_v41 }
 0x35a   : > { %v9054_v45 = vpack.c.bf16 %v7647_v44, %v7646_v42  ;;  %9052 = vmatpush3.bf16.msk.msra.mxu0 %vm9051_vm8, %v9050_v43 }
 0x35c   : > { %9056 = vmatpush3.bf16.msk.msra.mxu1 %vm9051_vm8, %v9054_v45 }
 0x35d   : > { %9040 = vmatmul.mubr.msk.f32.vlgmr.msra.gmra.mrb[32].mxu0 %vm7567_vm9, %v7566_v46 }
 0x35f   : > { %9047 = vmatmul.mubr.msk.f32.vlgmr.msra.gmra.mrb[32].mxu1 %vm7567_vm9, %v7566_v46 }
 0x430   : > { %v7641_v47 = vpop.f32.mrb[32].mxu0 }
 0x431   : > { %v7645_v48 = vmul.f32 0.11111111, %v7641_v47  ;;  %v9041_v49 = vpop.f32.mrb[33].mxu0 }
 0x432   : > { %v7717_v50 = vpop.f32.mrb[32].mxu1 }
 0x433   : > { %v7722_v51 = vmul.f32 %v7645_v48, %v7645_v48  ;;  %v7721_v52 = vmul.f32 0.11111111, %v7717_v50  ;;  %v9048_v53 = vpop.f32.mrb[33].mxu1  ;;  %v7728_v61 = vrot.slane %v7645_v48, %v7727_v59 }
 0x435   : > { %v7723_v54 = vsub.f32 %v7721_v52, %v7722_v51  ;;  %v7729_v63 = vsub.f32 %v7564_v39, %v7728_v61  ;;  %v7730_v0 = vsub.f32 %v7565_v41, %v7728_v61 }
 0x437   : > { %v7724_v56 = vmax.f32 %v7723_v54, 0.0 }
 0x439   : > { %v7731_v57 = vadd.f32 1e-05, %v7724_v56 }
 0x43b   : > { %9418 = vrsqrt.f32 %v7731_v57 }
 0x445   : > { %v9419_v62 = vpop.eup %9418 }
 0x446   : > { %v7736_v1 = vrot.slane %v9419_v62, %v7727_v59 }
 0x447   : > { %7753 = sbr.rel (!%p9588_p9) target bundleno = 1110 (0x456), region = 92 }
 0x448   : > { %v7737_v3 = vmul.f32 %v7736_v1, %v7729_v63  ;;  %v7738_v5 = vmul.f32 %v7736_v1, %v7730_v0 }
 0x44a   : > { %vm7739_vm10 = vcmp.ge.f32.partialorder %v7737_v3, 0.0  ;;  %vm7740_vm11 = vcmp.ge.f32.partialorder %v7738_v5, 0.0  ;;  %v7741_v6 = vmul.f32 0.2, %v7737_v3  ;;  %v7742_v7 = vmul.f32 0.2, %v7738_v5 }
 0x44c   : > { %v7743_v8 = vsel %vm7739_vm10, %v7737_v3, %v7741_v6  ;;  %v7744_v9 = vsel %vm7740_vm11, %v7738_v5, %v7742_v7 }
 0x44d   : > { %7745 = vst [vmem:[%s4394_s17] sm:$0xff] %v7743_v8  ;;  %7746 = vst [vmem:[%s4394_s17 + $0x8] sm:$0x7f] %v7744_v9 }
 0x454   : > { %v7787_v10 = vld [vmem:[%s4394_s17] sm:$0xff]  ;;  %v7789_v11 = vld [vmem:[%s4394_s17 + $0x8] sm:$0xff] }
 0x455   : > { %7788 = vst [vmem:[%s7757_s11] sm:$0xff] %v7787_v10  ;;  %7790 = vst [vmem:[%s7757_s11 + $0x20] sm:$0xff] %v7789_v11 }
 0x456 PF: > { %s14_s23 = sadd.s32 1, %s9490_s23   ;;  %s11017_s15 = smov %s9462_s16 }
 0x457   : > { %p11_p2 = scmp.ge.s32.totalorder %s14_s23, 10   ;;  %s11018_s16 = smov %s9593_s8 }
 0x458   : > { %s11019_s17 = smov %s9470_s18  ;;  %s11020_s18 = smov %s9582_s30 }
 0x459   : > { %s11021_s19 = smov %s9482_s21  ;;  %s11022_s20 = smov %s9486_s22 }
 0x45a   : > { %s11023_s21 = smov %s11026_s25  ;;  %s11024_s22 = smov %s11030_s26 }
 0x45b   :  { %13 = sbr.rel (!%p11_p2) target bundleno = 5 (0x5), region = 186 }

</bundles_post_ra>
